<compile_context>
chip_gen: v6e
topology: v6e:2x2x1
jax: 0.10.0
libtpu: 0.0.40
codegen_flags: <defaults>
</compile_context>

<pallas_src>
import functools
import math

import jax
import jax.numpy as jnp
from jax.experimental import pallas as pl
from jax.experimental.pallas import tpu as pltpu


# ----------------------------------------------------------------------------
# Parameter construction (deterministic, mirrors the PyTorch module layout)
# ----------------------------------------------------------------------------
def make_positional_encoding(d_model: int, max_len: int = 24, dtype=jnp.float32):
    """Sinusoidal pe buffer exactly like PositionalEncoding.__init__."""
    position = jnp.arange(max_len, dtype=jnp.float32)[:, None]
    div_term = jnp.exp(
        jnp.arange(0, d_model, 2, dtype=jnp.float32) * (-math.log(10000.0) / d_model)
    )
    angles = position * div_term
    pe = jnp.zeros((max_len, d_model), dtype=jnp.float32)
    pe = pe.at[:, 0::2].set(jnp.sin(angles))
    pe = pe.at[:, 1::2].set(jnp.cos(angles))
    return pe.astype(dtype)


def init_params(key, dim, num_heads, head_dim, ff_mult=4, max_len=24,
                dtype=jnp.float32):
    """Random weights for: 2 temporal self-attn blocks + GEGLU feed-forward."""
    inner = num_heads * head_dim          # attention inner dim (== dim here)
    ffi = dim * ff_mult                   # FeedForward inner dim
    ks = jax.random.split(key, 12)
    s = 0.2
    params = dict(
        pe=make_positional_encoding(dim, max_len=max_len),
        ln_g=jnp.ones((2, dim)) + 0.05 * jax.random.normal(ks[0], (2, dim)),
        ln_b=0.05 * jax.random.normal(ks[1], (2, dim)),
        wq=s * jax.random.normal(ks[2], (2, dim, inner)),
        wk=s * jax.random.normal(ks[3], (2, dim, inner)),
        wv=s * jax.random.normal(ks[4], (2, dim, inner)),
        wo=s * jax.random.normal(ks[5], (2, inner, dim)),
        bo=0.02 * jax.random.normal(ks[6], (2, dim)),
        ff_g=jnp.ones((1, dim)) + 0.05 * jax.random.normal(ks[7], (1, dim)),
        ff_b=0.05 * jax.random.normal(ks[8], (1, dim)),
        w1=s * jax.random.normal(ks[9], (dim, 2 * ffi)),
        b1=0.02 * jax.random.normal(ks[10], (1, 2 * ffi)),
        w2=s * jax.random.normal(ks[11], (ffi, dim)),
        b2=jnp.zeros((1, dim)),
    )
    return {k: v.astype(dtype) for k, v in params.items()}


# ----------------------------------------------------------------------------
# Fused Pallas kernel: processes a tile of TB independent (frames, channels)
# sequences, running the whole TemporalTransformerBlock on them.
# ----------------------------------------------------------------------------
def _temporal_block_kernel(
    x_ref,                      # (TB, F, C)   activations (batch*spatial rows)
    pe_ref,                     # (F, C)       positional encoding slice
    ln_g_ref, ln_b_ref,         # (2, C)       LayerNorm gamma/beta per attn block
    wq_ref, wk_ref, wv_ref,     # (2, C, INNER)
    wo_ref, bo_ref,             # (2, INNER, C), (2, C)
    ffg_ref, ffb_ref,           # (1, C)       FF LayerNorm gamma/beta
    w1_ref, b1_ref,             # (C, 2*FFI), (1, 2*FFI)   GEGLU projection
    w2_ref, b2_ref,             # (FFI, C),   (1, C)       FF output projection
    o_ref,                      # (TB, F, C)
    *, num_heads,
):
    TB, F, C = x_ref.shape
    INNER = wq_ref.shape[-1]
    DH = INNER // num_heads
    FFI = w2_ref.shape[0]
    scale = 1.0 / math.sqrt(DH)
    eps = 1e-5

    # Upcast once per tile; all math in f32.
    x = x_ref[...].astype(jnp.float32)               # (TB, F, C)
    pe = pe_ref[...].astype(jnp.float32)              # (F, C)
    ln_g = ln_g_ref[...].astype(jnp.float32)           # (2, C)
    ln_b = ln_b_ref[...].astype(jnp.float32)

    def layer_norm(h, g, b):
        mu = jnp.mean(h, axis=-1, keepdims=True)
        d = h - mu
        var = jnp.mean(d * d, axis=-1, keepdims=True)
        return d * jax.lax.rsqrt(var + eps) * g + b

    # --- two Temporal_Self attention blocks (statically unrolled) ------------
    for blk in range(2):
        g = ln_g[blk].reshape(1, 1, C)
        b = ln_b[blk].reshape(1, 1, C)
        h = layer_norm(x, g, b)
        h = h + pe[None, :, :]                         # positional encoding add

        h2 = h.reshape(TB * F, C)
        wq = wq_ref[blk].astype(jnp.float32)
        wk = wk_ref[blk].astype(jnp.float32)
        wv = wv_ref[blk].astype(jnp.float32)
        wo = wo_ref[blk].astype(jnp.float32)
        bo = bo_ref[...][blk].reshape(1, C).astype(jnp.float32)

        q = jnp.dot(h2, wq, preferred_element_type=jnp.float32).reshape(TB, F, INNER)
        k = jnp.dot(h2, wk, preferred_element_type=jnp.float32).reshape(TB, F, INNER)
        v = jnp.dot(h2, wv, preferred_element_type=jnp.float32).reshape(TB, F, INNER)

        # Multi-head attention over the (small) temporal axis F.
        # Per-head output projection is accumulated directly, avoiding a
        # lane-dim concatenate.
        attn = jnp.zeros((TB * F, C), dtype=jnp.float32)
        for hh in range(num_heads):
            lo = hh * DH
            qh = q[:, :, lo:lo + DH]                   # (TB, F, DH)
            kh = k[:, :, lo:lo + DH]
            vh = v[:, :, lo:lo + DH]
            s = jnp.einsum('bfd,bgd->bfg', qh, kh,
                           preferred_element_type=jnp.float32) * scale
            s = s - jnp.max(s, axis=-1, keepdims=True)
            p = jnp.exp(s)
            p = p / jnp.sum(p, axis=-1, keepdims=True)
            oh = jnp.einsum('bfg,bgd->bfd', p, vh,
                            preferred_element_type=jnp.float32)
            attn = attn + jnp.dot(oh.reshape(TB * F, DH), wo[lo:lo + DH, :],
                                  preferred_element_type=jnp.float32)
        x = x + (attn + bo).reshape(TB, F, C)          # residual

    # --- feed-forward (LayerNorm -> GEGLU -> Linear), residual ----------------
    ffg = ffg_ref[...].astype(jnp.float32).reshape(1, 1, C)
    ffb = ffb_ref[...].astype(jnp.float32).reshape(1, 1, C)
    h = layer_norm(x, ffg, ffb).reshape(TB * F, C)
    proj = jnp.dot(h, w1_ref[...].astype(jnp.float32),
                   preferred_element_type=jnp.float32)
    proj = proj + b1_ref[...].astype(jnp.float32)
    a = proj[:, :FFI]
    gate = proj[:, FFI:]
    hid = a * jax.nn.gelu(gate, approximate=True)
    ff_out = jnp.dot(hid, w2_ref[...].astype(jnp.float32),
                     preferred_element_type=jnp.float32)
    ff_out = ff_out + b2_ref[...].astype(jnp.float32)
    x = x + ff_out.reshape(TB, F, C)

    o_ref[...] = x.astype(o_ref.dtype)


# ----------------------------------------------------------------------------
# Wrapper: rearrange, tile, pallas_call, rearrange back
# ----------------------------------------------------------------------------
def temporal_transformer_block_forward(hidden_states, params, *,
                                       video_length, num_heads):
    """hidden_states: (b*f, d, c) exactly like the PyTorch forward."""
    bf, d, c = hidden_states.shape
    f = int(video_length)
    assert bf % f == 0, "leading dim must be batch*video_length"
    b = bf // f

    pe = params["pe"]
    assert f <= pe.shape[0], "video_length exceeds positional-encoding max_len"
    pe_s = pe[:f, :]                                   # hoisted slice

    # '(b f) d c -> (b d) f c' once, outside the kernel (XLA transpose).
    x3 = hidden_states.reshape(b, f, d, c).transpose(0, 2, 1, 3).reshape(b * d, f, c)

    Bp = b * d
    # Tile size: ~512 KiB of f32 activation rows per grid step, rows a multiple
    # of 8; cap at ceil(Bp/2) so there are >=2 parallel steps (v7x megacore).
    row_bytes = f * c * 4
    tb = max(8, min((512 * 1024) // row_bytes, -(-Bp // 2)))
    tb = ((tb + 7) // 8) * 8
    n_tiles = -(-Bp // tb)
    Bp_pad = n_tiles * tb
    if Bp_pad != Bp:
        x3 = jnp.pad(x3, ((0, Bp_pad - Bp), (0, 0), (0, 0)))

    row_spec = lambda: pl.BlockSpec((tb, f, c), lambda i: (i, 0, 0))

    def full_spec(shape):
        nd = len(shape)
        return pl.BlockSpec(shape, lambda i, nd=nd: (0,) * nd)

    weights = (
        pe_s, params["ln_g"], params["ln_b"],
        params["wq"], params["wk"], params["wv"], params["wo"], params["bo"],
        params["ff_g"], params["ff_b"],
        params["w1"], params["b1"], params["w2"], params["b2"],
    )

    grid_spec = pltpu.PrefetchScalarGridSpec(
        num_scalar_prefetch=0,
        grid=(n_tiles,),
        in_specs=[row_spec()] + [full_spec(w.shape) for w in weights],
        out_specs=row_spec(),
    )

    out = pl.pallas_call(
        functools.partial(_temporal_block_kernel, num_heads=num_heads),
        out_shape=jax.ShapeDtypeStruct((Bp_pad, f, c), hidden_states.dtype),
        grid_spec=grid_spec,
        compiler_params=pltpu.CompilerParams(
            dimension_semantics=("parallel",),
            vmem_limit_bytes=48 * 1024 * 1024,   # safe on v5e/v6e/v7x
        ),
    )(x3, *weights)

    out = out[:Bp]
    # '(b d) f c -> (b f) d c'
    return out.reshape(b, d, f, c).transpose(0, 2, 1, 3).reshape(b * f, d, c)


# ----------------------------------------------------------------------------
# Pure-JAX reference (mirrors the PyTorch forward op-for-op)
# ----------------------------------------------------------------------------
def reference_forward(hidden_states, params, *, video_length, num_heads):
    bf, d, c = hidden_states.shape
    f = video_length
    b = bf // f
    x = hidden_states.astype(jnp.float32)

    def layer_norm(h, g, bb):
        mu = jnp.mean(h, axis=-1, keepdims=True)
        var = jnp.mean((h - mu) ** 2, axis=-1, keepdims=True)
        return (h - mu) * jax.lax.rsqrt(var + 1e-5) * g + bb

    inner = params["wq"].shape[-1]
    dh = inner // num_heads
    scale = 1.0 / math.sqrt(dh)
    pe = params["pe"][:f].astype(jnp.float32)

    for blk in range(2):
        h = layer_norm(x, params["ln_g"][blk], params["ln_b"][blk])
        h = h.reshape(b, f, d, c).transpose(0, 2, 1, 3).reshape(b * d, f, c)
        h = h + pe[None]
        q = (h @ params["wq"][blk]).reshape(b * d, f, num_heads, dh)
        k = (h @ params["wk"][blk]).reshape(b * d, f, num_heads, dh)
        v = (h @ params["wv"][blk]).reshape(b * d, f, num_heads, dh)
        s = jnp.einsum('bfhd,bghd->bhfg', q, k) * scale
        p = jax.nn.softmax(s, axis=-1)
        o = jnp.einsum('bhfg,bghd->bfhd', p, v).reshape(b * d, f, inner)
        o = o @ params["wo"][blk] + params["bo"][blk]
        o = o.reshape(b, d, f, c).transpose(0, 2, 1, 3).reshape(b * f, d, c)
        x = x + o

    ffi = params["w2"].shape[0]
    h = layer_norm(x, params["ff_g"][0], params["ff_b"][0])
    proj = h @ params["w1"] + params["b1"][0]
    hid = proj[..., :ffi] * jax.nn.gelu(proj[..., ffi:], approximate=True)
    x = x + (hid @ params["w2"] + params["b2"][0])
    return x


if __name__ == "__main__":
    # Small shapes: batch=2, frames(video_length)=8, spatial tokens=16,
    # dim=32, heads=4, head_dim=8, max_len=24.
    B, F, D_SPATIAL, C = 2, 8, 16, 32
    HEADS, HEAD_DIM = 4, 8
    MAX_LEN = 24

    key = jax.random.PRNGKey(0)
    k_x, k_p = jax.random.split(key)
    hidden_states = jax.random.normal(k_x, (B * F, D_SPATIAL, C), dtype=jnp.float32)
    params = init_params(k_p, dim=C, num_heads=HEADS, head_dim=HEAD_DIM,
                         max_len=MAX_LEN)

    out = temporal_transformer_block_forward(
        hidden_states, params, video_length=F, num_heads=HEADS)
    out = jax.block_until_ready(out)

    ref = reference_forward(hidden_states, params, video_length=F, num_heads=HEADS)
    assert out.shape == hidden_states.shape
    max_err = float(jnp.max(jnp.abs(out.astype(jnp.float32) - ref)))
    assert jnp.allclose(out.astype(jnp.float32), ref, atol=2e-2, rtol=2e-2), (
        f"mismatch vs reference, max abs err={max_err}")

    print("KERNEL_OK")
</pallas_src>

<mosaic_0001>
module attributes {stable_mosaic.version = 11 : i64} {
  func.func @_temporal_block_kernel(%arg0: i32, %arg1: memref<16x8x32xf32, #tpu.memory_space<vmem>>, %arg2: memref<8x32xf32, #tpu.memory_space<vmem>>, %arg3: memref<2x32xf32, #tpu.memory_space<vmem>>, %arg4: memref<2x32xf32, #tpu.memory_space<vmem>>, %arg5: memref<2x32x32xf32, #tpu.memory_space<vmem>>, %arg6: memref<2x32x32xf32, #tpu.memory_space<vmem>>, %arg7: memref<2x32x32xf32, #tpu.memory_space<vmem>>, %arg8: memref<2x32x32xf32, #tpu.memory_space<vmem>>, %arg9: memref<2x32xf32, #tpu.memory_space<vmem>>, %arg10: memref<1x32xf32, #tpu.memory_space<vmem>>, %arg11: memref<1x32xf32, #tpu.memory_space<vmem>>, %arg12: memref<32x256xf32, #tpu.memory_space<vmem>>, %arg13: memref<1x256xf32, #tpu.memory_space<vmem>>, %arg14: memref<128x32xf32, #tpu.memory_space<vmem>>, %arg15: memref<1x32xf32, #tpu.memory_space<vmem>>, %arg16: memref<16x8x32xf32, #tpu.memory_space<vmem>>) attributes {dimension_semantics = [#tpu.dimension_semantics<parallel>], iteration_bounds = array<i64: 2>, scalar_prefetch = 0 : i64, scratch_operands = 0 : i64, tpu.core_type = #tpu.core_type<tc>, window_params = [{transform_indices = @transform_0, window_bounds = array<i64: 16, 8, 32>}, {pipeline_mode = #tpu.pipeline_mode<synchronous>, transform_indices = @transform_1, window_bounds = array<i64: 8, 32>}, {pipeline_mode = #tpu.pipeline_mode<synchronous>, transform_indices = @transform_2, window_bounds = array<i64: 2, 32>}, {pipeline_mode = #tpu.pipeline_mode<synchronous>, transform_indices = @transform_3, window_bounds = array<i64: 2, 32>}, {pipeline_mode = #tpu.pipeline_mode<synchronous>, transform_indices = @transform_4, window_bounds = array<i64: 2, 32, 32>}, {pipeline_mode = #tpu.pipeline_mode<synchronous>, transform_indices = @transform_5, window_bounds = array<i64: 2, 32, 32>}, {pipeline_mode = #tpu.pipeline_mode<synchronous>, transform_indices = @transform_6, window_bounds = array<i64: 2, 32, 32>}, {pipeline_mode = #tpu.pipeline_mode<synchronous>, transform_indices = @transform_7, window_bounds = array<i64: 2, 32, 32>}, {pipeline_mode = #tpu.pipeline_mode<synchronous>, transform_indices = @transform_8, window_bounds = array<i64: 2, 32>}, {pipeline_mode = #tpu.pipeline_mode<synchronous>, transform_indices = @transform_9, window_bounds = array<i64: 1, 32>}, {pipeline_mode = #tpu.pipeline_mode<synchronous>, transform_indices = @transform_10, window_bounds = array<i64: 1, 32>}, {pipeline_mode = #tpu.pipeline_mode<synchronous>, transform_indices = @transform_11, window_bounds = array<i64: 32, 256>}, {pipeline_mode = #tpu.pipeline_mode<synchronous>, transform_indices = @transform_12, window_bounds = array<i64: 1, 256>}, {pipeline_mode = #tpu.pipeline_mode<synchronous>, transform_indices = @transform_13, window_bounds = array<i64: 128, 32>}, {pipeline_mode = #tpu.pipeline_mode<synchronous>, transform_indices = @transform_14, window_bounds = array<i64: 1, 32>}, {transform_indices = @transform_15, window_bounds = array<i64: 16, 8, 32>}]} {
    %c0 = arith.constant 0 : index
    %c0_0 = arith.constant 0 : index
    %c0_1 = arith.constant 0 : index
    %0 = vector.load %arg1[%c0, %c0_0, %c0_1] : memref<16x8x32xf32, #tpu.memory_space<vmem>>, vector<16x8x32xf32>
    %c0_2 = arith.constant 0 : index
    %c0_3 = arith.constant 0 : index
    %1 = vector.load %arg2[%c0_2, %c0_3] : memref<8x32xf32, #tpu.memory_space<vmem>>, vector<8x32xf32>
    %c0_4 = arith.constant 0 : index
    %c0_5 = arith.constant 0 : index
    %2 = vector.load %arg3[%c0_4, %c0_5] : memref<2x32xf32, #tpu.memory_space<vmem>>, vector<2x32xf32>
    %c0_6 = arith.constant 0 : index
    %c0_7 = arith.constant 0 : index
    %3 = vector.load %arg4[%c0_6, %c0_7] : memref<2x32xf32, #tpu.memory_space<vmem>>, vector<2x32xf32>
    %4 = vector.extract_strided_slice %2 {offsets = [0, 0], sizes = [1, 32], strides = [1, 1]} : vector<2x32xf32> to vector<1x32xf32>
    %5 = vector.shape_cast %4 : vector<1x32xf32> to vector<32xf32>
    %6 = vector.shape_cast %5 : vector<32xf32> to vector<1x1x32xf32>
    %7 = vector.extract_strided_slice %3 {offsets = [0, 0], sizes = [1, 32], strides = [1, 1]} : vector<2x32xf32> to vector<1x32xf32>
    %8 = vector.shape_cast %7 : vector<1x32xf32> to vector<32xf32>
    %9 = vector.shape_cast %8 : vector<32xf32> to vector<1x1x32xf32>
    %cst = arith.constant dense<0.000000e+00> : vector<16x8xf32>
    %10 = vector.multi_reduction <add>, %0, %cst [2] : vector<16x8x32xf32> to vector<16x8xf32>
    %11 = vector.shape_cast %10 : vector<16x8xf32> to vector<16x8x1xf32>
    %cst_8 = arith.constant 3.200000e+01 : f32
    %12 = vector.broadcast %cst_8 : f32 to vector<16x8x1xf32>
    %13 = arith.divf %11, %12 : vector<16x8x1xf32>
    %14 = vector.broadcast %13 : vector<16x8x1xf32> to vector<16x8x32xf32>
    %15 = arith.subf %0, %14 : vector<16x8x32xf32>
    %16 = arith.mulf %15, %15 : vector<16x8x32xf32>
    %cst_9 = arith.constant dense<0.000000e+00> : vector<16x8xf32>
    %17 = vector.multi_reduction <add>, %16, %cst_9 [2] : vector<16x8x32xf32> to vector<16x8xf32>
    %18 = vector.shape_cast %17 : vector<16x8xf32> to vector<16x8x1xf32>
    %cst_10 = arith.constant 3.200000e+01 : f32
    %19 = vector.broadcast %cst_10 : f32 to vector<16x8x1xf32>
    %20 = arith.divf %18, %19 : vector<16x8x1xf32>
    %cst_11 = arith.constant 9.99999974E-6 : f32
    %21 = vector.broadcast %cst_11 : f32 to vector<16x8x1xf32>
    %22 = arith.addf %20, %21 : vector<16x8x1xf32>
    %23 = math.rsqrt %22 : vector<16x8x1xf32>
    %24 = vector.broadcast %23 : vector<16x8x1xf32> to vector<16x8x32xf32>
    %25 = arith.mulf %15, %24 : vector<16x8x32xf32>
    %26 = vector.broadcast %6 : vector<1x1x32xf32> to vector<16x8x32xf32>
    %27 = arith.mulf %25, %26 : vector<16x8x32xf32>
    %28 = vector.broadcast %9 : vector<1x1x32xf32> to vector<16x8x32xf32>
    %29 = arith.addf %27, %28 : vector<16x8x32xf32>
    %30 = vector.shape_cast %1 : vector<8x32xf32> to vector<1x8x32xf32>
    %31 = vector.broadcast %30 : vector<1x8x32xf32> to vector<16x8x32xf32>
    %32 = arith.addf %29, %31 : vector<16x8x32xf32>
    %33 = vector.shape_cast %32 : vector<16x8x32xf32> to vector<128x32xf32>
    %c0_12 = arith.constant 0 : index
    %c0_13 = arith.constant 0 : index
    %c0_14 = arith.constant 0 : index
    %34 = vector.load %arg5[%c0_12, %c0_13, %c0_14] : memref<2x32x32xf32, #tpu.memory_space<vmem>>, vector<1x32x32xf32>
    %35 = vector.shape_cast %34 : vector<1x32x32xf32> to vector<32x32xf32>
    %c0_15 = arith.constant 0 : index
    %c0_16 = arith.constant 0 : index
    %c0_17 = arith.constant 0 : index
    %36 = vector.load %arg6[%c0_15, %c0_16, %c0_17] : memref<2x32x32xf32, #tpu.memory_space<vmem>>, vector<1x32x32xf32>
    %37 = vector.shape_cast %36 : vector<1x32x32xf32> to vector<32x32xf32>
    %c0_18 = arith.constant 0 : index
    %c0_19 = arith.constant 0 : index
    %c0_20 = arith.constant 0 : index
    %38 = vector.load %arg7[%c0_18, %c0_19, %c0_20] : memref<2x32x32xf32, #tpu.memory_space<vmem>>, vector<1x32x32xf32>
    %39 = vector.shape_cast %38 : vector<1x32x32xf32> to vector<32x32xf32>
    %c0_21 = arith.constant 0 : index
    %c0_22 = arith.constant 0 : index
    %c0_23 = arith.constant 0 : index
    %40 = vector.load %arg8[%c0_21, %c0_22, %c0_23] : memref<2x32x32xf32, #tpu.memory_space<vmem>>, vector<1x32x32xf32>
    %41 = vector.shape_cast %40 : vector<1x32x32xf32> to vector<32x32xf32>
    %c0_24 = arith.constant 0 : index
    %c0_25 = arith.constant 0 : index
    %42 = vector.load %arg9[%c0_24, %c0_25] : memref<2x32xf32, #tpu.memory_space<vmem>>, vector<2x32xf32>
    %43 = vector.extract_strided_slice %42 {offsets = [0, 0], sizes = [1, 32], strides = [1, 1]} : vector<2x32xf32> to vector<1x32xf32>
    %44 = vector.shape_cast %43 : vector<1x32xf32> to vector<32xf32>
    %45 = vector.shape_cast %44 : vector<32xf32> to vector<1x32xf32>
    %cst_26 = arith.constant dense<0.000000e+00> : vector<128x32xf32>
    %46 = tpu.matmul %33, %35, %cst_26 {dimension_numbers = #tpu.dot_dimension_numbers<[1], [0], [0], [1], [0, 0, 1, 1], [], []>} : vector<128x32xf32>, vector<32x32xf32>, vector<128x32xf32> -> vector<128x32xf32>
    %47 = vector.shape_cast %46 : vector<128x32xf32> to vector<16x8x32xf32>
    %cst_27 = arith.constant dense<0.000000e+00> : vector<128x32xf32>
    %48 = tpu.matmul %33, %37, %cst_27 {dimension_numbers = #tpu.dot_dimension_numbers<[1], [0], [0], [1], [0, 0, 1, 1], [], []>} : vector<128x32xf32>, vector<32x32xf32>, vector<128x32xf32> -> vector<128x32xf32>
    %49 = vector.shape_cast %48 : vector<128x32xf32> to vector<16x8x32xf32>
    %cst_28 = arith.constant dense<0.000000e+00> : vector<128x32xf32>
    %50 = tpu.matmul %33, %39, %cst_28 {dimension_numbers = #tpu.dot_dimension_numbers<[1], [0], [0], [1], [0, 0, 1, 1], [], []>} : vector<128x32xf32>, vector<32x32xf32>, vector<128x32xf32> -> vector<128x32xf32>
    %51 = vector.shape_cast %50 : vector<128x32xf32> to vector<16x8x32xf32>
    %cst_29 = arith.constant 0.000000e+00 : f32
    %52 = vector.broadcast %cst_29 : f32 to vector<128x32xf32>
    %53 = vector.extract_strided_slice %47 {offsets = [0, 0, 0], sizes = [16, 8, 8], strides = [1, 1, 1]} : vector<16x8x32xf32> to vector<16x8x8xf32>
    %54 = vector.extract_strided_slice %49 {offsets = [0, 0, 0], sizes = [16, 8, 8], strides = [1, 1, 1]} : vector<16x8x32xf32> to vector<16x8x8xf32>
    %55 = vector.extract_strided_slice %51 {offsets = [0, 0, 0], sizes = [16, 8, 8], strides = [1, 1, 1]} : vector<16x8x32xf32> to vector<16x8x8xf32>
    "tpu.trace_start"() <{level = 10 : i32, message = "bfd,bgd->bfg"}> : () -> ()
    %cst_30 = arith.constant dense<0.000000e+00> : vector<16x8x8xf32>
    %56 = tpu.matmul %53, %54, %cst_30 {dimension_numbers = #tpu.dot_dimension_numbers<[2], [2], [1], [1], [0, 0, 0, 1, 1, 1], [0], [0]>} : vector<16x8x8xf32>, vector<16x8x8xf32>, vector<16x8x8xf32> -> vector<16x8x8xf32>
    "tpu.trace_stop"() : () -> ()
    %cst_31 = arith.constant 0.353553385 : f32
    %57 = vector.broadcast %cst_31 : f32 to vector<16x8x8xf32>
    %58 = arith.mulf %56, %57 : vector<16x8x8xf32>
    %cst_32 = arith.constant dense<0xFF800000> : vector<16x8xf32>
    %59 = vector.multi_reduction <maximumf>, %58, %cst_32 [2] : vector<16x8x8xf32> to vector<16x8xf32>
    %60 = vector.shape_cast %59 : vector<16x8xf32> to vector<16x8x1xf32>
    %61 = vector.broadcast %60 : vector<16x8x1xf32> to vector<16x8x8xf32>
    %62 = arith.subf %58, %61 : vector<16x8x8xf32>
    %63 = math.exp %62 : vector<16x8x8xf32>
    %cst_33 = arith.constant dense<0.000000e+00> : vector<16x8xf32>
    %64 = vector.multi_reduction <add>, %63, %cst_33 [2] : vector<16x8x8xf32> to vector<16x8xf32>
    %65 = vector.shape_cast %64 : vector<16x8xf32> to vector<16x8x1xf32>
    %66 = vector.broadcast %65 : vector<16x8x1xf32> to vector<16x8x8xf32>
    %67 = arith.divf %63, %66 : vector<16x8x8xf32>
    "tpu.trace_start"() <{level = 10 : i32, message = "bfg,bgd->bfd"}> : () -> ()
    %cst_34 = arith.constant dense<0.000000e+00> : vector<16x8x8xf32>
    %68 = tpu.matmul %67, %55, %cst_34 {dimension_numbers = #tpu.dot_dimension_numbers<[2], [1], [1], [2], [0, 0, 0, 1, 1, 2], [0], [0]>} : vector<16x8x8xf32>, vector<16x8x8xf32>, vector<16x8x8xf32> -> vector<16x8x8xf32>
    "tpu.trace_stop"() : () -> ()
    %69 = vector.shape_cast %68 : vector<16x8x8xf32> to vector<128x8xf32>
    %70 = vector.extract_strided_slice %41 {offsets = [0, 0], sizes = [8, 32], strides = [1, 1]} : vector<32x32xf32> to vector<8x32xf32>
    %cst_35 = arith.constant dense<0.000000e+00> : vector<128x32xf32>
    %71 = tpu.matmul %69, %70, %cst_35 {dimension_numbers = #tpu.dot_dimension_numbers<[1], [0], [0], [1], [0, 0, 1, 1], [], []>} : vector<128x8xf32>, vector<8x32xf32>, vector<128x32xf32> -> vector<128x32xf32>
    %72 = arith.addf %52, %71 : vector<128x32xf32>
    %73 = vector.extract_strided_slice %47 {offsets = [0, 0, 8], sizes = [16, 8, 8], strides = [1, 1, 1]} : vector<16x8x32xf32> to vector<16x8x8xf32>
    %74 = vector.extract_strided_slice %49 {offsets = [0, 0, 8], sizes = [16, 8, 8], strides = [1, 1, 1]} : vector<16x8x32xf32> to vector<16x8x8xf32>
    %75 = vector.extract_strided_slice %51 {offsets = [0, 0, 8], sizes = [16, 8, 8], strides = [1, 1, 1]} : vector<16x8x32xf32> to vector<16x8x8xf32>
    "tpu.trace_start"() <{level = 10 : i32, message = "bfd,bgd->bfg"}> : () -> ()
    %cst_36 = arith.constant dense<0.000000e+00> : vector<16x8x8xf32>
    %76 = tpu.matmul %73, %74, %cst_36 {dimension_numbers = #tpu.dot_dimension_numbers<[2], [2], [1], [1], [0, 0, 0, 1, 1, 1], [0], [0]>} : vector<16x8x8xf32>, vector<16x8x8xf32>, vector<16x8x8xf32> -> vector<16x8x8xf32>
    "tpu.trace_stop"() : () -> ()
    %cst_37 = arith.constant 0.353553385 : f32
    %77 = vector.broadcast %cst_37 : f32 to vector<16x8x8xf32>
    %78 = arith.mulf %76, %77 : vector<16x8x8xf32>
    %cst_38 = arith.constant dense<0xFF800000> : vector<16x8xf32>
    %79 = vector.multi_reduction <maximumf>, %78, %cst_38 [2] : vector<16x8x8xf32> to vector<16x8xf32>
    %80 = vector.shape_cast %79 : vector<16x8xf32> to vector<16x8x1xf32>
    %81 = vector.broadcast %80 : vector<16x8x1xf32> to vector<16x8x8xf32>
    %82 = arith.subf %78, %81 : vector<16x8x8xf32>
    %83 = math.exp %82 : vector<16x8x8xf32>
    %cst_39 = arith.constant dense<0.000000e+00> : vector<16x8xf32>
    %84 = vector.multi_reduction <add>, %83, %cst_39 [2] : vector<16x8x8xf32> to vector<16x8xf32>
    %85 = vector.shape_cast %84 : vector<16x8xf32> to vector<16x8x1xf32>
    %86 = vector.broadcast %85 : vector<16x8x1xf32> to vector<16x8x8xf32>
    %87 = arith.divf %83, %86 : vector<16x8x8xf32>
    "tpu.trace_start"() <{level = 10 : i32, message = "bfg,bgd->bfd"}> : () -> ()
    %cst_40 = arith.constant dense<0.000000e+00> : vector<16x8x8xf32>
    %88 = tpu.matmul %87, %75, %cst_40 {dimension_numbers = #tpu.dot_dimension_numbers<[2], [1], [1], [2], [0, 0, 0, 1, 1, 2], [0], [0]>} : vector<16x8x8xf32>, vector<16x8x8xf32>, vector<16x8x8xf32> -> vector<16x8x8xf32>
    "tpu.trace_stop"() : () -> ()
    %89 = vector.shape_cast %88 : vector<16x8x8xf32> to vector<128x8xf32>
    %90 = vector.extract_strided_slice %41 {offsets = [8, 0], sizes = [8, 32], strides = [1, 1]} : vector<32x32xf32> to vector<8x32xf32>
    %cst_41 = arith.constant dense<0.000000e+00> : vector<128x32xf32>
    %91 = tpu.matmul %89, %90, %cst_41 {dimension_numbers = #tpu.dot_dimension_numbers<[1], [0], [0], [1], [0, 0, 1, 1], [], []>} : vector<128x8xf32>, vector<8x32xf32>, vector<128x32xf32> -> vector<128x32xf32>
    %92 = arith.addf %72, %91 : vector<128x32xf32>
    %93 = vector.extract_strided_slice %47 {offsets = [0, 0, 16], sizes = [16, 8, 8], strides = [1, 1, 1]} : vector<16x8x32xf32> to vector<16x8x8xf32>
    %94 = vector.extract_strided_slice %49 {offsets = [0, 0, 16], sizes = [16, 8, 8], strides = [1, 1, 1]} : vector<16x8x32xf32> to vector<16x8x8xf32>
    %95 = vector.extract_strided_slice %51 {offsets = [0, 0, 16], sizes = [16, 8, 8], strides = [1, 1, 1]} : vector<16x8x32xf32> to vector<16x8x8xf32>
    "tpu.trace_start"() <{level = 10 : i32, message = "bfd,bgd->bfg"}> : () -> ()
    %cst_42 = arith.constant dense<0.000000e+00> : vector<16x8x8xf32>
    %96 = tpu.matmul %93, %94, %cst_42 {dimension_numbers = #tpu.dot_dimension_numbers<[2], [2], [1], [1], [0, 0, 0, 1, 1, 1], [0], [0]>} : vector<16x8x8xf32>, vector<16x8x8xf32>, vector<16x8x8xf32> -> vector<16x8x8xf32>
    "tpu.trace_stop"() : () -> ()
    %cst_43 = arith.constant 0.353553385 : f32
    %97 = vector.broadcast %cst_43 : f32 to vector<16x8x8xf32>
    %98 = arith.mulf %96, %97 : vector<16x8x8xf32>
    %cst_44 = arith.constant dense<0xFF800000> : vector<16x8xf32>
    %99 = vector.multi_reduction <maximumf>, %98, %cst_44 [2] : vector<16x8x8xf32> to vector<16x8xf32>
    %100 = vector.shape_cast %99 : vector<16x8xf32> to vector<16x8x1xf32>
    %101 = vector.broadcast %100 : vector<16x8x1xf32> to vector<16x8x8xf32>
    %102 = arith.subf %98, %101 : vector<16x8x8xf32>
    %103 = math.exp %102 : vector<16x8x8xf32>
    %cst_45 = arith.constant dense<0.000000e+00> : vector<16x8xf32>
    %104 = vector.multi_reduction <add>, %103, %cst_45 [2] : vector<16x8x8xf32> to vector<16x8xf32>
    %105 = vector.shape_cast %104 : vector<16x8xf32> to vector<16x8x1xf32>
    %106 = vector.broadcast %105 : vector<16x8x1xf32> to vector<16x8x8xf32>
    %107 = arith.divf %103, %106 : vector<16x8x8xf32>
    "tpu.trace_start"() <{level = 10 : i32, message = "bfg,bgd->bfd"}> : () -> ()
    %cst_46 = arith.constant dense<0.000000e+00> : vector<16x8x8xf32>
    %108 = tpu.matmul %107, %95, %cst_46 {dimension_numbers = #tpu.dot_dimension_numbers<[2], [1], [1], [2], [0, 0, 0, 1, 1, 2], [0], [0]>} : vector<16x8x8xf32>, vector<16x8x8xf32>, vector<16x8x8xf32> -> vector<16x8x8xf32>
    "tpu.trace_stop"() : () -> ()
    %109 = vector.shape_cast %108 : vector<16x8x8xf32> to vector<128x8xf32>
    %110 = vector.extract_strided_slice %41 {offsets = [16, 0], sizes = [8, 32], strides = [1, 1]} : vector<32x32xf32> to vector<8x32xf32>
    %cst_47 = arith.constant dense<0.000000e+00> : vector<128x32xf32>
    %111 = tpu.matmul %109, %110, %cst_47 {dimension_numbers = #tpu.dot_dimension_numbers<[1], [0], [0], [1], [0, 0, 1, 1], [], []>} : vector<128x8xf32>, vector<8x32xf32>, vector<128x32xf32> -> vector<128x32xf32>
    %112 = arith.addf %92, %111 : vector<128x32xf32>
    %113 = vector.extract_strided_slice %47 {offsets = [0, 0, 24], sizes = [16, 8, 8], strides = [1, 1, 1]} : vector<16x8x32xf32> to vector<16x8x8xf32>
    %114 = vector.extract_strided_slice %49 {offsets = [0, 0, 24], sizes = [16, 8, 8], strides = [1, 1, 1]} : vector<16x8x32xf32> to vector<16x8x8xf32>
    %115 = vector.extract_strided_slice %51 {offsets = [0, 0, 24], sizes = [16, 8, 8], strides = [1, 1, 1]} : vector<16x8x32xf32> to vector<16x8x8xf32>
    "tpu.trace_start"() <{level = 10 : i32, message = "bfd,bgd->bfg"}> : () -> ()
    %cst_48 = arith.constant dense<0.000000e+00> : vector<16x8x8xf32>
    %116 = tpu.matmul %113, %114, %cst_48 {dimension_numbers = #tpu.dot_dimension_numbers<[2], [2], [1], [1], [0, 0, 0, 1, 1, 1], [0], [0]>} : vector<16x8x8xf32>, vector<16x8x8xf32>, vector<16x8x8xf32> -> vector<16x8x8xf32>
    "tpu.trace_stop"() : () -> ()
    %cst_49 = arith.constant 0.353553385 : f32
    %117 = vector.broadcast %cst_49 : f32 to vector<16x8x8xf32>
    %118 = arith.mulf %116, %117 : vector<16x8x8xf32>
    %cst_50 = arith.constant dense<0xFF800000> : vector<16x8xf32>
    %119 = vector.multi_reduction <maximumf>, %118, %cst_50 [2] : vector<16x8x8xf32> to vector<16x8xf32>
    %120 = vector.shape_cast %119 : vector<16x8xf32> to vector<16x8x1xf32>
    %121 = vector.broadcast %120 : vector<16x8x1xf32> to vector<16x8x8xf32>
    %122 = arith.subf %118, %121 : vector<16x8x8xf32>
    %123 = math.exp %122 : vector<16x8x8xf32>
    %cst_51 = arith.constant dense<0.000000e+00> : vector<16x8xf32>
    %124 = vector.multi_reduction <add>, %123, %cst_51 [2] : vector<16x8x8xf32> to vector<16x8xf32>
    %125 = vector.shape_cast %124 : vector<16x8xf32> to vector<16x8x1xf32>
    %126 = vector.broadcast %125 : vector<16x8x1xf32> to vector<16x8x8xf32>
    %127 = arith.divf %123, %126 : vector<16x8x8xf32>
    "tpu.trace_start"() <{level = 10 : i32, message = "bfg,bgd->bfd"}> : () -> ()
    %cst_52 = arith.constant dense<0.000000e+00> : vector<16x8x8xf32>
    %128 = tpu.matmul %127, %115, %cst_52 {dimension_numbers = #tpu.dot_dimension_numbers<[2], [1], [1], [2], [0, 0, 0, 1, 1, 2], [0], [0]>} : vector<16x8x8xf32>, vector<16x8x8xf32>, vector<16x8x8xf32> -> vector<16x8x8xf32>
    "tpu.trace_stop"() : () -> ()
    %129 = vector.shape_cast %128 : vector<16x8x8xf32> to vector<128x8xf32>
    %130 = vector.extract_strided_slice %41 {offsets = [24, 0], sizes = [8, 32], strides = [1, 1]} : vector<32x32xf32> to vector<8x32xf32>
    %cst_53 = arith.constant dense<0.000000e+00> : vector<128x32xf32>
    %131 = tpu.matmul %129, %130, %cst_53 {dimension_numbers = #tpu.dot_dimension_numbers<[1], [0], [0], [1], [0, 0, 1, 1], [], []>} : vector<128x8xf32>, vector<8x32xf32>, vector<128x32xf32> -> vector<128x32xf32>
    %132 = arith.addf %112, %131 : vector<128x32xf32>
    %133 = vector.broadcast %45 : vector<1x32xf32> to vector<128x32xf32>
    %134 = arith.addf %132, %133 : vector<128x32xf32>
    %135 = vector.shape_cast %134 : vector<128x32xf32> to vector<16x8x32xf32>
    %136 = arith.addf %0, %135 : vector<16x8x32xf32>
    %137 = vector.extract_strided_slice %2 {offsets = [1, 0], sizes = [1, 32], strides = [1, 1]} : vector<2x32xf32> to vector<1x32xf32>
    %138 = vector.shape_cast %137 : vector<1x32xf32> to vector<32xf32>
    %139 = vector.shape_cast %138 : vector<32xf32> to vector<1x1x32xf32>
    %140 = vector.extract_strided_slice %3 {offsets = [1, 0], sizes = [1, 32], strides = [1, 1]} : vector<2x32xf32> to vector<1x32xf32>
    %141 = vector.shape_cast %140 : vector<1x32xf32> to vector<32xf32>
    %142 = vector.shape_cast %141 : vector<32xf32> to vector<1x1x32xf32>
    %cst_54 = arith.constant dense<0.000000e+00> : vector<16x8xf32>
    %143 = vector.multi_reduction <add>, %136, %cst_54 [2] : vector<16x8x32xf32> to vector<16x8xf32>
    %144 = vector.shape_cast %143 : vector<16x8xf32> to vector<16x8x1xf32>
    %cst_55 = arith.constant 3.200000e+01 : f32
    %145 = vector.broadcast %cst_55 : f32 to vector<16x8x1xf32>
    %146 = arith.divf %144, %145 : vector<16x8x1xf32>
    %147 = vector.broadcast %146 : vector<16x8x1xf32> to vector<16x8x32xf32>
    %148 = arith.subf %136, %147 : vector<16x8x32xf32>
    %149 = arith.mulf %148, %148 : vector<16x8x32xf32>
    %cst_56 = arith.constant dense<0.000000e+00> : vector<16x8xf32>
    %150 = vector.multi_reduction <add>, %149, %cst_56 [2] : vector<16x8x32xf32> to vector<16x8xf32>
    %151 = vector.shape_cast %150 : vector<16x8xf32> to vector<16x8x1xf32>
    %cst_57 = arith.constant 3.200000e+01 : f32
    %152 = vector.broadcast %cst_57 : f32 to vector<16x8x1xf32>
    %153 = arith.divf %151, %152 : vector<16x8x1xf32>
    %cst_58 = arith.constant 9.99999974E-6 : f32
    %154 = vector.broadcast %cst_58 : f32 to vector<16x8x1xf32>
    %155 = arith.addf %153, %154 : vector<16x8x1xf32>
    %156 = math.rsqrt %155 : vector<16x8x1xf32>
    %157 = vector.broadcast %156 : vector<16x8x1xf32> to vector<16x8x32xf32>
    %158 = arith.mulf %148, %157 : vector<16x8x32xf32>
    %159 = vector.broadcast %139 : vector<1x1x32xf32> to vector<16x8x32xf32>
    %160 = arith.mulf %158, %159 : vector<16x8x32xf32>
    %161 = vector.broadcast %142 : vector<1x1x32xf32> to vector<16x8x32xf32>
    %162 = arith.addf %160, %161 : vector<16x8x32xf32>
    %163 = vector.shape_cast %1 : vector<8x32xf32> to vector<1x8x32xf32>
    %164 = vector.broadcast %163 : vector<1x8x32xf32> to vector<16x8x32xf32>
    %165 = arith.addf %162, %164 : vector<16x8x32xf32>
    %166 = vector.shape_cast %165 : vector<16x8x32xf32> to vector<128x32xf32>
    %c1 = arith.constant 1 : index
    %c0_59 = arith.constant 0 : index
    %c0_60 = arith.constant 0 : index
    %167 = vector.load %arg5[%c1, %c0_59, %c0_60] : memref<2x32x32xf32, #tpu.memory_space<vmem>>, vector<1x32x32xf32>
    %168 = vector.shape_cast %167 : vector<1x32x32xf32> to vector<32x32xf32>
    %c1_61 = arith.constant 1 : index
    %c0_62 = arith.constant 0 : index
    %c0_63 = arith.constant 0 : index
    %169 = vector.load %arg6[%c1_61, %c0_62, %c0_63] : memref<2x32x32xf32, #tpu.memory_space<vmem>>, vector<1x32x32xf32>
    %170 = vector.shape_cast %169 : vector<1x32x32xf32> to vector<32x32xf32>
    %c1_64 = arith.constant 1 : index
    %c0_65 = arith.constant 0 : index
    %c0_66 = arith.constant 0 : index
    %171 = vector.load %arg7[%c1_64, %c0_65, %c0_66] : memref<2x32x32xf32, #tpu.memory_space<vmem>>, vector<1x32x32xf32>
    %172 = vector.shape_cast %171 : vector<1x32x32xf32> to vector<32x32xf32>
    %c1_67 = arith.constant 1 : index
    %c0_68 = arith.constant 0 : index
    %c0_69 = arith.constant 0 : index
    %173 = vector.load %arg8[%c1_67, %c0_68, %c0_69] : memref<2x32x32xf32, #tpu.memory_space<vmem>>, vector<1x32x32xf32>
    %174 = vector.shape_cast %173 : vector<1x32x32xf32> to vector<32x32xf32>
    %c0_70 = arith.constant 0 : index
    %c0_71 = arith.constant 0 : index
    %175 = vector.load %arg9[%c0_70, %c0_71] : memref<2x32xf32, #tpu.memory_space<vmem>>, vector<2x32xf32>
    %176 = vector.extract_strided_slice %175 {offsets = [1, 0], sizes = [1, 32], strides = [1, 1]} : vector<2x32xf32> to vector<1x32xf32>
    %177 = vector.shape_cast %176 : vector<1x32xf32> to vector<32xf32>
    %178 = vector.shape_cast %177 : vector<32xf32> to vector<1x32xf32>
    %cst_72 = arith.constant dense<0.000000e+00> : vector<128x32xf32>
    %179 = tpu.matmul %166, %168, %cst_72 {dimension_numbers = #tpu.dot_dimension_numbers<[1], [0], [0], [1], [0, 0, 1, 1], [], []>} : vector<128x32xf32>, vector<32x32xf32>, vector<128x32xf32> -> vector<128x32xf32>
    %180 = vector.shape_cast %179 : vector<128x32xf32> to vector<16x8x32xf32>
    %cst_73 = arith.constant dense<0.000000e+00> : vector<128x32xf32>
    %181 = tpu.matmul %166, %170, %cst_73 {dimension_numbers = #tpu.dot_dimension_numbers<[1], [0], [0], [1], [0, 0, 1, 1], [], []>} : vector<128x32xf32>, vector<32x32xf32>, vector<128x32xf32> -> vector<128x32xf32>
    %182 = vector.shape_cast %181 : vector<128x32xf32> to vector<16x8x32xf32>
    %cst_74 = arith.constant dense<0.000000e+00> : vector<128x32xf32>
    %183 = tpu.matmul %166, %172, %cst_74 {dimension_numbers = #tpu.dot_dimension_numbers<[1], [0], [0], [1], [0, 0, 1, 1], [], []>} : vector<128x32xf32>, vector<32x32xf32>, vector<128x32xf32> -> vector<128x32xf32>
    %184 = vector.shape_cast %183 : vector<128x32xf32> to vector<16x8x32xf32>
    %cst_75 = arith.constant 0.000000e+00 : f32
    %185 = vector.broadcast %cst_75 : f32 to vector<128x32xf32>
    %186 = vector.extract_strided_slice %180 {offsets = [0, 0, 0], sizes = [16, 8, 8], strides = [1, 1, 1]} : vector<16x8x32xf32> to vector<16x8x8xf32>
    %187 = vector.extract_strided_slice %182 {offsets = [0, 0, 0], sizes = [16, 8, 8], strides = [1, 1, 1]} : vector<16x8x32xf32> to vector<16x8x8xf32>
    %188 = vector.extract_strided_slice %184 {offsets = [0, 0, 0], sizes = [16, 8, 8], strides = [1, 1, 1]} : vector<16x8x32xf32> to vector<16x8x8xf32>
    "tpu.trace_start"() <{level = 10 : i32, message = "bfd,bgd->bfg"}> : () -> ()
    %cst_76 = arith.constant dense<0.000000e+00> : vector<16x8x8xf32>
    %189 = tpu.matmul %186, %187, %cst_76 {dimension_numbers = #tpu.dot_dimension_numbers<[2], [2], [1], [1], [0, 0, 0, 1, 1, 1], [0], [0]>} : vector<16x8x8xf32>, vector<16x8x8xf32>, vector<16x8x8xf32> -> vector<16x8x8xf32>
    "tpu.trace_stop"() : () -> ()
    %cst_77 = arith.constant 0.353553385 : f32
    %190 = vector.broadcast %cst_77 : f32 to vector<16x8x8xf32>
    %191 = arith.mulf %189, %190 : vector<16x8x8xf32>
    %cst_78 = arith.constant dense<0xFF800000> : vector<16x8xf32>
    %192 = vector.multi_reduction <maximumf>, %191, %cst_78 [2] : vector<16x8x8xf32> to vector<16x8xf32>
    %193 = vector.shape_cast %192 : vector<16x8xf32> to vector<16x8x1xf32>
    %194 = vector.broadcast %193 : vector<16x8x1xf32> to vector<16x8x8xf32>
    %195 = arith.subf %191, %194 : vector<16x8x8xf32>
    %196 = math.exp %195 : vector<16x8x8xf32>
    %cst_79 = arith.constant dense<0.000000e+00> : vector<16x8xf32>
    %197 = vector.multi_reduction <add>, %196, %cst_79 [2] : vector<16x8x8xf32> to vector<16x8xf32>
    %198 = vector.shape_cast %197 : vector<16x8xf32> to vector<16x8x1xf32>
    %199 = vector.broadcast %198 : vector<16x8x1xf32> to vector<16x8x8xf32>
    %200 = arith.divf %196, %199 : vector<16x8x8xf32>
    "tpu.trace_start"() <{level = 10 : i32, message = "bfg,bgd->bfd"}> : () -> ()
    %cst_80 = arith.constant dense<0.000000e+00> : vector<16x8x8xf32>
    %201 = tpu.matmul %200, %188, %cst_80 {dimension_numbers = #tpu.dot_dimension_numbers<[2], [1], [1], [2], [0, 0, 0, 1, 1, 2], [0], [0]>} : vector<16x8x8xf32>, vector<16x8x8xf32>, vector<16x8x8xf32> -> vector<16x8x8xf32>
    "tpu.trace_stop"() : () -> ()
    %202 = vector.shape_cast %201 : vector<16x8x8xf32> to vector<128x8xf32>
    %203 = vector.extract_strided_slice %174 {offsets = [0, 0], sizes = [8, 32], strides = [1, 1]} : vector<32x32xf32> to vector<8x32xf32>
    %cst_81 = arith.constant dense<0.000000e+00> : vector<128x32xf32>
    %204 = tpu.matmul %202, %203, %cst_81 {dimension_numbers = #tpu.dot_dimension_numbers<[1], [0], [0], [1], [0, 0, 1, 1], [], []>} : vector<128x8xf32>, vector<8x32xf32>, vector<128x32xf32> -> vector<128x32xf32>
    %205 = arith.addf %185, %204 : vector<128x32xf32>
    %206 = vector.extract_strided_slice %180 {offsets = [0, 0, 8], sizes = [16, 8, 8], strides = [1, 1, 1]} : vector<16x8x32xf32> to vector<16x8x8xf32>
    %207 = vector.extract_strided_slice %182 {offsets = [0, 0, 8], sizes = [16, 8, 8], strides = [1, 1, 1]} : vector<16x8x32xf32> to vector<16x8x8xf32>
    %208 = vector.extract_strided_slice %184 {offsets = [0, 0, 8], sizes = [16, 8, 8], strides = [1, 1, 1]} : vector<16x8x32xf32> to vector<16x8x8xf32>
    "tpu.trace_start"() <{level = 10 : i32, message = "bfd,bgd->bfg"}> : () -> ()
    %cst_82 = arith.constant dense<0.000000e+00> : vector<16x8x8xf32>
    %209 = tpu.matmul %206, %207, %cst_82 {dimension_numbers = #tpu.dot_dimension_numbers<[2], [2], [1], [1], [0, 0, 0, 1, 1, 1], [0], [0]>} : vector<16x8x8xf32>, vector<16x8x8xf32>, vector<16x8x8xf32> -> vector<16x8x8xf32>
    "tpu.trace_stop"() : () -> ()
    %cst_83 = arith.constant 0.353553385 : f32
    %210 = vector.broadcast %cst_83 : f32 to vector<16x8x8xf32>
    %211 = arith.mulf %209, %210 : vector<16x8x8xf32>
    %cst_84 = arith.constant dense<0xFF800000> : vector<16x8xf32>
    %212 = vector.multi_reduction <maximumf>, %211, %cst_84 [2] : vector<16x8x8xf32> to vector<16x8xf32>
    %213 = vector.shape_cast %212 : vector<16x8xf32> to vector<16x8x1xf32>
    %214 = vector.broadcast %213 : vector<16x8x1xf32> to vector<16x8x8xf32>
    %215 = arith.subf %211, %214 : vector<16x8x8xf32>
    %216 = math.exp %215 : vector<16x8x8xf32>
    %cst_85 = arith.constant dense<0.000000e+00> : vector<16x8xf32>
    %217 = vector.multi_reduction <add>, %216, %cst_85 [2] : vector<16x8x8xf32> to vector<16x8xf32>
    %218 = vector.shape_cast %217 : vector<16x8xf32> to vector<16x8x1xf32>
    %219 = vector.broadcast %218 : vector<16x8x1xf32> to vector<16x8x8xf32>
    %220 = arith.divf %216, %219 : vector<16x8x8xf32>
    "tpu.trace_start"() <{level = 10 : i32, message = "bfg,bgd->bfd"}> : () -> ()
    %cst_86 = arith.constant dense<0.000000e+00> : vector<16x8x8xf32>
    %221 = tpu.matmul %220, %208, %cst_86 {dimension_numbers = #tpu.dot_dimension_numbers<[2], [1], [1], [2], [0, 0, 0, 1, 1, 2], [0], [0]>} : vector<16x8x8xf32>, vector<16x8x8xf32>, vector<16x8x8xf32> -> vector<16x8x8xf32>
    "tpu.trace_stop"() : () -> ()
    %222 = vector.shape_cast %221 : vector<16x8x8xf32> to vector<128x8xf32>
    %223 = vector.extract_strided_slice %174 {offsets = [8, 0], sizes = [8, 32], strides = [1, 1]} : vector<32x32xf32> to vector<8x32xf32>
    %cst_87 = arith.constant dense<0.000000e+00> : vector<128x32xf32>
    %224 = tpu.matmul %222, %223, %cst_87 {dimension_numbers = #tpu.dot_dimension_numbers<[1], [0], [0], [1], [0, 0, 1, 1], [], []>} : vector<128x8xf32>, vector<8x32xf32>, vector<128x32xf32> -> vector<128x32xf32>
    %225 = arith.addf %205, %224 : vector<128x32xf32>
    %226 = vector.extract_strided_slice %180 {offsets = [0, 0, 16], sizes = [16, 8, 8], strides = [1, 1, 1]} : vector<16x8x32xf32> to vector<16x8x8xf32>
    %227 = vector.extract_strided_slice %182 {offsets = [0, 0, 16], sizes = [16, 8, 8], strides = [1, 1, 1]} : vector<16x8x32xf32> to vector<16x8x8xf32>
    %228 = vector.extract_strided_slice %184 {offsets = [0, 0, 16], sizes = [16, 8, 8], strides = [1, 1, 1]} : vector<16x8x32xf32> to vector<16x8x8xf32>
    "tpu.trace_start"() <{level = 10 : i32, message = "bfd,bgd->bfg"}> : () -> ()
    %cst_88 = arith.constant dense<0.000000e+00> : vector<16x8x8xf32>
    %229 = tpu.matmul %226, %227, %cst_88 {dimension_numbers = #tpu.dot_dimension_numbers<[2], [2], [1], [1], [0, 0, 0, 1, 1, 1], [0], [0]>} : vector<16x8x8xf32>, vector<16x8x8xf32>, vector<16x8x8xf32> -> vector<16x8x8xf32>
    "tpu.trace_stop"() : () -> ()
    %cst_89 = arith.constant 0.353553385 : f32
    %230 = vector.broadcast %cst_89 : f32 to vector<16x8x8xf32>
    %231 = arith.mulf %229, %230 : vector<16x8x8xf32>
    %cst_90 = arith.constant dense<0xFF800000> : vector<16x8xf32>
    %232 = vector.multi_reduction <maximumf>, %231, %cst_90 [2] : vector<16x8x8xf32> to vector<16x8xf32>
    %233 = vector.shape_cast %232 : vector<16x8xf32> to vector<16x8x1xf32>
    %234 = vector.broadcast %233 : vector<16x8x1xf32> to vector<16x8x8xf32>
    %235 = arith.subf %231, %234 : vector<16x8x8xf32>
    %236 = math.exp %235 : vector<16x8x8xf32>
    %cst_91 = arith.constant dense<0.000000e+00> : vector<16x8xf32>
    %237 = vector.multi_reduction <add>, %236, %cst_91 [2] : vector<16x8x8xf32> to vector<16x8xf32>
    %238 = vector.shape_cast %237 : vector<16x8xf32> to vector<16x8x1xf32>
    %239 = vector.broadcast %238 : vector<16x8x1xf32> to vector<16x8x8xf32>
    %240 = arith.divf %236, %239 : vector<16x8x8xf32>
    "tpu.trace_start"() <{level = 10 : i32, message = "bfg,bgd->bfd"}> : () -> ()
    %cst_92 = arith.constant dense<0.000000e+00> : vector<16x8x8xf32>
    %241 = tpu.matmul %240, %228, %cst_92 {dimension_numbers = #tpu.dot_dimension_numbers<[2], [1], [1], [2], [0, 0, 0, 1, 1, 2], [0], [0]>} : vector<16x8x8xf32>, vector<16x8x8xf32>, vector<16x8x8xf32> -> vector<16x8x8xf32>
    "tpu.trace_stop"() : () -> ()
    %242 = vector.shape_cast %241 : vector<16x8x8xf32> to vector<128x8xf32>
    %243 = vector.extract_strided_slice %174 {offsets = [16, 0], sizes = [8, 32], strides = [1, 1]} : vector<32x32xf32> to vector<8x32xf32>
    %cst_93 = arith.constant dense<0.000000e+00> : vector<128x32xf32>
    %244 = tpu.matmul %242, %243, %cst_93 {dimension_numbers = #tpu.dot_dimension_numbers<[1], [0], [0], [1], [0, 0, 1, 1], [], []>} : vector<128x8xf32>, vector<8x32xf32>, vector<128x32xf32> -> vector<128x32xf32>
    %245 = arith.addf %225, %244 : vector<128x32xf32>
    %246 = vector.extract_strided_slice %180 {offsets = [0, 0, 24], sizes = [16, 8, 8], strides = [1, 1, 1]} : vector<16x8x32xf32> to vector<16x8x8xf32>
    %247 = vector.extract_strided_slice %182 {offsets = [0, 0, 24], sizes = [16, 8, 8], strides = [1, 1, 1]} : vector<16x8x32xf32> to vector<16x8x8xf32>
    %248 = vector.extract_strided_slice %184 {offsets = [0, 0, 24], sizes = [16, 8, 8], strides = [1, 1, 1]} : vector<16x8x32xf32> to vector<16x8x8xf32>
    "tpu.trace_start"() <{level = 10 : i32, message = "bfd,bgd->bfg"}> : () -> ()
    %cst_94 = arith.constant dense<0.000000e+00> : vector<16x8x8xf32>
    %249 = tpu.matmul %246, %247, %cst_94 {dimension_numbers = #tpu.dot_dimension_numbers<[2], [2], [1], [1], [0, 0, 0, 1, 1, 1], [0], [0]>} : vector<16x8x8xf32>, vector<16x8x8xf32>, vector<16x8x8xf32> -> vector<16x8x8xf32>
    "tpu.trace_stop"() : () -> ()
    %cst_95 = arith.constant 0.353553385 : f32
    %250 = vector.broadcast %cst_95 : f32 to vector<16x8x8xf32>
    %251 = arith.mulf %249, %250 : vector<16x8x8xf32>
    %cst_96 = arith.constant dense<0xFF800000> : vector<16x8xf32>
    %252 = vector.multi_reduction <maximumf>, %251, %cst_96 [2] : vector<16x8x8xf32> to vector<16x8xf32>
    %253 = vector.shape_cast %252 : vector<16x8xf32> to vector<16x8x1xf32>
    %254 = vector.broadcast %253 : vector<16x8x1xf32> to vector<16x8x8xf32>
    %255 = arith.subf %251, %254 : vector<16x8x8xf32>
    %256 = math.exp %255 : vector<16x8x8xf32>
    %cst_97 = arith.constant dense<0.000000e+00> : vector<16x8xf32>
    %257 = vector.multi_reduction <add>, %256, %cst_97 [2] : vector<16x8x8xf32> to vector<16x8xf32>
    %258 = vector.shape_cast %257 : vector<16x8xf32> to vector<16x8x1xf32>
    %259 = vector.broadcast %258 : vector<16x8x1xf32> to vector<16x8x8xf32>
    %260 = arith.divf %256, %259 : vector<16x8x8xf32>
    "tpu.trace_start"() <{level = 10 : i32, message = "bfg,bgd->bfd"}> : () -> ()
    %cst_98 = arith.constant dense<0.000000e+00> : vector<16x8x8xf32>
    %261 = tpu.matmul %260, %248, %cst_98 {dimension_numbers = #tpu.dot_dimension_numbers<[2], [1], [1], [2], [0, 0, 0, 1, 1, 2], [0], [0]>} : vector<16x8x8xf32>, vector<16x8x8xf32>, vector<16x8x8xf32> -> vector<16x8x8xf32>
    "tpu.trace_stop"() : () -> ()
    %262 = vector.shape_cast %261 : vector<16x8x8xf32> to vector<128x8xf32>
    %263 = vector.extract_strided_slice %174 {offsets = [24, 0], sizes = [8, 32], strides = [1, 1]} : vector<32x32xf32> to vector<8x32xf32>
    %cst_99 = arith.constant dense<0.000000e+00> : vector<128x32xf32>
    %264 = tpu.matmul %262, %263, %cst_99 {dimension_numbers = #tpu.dot_dimension_numbers<[1], [0], [0], [1], [0, 0, 1, 1], [], []>} : vector<128x8xf32>, vector<8x32xf32>, vector<128x32xf32> -> vector<128x32xf32>
    %265 = arith.addf %245, %264 : vector<128x32xf32>
    %266 = vector.broadcast %178 : vector<1x32xf32> to vector<128x32xf32>
    %267 = arith.addf %265, %266 : vector<128x32xf32>
    %268 = vector.shape_cast %267 : vector<128x32xf32> to vector<16x8x32xf32>
    %269 = arith.addf %136, %268 : vector<16x8x32xf32>
    %c0_100 = arith.constant 0 : index
    %c0_101 = arith.constant 0 : index
    %270 = vector.load %arg10[%c0_100, %c0_101] : memref<1x32xf32, #tpu.memory_space<vmem>>, vector<1x32xf32>
    %271 = vector.shape_cast %270 : vector<1x32xf32> to vector<1x1x32xf32>
    %c0_102 = arith.constant 0 : index
    %c0_103 = arith.constant 0 : index
    %272 = vector.load %arg11[%c0_102, %c0_103] : memref<1x32xf32, #tpu.memory_space<vmem>>, vector<1x32xf32>
    %273 = vector.shape_cast %272 : vector<1x32xf32> to vector<1x1x32xf32>
    %cst_104 = arith.constant dense<0.000000e+00> : vector<16x8xf32>
    %274 = vector.multi_reduction <add>, %269, %cst_104 [2] : vector<16x8x32xf32> to vector<16x8xf32>
    %275 = vector.shape_cast %274 : vector<16x8xf32> to vector<16x8x1xf32>
    %cst_105 = arith.constant 3.200000e+01 : f32
    %276 = vector.broadcast %cst_105 : f32 to vector<16x8x1xf32>
    %277 = arith.divf %275, %276 : vector<16x8x1xf32>
    %278 = vector.broadcast %277 : vector<16x8x1xf32> to vector<16x8x32xf32>
    %279 = arith.subf %269, %278 : vector<16x8x32xf32>
    %280 = arith.mulf %279, %279 : vector<16x8x32xf32>
    %cst_106 = arith.constant dense<0.000000e+00> : vector<16x8xf32>
    %281 = vector.multi_reduction <add>, %280, %cst_106 [2] : vector<16x8x32xf32> to vector<16x8xf32>
    %282 = vector.shape_cast %281 : vector<16x8xf32> to vector<16x8x1xf32>
    %cst_107 = arith.constant 3.200000e+01 : f32
    %283 = vector.broadcast %cst_107 : f32 to vector<16x8x1xf32>
    %284 = arith.divf %282, %283 : vector<16x8x1xf32>
    %cst_108 = arith.constant 9.99999974E-6 : f32
    %285 = vector.broadcast %cst_108 : f32 to vector<16x8x1xf32>
    %286 = arith.addf %284, %285 : vector<16x8x1xf32>
    %287 = math.rsqrt %286 : vector<16x8x1xf32>
    %288 = vector.broadcast %287 : vector<16x8x1xf32> to vector<16x8x32xf32>
    %289 = arith.mulf %279, %288 : vector<16x8x32xf32>
    %290 = vector.broadcast %271 : vector<1x1x32xf32> to vector<16x8x32xf32>
    %291 = arith.mulf %289, %290 : vector<16x8x32xf32>
    %292 = vector.broadcast %273 : vector<1x1x32xf32> to vector<16x8x32xf32>
    %293 = arith.addf %291, %292 : vector<16x8x32xf32>
    %294 = vector.shape_cast %293 : vector<16x8x32xf32> to vector<128x32xf32>
    %c0_109 = arith.constant 0 : index
    %c0_110 = arith.constant 0 : index
    %295 = vector.load %arg12[%c0_109, %c0_110] : memref<32x256xf32, #tpu.memory_space<vmem>>, vector<32x256xf32>
    %cst_111 = arith.constant dense<0.000000e+00> : vector<128x256xf32>
    %296 = tpu.matmul %294, %295, %cst_111 {dimension_numbers = #tpu.dot_dimension_numbers<[1], [0], [0], [1], [0, 0, 1, 1], [], []>} : vector<128x32xf32>, vector<32x256xf32>, vector<128x256xf32> -> vector<128x256xf32>
    %c0_112 = arith.constant 0 : index
    %c0_113 = arith.constant 0 : index
    %297 = vector.load %arg13[%c0_112, %c0_113] : memref<1x256xf32, #tpu.memory_space<vmem>>, vector<1x256xf32>
    %298 = vector.broadcast %297 : vector<1x256xf32> to vector<128x256xf32>
    %299 = arith.addf %296, %298 : vector<128x256xf32>
    %300 = vector.extract_strided_slice %299 {offsets = [0, 0], sizes = [128, 128], strides = [1, 1]} : vector<128x256xf32> to vector<128x128xf32>
    %301 = vector.extract_strided_slice %299 {offsets = [0, 128], sizes = [128, 128], strides = [1, 1]} : vector<128x256xf32> to vector<128x128xf32>
    %302 = arith.mulf %301, %301 : vector<128x128xf32>
    %303 = arith.mulf %301, %302 : vector<128x128xf32>
    %cst_114 = arith.constant 4.471500e-02 : f32
    %304 = vector.broadcast %cst_114 : f32 to vector<128x128xf32>
    %305 = arith.mulf %304, %303 : vector<128x128xf32>
    %306 = arith.addf %301, %305 : vector<128x128xf32>
    %cst_115 = arith.constant 0.797884583 : f32
    %307 = vector.broadcast %cst_115 : f32 to vector<128x128xf32>
    %308 = arith.mulf %307, %306 : vector<128x128xf32>
    %309 = math.tanh %308 : vector<128x128xf32>
    %cst_116 = arith.constant 1.000000e+00 : f32
    %310 = vector.broadcast %cst_116 : f32 to vector<128x128xf32>
    %311 = arith.addf %310, %309 : vector<128x128xf32>
    %cst_117 = arith.constant 5.000000e-01 : f32
    %312 = vector.broadcast %cst_117 : f32 to vector<128x128xf32>
    %313 = arith.mulf %312, %311 : vector<128x128xf32>
    %314 = arith.mulf %301, %313 : vector<128x128xf32>
    %315 = arith.mulf %300, %314 : vector<128x128xf32>
    %c0_118 = arith.constant 0 : index
    %c0_119 = arith.constant 0 : index
    %316 = vector.load %arg14[%c0_118, %c0_119] : memref<128x32xf32, #tpu.memory_space<vmem>>, vector<128x32xf32>
    %cst_120 = arith.constant dense<0.000000e+00> : vector<128x32xf32>
    %317 = tpu.matmul %315, %316, %cst_120 {dimension_numbers = #tpu.dot_dimension_numbers<[1], [0], [0], [1], [0, 0, 1, 1], [], []>} : vector<128x128xf32>, vector<128x32xf32>, vector<128x32xf32> -> vector<128x32xf32>
    %c0_121 = arith.constant 0 : index
    %c0_122 = arith.constant 0 : index
    %318 = vector.load %arg15[%c0_121, %c0_122] : memref<1x32xf32, #tpu.memory_space<vmem>>, vector<1x32xf32>
    %319 = vector.broadcast %318 : vector<1x32xf32> to vector<128x32xf32>
    %320 = arith.addf %317, %319 : vector<128x32xf32>
    %321 = vector.shape_cast %320 : vector<128x32xf32> to vector<16x8x32xf32>
    %322 = arith.addf %269, %321 : vector<16x8x32xf32>
    %c0_123 = arith.constant 0 : index
    %c0_124 = arith.constant 0 : index
    %c0_125 = arith.constant 0 : index
    %323 = vector.load %arg16[%c0_123, %c0_124, %c0_125] : memref<16x8x32xf32, #tpu.memory_space<vmem>>, vector<16x8x32xf32>
    tpu.vector_store %arg16[%c0_123, %c0_124, %c0_125], %322 {strides = array<i32>} : memref<16x8x32xf32, #tpu.memory_space<vmem>>, vector<16x8x32xf32>,
    return
  }
  func.func @transform_0(%arg0: i32) -> (i32, i32, i32) {
    %c0_i32 = arith.constant 0 : i32
    %c0_i32_0 = arith.constant 0 : i32
    %c0_i32_1 = arith.constant 0 : i32
    return %arg0, %c0_i32, %c0_i32_0 : i32, i32, i32
  }
  func.func @transform_1(%arg0: i32) -> (i32, i32) {
    %c0_i32 = arith.constant 0 : i32
    %c0_i32_0 = arith.constant 0 : i32
    %c0_i32_1 = arith.constant 0 : i32
    return %c0_i32, %c0_i32_0 : i32, i32
  }
  func.func @transform_2(%arg0: i32) -> (i32, i32) {
    %c0_i32 = arith.constant 0 : i32
    %c0_i32_0 = arith.constant 0 : i32
    %c0_i32_1 = arith.constant 0 : i32
    return %c0_i32, %c0_i32_0 : i32, i32
  }
  func.func @transform_3(%arg0: i32) -> (i32, i32) {
    %c0_i32 = arith.constant 0 : i32
    %c0_i32_0 = arith.constant 0 : i32
    %c0_i32_1 = arith.constant 0 : i32
    return %c0_i32, %c0_i32_0 : i32, i32
  }
  func.func @transform_4(%arg0: i32) -> (i32, i32, i32) {
    %c0_i32 = arith.constant 0 : i32
    %c0_i32_0 = arith.constant 0 : i32
    %c0_i32_1 = arith.constant 0 : i32
    %c0_i32_2 = arith.constant 0 : i32
    return %c0_i32, %c0_i32_0, %c0_i32_1 : i32, i32, i32
  }
  func.func @transform_5(%arg0: i32) -> (i32, i32, i32) {
    %c0_i32 = arith.constant 0 : i32
    %c0_i32_0 = arith.constant 0 : i32
    %c0_i32_1 = arith.constant 0 : i32
    %c0_i32_2 = arith.constant 0 : i32
    return %c0_i32, %c0_i32_0, %c0_i32_1 : i32, i32, i32
  }
  func.func @transform_6(%arg0: i32) -> (i32, i32, i32) {
    %c0_i32 = arith.constant 0 : i32
    %c0_i32_0 = arith.constant 0 : i32
    %c0_i32_1 = arith.constant 0 : i32
    %c0_i32_2 = arith.constant 0 : i32
    return %c0_i32, %c0_i32_0, %c0_i32_1 : i32, i32, i32
  }
  func.func @transform_7(%arg0: i32) -> (i32, i32, i32) {
    %c0_i32 = arith.constant 0 : i32
    %c0_i32_0 = arith.constant 0 : i32
    %c0_i32_1 = arith.constant 0 : i32
    %c0_i32_2 = arith.constant 0 : i32
    return %c0_i32, %c0_i32_0, %c0_i32_1 : i32, i32, i32
  }
  func.func @transform_8(%arg0: i32) -> (i32, i32) {
    %c0_i32 = arith.constant 0 : i32
    %c0_i32_0 = arith.constant 0 : i32
    %c0_i32_1 = arith.constant 0 : i32
    return %c0_i32, %c0_i32_0 : i32, i32
  }
  func.func @transform_9(%arg0: i32) -> (i32, i32) {
    %c0_i32 = arith.constant 0 : i32
    %c0_i32_0 = arith.constant 0 : i32
    %c0_i32_1 = arith.constant 0 : i32
    return %c0_i32, %c0_i32_0 : i32, i32
  }
  func.func @transform_10(%arg0: i32) -> (i32, i32) {
    %c0_i32 = arith.constant 0 : i32
    %c0_i32_0 = arith.constant 0 : i32
    %c0_i32_1 = arith.constant 0 : i32
    return %c0_i32, %c0_i32_0 : i32, i32
  }
  func.func @transform_11(%arg0: i32) -> (i32, i32) {
    %c0_i32 = arith.constant 0 : i32
    %c0_i32_0 = arith.constant 0 : i32
    %c0_i32_1 = arith.constant 0 : i32
    return %c0_i32, %c0_i32_0 : i32, i32
  }
  func.func @transform_12(%arg0: i32) -> (i32, i32) {
    %c0_i32 = arith.constant 0 : i32
    %c0_i32_0 = arith.constant 0 : i32
    %c0_i32_1 = arith.constant 0 : i32
    return %c0_i32, %c0_i32_0 : i32, i32
  }
  func.func @transform_13(%arg0: i32) -> (i32, i32) {
    %c0_i32 = arith.constant 0 : i32
    %c0_i32_0 = arith.constant 0 : i32
    %c0_i32_1 = arith.constant 0 : i32
    return %c0_i32, %c0_i32_0 : i32, i32
  }
  func.func @transform_14(%arg0: i32) -> (i32, i32) {
    %c0_i32 = arith.constant 0 : i32
    %c0_i32_0 = arith.constant 0 : i32
    %c0_i32_1 = arith.constant 0 : i32
    return %c0_i32, %c0_i32_0 : i32, i32
  }
  func.func @transform_15(%arg0: i32) -> (i32, i32, i32) {
    %c0_i32 = arith.constant 0 : i32
    %c0_i32_0 = arith.constant 0 : i32
    %c0_i32_1 = arith.constant 0 : i32
    return %arg0, %c0_i32, %c0_i32_0 : i32, i32, i32
  }
}

</mosaic_0001>

<bundles_post_ra>
// kernel: tpu_custom_call.1
= control target key start
LH: loop header
LB: loop body
LE: loop exit
PB: predicated region body
PF: predicated region fallthrough
CT: control target
= control target key end

     0   :  { %s35681_s0 = inlined_call_operand.hbm [shape: f32[32,8,32], index: 0, kind: input, shape index: {}]   ;;  %s35682_s1 = inlined_call_operand.vmem [shape: f32[8,32], index: 1, kind: input, shape index: {}]   ;;  %s35683_s2 = inlined_call_operand.vmem [shape: f32[2,32], index: 2, kind: input, shape index: {}]   ;;  %s35684_s3 = inlined_call_operand.vmem [shape: f32[2,32], index: 3, kind: input, shape index: {}]   ;;  %s35685_s4 = inlined_call_operand.vmem [shape: f32[2,32,32], index: 4, kind: input, shape index: {}]   ;;  %s35686_s5 = inlined_call_operand.vmem [shape: f32[2,32,32], index: 5, kind: input, shape index: {}]   ;;  %s35687_s6 = inlined_call_operand.hbm [shape: f32[2,32,32], index: 6, kind: input, shape index: {}]   ;;  %s35688_s7 = inlined_call_operand.hbm [shape: f32[2,32,32], index: 7, kind: input, shape index: {}]   ;;  %s35689_s8 = inlined_call_operand.vmem [shape: f32[2,32], index: 8, kind: input, shape index: {}]   ;;  %s35690_s9 = inlined_call_operand.vmem [shape: f32[1,32], index: 9, kind: input, shape index: {}]   ;;  %s35691_s10 = inlined_call_operand.vmem [shape: f32[1,32], index: 10, kind: input, shape index: {}]   ;;  %s35692_s11 = inlined_call_operand.hbm [shape: f32[32,256], index: 11, kind: input, shape index: {}]   ;;  %s35693_s12 = inlined_call_operand.vmem [shape: f32[1,256], index: 12, kind: input, shape index: {}]   ;;  %s35694_s13 = inlined_call_operand.vmem [shape: f32[128,32], index: 13, kind: input, shape index: {}]   ;;  %s35695_s14 = inlined_call_operand.vmem [shape: f32[1,32], index: 14, kind: input, shape index: {}]   ;;  %s35696_s15 = inlined_call_operand.hbm [shape: f32[32,8,32], index: 15, kind: output, shape index: {}]  }
   0x1   :  { %35840 = sst [smem:[#allocation88_spill]] %s35687_s6 }
   0x2   :  { %35841 = sst [smem:[#allocation89_spill]] %s35688_s7 }
   0x3   :  { %35842 = sst [smem:[#allocation90_spill]] %s35692_s11 }
   0x4   :  { %35843 = sst [smem:[#allocation91_spill]] %s35695_s14 }
   0x5   :  { %35844 = sst [smem:[#allocation92_spill]] %s35696_s15 }
   0x6   :  { %20 = vsyncpa [#allocation3], 0 }
   0x7   :  { %22 = vsyncpa [#allocation3 + $0x1], 0 }
   0x8   :  { %23 = vsyncpa [#allocation6], 0 }
   0x9   :  { %24 = vsyncpa [#allocation9], 0 }
   0xa   :  { %25 = vsyncpa [#allocation4], 0 }
   0xb   :  { %27 = vsyncpa [#allocation4 + $0x1], 0  ;;  %s30096_s18 = smov 0   ;;  %s30098_s19 = smov 0  }
   0xc   :  { %s30100_s20 = smov 0   ;;  %s30102_s21 = smov 0  }
   0xd LB: > { %35845 = sst [smem:[#allocation15_spill]] %s29986_s18  ;;  %s30117_s22 = sadd.s32 4294967295, %s29998_s21   ;;  %s29998_s21 = sphi %s30102_s21, %s36254_s21   ;;  %s29994_s20 = sphi %s30100_s20, %s36251_s20   ;;  %s29990_s19 = sphi %s30098_s19, %s36253_s19   ;;  %s29986_s18 = sphi %s30096_s18, %s36252_s18  }
   0xe   : > { %35846 = sst [smem:[#allocation16_spill]] %s29994_s20  ;;  %s25872_s23 = sadd.s32 4294967294, %s29998_s21  }
   0xf   : > { %p53_p0 = scmp.ne.s32.totalorder %s29990_s19, %s29986_s18  ;;  %p35700_p1 = scmp.eq.s32.totalorder %s30117_s22, 0 }
  0x10   : > { %p371_p2 = scmp.eq.s32.totalorder %s30117_s22, 1  ;;  %p377_p3 = scmp.eq.s32.totalorder %s25872_s23, 1 }
  0x11   : > { %p30126_p4 = por %p35700_p1, %p53_p0  ;;  %p25873_p5 = scmp.ge.s32.totalorder %s29998_s21, 1 }
  0x12   : > { %p30131_p6 = por %p377_p3, %p53_p0  ;;  %p384_p7 = scmp.lt.s32.totalorder %s29998_s21, 3 }
  0x13   : > { %s35847_s24 = scalar_select %p30126_p4, 1, 0 }
  0x14   : > { %s35848_s25 = scalar_select %p30131_p6, 1, 0 }
  0x15   : > { %p30136_p8 = pnand %p25873_p5, %p384_p7  ;;  %s30000_s27 = smov [#allocation5]  }
  0x16   : > { %35849 = sst [smem:[#allocation17_spill]] %s35848_s25  ;;  %s411_s28 = sshll.u32 %s30000_s27, 4  ;;  %s412_s28 = int_to_ptr.vmem [resolvable:$true] %s411_s28 }
  0x17   : > { %s35850_s26 = scalar_select %p30136_p8, 1, 0 }
  0x18   : > { %p29089_p9 = pneg %p30136_p8  ;;  %s30001_s30 = smov [#allocation7]  }
  0x19   : > { %s424_s16 = sshll.u32 %s30001_s30, 4  ;;  %s30002_s17 = smov [#allocation8]   ;;  %s425_s16 = int_to_ptr.vmem [resolvable:$true] %s424_s16 }
  0x1a   : > { %p30145_p11 = pnand %p29089_p9, %p35700_p1  ;;  %s446_s23 = sshll.u32 %s30002_s17, 4  ;;  %s447_s23 = int_to_ptr.vmem [resolvable:$true] %s446_s23 }
  0x1b   : > { %s29831_s25 = scalar_lea.vmem %s412_s28, 1024  ;;  %p29839_p5 = scmp.lt.s32.totalorder %s412_s28, %s412_s28 }
  0x1c   : > { %p29822_p12 = pneg %p30145_p11  ;;  %p29832_p13 = scmp.ne.s32.totalorder %s412_s28, %s29831_s25 }
  0x1d   : > { %p29840_p7 = scmp.lt.s32.totalorder %s29831_s25, %s29831_s25 }
  0x1e   : > { %p29834_p0 = pnand %p29832_p13, %p29822_p12 }
  0x1f   : > { %p29841_p9 = por %p29840_p7, %p29839_p5 }
  0x20   : > { %p29835_p3 = pneg %p29834_p0 }
  0x22   : > { %p29842_p10 = pnand %p29841_p9, %p29835_p3 }
  0x24   : > { %29845 = shalt.err (!%p29842_p10)
}
  0x25   : > { %s35701_s27 = smov 128   ;;  %s35702_s30 = smov 8  }
  0x26   : > { %s35852_s6 = sld [smem:[#allocation88_spill]]  ;;  %s29857_s15 = scalar_lea.vmem %s425_s16, 1024 }
  0x27   : > { %p29858_p13 = scmp.ne.s32.totalorder %s425_s16, %s29857_s15  ;;  %p29865_p3 = scmp.lt.s32.totalorder %s425_s16, %s425_s16 }
  0x28   : > { %p29866_p10 = scmp.lt.s32.totalorder %s29857_s15, %s29857_s15 }
  0x29   : > { %p29860_p0 = pnand %p29858_p13, %p29822_p12 }
  0x2a   : > { %p29867_p7 = por %p29866_p10, %p29865_p3 }
  0x2b   : > { %p29861_p5 = pneg %p29860_p0 }
  0x2c   : > { %29092 = dma.hbm_to_vmem [thread:$0]  (!%p30145_p11), %s35852_s6, 1024, %s412_s28, [#allocation6], %s35701_s27, %s35701_s27, %s35702_s30  }
  0x2d   : > { %p29868_p9 = pnand %p29867_p7, %p29861_p5 }
  0x2f   : > { %29871 = shalt.err (!%p29868_p9)
}
  0x30   : > { %s35853_s7 = sld [smem:[#allocation89_spill]]  ;;  %s29883_s18 = scalar_lea.vmem %s447_s23, 1024 }
  0x31   : > { %p29884_p1 = scmp.ne.s32.totalorder %s447_s23, %s29883_s18  ;;  %p29891_p3 = scmp.lt.s32.totalorder %s447_s23, %s447_s23 }
  0x32   : > { %p29892_p5 = scmp.lt.s32.totalorder %s29883_s18, %s29883_s18 }
  0x33   : > { %p29886_p13 = pnand %p29884_p1, %p29822_p12 }
  0x34   : > { %p29893_p10 = por %p29892_p5, %p29891_p3 }
  0x35   : > { %p29887_p0 = pneg %p29886_p13 }
  0x36   : > { %29095 = dma.hbm_to_vmem [thread:$0]  (!%p30145_p11), %s35853_s7, 1024, %s425_s16, [#allocation6], %s35701_s27, %s35701_s27, %s35702_s30  }
  0x37   : > { %p29894_p7 = pnand %p29893_p10, %p29887_p0 }
  0x39   : > { %29897 = shalt.err (!%p29894_p7)
}
  0x3a   : > { %s30005_s15 = smov 256   ;;  %s30006_s14 = smov 16  }
  0x3b   : > { %s35854_s11 = sld [smem:[#allocation90_spill]]  ;;  %s30182_s17 = sadd.s32 1, %s29998_s21  }
  0x3c   : > { %s37_s25 = ssub.s32 %s29998_s21, %s30182_s17  ;;  %s40_s18 = sadd.s32 1, %s29994_s20 }
  0x3d   : > { %p38_p1 = scmp.eq.s32.totalorder %s37_s25, 0  ;;  %p47_p12 = scmp.ne.s32.totalorder %s29994_s20, %s29990_s19 }
  0x3e   : > { %p48_p9 = scmp.eq.s32.totalorder %s29998_s21, 0  ;;  %p29110_p13 = scmp.lt.s32.totalorder %s29998_s21, 2 }
  0x3f   : > { %s30192_s27 = scalar_select %p38_p1, %s29994_s20, %s40_s18  }
  0x40   : > { %p49_p0 = por %p48_p9, %p47_p12  ;;  %p30196_p3 = por %p371_p2, %p47_p12 }
  0x41   : > { %29098 = dma.hbm_to_vmem [thread:$0]  (!%p30145_p11), %s35854_s11, 1024, %s447_s23, [#allocation9], %s30005_s15, %s30005_s15, %s30006_s14  }
  0x42   : > { %35855 = sst [smem:[#allocation18_spill]] %s30192_s27  ;;  %s469_s29 = sand.u32 1, %s29994_s20  }
  0x43   : > { %s35856_s30 = scalar_select %p30196_p3, 1, 0 }
  0x44   : > { %s26527_s28 = sshll.u32 %s29998_s21, 11  ;;  %s25878_s23 = sshll.u32 %s469_s29, 7 }
  0x45   : > { %s30205_s16 = scalar_lea.hbm %s35681_s0, %s26527_s28  ;;  %s473_s25 = scalar_lea.vmem [#allocation2], %s25878_s23 }
  0x46   : > { %s480_s18 = sshll.u32 %s473_s25, 4  ;;  %p30207_p11 = pnand %p29110_p13, %p49_p0  ;;  %s30211_s18 = int_to_ptr.vmem [resolvable:$true] %s480_s18 }
  0x47   : > { %s30213_s7 = scalar_lea.sflag [#allocation3], %s469_s29  ;;  %s29898_s11 = scalar_lea.hbm %s30205_s16, 2048 }
  0x48   : > { %p29899_p2 = scmp.ne.s32.totalorder %s30205_s16, %s29898_s11  ;;  %p29900_p5 = pneg %p30207_p11 }
  0x49   : > { %s29903_s23 = scalar_lea.hbm %s35681_s0, 4096  ;;  %p29904_p1 = scmp.lt.s32.totalorder %s30205_s16, %s35681_s0 }
  0x4a   : > { %p29901_p10 = pnand %p29900_p5, %p29899_p2  ;;  %p29905_p12 = scmp.lt.s32.totalorder %s29903_s23, %s29898_s11 }
  0x4c   : > { %p29902_p7 = pneg %p29901_p10  ;;  %p29906_p9 = por %p29905_p12, %p29904_p1 }
  0x4e   : > { %p29907_p13 = pnand %p29906_p9, %p29902_p7 }
  0x50   : > { %29910 = shalt.err (!%p29907_p13)
}
  0x51   : > { %s29911_s29 = scalar_lea.vmem %s30211_s18, 2048  ;;  %s30007_s27 = smov [#allocation2]  }
  0x52   : > { %p29912_p0 = scmp.ne.s32.totalorder %s30211_s18, %s29911_s29  ;;  %s29916_s20 = sshll.u32 %s30007_s27, 4  ;;  %s29917_s20 = int_to_ptr.vmem [resolvable:$false] %s29916_s20 }
  0x53   : > { %s29918_s28 = scalar_lea.vmem %s29917_s20, 4096  ;;  %p29919_p10 = scmp.lt.s32.totalorder %s30211_s18, %s29917_s20 }
  0x54   : > { %p29914_p6 = pnand %p29912_p0, %p29900_p5  ;;  %p29920_p3 = scmp.lt.s32.totalorder %s29918_s28, %s29911_s29 }
  0x56   : > { %p29915_p2 = pneg %p29914_p6  ;;  %p29921_p4 = por %p29920_p3, %p29919_p10 }
  0x58   : > { %p29922_p8 = pnand %p29921_p4, %p29915_p2 }
  0x5a   : > { %29925 = shalt.err (!%p29922_p8)
}
  0x5b   : > { %s35858_s11 = smov 8   ;;  %s35859_s15 = smov 128  }
  0x5c   : > { %29102 = dma.hbm_to_vmem [thread:$0]  (!%p30207_p11), %s30205_s16, 2048, %s30211_s18, %s30213_s7, %s35859_s15, %s35859_s15, %s35858_s11  }
  0x5d   : > { %p35860_p6 = scmp.ne.s32.totalorder %s35850_s26, 0 }
  0x5f   : > { %492 = sbr.rel (%p35860_p6) target bundleno = 8007 (0x1f47), region = 80 }
  0x64   : > { %s30240_s27 = sand.u32 1, %s29990_s19   ;;  %p35861_p4 = scmp.ne.s32.totalorder %s35847_s24, 0 }
  0x65   : > { %s25882_s20 = sshll.u32 %s30240_s27, 7  ;;  %s495_s23 = scalar_lea.sflag [#allocation3], %s30240_s27 }
  0x66   : > { %s30246_s6 = scalar_lea.vmem [#allocation2], %s25882_s20 }
  0x67   : > { %29969 = dma.done.wait (%p35861_p4), %s495_s23, 2048  }
  0x68   : > { %29971 = vsyncadd (%p35861_p4), %s495_s23, 4294965248  ;;  %p35862_p8 = scmp.eq.s32.totalorder %s30117_s22, 0 }
  0x6a   : > { %29973 = dma.done.wait (%p35862_p8), [#allocation6], 2048   ;;  %p35863_p3 = pmov %p35862_p8 }
  0x6c   : > { %29975 = vsyncadd (%p35863_p3), [#allocation6], 4294965248  ;;  %p35864_p11 = pmov %p35863_p3 }
  0x6d   : > { %p35865_p5 = pmov %p35863_p3 }
  0x6e   : > { %29977 = dma.done.wait (%p35864_p11), [#allocation9], 1024  }
  0x6f   : > { %29979 = vsyncadd (%p35865_p5), [#allocation9], 4294966272  ;;  %vm578_vm0 = vcmask 261120   ;;  %v559_v0 = vld [vmem:[%s30246_s6] sm:$0xff]  ;;  %v561_v1 = vld [vmem:[%s30246_s6 + $0x10] sm:$0xff]  ;;  %vm30009_vm1 = vmmov 0  }
  0x70   : > { %v560_v2 = vld [vmem:[%s30246_s6 + $0x8] sm:$0xff]  ;;  %v579_v3 = vsel %vm578_vm0, %v559_v0, 0.0  ;;  %v585_v4 = vsel %vm578_vm0, %v561_v1, 0.0  ;;  %v562_v5 = vld [vmem:[%s30246_s6 + $0x18] sm:$0xff]  ;;  %v563_v8 = vld [vmem:[%s30246_s6 + $0x20] sm:$0xff]  ;;  %vm1344_vm2 = vcmask 64512  }
  0x71   : > { %580 = vadd.xlane.f32.xlu0 %v579_v3  ;;  %586 = vadd.xlane.f32.xlu1 %v585_v4  ;;  %v582_v6 = vsel %vm578_vm0, %v560_v2, 0.0  ;;  %v588_v7 = vsel %vm578_vm0, %v562_v5, 0.0  ;;  %v564_v9 = vld [vmem:[%s30246_s6 + $0x28] sm:$0xff]  ;;  %v591_v10 = vsel %vm578_vm0, %v563_v8, 0.0  ;;  %v30273_v12 = vld [vmem:[%s30246_s6 + $0x30] sm:$0xff]  ;;  %v30276_v13 = vld [vmem:[%s30246_s6 + $0x38] sm:$0xff] }
  0x72   : > { %v594_v11 = vsel %vm578_vm0, %v564_v9, 0.0  ;;  %v597_v14 = vsel %vm578_vm0, %v30273_v12, 0.0  ;;  %v600_v15 = vsel %vm578_vm0, %v30276_v13, 0.0  ;;  %v30283_v16 = vld [vmem:[%s30246_s6 + $0x40] sm:$0xff]  ;;  %v30286_v17 = vld [vmem:[%s30246_s6 + $0x48] sm:$0xff]  ;;  %v30293_v20 = vld [vmem:[%s30246_s6 + $0x50] sm:$0xff] }
  0x73   : > { %v603_v18 = vsel %vm578_vm0, %v30283_v16, 0.0  ;;  %v606_v19 = vsel %vm578_vm0, %v30286_v17, 0.0  ;;  %v30296_v21 = vld [vmem:[%s30246_s6 + $0x58] sm:$0xff]  ;;  %v609_v22 = vsel %vm578_vm0, %v30293_v20, 0.0  ;;  %v30303_v24 = vld [vmem:[%s30246_s6 + $0x60] sm:$0xff]  ;;  %v30306_v25 = vld [vmem:[%s30246_s6 + $0x68] sm:$0xff] }
  0x74   : > { %v612_v23 = vsel %vm578_vm0, %v30296_v21, 0.0  ;;  %v615_v26 = vsel %vm578_vm0, %v30303_v24, 0.0  ;;  %v618_v27 = vsel %vm578_vm0, %v30306_v25, 0.0  ;;  %v30313_v28 = vld [vmem:[%s30246_s6 + $0x70] sm:$0xff]  ;;  %v30316_v29 = vld [vmem:[%s30246_s6 + $0x78] sm:$0xff]  ;;  %s30010_s15 = smov 120  }
  0x75   : > { %583 = vadd.xlane.f32.xlu0 %v582_v6  ;;  %589 = vadd.xlane.f32.xlu1 %v588_v7  ;;  %v621_v30 = vsel %vm578_vm0, %v30313_v28, 0.0  ;;  %v624_v31 = vsel %vm578_vm0, %v30316_v29, 0.0  ;;  %s30011_s23 = smov 112   ;;  %s30012_s7 = smov 104  }
  0x76   : > { %s36243_s18 = sld [smem:[#allocation91_spill]]  ;;  %s35568_s14 = scalar_lea.vmem [#allocation10], %s25882_s20 }
  0x77   : > { %s26528_s20 = sshll.u32 %s30117_s22, 11  ;;  %s25770_s25 = sshll.u32 %s35568_s14, 4  ;;  %s35633_s25 = int_to_ptr.vmem [resolvable:$true] %s25770_s25 }
  0x78   : > { %s36244_s11 = sld [smem:[#allocation92_spill]]  ;;  %s25757_s22 = scalar_lea.sflag [#allocation4], %s30240_s27 }
  0x79   : > { %592 = vadd.xlane.f32.xlu0 %v591_v10  ;;  %595 = vadd.xlane.f32.xlu1 %v594_v11  ;;  %s29926_s26 = scalar_lea.vmem %s35633_s25, 2048  ;;  %p36245_p1 = scmp.ne.s32.totalorder %s35856_s30, 0 }
  0x7a   : > { %p29927_p7 = scmp.ne.s32.totalorder %s35633_s25, %s29926_s26 }
  0x7c   : > { %p29928_p12 = pnand %p29927_p7, %p36245_p1 }
  0x7d   : > { %598 = vadd.xlane.f32.xlu0 %v597_v14  ;;  %601 = vadd.xlane.f32.xlu1 %v600_v15 }
  0x7e   : > { %s35631_s24 = scalar_lea.hbm %s36244_s11, %s26528_s20  ;;  %p29929_p9 = pneg %p29928_p12 }
  0x81   : > { %604 = vadd.xlane.f32.xlu0 %v603_v18  ;;  %607 = vadd.xlane.f32.xlu1 %v606_v19 }
  0x85   : > { %610 = vadd.xlane.f32.xlu0 %v609_v22  ;;  %613 = vadd.xlane.f32.xlu1 %v612_v23 }
  0x89   : > { %616 = vadd.xlane.f32.xlu0 %v615_v26  ;;  %619 = vadd.xlane.f32.xlu1 %v618_v27 }
  0x8d   : > { %622 = vadd.xlane.f32.xlu0 %v621_v30  ;;  %625 = vadd.xlane.f32.xlu1 %v624_v31 }
  0xfa   : > { %v581_v32 = vpop.xlane.xlu0 %580  ;;  %v587_v33 = vpop.xlane.xlu1 %586 }
  0xfb   : > { %v628_v34 = vmul.f32 0.03125, %v581_v32  ;;  %v630_v35 = vmul.f32 0.03125, %v587_v33 }
  0xfd   : > { %v30322_v36 = vsub.f32 %v559_v0, %v628_v34  ;;  %v30324_v37 = vsub.f32 %v561_v1, %v630_v35 }
  0xfe   : > { %v584_v38 = vpop.xlane.xlu0 %583  ;;  %v590_v39 = vpop.xlane.xlu1 %589 }
  0xff   : > { %v629_v40 = vmul.f32 0.03125, %v584_v38  ;;  %v631_v41 = vmul.f32 0.03125, %v590_v39  ;;  %v660_v42 = vmul.f32 %v30322_v36, %v30322_v36  ;;  %v662_v43 = vmul.f32 %v30324_v37, %v30324_v37 }
 0x101   : > { %v30330_v44 = vsub.f32 %v560_v2, %v629_v40  ;;  %v30332_v45 = vsub.f32 %v562_v5, %v631_v41  ;;  %v676_v46 = vsel %vm578_vm0, %v660_v42, 0.0  ;;  %v682_v49 = vsel %vm578_vm0, %v662_v43, 0.0 }
 0x102   : > { %677 = vadd.xlane.f32.xlu0 %v676_v46  ;;  %v593_v47 = vpop.xlane.xlu0 %592  ;;  %v596_v48 = vpop.xlane.xlu1 %595 }
 0x103   : > { %v632_v50 = vmul.f32 0.03125, %v593_v47  ;;  %v633_v51 = vmul.f32 0.03125, %v596_v48  ;;  %v661_v52 = vmul.f32 %v30330_v44, %v30330_v44  ;;  %v663_v53 = vmul.f32 %v30332_v45, %v30332_v45 }
 0x105   : > { %v30340_v54 = vsub.f32 %v563_v8, %v632_v50  ;;  %v30342_v55 = vsub.f32 %v564_v9, %v633_v51  ;;  %v679_v56 = vsel %vm578_vm0, %v661_v52, 0.0  ;;  %v685_v59 = vsel %vm578_vm0, %v663_v53, 0.0  ;;  %v851_v53 = vld [vmem:[%s35686_s5 + $0x18] sm:$0xff] }
 0x106   : > { %683 = vadd.xlane.f32.xlu0 %v682_v49  ;;  %680 = vadd.xlane.f32.xlu1 %v679_v56  ;;  %v599_v57 = vpop.xlane.xlu0 %598  ;;  %v602_v58 = vpop.xlane.xlu1 %601  ;;  %v846_v56 = vld [vmem:[%s35685_s4 + $0x10] sm:$0xff] }
 0x107   : > { %v634_v60 = vmul.f32 0.03125, %v599_v57  ;;  %v635_v61 = vmul.f32 0.03125, %v602_v58  ;;  %v664_v62 = vmul.f32 %v30340_v54, %v30340_v54  ;;  %v665_v63 = vmul.f32 %v30342_v55, %v30342_v55  ;;  %27361 = vmatprep.subr.mxu1 %v851_v53  ;;  %v850_v57 = vld [vmem:[%s35686_s5 + $0x10] sm:$0xff]  ;;  %v845_v58 = vld [vmem:[%s35685_s4 + $0x8] sm:$0xff] }
 0x108   : > { %27362 = vmatpush3.msra.mxu1 %v851_v53 }
 0x109   : > { %v30351_v0 = vsub.f32 %v30273_v12, %v634_v60  ;;  %v30354_v1 = vsub.f32 %v30276_v13, %v635_v61  ;;  %v688_v2 = vsel %vm578_vm0, %v664_v62, 0.0  ;;  %v691_v5 = vsel %vm578_vm0, %v665_v63, 0.0  ;;  %27363 = vmatprep.subr.mxu1 %v850_v57  ;;  %v844_v60 = vld [vmem:[%s35685_s4] sm:$0xff]  ;;  %v30436_v62 = vld [vmem:[#allocation5 + $0x18] sm:$0xff] }
 0x10a   : > { %686 = vadd.xlane.f32.xlu1 %v685_v59  ;;  %689 = vadd.xlane.f32.xlu0 %v688_v2  ;;  %v605_v3 = vpop.xlane.xlu0 %604  ;;  %v608_v4 = vpop.xlane.xlu1 %607  ;;  %v849_v59 = vld [vmem:[%s35686_s5 + $0x8] sm:$0xff]  ;;  %v848_v61 = vld [vmem:[%s35686_s5] sm:$0xff] }
 0x10b   : > { %v636_v6 = vmul.f32 0.03125, %v605_v3  ;;  %v637_v7 = vmul.f32 0.03125, %v608_v4  ;;  %v666_v8 = vmul.f32 %v30351_v0, %v30351_v0  ;;  %v667_v9 = vmul.f32 %v30354_v1, %v30354_v1  ;;  %27364 = vmatpush3.msra.mxu1 %v850_v57  ;;  %v30462_v57 = vld [vmem:[%s35682_s1] sm:$0xff] }
 0x10c   : > { %27365 = vmatprep.subr.mxu1 %v849_v59 }
 0x10d   : > { %v30363_v10 = vsub.f32 %v30283_v16, %v636_v6  ;;  %v30366_v11 = vsub.f32 %v30286_v17, %v637_v7  ;;  %v694_v12 = vsel %vm578_vm0, %v666_v8, 0.0  ;;  %v697_v15 = vsel %vm578_vm0, %v667_v9, 0.0  ;;  %27366 = vmatpush3.msra.mxu1 %v849_v59 }
 0x10e   : > { %692 = vadd.xlane.f32.xlu1 %v691_v5  ;;  %695 = vadd.xlane.f32.xlu0 %v694_v12  ;;  %v611_v13 = vpop.xlane.xlu0 %610  ;;  %v614_v14 = vpop.xlane.xlu1 %613  ;;  %v788_v8 = vlaneseq }
 0x10f   : > { %v638_v18 = vmul.f32 0.03125, %v611_v13  ;;  %v639_v19 = vmul.f32 0.03125, %v614_v14  ;;  %v668_v22 = vmul.f32 %v30363_v10, %v30363_v10  ;;  %v669_v16 = vmul.f32 %v30366_v11, %v30366_v11  ;;  %27367 = vmatprep.subr.mxu1 %v848_v61 }
 0x110   : > { %27368 = vmatpush3.msra.mxu1 %v848_v61 }
 0x111   : > { %v30375_v23 = vsub.f32 %v30293_v20, %v638_v18  ;;  %v30378_v17 = vsub.f32 %v30296_v21, %v639_v19  ;;  %v700_v26 = vsel %vm578_vm0, %v668_v22, 0.0  ;;  %v703_v31 = vsel %vm578_vm0, %v669_v16, 0.0  ;;  %29065 = vmatprep.subr.mxu1 %v30436_v62 }
 0x112   : > { %698 = vadd.xlane.f32.xlu1 %v697_v15  ;;  %701 = vadd.xlane.f32.xlu0 %v700_v26  ;;  %v617_v27 = vpop.xlane.xlu0 %616  ;;  %v620_v30 = vpop.xlane.xlu1 %619  ;;  %v30440_v19 = vshrl.u32 %v788_v8, 7 }
 0x113   : > { %v640_v32 = vmul.f32 0.03125, %v617_v27  ;;  %v641_v33 = vmul.f32 0.03125, %v620_v30  ;;  %v670_v34 = vmul.f32 %v30375_v23, %v30375_v23  ;;  %v671_v20 = vmul.f32 %v30378_v17, %v30378_v17 }
 0x114   : > { %35866 = vst [vmem:[#allocation19_spill] sm:$0xff] %v30440_v19 }
 0x115   : > { %v30387_v35 = vsub.f32 %v30303_v24, %v640_v32  ;;  %v30390_v21 = vsub.f32 %v30306_v25, %v641_v33  ;;  %v706_v38 = vsel %vm578_vm0, %v670_v34, 0.0  ;;  %v709_v41 = vsel %vm578_vm0, %v671_v20, 0.0  ;;  %v576_v33 = vld [vmem:[%s35683_s2] sm:$0x3] }
 0x116   : > { %704 = vadd.xlane.f32.xlu1 %v703_v31  ;;  %707 = vadd.xlane.f32.xlu0 %v706_v38  ;;  %v623_v39 = vpop.xlane.xlu0 %622  ;;  %v626_v40 = vpop.xlane.xlu1 %625  ;;  %v30443_v32 = vsub.s32 0, %v30440_v19 }
 0x117   : > { %v642_v42 = vmul.f32 0.03125, %v623_v39  ;;  %v643_v43 = vmul.f32 0.03125, %v626_v40  ;;  %v672_v46 = vmul.f32 %v30387_v35, %v30387_v35  ;;  %v673_v24 = vmul.f32 %v30390_v21, %v30390_v21  ;;  %v577_v40 = vld [vmem:[%s35684_s3] sm:$0x3] }
 0x118   : > { %35867 = vst [vmem:[#allocation20_spill] sm:$0xff] %v30443_v32 }
 0x119   : > { %v30399_v47 = vsub.f32 %v30313_v28, %v642_v42  ;;  %v30402_v25 = vsub.f32 %v30316_v29, %v643_v43  ;;  %v712_v48 = vsel %vm578_vm0, %v672_v46, 0.0  ;;  %v715_v49 = vsel %vm578_vm0, %v673_v24, 0.0  ;;  %v847_v29 = vld [vmem:[%s35685_s4 + $0x18] sm:$0xff] }
 0x11a   : > { %710 = vadd.xlane.f32.xlu1 %v709_v41  ;;  %713 = vadd.xlane.f32.xlu0 %v712_v48  ;;  %v30452_v43 = vrot.slane %v576_v33, %v30443_v32 }
 0x11b   : > { %v674_v50 = vmul.f32 %v30399_v47, %v30399_v47  ;;  %v675_v51 = vmul.f32 %v30402_v25, %v30402_v25  ;;  %27329 = vmatprep.subr.mxu0 %v847_v29 }
 0x11c   : > { %27330 = vmatpush3.msra.mxu0 %v847_v29 }
 0x11d   : > { %v718_v52 = vsel %vm578_vm0, %v674_v50, 0.0  ;;  %v721_v28 = vsel %vm578_vm0, %v675_v51, 0.0  ;;  %27331 = vmatprep.subr.mxu0 %v846_v56  ;;  %v30456_v50 = vrot.slane %v577_v40, %v30443_v32 }
 0x11e   : > { %716 = vadd.xlane.f32.xlu1 %v715_v49  ;;  %719 = vadd.xlane.f32.xlu0 %v718_v52 }
 0x11f   : > { %27332 = vmatpush3.msra.mxu0 %v846_v56 }
 0x120   : > { %27333 = vmatprep.subr.mxu0 %v845_v58 }
 0x121   : > { %27334 = vmatpush3.msra.mxu0 %v845_v58 }
 0x122   : > { %722 = vadd.xlane.f32.xlu1 %v721_v28  ;;  %27335 = vmatprep.subr.mxu0 %v844_v60 }
 0x123   : > { %27336 = vmatpush3.msra.mxu0 %v844_v60 }
 0x124   : > { %27393 = vmatprep.subr.mxu0 %v30436_v62 }
 0x18b   : > { %v678_v63 = vpop.xlane.xlu0 %677 }
 0x18c   : > { %v724_v2 = vmul.f32 0.03125, %v678_v63 }
 0x18e   : > { %v740_v3 = vadd.f32 1e-05, %v724_v2 }
 0x18f   : > { %v681_v4 = vpop.xlane.xlu1 %680  ;;  %v684_v5 = vpop.xlane.xlu0 %683 }
 0x190   : > { %29161 = vrsqrt.f32 %v740_v3  ;;  %v725_v6 = vmul.f32 0.03125, %v681_v4  ;;  %v726_v7 = vmul.f32 0.03125, %v684_v5 }
 0x192   : > { %v741_v9 = vadd.f32 1e-05, %v725_v6  ;;  %v742_v12 = vadd.f32 1e-05, %v726_v7 }
 0x193   : > { %v687_v13 = vpop.xlane.xlu1 %686  ;;  %v690_v14 = vpop.xlane.xlu0 %689 }
 0x194   : > { %29163 = vrsqrt.f32 %v741_v9  ;;  %v727_v15 = vmul.f32 0.03125, %v687_v13  ;;  %v728_v18 = vmul.f32 0.03125, %v690_v14 }
 0x195   : > { %29165 = vrsqrt.f32 %v742_v12 }
 0x196   : > { %v743_v22 = vadd.f32 1e-05, %v727_v15  ;;  %v744_v16 = vadd.f32 1e-05, %v728_v18 }
 0x197   : > { %v693_v26 = vpop.xlane.xlu1 %692  ;;  %v696_v27 = vpop.xlane.xlu0 %695 }
 0x198   : > { %29167 = vrsqrt.f32 %v743_v22  ;;  %v729_v30 = vmul.f32 0.03125, %v693_v26  ;;  %v730_v31 = vmul.f32 0.03125, %v696_v27 }
 0x199   : > { %29169 = vrsqrt.f32 %v744_v16 }
 0x19a   : > { %v745_v34 = vadd.f32 1e-05, %v729_v30  ;;  %v746_v20 = vadd.f32 1e-05, %v730_v31 }
 0x19b   : > { %v699_v38 = vpop.xlane.xlu1 %698  ;;  %v702_v39 = vpop.xlane.xlu0 %701 }
 0x19c   : > { %29171 = vrsqrt.f32 %v745_v34  ;;  %v731_v41 = vmul.f32 0.03125, %v699_v38  ;;  %v732_v42 = vmul.f32 0.03125, %v702_v39 }
 0x19d   : > { %v29162_v46 = vpop.eup %29161  ;;  %29173 = vrsqrt.f32 %v746_v20 }
 0x19e   : > { %v747_v24 = vadd.f32 1e-05, %v731_v41  ;;  %v748_v48 = vadd.f32 1e-05, %v732_v42  ;;  %v772_v49 = vmul.f32 %v29162_v46, %v30322_v36 }
 0x19f   : > { %v705_v51 = vpop.xlane.xlu1 %704  ;;  %v708_v52 = vpop.xlane.xlu0 %707 }
 0x1a0   : > { %29175 = vrsqrt.f32 %v747_v24  ;;  %v733_v28 = vmul.f32 0.03125, %v705_v51  ;;  %v734_v29 = vmul.f32 0.03125, %v708_v52  ;;  %v792_v53 = vmul.f32 %v30452_v43, %v772_v49  ;;  %v854_v24 = vld [vmem:[#allocation5 + $0x10] sm:$0xff] }
 0x1a1   : > { %v29164_v56 = vpop.eup %29163  ;;  %29177 = vrsqrt.f32 %v748_v48 }
 0x1a2   : > { %v29166_v58 = vpop.eup %29165  ;;  %v749_v59 = vadd.f32 1e-05, %v733_v28  ;;  %v750_v36 = vadd.f32 1e-05, %v734_v29  ;;  %v812_v60 = vadd.f32 %v30456_v50, %v792_v53  ;;  %v773_v61 = vmul.f32 %v29164_v56, %v30330_v44 }
 0x1a3   : > { %v711_v63 = vpop.xlane.xlu1 %710  ;;  %v714_v2 = vpop.xlane.xlu0 %713  ;;  %v774_v3 = vmul.f32 %v29166_v58, %v30324_v37 }
 0x1a4   : > { %29179 = vrsqrt.f32 %v749_v59  ;;  %v735_v4 = vmul.f32 0.03125, %v711_v63  ;;  %v736_v5 = vmul.f32 0.03125, %v714_v2  ;;  %v30468_v6 = vadd.f32 %v812_v60, %v30462_v57 }
 0x1a5   : > { %v29168_v7 = vpop.eup %29167  ;;  %29181 = vrsqrt.f32 %v750_v36  ;;  %v793_v8 = vmul.f32 %v30452_v43, %v773_v61  ;;  %v794_v9 = vmul.f32 %v30452_v43, %v774_v3  ;;  %v853_v36 = vld [vmem:[#allocation5 + $0x8] sm:$0xff] }
 0x1a6   : > { %v29170_v12 = vpop.eup %29169  ;;  %v751_v13 = vadd.f32 1e-05, %v735_v4  ;;  %v752_v14 = vadd.f32 1e-05, %v736_v5  ;;  %27337 = vmatprep.mubr.msk.f32.mxu0 %vm578_vm0, %v30468_v6  ;;  %27369 = vmatprep.mubr.msk.f32.mxu1 %vm578_vm0, %v30468_v6  ;;  %v775_v37 = vmul.f32 %v29168_v7, %v30332_v45  ;;  %v852_v7 = vld [vmem:[#allocation5] sm:$0xff] }
 0x1a7   : > { %v717_v44 = vpop.xlane.xlu1 %716  ;;  %v720_v15 = vpop.xlane.xlu0 %719  ;;  %v813_v18 = vadd.f32 %v30456_v50, %v793_v8  ;;  %v814_v22 = vadd.f32 %v30456_v50, %v794_v9  ;;  %v776_v16 = vmul.f32 %v29170_v12, %v30340_v54 }
 0x1a8   : > { %29183 = vrsqrt.f32 %v751_v13  ;;  %v737_v26 = vmul.f32 0.03125, %v717_v44  ;;  %v738_v27 = vmul.f32 0.03125, %v720_v15  ;;  %v795_v30 = vmul.f32 %v30452_v43, %v775_v37 }
 0x1a9   : > { %v29172_v31 = vpop.eup %29171  ;;  %29185 = vrsqrt.f32 %v752_v14  ;;  %v30482_v33 = vadd.f32 %v813_v18, %v30462_v57  ;;  %v30485_v45 = vadd.f32 %v814_v22, %v30462_v57  ;;  %v796_v34 = vmul.f32 %v30452_v43, %v776_v16 }
 0x1aa   : > { %v29174_v20 = vpop.eup %29173  ;;  %v753_v38 = vadd.f32 1e-05, %v737_v26  ;;  %v754_v39 = vadd.f32 1e-05, %v738_v27  ;;  %v815_v54 = vadd.f32 %v30456_v50, %v795_v30  ;;  %v777_v40 = vmul.f32 %v29172_v31, %v30342_v55 }
 0x1ab   : > { %27338 = vmatmul.mubr.msk.f32.vlgmr.msra.gmra.mxu0 %vm578_vm0, %v30482_v33  ;;  %27370 = vmatmul.mubr.msk.f32.vlgmr.msra.gmra.mxu1 %vm578_vm0, %v30482_v33  ;;  %v723_v41 = vpop.xlane.xlu1 %722  ;;  %v816_v42 = vadd.f32 %v30456_v50, %v796_v34  ;;  %v778_v46 = vmul.f32 %v29174_v20, %v30351_v0 }
 0x1ac   : > { %29187 = vrsqrt.f32 %v753_v38  ;;  %v739_v48 = vmul.f32 0.03125, %v723_v41  ;;  %27340 = vmatprep.mubr.msk.f32.mxu0 %vm578_vm0, %v30485_v45  ;;  %27372 = vmatprep.mubr.msk.f32.mxu1 %vm578_vm0, %v30485_v45  ;;  %v30501_v55 = vadd.f32 %v815_v54, %v30462_v57  ;;  %v797_v49 = vmul.f32 %v30452_v43, %v777_v40 }
 0x1ad   : > { %v29176_v51 = vpop.eup %29175  ;;  %29189 = vrsqrt.f32 %v754_v39  ;;  %v30505_v52 = vadd.f32 %v816_v42, %v30462_v57  ;;  %v798_v0 = vmul.f32 %v30452_v43, %v778_v46  ;;  %27394 = vmatpush3.msra.mxu0 %v30436_v62  ;;  %29069 = vmatpush3.msra.mxu1 %v30436_v62 }
 0x1ae   : > { %v29178_v28 = vpop.eup %29177  ;;  %v755_v29 = vadd.f32 1e-05, %v739_v48  ;;  %v817_v53 = vadd.f32 %v30456_v50, %v797_v49  ;;  %v779_v56 = vmul.f32 %v29176_v51, %v30354_v1  ;;  %27395 = vmatprep.subr.mxu0 %v854_v24  ;;  %29066 = vmatprep.subr.mxu1 %v854_v24 }
 0x1af   : > { %27341 = vmatmul.mubr.msk.f32.gmra.mxu0 %vm578_vm0, %v30501_v55  ;;  %27373 = vmatmul.mubr.msk.f32.gmra.mxu1 %vm578_vm0, %v30501_v55  ;;  %v818_v58 = vadd.f32 %v30456_v50, %v798_v0  ;;  %v780_v59 = vmul.f32 %v29178_v28, %v30363_v10 }
 0x1b0   : > { %29191 = vrsqrt.f32 %v755_v29  ;;  %27343 = vmatprep.mubr.msk.f32.mxu0 %vm578_vm0, %v30505_v52  ;;  %27375 = vmatprep.mubr.msk.f32.mxu1 %vm578_vm0, %v30505_v52  ;;  %v30523_v1 = vadd.f32 %v817_v53, %v30462_v57  ;;  %v799_v62 = vmul.f32 %v30452_v43, %v779_v56 }
 0x1b1   : > { %v29180_v60 = vpop.eup %29179  ;;  %v30527_v61 = vadd.f32 %v818_v58, %v30462_v57  ;;  %v800_v63 = vmul.f32 %v30452_v43, %v780_v59  ;;  %27396 = vmatpush3.msra.mxu0 %v854_v24  ;;  %29070 = vmatpush3.msra.mxu1 %v854_v24 }
 0x1b2   : > { %v29182_v10 = vpop.eup %29181  ;;  %v819_v2 = vadd.f32 %v30456_v50, %v799_v62  ;;  %v781_v3 = vmul.f32 %v29180_v60, %v30366_v11  ;;  %27397 = vmatprep.subr.mxu0 %v853_v36  ;;  %29067 = vmatprep.subr.mxu1 %v853_v36 }
 0x1b3   : > { %27344 = vmatmul.mubr.msk.f32.gmra.mxu0 %vm578_vm0, %v30523_v1  ;;  %27376 = vmatmul.mubr.msk.f32.gmra.mxu1 %vm578_vm0, %v30523_v1  ;;  %v820_v4 = vadd.f32 %v30456_v50, %v800_v63  ;;  %v782_v5 = vmul.f32 %v29182_v10, %v30375_v23 }
 0x1b4   : > { %27346 = vmatprep.mubr.msk.f32.mxu0 %vm578_vm0, %v30527_v61  ;;  %27378 = vmatprep.mubr.msk.f32.mxu1 %vm578_vm0, %v30527_v61  ;;  %v30543_v11 = vadd.f32 %v819_v2, %v30462_v57  ;;  %v801_v8 = vmul.f32 %v30452_v43, %v781_v3 }
 0x1b5   : > { %v29184_v9 = vpop.eup %29183  ;;  %v30547_v12 = vadd.f32 %v820_v4, %v30462_v57  ;;  %v802_v13 = vmul.f32 %v30452_v43, %v782_v5  ;;  %27398 = vmatpush3.msra.mxu0 %v853_v36  ;;  %29071 = vmatpush3.msra.mxu1 %v853_v36 }
 0x1b6   : > { %v29186_v23 = vpop.eup %29185  ;;  %v821_v14 = vadd.f32 %v30456_v50, %v801_v8  ;;  %v783_v37 = vmul.f32 %v29184_v9, %v30378_v17  ;;  %27399 = vmatprep.subr.mxu0 %v852_v7  ;;  %29068 = vmatprep.subr.mxu1 %v852_v7 }
 0x1b7   : > { %27347 = vmatmul.mubr.msk.f32.gmra.mxu0 %vm578_vm0, %v30543_v11  ;;  %27379 = vmatmul.mubr.msk.f32.gmra.mxu1 %vm578_vm0, %v30543_v11  ;;  %v822_v44 = vadd.f32 %v30456_v50, %v802_v13  ;;  %v784_v15 = vmul.f32 %v29186_v23, %v30387_v35 }
 0x1b8   : > { %27349 = vmatprep.mubr.msk.f32.mxu0 %vm578_vm0, %v30547_v12  ;;  %27381 = vmatprep.mubr.msk.f32.mxu1 %vm578_vm0, %v30547_v12  ;;  %v837_v17 = vadd.f32 %v821_v14, %v30462_v57  ;;  %v803_v18 = vmul.f32 %v30452_v43, %v783_v37 }
 0x1b9   : > { %v29188_v22 = vpop.eup %29187  ;;  %v838_v16 = vadd.f32 %v822_v44, %v30462_v57  ;;  %v804_v26 = vmul.f32 %v30452_v43, %v784_v15  ;;  %27400 = vmatpush3.msra.mxu0 %v852_v7  ;;  %29072 = vmatpush3.msra.mxu1 %v852_v7 }
 0x1ba   : > { %v29190_v27 = vpop.eup %29189  ;;  %v823_v35 = vadd.f32 %v30456_v50, %v803_v18  ;;  %v785_v30 = vmul.f32 %v29188_v22, %v30390_v21 }
 0x1bb   : > { %27350 = vmatmul.mubr.msk.f32.gmra.mxu0 %vm578_vm0, %v837_v17  ;;  %27382 = vmatmul.mubr.msk.f32.gmra.mxu1 %vm578_vm0, %v837_v17  ;;  %v824_v31 = vadd.f32 %v30456_v50, %v804_v26  ;;  %v786_v34 = vmul.f32 %v29190_v27, %v30399_v47 }
 0x1bc   : > { %27352 = vmatprep.mubr.msk.f32.mxu0 %vm578_vm0, %v838_v16  ;;  %27384 = vmatprep.mubr.msk.f32.mxu1 %vm578_vm0, %v838_v16  ;;  %v839_v20 = vadd.f32 %v823_v35, %v30462_v57  ;;  %v805_v38 = vmul.f32 %v30452_v43, %v785_v30 }
 0x1bd   : > { %v29192_v39 = vpop.eup %29191  ;;  %v840_v54 = vadd.f32 %v824_v31, %v30462_v57  ;;  %v806_v21 = vmul.f32 %v30452_v43, %v786_v34 }
 0x1be   : > { %v825_v40 = vadd.f32 %v30456_v50, %v805_v38  ;;  %v787_v41 = vmul.f32 %v29192_v39, %v30402_v25 }
 0x1bf   : > { %27353 = vmatmul.mubr.msk.f32.gmra.mxu0 %vm578_vm0, %v839_v20  ;;  %27385 = vmatmul.mubr.msk.f32.gmra.mxu1 %vm578_vm0, %v839_v20  ;;  %v826_v47 = vadd.f32 %v30456_v50, %v806_v21 }
 0x1c0   : > { %27355 = vmatprep.mubr.msk.f32.mxu0 %vm578_vm0, %v840_v54  ;;  %27387 = vmatprep.mubr.msk.f32.mxu1 %vm578_vm0, %v840_v54  ;;  %v841_v42 = vadd.f32 %v825_v40, %v30462_v57  ;;  %v807_v46 = vmul.f32 %v30452_v43, %v787_v41  ;;  %v35707_v43 = vmov 0.0  }
 0x1c1   : > { %v842_v24 = vadd.f32 %v826_v47, %v30462_v57  ;;  %27425 = vmatprep.subr.mxu1 %v35707_v43  ;;  %27465 = vmatprep.subr.mxu0 %v35707_v43 }
 0x1c2   : > { %v827_v48 = vadd.f32 %v30456_v50, %v807_v46 }
 0x1c3   : > { %27356 = vmatmul.mubr.msk.f32.gmra.mxu0 %vm578_vm0, %v841_v42  ;;  %27388 = vmatmul.mubr.msk.f32.gmra.mxu1 %vm578_vm0, %v841_v42 }
 0x1c4   : > { %27358 = vmatprep.mubr.msk.f32.mxu0 %vm578_vm0, %v842_v24  ;;  %27390 = vmatprep.mubr.msk.f32.mxu1 %vm578_vm0, %v842_v24  ;;  %v843_v25 = vadd.f32 %v827_v48, %v30462_v57 }
 0x1c7   : > { %27359 = vmatmul.mubr.msk.f32.gmra.mxu0 %vm578_vm0, %v843_v25  ;;  %27391 = vmatmul.mubr.msk.f32.gmra.mxu1 %vm578_vm0, %v843_v25 }
 0x1c8   : > { %27401 = vmatprep.mubr.msk.f32.mxu0 %vm578_vm0, %v30468_v6  ;;  %27422 = vmatprep.mubr.msk.f32.mxu1 %vm578_vm0, %v842_v24 }
 0x1cb   : > { %27402 = vmatmul.mubr.msk.f32.vlgmr.msra.gmra.mxu0 %vm578_vm0, %v30482_v33  ;;  %27423 = vmatmul.mubr.msk.f32.vlgmr.msra.gmra.mxu1 %vm578_vm0, %v843_v25 }
 0x1cc   : > { %27404 = vmatprep.mubr.msk.f32.mxu0 %vm578_vm0, %v30485_v45  ;;  %27427 = vmatprep.mubr.msk.f32.mxu1 %vm30009_vm1, %v35707_v43 }
 0x1cf   : > { %27405 = vmatmul.mubr.msk.f32.gmra.mxu0 %vm578_vm0, %v30501_v55 }
 0x1d0   : > { %27407 = vmatprep.mubr.msk.f32.mxu0 %vm578_vm0, %v30505_v52 }
 0x1d3   : > { %27408 = vmatmul.mubr.msk.f32.gmra.mxu0 %vm578_vm0, %v30523_v1 }
 0x1d4   : > { %27410 = vmatprep.mubr.msk.f32.mxu0 %vm578_vm0, %v30527_v61 }
 0x1d7   : > { %27411 = vmatmul.mubr.msk.f32.gmra.mxu0 %vm578_vm0, %v30543_v11 }
 0x1d8   : > { %27413 = vmatprep.mubr.msk.f32.mxu0 %vm578_vm0, %v30547_v12 }
 0x1db   : > { %27414 = vmatmul.mubr.msk.f32.gmra.mxu0 %vm578_vm0, %v837_v17 }
 0x1dc   : > { %27416 = vmatprep.mubr.msk.f32.mxu0 %vm578_vm0, %v838_v16 }
 0x1df   : > { %27417 = vmatmul.mubr.msk.f32.gmra.mxu0 %vm578_vm0, %v839_v20 }
 0x1e0   : > { %27419 = vmatprep.mubr.msk.f32.mxu0 %vm578_vm0, %v840_v54 }
 0x1e3   : > { %27420 = vmatmul.mubr.msk.f32.gmra.mxu0 %vm578_vm0, %v841_v42 }
 0x1e4   : > { %27467 = vmatprep.mubr.msk.f32.mxu0 %vm30009_vm1, %v35707_v43 }
 0x26b   : > { %v30627_v50 = vpop.f32.mrf.mxu0  ;;  %v30629_v57 = vpop.f32.mrf.mxu1 }
 0x26c   : > { %35868 = vst [vmem:[#allocation21_spill] sm:$0xff] %v30627_v50  ;;  %35869 = vst [vmem:[#allocation22_spill] sm:$0xff] %v30629_v57  ;;  %4001 = vrot.lane.b32.xlu1 %v30629_v57, %s30010_s15 }
 0x26d   : > { %v30633_v6 = vpop.f32.mrf.mxu0  ;;  %v30635_v33 = vpop.f32.mrf.mxu1 }
 0x26e   : > { %35870 = vst [vmem:[#allocation23_spill] sm:$0xff] %v30633_v6  ;;  %35871 = vst [vmem:[#allocation24_spill] sm:$0xff] %v30635_v33  ;;  %3923 = vrot.lane.b32.xlu0 %v30635_v33, %s30010_s15  ;;  %27426 = vmatpush3.xpose.msk.msra.mxu1 %vm1344_vm2, %v30635_v33 }
 0x26f   : > { %v30641_v45 = vpop.f32.mrf.mxu0  ;;  %v30643_v55 = vpop.f32.mrf.mxu1  ;;  %27430 = vmatprep.subr.mxu1 %v35707_v43 }
 0x270   : > { %35872 = vst [vmem:[#allocation25_spill] sm:$0xff] %v30641_v45  ;;  %35873 = vst [vmem:[#allocation26_spill] sm:$0xff] %v30643_v55  ;;  %3999 = vrot.lane.b32.xlu1 %v30627_v50, %s30010_s15 }
 0x271   : > { %v30648_v49 = vpop.f32.mrf.mxu0  ;;  %v30650_v51 = vpop.f32.mrf.mxu1  ;;  %27428 = vmatmul.mubr.msk.f32.vlgmr.msra.gmra.mxu1 %vm1344_vm2, %v30633_v6 }
 0x272   : > { %35874 = vst [vmem:[#allocation27_spill] sm:$0xff] %v30648_v49  ;;  %35875 = vst [vmem:[#allocation28_spill] sm:$0xff] %v30650_v51  ;;  %4079 = vrot.lane.b32.xlu0 %v30650_v51, %s30010_s15  ;;  %27431 = vmatpush3.xpose.msk.msra.mxu1 %vm1344_vm2, %v30629_v57 }
 0x273   : > { %v30658_v52 = vpop.f32.mrf.mxu0  ;;  %v30660_v0 = vpop.f32.mrf.mxu1  ;;  %27432 = vmatprep.mubr.msk.f32.mxu1 %vm30009_vm1, %v35707_v43  ;;  %27435 = vmatprep.subr.mxu1 %v35707_v43 }
 0x274   : > { %35876 = vst [vmem:[#allocation29_spill] sm:$0xff] %v30658_v52  ;;  %35877 = vst [vmem:[#allocation30_spill] sm:$0xff] %v30660_v0  ;;  %3921 = vrot.lane.b32.xlu1 %v30633_v6, %s30010_s15 }
 0x275   : > { %v30667_v28 = vpop.f32.mrf.mxu0  ;;  %v30669_v29 = vpop.f32.mrf.mxu1  ;;  %27433 = vmatmul.mubr.msk.f32.vlgmr.msra.gmra.mxu1 %vm1344_vm2, %v30627_v50 }
 0x276   : > { %35878 = vst [vmem:[#allocation31_spill] sm:$0xff] %v30667_v28  ;;  %35879 = vst [vmem:[#allocation32_spill] sm:$0xff] %v30669_v29  ;;  %4077 = vrot.lane.b32.xlu0 %v30648_v49, %s30010_s15  ;;  %27436 = vmatpush3.xpose.msk.msra.mxu1 %vm1344_vm2, %v30650_v51 }
 0x277   : > { %v30677_v53 = vpop.f32.mrf.mxu0  ;;  %v30679_v56 = vpop.f32.mrf.mxu1  ;;  %27437 = vmatprep.mubr.msk.f32.mxu1 %vm30009_vm1, %v35707_v43  ;;  %27440 = vmatprep.subr.mxu1 %v35707_v43 }
 0x278   : > { %35880 = vst [vmem:[#allocation33_spill] sm:$0xff] %v30677_v53  ;;  %4157 = vrot.lane.b32.xlu1 %v30643_v55, %s30010_s15 }
 0x279   : > { %v30686_v58 = vpop.f32.mrf.mxu0  ;;  %v30688_v59 = vpop.f32.mrf.mxu1  ;;  %27438 = vmatmul.mubr.msk.f32.vlgmr.msra.gmra.mxu1 %vm1344_vm2, %v30648_v49 }
 0x27a   : > { %4235 = vrot.lane.b32.xlu0 %v30669_v29, %s30010_s15  ;;  %27441 = vmatpush3.xpose.msk.msra.mxu1 %vm1344_vm2, %v30643_v55 }
 0x27b   : > { %v30696_v36 = vpop.f32.mrf.mxu0  ;;  %v30698_v1 = vpop.f32.mrf.mxu1  ;;  %27442 = vmatprep.mubr.msk.f32.mxu1 %vm30009_vm1, %v35707_v43  ;;  %27445 = vmatprep.subr.mxu1 %v35707_v43 }
 0x27c   : > { %35881 = vst [vmem:[#allocation34_spill] sm:$0xff] %v30698_v1  ;;  %4155 = vrot.lane.b32.xlu1 %v30641_v45, %s30010_s15 }
 0x27d   : > { %v30705_v62 = vpop.f32.mrf.mxu0  ;;  %v30707_v60 = vpop.f32.mrf.mxu1  ;;  %27443 = vmatmul.mubr.msk.f32.vlgmr.msra.gmra.mxu1 %vm1344_vm2, %v30641_v45 }
 0x27e   : > { %27446 = vmatpush3.xpose.msk.msra.mxu1 %vm1344_vm2, %v30669_v29  ;;  %27466 = vmatpush3.xpose.msk.msra.mxu0 %vm1344_vm2, %v30707_v60 }
 0x27f   : > { %v30715_v61 = vpop.f32.mrf.mxu0  ;;  %v30717_v63 = vpop.f32.mrf.mxu1  ;;  %27447 = vmatprep.mubr.msk.f32.mxu1 %vm30009_vm1, %v35707_v43  ;;  %27450 = vmatprep.subr.mxu1 %v35707_v43 }
 0x280   : > { %35882 = vst [vmem:[#allocation35_spill] sm:$0xff] %v30717_v63  ;;  %4313 = vrot.lane.b32.xlu1 %v30660_v0, %s30010_s15  ;;  %27475 = vmatprep.subr.mxu0 %v35707_v43 }
 0x281   : > { %v30725_v10 = vpop.f32.mrf.mxu0  ;;  %v30727_v2 = vpop.f32.mrf.mxu1  ;;  %27448 = vmatmul.mubr.msk.f32.vlgmr.msra.gmra.mxu1 %vm1344_vm2, %v30667_v28  ;;  %27468 = vmatmul.mubr.msk.f32.vlgmr.msra.gmra.mxu0 %vm1344_vm2, %v30705_v62 }
 0x282   : > { %27451 = vmatpush3.xpose.msk.msra.mxu1 %vm1344_vm2, %v30660_v0  ;;  %27476 = vmatpush3.xpose.msk.msra.mxu0 %vm1344_vm2, %v30727_v2 }
 0x283   : > { %v30737_v3 = vpop.f32.mrf.mxu0  ;;  %v30739_v4 = vpop.f32.mrf.mxu1  ;;  %27452 = vmatprep.mubr.msk.f32.mxu1 %vm30009_vm1, %v35707_v43  ;;  %27477 = vmatprep.mubr.msk.f32.mxu0 %vm30009_vm1, %v35707_v43 }
 0x284   : > { %35883 = vst [vmem:[#allocation36_spill] sm:$0xff] %v30737_v3  ;;  %27455 = vmatprep.subr.mxu1 %v35707_v43  ;;  %27485 = vmatprep.subr.mxu0 %v35707_v43 }
 0x285   : > { %v30747_v5 = vpop.f32.mrf.mxu0  ;;  %v30749_v7 = vpop.f32.mrf.mxu1  ;;  %27453 = vmatmul.mubr.msk.f32.vlgmr.msra.gmra.mxu1 %vm1344_vm2, %v30658_v52  ;;  %27478 = vmatmul.mubr.msk.f32.vlgmr.msra.gmra.mxu0 %vm1344_vm2, %v30725_v10 }
 0x286   : > { %27456 = vmatpush3.xpose.msk.msra.mxu1 %vm1344_vm2, %v30688_v59  ;;  %27486 = vmatpush3.xpose.msk.msra.mxu0 %vm1344_vm2, %v30749_v7 }
 0x287   : > { %v30759_v11 = vpop.f32.mrf.mxu0  ;;  %v30761_v8 = vpop.f32.mrf.mxu1  ;;  %27457 = vmatprep.mubr.msk.f32.mxu1 %vm30009_vm1, %v35707_v43  ;;  %27487 = vmatprep.mubr.msk.f32.mxu0 %vm30009_vm1, %v35707_v43 }
 0x288   : > { %35884 = vst [vmem:[#allocation37_spill] sm:$0xff] %v30759_v11  ;;  %35885 = vst [vmem:[#allocation38_spill] sm:$0xff] %v30761_v8  ;;  %27460 = vmatprep.subr.mxu1 %v35707_v43  ;;  %27495 = vmatprep.subr.mxu0 %v35707_v43 }
 0x289   : > { %v30769_v9 = vpop.f32.mrf.mxu0  ;;  %v30771_v12 = vpop.f32.mrf.mxu1  ;;  %27458 = vmatmul.mubr.msk.f32.vlgmr.msra.gmra.mxu1 %vm1344_vm2, %v30686_v58  ;;  %27488 = vmatmul.mubr.msk.f32.vlgmr.msra.gmra.mxu0 %vm1344_vm2, %v30747_v5 }
 0x28a   : > { %27461 = vmatpush3.xpose.msk.msra.mxu1 %vm1344_vm2, %v30679_v56  ;;  %27496 = vmatpush3.xpose.msk.msra.mxu0 %vm1344_vm2, %v30771_v12 }
 0x28b   : > { %v30781_v13 = vpop.f32.mrf.mxu0  ;;  %27462 = vmatprep.mubr.msk.f32.mxu1 %vm30009_vm1, %v35707_v43  ;;  %27497 = vmatprep.mubr.msk.f32.mxu0 %vm30009_vm1, %v35707_v43  ;;  %v30843_v22 = vpop.f32.mrf.mxu1 }
 0x28c   : > { %35886 = vst [vmem:[#allocation39_spill] sm:$0xff] %v30781_v13  ;;  %27470 = vmatprep.subr.mxu1 %v35707_v43  ;;  %27505 = vmatprep.subr.mxu0 %v35707_v43  ;;  %35894 = vst [vmem:[#allocation47_spill] sm:$0xff] %v30843_v22 }
 0x28d   : > { %v30789_v23 = vpop.f32.mrf.mxu0  ;;  %27463 = vmatmul.mubr.msk.f32.vlgmr.msra.gmra.mxu1 %vm1344_vm2, %v30677_v53  ;;  %27498 = vmatmul.mubr.msk.f32.vlgmr.msra.gmra.mxu0 %vm1344_vm2, %v30769_v9  ;;  %v30847_v26 = vpop.f32.mrf.mxu1 }
 0x28e   : > { %35887 = vst [vmem:[#allocation40_spill] sm:$0xff] %v30789_v23  ;;  %27471 = vmatpush3.xpose.msk.msra.mxu1 %vm1344_vm2, %v30698_v1  ;;  %27506 = vmatpush3.msra.mxu0 %v30789_v23 }
 0x28f   : > { %27472 = vmatprep.mubr.msk.f32.mxu1 %vm30009_vm1, %v35707_v43  ;;  %27480 = vmatprep.subr.mxu1 %v35707_v43  ;;  %v30831_v14 = vpop.f32.mrf.mxu0 }
 0x290   : > { %27507 = vmatprep.mubr.msk.f32.mxu0 %vm30009_vm1, %v35707_v43  ;;  %27515 = vmatprep.subr.mxu0 %v35707_v43  ;;  %35888 = vst [vmem:[#allocation41_spill] sm:$0xff] %v30831_v14 }
 0x291   : > { %27473 = vmatmul.mubr.msk.f32.vlgmr.msra.gmra.mxu1 %vm1344_vm2, %v30696_v36  ;;  %v30833_v37 = vpop.f32.mrf.mxu0 }
 0x292   : > { %27481 = vmatpush3.xpose.msk.msra.mxu1 %vm1344_vm2, %v30717_v63  ;;  %27482 = vmatprep.mubr.msk.f32.mxu1 %vm30009_vm1, %v35707_v43  ;;  %35889 = vst [vmem:[#allocation42_spill] sm:$0xff] %v30833_v37 }
 0x293   : > { %27490 = vmatprep.subr.mxu1 %v35707_v43  ;;  %v30835_v44 = vpop.f32.mrf.mxu0 }
 0x294   : > { %35890 = vst [vmem:[#allocation43_spill] sm:$0xff] %v30835_v44 }
 0x295   : > { %27483 = vmatmul.mubr.msk.f32.vlgmr.msra.gmra.mxu1 %vm1344_vm2, %v30715_v61  ;;  %v30837_v15 = vpop.f32.mrf.mxu0 }
 0x296   : > { %27491 = vmatpush3.xpose.msk.msra.mxu1 %vm1344_vm2, %v30739_v4  ;;  %27492 = vmatprep.mubr.msk.f32.mxu1 %vm30009_vm1, %v35707_v43  ;;  %35891 = vst [vmem:[#allocation44_spill] sm:$0xff] %v30837_v15 }
 0x297   : > { %27500 = vmatprep.subr.mxu1 %v35707_v43  ;;  %v30839_v17 = vpop.f32.mrf.mxu0 }
 0x298   : > { %35892 = vst [vmem:[#allocation45_spill] sm:$0xff] %v30839_v17 }
 0x299   : > { %27493 = vmatmul.mubr.msk.f32.vlgmr.msra.gmra.mxu1 %vm1344_vm2, %v30737_v3  ;;  %v30841_v18 = vpop.f32.mrf.mxu0 }
 0x29a   : > { %27501 = vmatpush3.xpose.msk.msra.mxu1 %vm1344_vm2, %v30761_v8  ;;  %27502 = vmatprep.mubr.msk.f32.mxu1 %vm30009_vm1, %v35707_v43  ;;  %35893 = vst [vmem:[#allocation46_spill] sm:$0xff] %v30841_v18 }
 0x29b   : > { %27510 = vmatprep.subr.mxu1 %v35707_v43  ;;  %v30845_v16 = vpop.f32.mrf.mxu0 }
 0x29c   : > { %35895 = vst [vmem:[#allocation48_spill] sm:$0xff] %v30845_v16 }
 0x29d   : > { %27503 = vmatmul.mubr.msk.f32.vlgmr.msra.gmra.mxu1 %vm1344_vm2, %v30759_v11  ;;  %v30849_v27 = vpop.f32.mrf.mxu0 }
 0x29e   : > { %27511 = vmatpush3.msra.mxu1 %v30781_v13  ;;  %27512 = vmatprep.mubr.msk.f32.mxu1 %vm30009_vm1, %v35707_v43  ;;  %35896 = vst [vmem:[#allocation49_spill] sm:$0xff] %v30849_v27 }
 0x29f   : > { %27520 = vmatprep.subr.mxu1 %v35707_v43  ;;  %v30853_v31 = vpop.f32.mrf.mxu0 }
 0x2a0   : > { %35897 = vst [vmem:[#allocation50_spill] sm:$0xff] %v30853_v31 }
 0x2a1   : > { %v30859_v54 = vpop.f32.mrf.mxu0 }
 0x2a2   : > { %35898 = vst [vmem:[#allocation51_spill] sm:$0xff] %v30859_v54 }
 0x2a3   : > { %v30865_v42 = vpop.f32.mrf.mxu0 }
 0x2a4   : > { %35899 = vst [vmem:[#allocation52_spill] sm:$0xff] %v30865_v42 }
 0x331   : > { %v1417_v35 = vpop.f32.mrf.mxu1 }
 0x332   : > { %v30851_v30 = vmul.f32 0.35355338, %v1417_v35  ;;  %v30871_v35 = vpop.f32.mrf.mxu0 }
 0x333   : > { %v27429_v34 = vpop.f32.mrf.mxu1  ;;  %35900 = vst [vmem:[#allocation53_spill] sm:$0xff] %v30871_v35 }
 0x334   : > { %v2577_v20 = vsel %vm1344_vm2, %v30851_v30, -inf }
 0x335   : > { %2578 = vmax.xlane.f32.xlu0 %v2577_v20  ;;  %v1493_v38 = vpop.f32.mrf.mxu1 }
 0x336   : > { %v30857_v39 = vmul.f32 0.35355338, %v1493_v38 }
 0x337   : > { %v27434_v21 = vpop.f32.mrf.mxu1 }
 0x338   : > { %v2580_v40 = vsel %vm1344_vm2, %v30857_v39, -inf }
 0x339   : > { %2581 = vmax.xlane.f32.xlu1 %v2580_v40  ;;  %v1569_v41 = vpop.f32.mrf.mxu1 }
 0x33a   : > { %v30863_v47 = vmul.f32 0.35355338, %v1569_v41 }
 0x33b   : > { %v27439_v46 = vpop.f32.mrf.mxu1 }
 0x33c   : > { %v2583_v24 = vsel %vm1344_vm2, %v30863_v47, -inf }
 0x33d   : > { %2584 = vmax.xlane.f32.xlu0 %v2583_v24  ;;  %v1645_v48 = vpop.f32.mrf.mxu1 }
 0x33e   : > { %v30869_v25 = vmul.f32 0.35355338, %v1645_v48 }
 0x33f   : > { %v27444_v34 = vpop.f32.mrf.mxu1 }
 0x340   : > { %v2586_v20 = vsel %vm1344_vm2, %v30869_v25, -inf }
 0x341   : > { %2587 = vmax.xlane.f32.xlu1 %v2586_v20  ;;  %v1721_v38 = vpop.f32.mrf.mxu1  ;;  %v2025_v21 = vpop.f32.mrf.mxu0 }
 0x342   : > { %v30875_v40 = vmul.f32 0.35355338, %v1721_v38  ;;  %v30877_v43 = vmul.f32 0.35355338, %v2025_v21 }
 0x343   : > { %v27449_v41 = vpop.f32.mrf.mxu1  ;;  %v27469_v46 = vpop.f32.mrf.mxu0 }
 0x344   : > { %v2589_v24 = vsel %vm1344_vm2, %v30875_v40, -inf  ;;  %v2601_v38 = vsel %vm1344_vm2, %v30877_v43, -inf }
 0x345   : > { %2590 = vmax.xlane.f32.xlu0 %v2589_v24  ;;  %v1797_v48 = vpop.f32.mrf.mxu1  ;;  %v2177_v19 = vpop.f32.mrf.mxu0 }
 0x346   : > { %v30881_v32 = vmul.f32 0.35355338, %v1797_v48  ;;  %v30883_v49 = vmul.f32 0.35355338, %v2177_v19 }
 0x347   : > { %v27454_v34 = vpop.f32.mrf.mxu1  ;;  %v27479_v29 = vpop.f32.mrf.mxu0 }
 0x348   : > { %v2592_v20 = vsel %vm1344_vm2, %v30881_v32, -inf  ;;  %v2607_v48 = vsel %vm1344_vm2, %v30883_v49, -inf }
 0x349   : > { %2593 = vmax.xlane.f32.xlu1 %v2592_v20  ;;  %v1873_v21 = vpop.f32.mrf.mxu1  ;;  %2602 = vmax.xlane.f32.xlu0 %v2601_v38  ;;  %v2329_v41 = vpop.f32.mrf.mxu0 }
 0x34a   : > { %v30889_v51 = vmul.f32 0.35355338, %v1873_v21  ;;  %v30895_v45 = vmul.f32 0.35355338, %v2329_v41 }
 0x34b   : > { %v27459_v46 = vpop.f32.mrf.mxu1  ;;  %v27489_v24 = vpop.f32.mrf.mxu0 }
 0x34c   : > { %v2595_v38 = vsel %vm1344_vm2, %v30889_v51, -inf }
 0x34d   : > { %v1949_v29 = vpop.f32.mrf.mxu1  ;;  %2608 = vmax.xlane.f32.xlu0 %v2607_v48  ;;  %v2481_v19 = vpop.f32.mrf.mxu0  ;;  %v2613_v48 = vsel %vm1344_vm2, %v30895_v45, -inf }
 0x34e   : > { %v30893_v34 = vmul.f32 0.35355338, %v1949_v29  ;;  %v30901_v24 = vmul.f32 0.35355338, %v2481_v19 }
 0x34f   : > { %v27464_v0 = vpop.f32.mrf.mxu1  ;;  %v27499_v6 = vpop.f32.mrf.mxu0 }
 0x350   : > { %v2598_v20 = vsel %vm1344_vm2, %v30893_v34, -inf  ;;  %v2619_v0 = vsel %vm1344_vm2, %v30901_v24, -inf }
 0x351   : > { %2599 = vmax.xlane.f32.xlu1 %v2598_v20  ;;  %v2101_v21 = vpop.f32.mrf.mxu1  ;;  %2596 = vmax.xlane.f32.xlu0 %v2595_v38 }
 0x352   : > { %v30911_v19 = vmul.f32 0.35355338, %v2101_v21 }
 0x353   : > { %v27474_v46 = vpop.f32.mrf.mxu1 }
 0x354   : > { %v2604_v38 = vsel %vm1344_vm2, %v30911_v19, -inf }
 0x355   : > { %v2253_v29 = vpop.f32.mrf.mxu1  ;;  %2614 = vmax.xlane.f32.xlu0 %v2613_v48 }
 0x356   : > { %v30913_v20 = vmul.f32 0.35355338, %v2253_v29  ;;  %v30927_v29 = vpop.permute.xlu1 %4001 }
 0x357   : > { %v27484_v6 = vpop.f32.mrf.mxu1  ;;  %35901 = vst [vmem:[#allocation54_spill] sm:$0xff] %v30927_v29 }
 0x359   : > { %v2405_v41 = vpop.f32.mrf.mxu1  ;;  %2620 = vmax.xlane.f32.xlu0 %v2619_v0  ;;  %v30931_v0 = vpop.permute.xlu0 %3923 }
 0x35a   : > { %v30917_v46 = vmul.f32 0.35355338, %v2405_v41  ;;  %v30929_v6 = vpop.permute.xlu1 %3999 }
 0x35b   : > { %v27494_v33 = vpop.f32.mrf.mxu1  ;;  %35902 = vst [vmem:[#allocation55_spill] sm:$0xff] %v30929_v6 }
 0x35c   : > { %v2610_v33 = vsel %vm1344_vm2, %v30913_v20, -inf  ;;  %v2616_v48 = vsel %vm1344_vm2, %v30917_v46, -inf }
 0x35d   : > { %v2557_v55 = vpop.f32.mrf.mxu1 }
 0x35e   : > { %v30933_v41 = vpop.permute.xlu1 %3921 }
 0x35f   : > { %v27504_v50 = vpop.f32.mrf.mxu1 }
 0x360   : > { %v30921_v50 = vmul.f32 0.35355338, %v2557_v55 }
 0x362   : > { %4311 = vrot.lane.b32.xlu1 %v30658_v52, %s30010_s15  ;;  %v2622_v21 = vsel %vm1344_vm2, %v30921_v50, -inf  ;;  %v30937_v55 = vpop.permute.xlu1 %4157 }
 0x363   : > { %35903 = vst [vmem:[#allocation56_spill] sm:$0xff] %v30937_v55 }
 0x36f   : > { %4233 = vrot.lane.b32.xlu0 %v30667_v28, %s30010_s15  ;;  %v30941_v28 = vpop.permute.xlu1 %4155 }
 0x370   : > { %35905 = vst [vmem:[#allocation58_spill] sm:$0xff] %v30941_v28 }
 0x373   : > { %v30945_v52 = vpop.permute.xlu1 %4313 }
 0x374   : > { %35907 = vst [vmem:[#allocation60_spill] sm:$0xff] %v30945_v52 }
 0x386   : > { %2605 = vmax.xlane.f32.xlu1 %v2604_v38  ;;  %v30935_v38 = vpop.permute.xlu0 %4079 }
 0x38a   : > { %2611 = vmax.xlane.f32.xlu1 %v2610_v33  ;;  %v30939_v33 = vpop.permute.xlu0 %4077 }
 0x38b   : > { %35904 = vst [vmem:[#allocation57_spill] sm:$0xff] %v30939_v33 }
 0x38e   : > { %2617 = vmax.xlane.f32.xlu1 %v2616_v48  ;;  %v30943_v48 = vpop.permute.xlu0 %4235 }
 0x38f   : > { %35906 = vst [vmem:[#allocation59_spill] sm:$0xff] %v30943_v48 }
 0x392   : > { %2623 = vmax.xlane.f32.xlu1 %v2622_v21 }
 0x3be   : > { %v2579_v21 = vpop.xlane.xlu0 %2578 }
 0x3bf   : > { %v2625_v57 = vsub.f32 %v30851_v30, %v2579_v21 }
 0x3c1   : > { %v2641_v13 = vmul.f32 1.442695, %v2625_v57 }
 0x3c2   : > { %v2582_v6 = vpop.xlane.xlu1 %2581 }
 0x3c3   : > { %29193 = vpow2.f32 %v2641_v13  ;;  %v2626_v29 = vsub.f32 %v30857_v39, %v2582_v6 }
 0x3c5   : > { %v2643_v22 = vmul.f32 1.442695, %v2626_v29 }
 0x3c6   : > { %v2585_v42 = vpop.xlane.xlu0 %2584 }
 0x3c7   : > { %29195 = vpow2.f32 %v2643_v22  ;;  %v2627_v55 = vsub.f32 %v30863_v47, %v2585_v42 }
 0x3c9   : > { %v2645_v31 = vmul.f32 1.442695, %v2627_v55 }
 0x3ca   : > { %v2588_v33 = vpop.xlane.xlu1 %2587 }
 0x3cb   : > { %29197 = vpow2.f32 %v2645_v31  ;;  %v2628_v28 = vsub.f32 %v30869_v25, %v2588_v33 }
 0x3cd   : > { %v2647_v48 = vmul.f32 1.442695, %v2628_v28 }
 0x3ce   : > { %v2591_v52 = vpop.xlane.xlu0 %2590 }
 0x3cf   : > { %29199 = vpow2.f32 %v2647_v48  ;;  %v2629_v30 = vsub.f32 %v30875_v40, %v2591_v52 }
 0x3d0   : > { %v30952_v57 = vpop.eup %29193 }
 0x3d1   : > { %v2649_v13 = vmul.f32 1.442695, %v2629_v30  ;;  %v2673_v39 = vsel %vm1344_vm2, %v30952_v57, 0.0 }
 0x3d2   : > { %v2594_v29 = vpop.xlane.xlu1 %2593  ;;  %2674 = vadd.xlane.f32.xlu0 %v2673_v39  ;;  %v2603_v22 = vpop.xlane.xlu0 %2602 }
 0x3d3   : > { %29201 = vpow2.f32 %v2649_v13  ;;  %v2630_v47 = vsub.f32 %v30881_v32, %v2594_v29  ;;  %v2633_v31 = vsub.f32 %v30877_v43, %v2603_v22 }
 0x3d4   : > { %v30958_v42 = vpop.eup %29195 }
 0x3d5   : > { %v2651_v28 = vmul.f32 1.442695, %v2630_v47  ;;  %v2657_v25 = vmul.f32 1.442695, %v2633_v31  ;;  %v2676_v52 = vsel %vm1344_vm2, %v30958_v42, 0.0 }
 0x3d6   : > { %2677 = vadd.xlane.f32.xlu1 %v2676_v52  ;;  %v2609_v40 = vpop.xlane.xlu0 %2608 }
 0x3d7   : > { %29203 = vpow2.f32 %v2651_v28  ;;  %v2635_v6 = vsub.f32 %v30883_v49, %v2609_v40 }
 0x3d8   : > { %v30963_v55 = vpop.eup %29197  ;;  %29205 = vpow2.f32 %v2657_v25 }
 0x3d9   : > { %v2661_v33 = vmul.f32 1.442695, %v2635_v6  ;;  %v2679_v32 = vsel %vm1344_vm2, %v30963_v55, 0.0 }
 0x3da   : > { %2680 = vadd.xlane.f32.xlu0 %v2679_v32  ;;  %v2597_v43 = vpop.xlane.xlu0 %2596  ;;  %v2600_v40 = vpop.xlane.xlu1 %2599 }
 0x3db   : > { %29207 = vpow2.f32 %v2661_v33  ;;  %v2631_v48 = vsub.f32 %v30889_v51, %v2597_v43  ;;  %v2632_v6 = vsub.f32 %v30893_v34, %v2600_v40 }
 0x3dc   : > { %v30968_v21 = vpop.eup %29199 }
 0x3dd   : > { %v2653_v30 = vmul.f32 1.442695, %v2631_v48  ;;  %v2682_v13 = vsel %vm1344_vm2, %v30968_v21, 0.0  ;;  %v2655_v33 = vmul.f32 1.442695, %v2632_v6 }
 0x3de   : > { %2683 = vadd.xlane.f32.xlu1 %v2682_v13  ;;  %v2615_v32 = vpop.xlane.xlu0 %2614 }
 0x3df   : > { %29209 = vpow2.f32 %v2653_v30  ;;  %v2637_v43 = vsub.f32 %v30895_v45, %v2615_v32 }
 0x3e0   : > { %v30972_v49 = vpop.eup %29201  ;;  %29211 = vpow2.f32 %v2655_v33 }
 0x3e1   : > { %v2685_v39 = vsel %vm1344_vm2, %v30972_v49, 0.0  ;;  %v2665_v30 = vmul.f32 1.442695, %v2637_v43 }
 0x3e2   : > { %2686 = vadd.xlane.f32.xlu0 %v2685_v39  ;;  %v2621_v48 = vpop.xlane.xlu0 %2620 }
 0x3e3   : > { %v2639_v13 = vsub.f32 %v30901_v24, %v2621_v48  ;;  %29213 = vpow2.f32 %v2665_v30  ;;  %v31013_v24 = vpop.permute.xlu1 %4311 }
 0x3e4   : > { %v30976_v29 = vpop.eup %29203 }
 0x3e5   : > { %v30978_v22 = vpop.eup %29205  ;;  %v2688_v51 = vsel %vm1344_vm2, %v30976_v29, 0.0  ;;  %v2669_v39 = vmul.f32 1.442695, %v2639_v13 }
 0x3e6   : > { %2689 = vadd.xlane.f32.xlu1 %v2688_v51  ;;  %v2697_v47 = vsel %vm1344_vm2, %v30978_v22, 0.0 }
 0x3e7   : > { %2698 = vadd.xlane.f32.xlu0 %v2697_v47  ;;  %29215 = vpow2.f32 %v2669_v39 }
 0x3e8   : > { %v30984_v31 = vpop.eup %29207 }
 0x3e9   : > { %v2703_v28 = vsel %vm1344_vm2, %v30984_v31, 0.0 }
 0x3eb   : > { %2704 = vadd.xlane.f32.xlu0 %v2703_v28 }
 0x3ec   : > { %v30988_v25 = vpop.eup %29209 }
 0x3ed   : > { %v2691_v52 = vsel %vm1344_vm2, %v30988_v25, 0.0  ;;  %v30999_v51 = vpop.eup %29211 }
 0x3ee   : > { %v2694_v34 = vsel %vm1344_vm2, %v30999_v51, 0.0 }
 0x3ef   : > { %2692 = vadd.xlane.f32.xlu0 %v2691_v52 }
 0x3f0   : > { %v31003_v47 = vpop.eup %29213 }
 0x3f1   : > { %v2709_v28 = vsel %vm1344_vm2, %v31003_v47, 0.0 }
 0x3f4   : > { %v31007_v52 = vpop.eup %29215 }
 0x3f5   : > { %v2715_v45 = vsel %vm1344_vm2, %v31007_v52, 0.0 }
 0x3f7   : > { %4469 = vrot.lane.b32.xlu1 %v30679_v56, %s30010_s15 }
 0x405   : > { %4391 = vrot.lane.b32.xlu0 %v30688_v59, %s30010_s15 }
 0x40f   : > { %v2606_v40 = vpop.xlane.xlu1 %2605 }
 0x410   : > { %v2634_v33 = vsub.f32 %v30911_v19, %v2606_v40 }
 0x412   : > { %v2659_v43 = vmul.f32 1.442695, %v2634_v33 }
 0x413   : > { %v2612_v6 = vpop.xlane.xlu1 %2611 }
 0x414   : > { %v2636_v48 = vsub.f32 %v30913_v20, %v2612_v6  ;;  %29217 = vpow2.f32 %v2659_v43 }
 0x416   : > { %v2663_v30 = vmul.f32 1.442695, %v2636_v48 }
 0x417   : > { %v2618_v32 = vpop.xlane.xlu1 %2617 }
 0x418   : > { %v2638_v13 = vsub.f32 %v30917_v46, %v2618_v32  ;;  %29219 = vpow2.f32 %v2663_v30 }
 0x41a   : > { %v2667_v19 = vmul.f32 1.442695, %v2638_v13 }
 0x41b   : > { %2695 = vadd.xlane.f32.xlu1 %v2694_v34  ;;  %v2624_v39 = vpop.xlane.xlu1 %2623 }
 0x41c   : > { %v2640_v34 = vsub.f32 %v30921_v50, %v2624_v39  ;;  %29221 = vpow2.f32 %v2667_v19  ;;  %v31041_v50 = vpop.permute.xlu0 %4233 }
 0x41e   : > { %v2671_v20 = vmul.f32 1.442695, %v2640_v34 }
 0x420   : > { %29223 = vpow2.f32 %v2671_v20 }
 0x424   : > { %2710 = vadd.xlane.f32.xlu0 %v2709_v28  ;;  %v31031_v28 = vpop.eup %29217 }
 0x425   : > { %v2700_v46 = vsel %vm1344_vm2, %v31031_v28, 0.0 }
 0x428   : > { %2716 = vadd.xlane.f32.xlu0 %v2715_v45  ;;  %v31037_v45 = vpop.eup %29219 }
 0x429   : > { %v2706_v40 = vsel %vm1344_vm2, %v31037_v45, 0.0  ;;  %v31045_v6 = vpop.eup %29221 }
 0x42a   : > { %v2712_v32 = vsel %vm1344_vm2, %v31045_v6, 0.0 }
 0x42c   : > { %4467 = vrot.lane.b32.xlu1 %v30677_v53, %s30010_s15 }
 0x42d   : > { %v31051_v43 = vpop.eup %29223 }
 0x42e   : > { %v2718_v30 = vsel %vm1344_vm2, %v31051_v43, 0.0 }
 0x430   : > { %4625 = vrot.lane.b32.xlu1 %v30698_v1, %s30010_s15 }
 0x43e   : > { %4389 = vrot.lane.b32.xlu0 %v30686_v58, %s30010_s15 }
 0x442   : > { %4547 = vrot.lane.b32.xlu0 %v30707_v60, %s30010_s15 }
 0x446   : > { %4545 = vrot.lane.b32.xlu0 %v30705_v62, %s30010_s15 }
 0x44a   : > { %4703 = vrot.lane.b32.xlu0 %v30727_v2, %s30010_s15 }
 0x44e   : > { %4701 = vrot.lane.b32.xlu0 %v30725_v10, %s30010_s15 }
 0x452   : > { %4859 = vrot.lane.b32.xlu0 %v30749_v7, %s30010_s15 }
 0x454   : > { %2701 = vadd.xlane.f32.xlu1 %v2700_v46 }
 0x456   : > { %4857 = vrot.lane.b32.xlu0 %v30747_v5, %s30010_s15 }
 0x458   : > { %2707 = vadd.xlane.f32.xlu1 %v2706_v40  ;;  %v35908_v40 = vmov 0.0  }
 0x45a   : > { %5015 = vrot.lane.b32.xlu0 %v30771_v12, %s30010_s15 }
 0x45b   : > { %v2675_v33 = vpop.xlane.xlu0 %2674 }
 0x45c   : > { %29225 = vrcp.f32 %v2675_v33  ;;  %2713 = vadd.xlane.f32.xlu1 %v2712_v32 }
 0x45e   : > { %5013 = vrot.lane.b32.xlu0 %v30769_v9, %s30010_s15 }
 0x45f   : > { %v2678_v48 = vpop.xlane.xlu1 %2677 }
 0x460   : > { %29227 = vrcp.f32 %v2678_v48  ;;  %2719 = vadd.xlane.f32.xlu1 %v2718_v30 }
 0x462   : > { %5362 = vrot.lane.b32.xlu0 %v30789_v23, %s30010_s15 }
 0x463   : > { %v2681_v13 = vpop.xlane.xlu0 %2680 }
 0x464   : > { %29229 = vrcp.f32 %v2681_v13 }
 0x467   : > { %v2684_v39 = vpop.xlane.xlu1 %2683 }
 0x468   : > { %29231 = vrcp.f32 %v2684_v39 }
 0x469   : > { %v29226_v19 = vpop.eup %29225 }
 0x46a   : > { %v2722_v34 = vmul.f32 %v29226_v19, %v30952_v57 }
 0x46b   : > { %v2687_v20 = vpop.xlane.xlu0 %2686 }
 0x46c   : > { %29233 = vrcp.f32 %v2687_v20  ;;  %27508 = vmatmul.mubr.msk.f32.vlgmr.msra.gmra.mxu0 %vm1344_vm2, %v2722_v34 }
 0x46d   : > { %v29228_v46 = vpop.eup %29227  ;;  %27516 = vmatpush3.msra.mxu0 %v30833_v37  ;;  %27517 = vmatprep.mubr.msk.f32.mxu0 %vm30009_vm1, %v35908_v40 }
 0x46e   : > { %v2724_v33 = vmul.f32 %v29228_v46, %v30958_v42  ;;  %27525 = vmatprep.subr.mxu0 %v35908_v40 }
 0x46f   : > { %v2690_v32 = vpop.xlane.xlu1 %2689 }
 0x470   : > { %29235 = vrcp.f32 %v2690_v32  ;;  %v2699_v48 = vpop.xlane.xlu0 %2698  ;;  %27513 = vmatmul.mubr.msk.f32.vlgmr.msra.gmra.mxu1 %vm1344_vm2, %v2724_v33 }
 0x471   : > { %v29230_v57 = vpop.eup %29229  ;;  %27521 = vmatpush3.msra.mxu1 %v30831_v14  ;;  %4623 = vrot.lane.b32.xlu1 %v30696_v36, %s30010_s15 }
 0x472   : > { %v2726_v30 = vmul.f32 %v29230_v57, %v30963_v55  ;;  %27522 = vmatprep.mubr.msk.f32.mxu1 %vm30009_vm1, %v35908_v40  ;;  %27530 = vmatprep.subr.mxu1 %v35908_v40 }
 0x474   : > { %v2705_v42 = vpop.xlane.xlu0 %2704  ;;  %27518 = vmatmul.mubr.msk.f32.vlgmr.msra.gmra.mxu0 %vm1344_vm2, %v2726_v30 }
 0x475   : > { %v29232_v13 = vpop.eup %29231  ;;  %27526 = vmatpush3.msra.mxu0 %v30837_v15  ;;  %4781 = vrot.lane.b32.xlu1 %v30717_v63, %s30010_s15 }
 0x476   : > { %v2728_v39 = vmul.f32 %v29232_v13, %v30968_v21  ;;  %27527 = vmatprep.mubr.msk.f32.mxu0 %vm30009_vm1, %v35908_v40  ;;  %27535 = vmatprep.subr.mxu0 %v35908_v40 }
 0x478   : > { %v2693_v55 = vpop.xlane.xlu0 %2692  ;;  %27523 = vmatmul.mubr.msk.f32.vlgmr.msra.gmra.mxu1 %vm1344_vm2, %v2728_v39 }
 0x479   : > { %v29234_v19 = vpop.eup %29233  ;;  %29237 = vrcp.f32 %v2693_v55  ;;  %27531 = vmatpush3.msra.mxu1 %v30835_v44  ;;  %4779 = vrot.lane.b32.xlu1 %v30715_v61, %s30010_s15 }
 0x47a   : > { %v2730_v34 = vmul.f32 %v29234_v19, %v30972_v49  ;;  %27532 = vmatprep.mubr.msk.f32.mxu1 %vm30009_vm1, %v35908_v40  ;;  %27540 = vmatprep.subr.mxu1 %v35908_v40  ;;  %29239 = vrcp.f32 %v2699_v48 }
 0x47b   : > { %29241 = vrcp.f32 %v2705_v42 }
 0x47c   : > { %27528 = vmatmul.mubr.msk.f32.vlgmr.msra.gmra.mxu0 %vm1344_vm2, %v2730_v34  ;;  %v4392_v57 = vpop.permute.xlu0 %4391 }
 0x47d   : > { %v29236_v21 = vpop.eup %29235  ;;  %27536 = vmatpush3.msra.mxu0 %v30841_v18  ;;  %4937 = vrot.lane.b32.xlu1 %v30739_v4, %s30010_s15 }
 0x47e   : > { %v2732_v20 = vmul.f32 %v29236_v21, %v30976_v29  ;;  %27537 = vmatprep.mubr.msk.f32.mxu0 %vm30009_vm1, %v35908_v40  ;;  %27545 = vmatprep.subr.mxu0 %v35908_v40 }
 0x480   : > { %27533 = vmatmul.mubr.msk.f32.vlgmr.msra.gmra.mxu1 %vm1344_vm2, %v2732_v20 }
 0x481   : > { %27541 = vmatpush3.msra.mxu1 %v30839_v17  ;;  %4935 = vrot.lane.b32.xlu1 %v30737_v3, %s30010_s15 }
 0x482   : > { %27542 = vmatprep.mubr.msk.f32.mxu1 %vm30009_vm1, %v35908_v40  ;;  %27550 = vmatprep.subr.mxu1 %v35908_v40 }
 0x485   : > { %5093 = vrot.lane.b32.xlu1 %v30761_v8, %s30010_s15 }
 0x486   : > { %v29238_v49 = vpop.eup %29237 }
 0x487   : > { %v2734_v29 = vmul.f32 %v29238_v49, %v30988_v25  ;;  %v29240_v46 = vpop.eup %29239 }
 0x488   : > { %v2738_v33 = vmul.f32 %v29240_v46, %v30978_v22  ;;  %v29242_v32 = vpop.eup %29241  ;;  %v31127_v22 = vpop.permute.xlu1 %4469 }
 0x489   : > { %27538 = vmatmul.mubr.msk.f32.vlgmr.msra.gmra.mxu0 %vm1344_vm2, %v2734_v29  ;;  %5091 = vrot.lane.b32.xlu1 %v30759_v11, %s30010_s15  ;;  %v2742_v25 = vmul.f32 %v29242_v32, %v30984_v31  ;;  %v35909_v29 = vld [vmem:[#allocation57_spill] sm:$0xff] }
 0x48a   : > { %27546 = vmatpush3.msra.mxu0 %v30849_v27  ;;  %27547 = vmatprep.mubr.msk.f32.mxu0 %vm30009_vm1, %v35908_v40 }
 0x48b   : > { %27555 = vmatprep.subr.mxu0 %v35908_v40 }
 0x48d   : > { %27548 = vmatmul.mubr.msk.f32.vlgmr.msra.gmra.mxu0 %vm1344_vm2, %v2738_v33 }
 0x48e   : > { %27556 = vmatpush3.msra.mxu0 %v30859_v54  ;;  %27557 = vmatprep.mubr.msk.f32.mxu0 %vm30009_vm1, %v35908_v40 }
 0x48f   : > { %27565 = vmatprep.subr.mxu0 %v35908_v40 }
 0x491   : > { %27558 = vmatmul.mubr.msk.f32.vlgmr.msra.gmra.mxu0 %vm1344_vm2, %v2742_v25 }
 0x492   : > { %27566 = vmatpush3.msra.mxu0 %v30871_v35  ;;  %27567 = vmatprep.mubr.msk.f32.mxu0 %vm30009_vm1, %v35908_v40 }
 0x493   : > { %27575 = vmatprep.subr.mxu0 %v35908_v40 }
 0x4a4   : > { %v2696_v48 = vpop.xlane.xlu1 %2695 }
 0x4a5   : > { %29243 = vrcp.f32 %v2696_v48 }
 0x4ad   : > { %v2711_v30 = vpop.xlane.xlu0 %2710 }
 0x4ae   : > { %29245 = vrcp.f32 %v2711_v30 }
 0x4b1   : > { %v2717_v42 = vpop.xlane.xlu0 %2716 }
 0x4b2   : > { %v29244_v13 = vpop.eup %29243  ;;  %29247 = vrcp.f32 %v2717_v42 }
 0x4b3   : > { %v2736_v31 = vmul.f32 %v29244_v13, %v30999_v51 }
 0x4b5   : > { %v4390_v39 = vpop.permute.xlu0 %4389  ;;  %27543 = vmatmul.mubr.msk.f32.vlgmr.msra.gmra.mxu1 %vm1344_vm2, %v2736_v31 }
 0x4b6   : > { %27551 = vmatpush3.msra.mxu1 %v30845_v16  ;;  %27552 = vmatprep.mubr.msk.f32.mxu1 %vm30009_vm1, %v35908_v40 }
 0x4b7   : > { %27560 = vmatprep.subr.mxu1 %v35908_v40 }
 0x4b9   : > { %v4548_v55 = vpop.permute.xlu0 %4547 }
 0x4bb   : > { %v29246_v19 = vpop.eup %29245 }
 0x4bc   : > { %v2746_v34 = vmul.f32 %v29246_v19, %v31003_v47 }
 0x4bd   : > { %v4546_v21 = vpop.permute.xlu0 %4545 }
 0x4be   : > { %27568 = vmatmul.mubr.msk.f32.vlgmr.msra.gmra.mxu0 %vm1344_vm2, %v2746_v34  ;;  %v35912_v34 = vld [vmem:[#allocation52_spill] sm:$0xff] }
 0x4bf   : > { %v29248_v20 = vpop.eup %29247  ;;  %27576 = vmatpush3.msra.mxu0 %v30847_v26  ;;  %27577 = vmatprep.mubr.msk.f32.mxu0 %vm30009_vm1, %v35908_v40 }
 0x4c0   : > { %27585 = vmatprep.subr.mxu0 %v35908_v40  ;;  %v2750_v51 = vmul.f32 %v29248_v20, %v31007_v52 }
 0x4c1   : > { %v4704_v49 = vpop.permute.xlu0 %4703 }
 0x4c2   : > { %27578 = vmatmul.mubr.msk.f32.vlgmr.msra.gmra.mxu0 %vm1344_vm2, %v2750_v51  ;;  %v35913_v51 = vld [vmem:[#allocation47_spill] sm:$0xff] }
 0x4c3   : > { %27586 = vmatpush3.xpose.msk.msra.mxu0 %vm1344_vm2, %v30931_v0  ;;  %27587 = vmatprep.mubr.msk.f32.mxu0 %vm30009_vm1, %v35908_v40  ;;  %v35910_v0 = vld [vmem:[#allocation59_spill] sm:$0xff] }
 0x4c4   : > { %27595 = vmatprep.subr.mxu0 %v35908_v40 }
 0x4c5   : > { %v4702_v47 = vpop.permute.xlu0 %4701 }
 0x4c6   : > { %27588 = vmatmul.mubr.msk.f32.vlgmr.msra.gmra.mxu0 %vm1344_vm2, %v30933_v41 }
 0x4c7   : > { %27596 = vmatpush3.xpose.msk.msra.mxu0 %vm1344_vm2, %v30935_v38  ;;  %27597 = vmatprep.mubr.msk.f32.mxu0 %vm30009_vm1, %v35908_v40  ;;  %v31169_v38 = vpop.permute.xlu1 %4467 }
 0x4c8   : > { %27605 = vmatprep.subr.mxu0 %v35908_v40 }
 0x4c9   : > { %v4860_v52 = vpop.permute.xlu0 %4859 }
 0x4ca   : > { %27598 = vmatmul.mubr.msk.f32.vlgmr.msra.gmra.mxu0 %vm1344_vm2, %v35909_v29  ;;  %v35917_v29 = vld [vmem:[#allocation58_spill] sm:$0xff] }
 0x4cb   : > { %27606 = vmatpush3.xpose.msk.msra.mxu0 %vm1344_vm2, %v35910_v0  ;;  %27607 = vmatprep.mubr.msk.f32.mxu0 %vm30009_vm1, %v35908_v40  ;;  %v31180_v46 = vpop.permute.xlu1 %4625  ;;  %v35918_v0 = vld [vmem:[#allocation60_spill] sm:$0xff] }
 0x4cc   : > { %27615 = vmatprep.subr.mxu0 %v35908_v40 }
 0x4cd   : > { %v4858_v41 = vpop.permute.xlu0 %4857 }
 0x4ce   : > { %27608 = vmatmul.mubr.msk.f32.vlgmr.msra.gmra.mxu0 %vm1344_vm2, %v31041_v50 }
 0x4cf   : > { %27616 = vmatpush3.xpose.msk.msra.mxu0 %vm1344_vm2, %v4392_v57  ;;  %27617 = vmatprep.mubr.msk.f32.mxu0 %vm30009_vm1, %v35908_v40 }
 0x4d0   : > { %27625 = vmatprep.subr.mxu0 %v35908_v40 }
 0x4d1   : > { %v5016_v50 = vpop.permute.xlu0 %5015 }
 0x4d2   : > { %27618 = vmatmul.mubr.msk.f32.vlgmr.msra.gmra.mxu0 %vm1344_vm2, %v4390_v39  ;;  %v35911_v39 = vld [vmem:[#allocation50_spill] sm:$0xff] }
 0x4d3   : > { %27626 = vmatpush3.xpose.msk.msra.mxu0 %vm1344_vm2, %v4548_v55  ;;  %27627 = vmatprep.mubr.msk.f32.mxu0 %vm30009_vm1, %v35908_v40 }
 0x4d4   : > { %27635 = vmatprep.subr.mxu0 %v35908_v40 }
 0x4d5   : > { %v5014_v33 = vpop.permute.xlu0 %5013 }
 0x4d6   : > { %27628 = vmatmul.mubr.msk.f32.vlgmr.msra.gmra.mxu0 %vm1344_vm2, %v4546_v21 }
 0x4d7   : > { %27636 = vmatpush3.xpose.msk.msra.mxu0 %vm1344_vm2, %v4704_v49  ;;  %27637 = vmatprep.mubr.msk.f32.mxu0 %vm30009_vm1, %v35908_v40 }
 0x4d8   : > { %27645 = vmatprep.subr.mxu0 %v35908_v40 }
 0x4d9   : > { %v5363_v48 = vpop.permute.xlu0 %5362 }
 0x4da   : > { %27638 = vmatmul.mubr.msk.f32.vlgmr.msra.gmra.mxu0 %vm1344_vm2, %v4702_v47  ;;  %v35914_v47 = vld [vmem:[#allocation54_spill] sm:$0xff] }
 0x4db   : > { %27646 = vmatpush3.xpose.msk.msra.mxu0 %vm1344_vm2, %v4860_v52  ;;  %27647 = vmatprep.mubr.msk.f32.mxu0 %vm30009_vm1, %v35908_v40  ;;  %v35916_v52 = vld [vmem:[#allocation56_spill] sm:$0xff] }
 0x4dc   : > { %27655 = vmatprep.subr.mxu0 %v35908_v40 }
 0x4dd   : > { %v2702_v32 = vpop.xlane.xlu1 %2701 }
 0x4de   : > { %29249 = vrcp.f32 %v2702_v32  ;;  %27648 = vmatmul.mubr.msk.f32.vlgmr.msra.gmra.mxu0 %vm1344_vm2, %v4858_v41 }
 0x4df   : > { %27656 = vmatpush3.xpose.msk.msra.mxu0 %vm1344_vm2, %v5016_v50  ;;  %27657 = vmatprep.mubr.msk.f32.mxu0 %vm30009_vm1, %v35908_v40 }
 0x4e0   : > { %27665 = vmatprep.subr.mxu0 %v35908_v40 }
 0x4e1   : > { %v2708_v25 = vpop.xlane.xlu1 %2707 }
 0x4e2   : > { %29251 = vrcp.f32 %v2708_v25  ;;  %27658 = vmatmul.mubr.msk.f32.vlgmr.msra.gmra.mxu0 %vm1344_vm2, %v5014_v33 }
 0x4e3   : > { %27666 = vmatpush3.msra.mxu0 %v5363_v48  ;;  %27667 = vmatprep.mubr.msk.f32.mxu0 %vm30009_vm1, %v35908_v40 }
 0x4e4   : > { %27675 = vmatprep.subr.mxu0 %v35908_v40 }
 0x4e5   : > { %v2714_v57 = vpop.xlane.xlu1 %2713 }
 0x4e6   : > { %29253 = vrcp.f32 %v2714_v57 }
 0x4e9   : > { %v2720_v30 = vpop.xlane.xlu1 %2719 }
 0x4ea   : > { %29255 = vrcp.f32 %v2720_v30 }
 0x4eb   : > { %v29250_v42 = vpop.eup %29249 }
 0x4ec   : > { %v2740_v13 = vmul.f32 %v29250_v42, %v31031_v28 }
 0x4ed   : > { %v4624_v21 = vpop.permute.xlu1 %4623 }
 0x4ee   : > { %27553 = vmatmul.mubr.msk.f32.vlgmr.msra.gmra.mxu1 %vm1344_vm2, %v2740_v13 }
 0x4ef   : > { %v29252_v31 = vpop.eup %29251  ;;  %27561 = vmatpush3.msra.mxu1 %v35911_v39  ;;  %27562 = vmatprep.mubr.msk.f32.mxu1 %vm30009_vm1, %v35908_v40 }
 0x4f0   : > { %27570 = vmatprep.subr.mxu1 %v35908_v40  ;;  %v2744_v55 = vmul.f32 %v29252_v31, %v31037_v45 }
 0x4f1   : > { %v4782_v49 = vpop.permute.xlu1 %4781 }
 0x4f2   : > { %27563 = vmatmul.mubr.msk.f32.vlgmr.msra.gmra.mxu1 %vm1344_vm2, %v2744_v55 }
 0x4f3   : > { %v29254_v19 = vpop.eup %29253  ;;  %27571 = vmatpush3.msra.mxu1 %v35912_v34  ;;  %27572 = vmatprep.mubr.msk.f32.mxu1 %vm30009_vm1, %v35908_v40 }
 0x4f4   : > { %27580 = vmatprep.subr.mxu1 %v35908_v40  ;;  %v2748_v28 = vmul.f32 %v29254_v19, %v31045_v6  ;;  %v35915_v6 = vld [vmem:[#allocation55_spill] sm:$0xff] }
 0x4f6   : > { %27573 = vmatmul.mubr.msk.f32.vlgmr.msra.gmra.mxu1 %vm1344_vm2, %v2748_v28 }
 0x4f7   : > { %v29256_v20 = vpop.eup %29255  ;;  %27581 = vmatpush3.msra.mxu1 %v35913_v51  ;;  %27582 = vmatprep.mubr.msk.f32.mxu1 %vm30009_vm1, %v35908_v40 }
 0x4f8   : > { %27590 = vmatprep.subr.mxu1 %v35908_v40  ;;  %v2752_v45 = vmul.f32 %v29256_v20, %v31051_v43  ;;  %v4780_v43 = vpop.permute.xlu1 %4779 }
 0x4fa   : > { %27583 = vmatmul.mubr.msk.f32.vlgmr.msra.gmra.mxu1 %vm1344_vm2, %v2752_v45 }
 0x4fb   : > { %27591 = vmatpush3.xpose.msk.msra.mxu1 %vm1344_vm2, %v35914_v47  ;;  %27592 = vmatprep.mubr.msk.f32.mxu1 %vm30009_vm1, %v35908_v40 }
 0x4fc   : > { %27600 = vmatprep.subr.mxu1 %v35908_v40  ;;  %v4938_v41 = vpop.permute.xlu1 %4937 }
 0x4fe   : > { %27593 = vmatmul.mubr.msk.f32.vlgmr.msra.gmra.mxu1 %vm1344_vm2, %v35915_v6 }
 0x4ff   : > { %27601 = vmatpush3.xpose.msk.msra.mxu1 %vm1344_vm2, %v35916_v52  ;;  %27602 = vmatprep.mubr.msk.f32.mxu1 %vm30009_vm1, %v35908_v40 }
 0x500   : > { %27610 = vmatprep.subr.mxu1 %v35908_v40 }
 0x502   : > { %27603 = vmatmul.mubr.msk.f32.vlgmr.msra.gmra.mxu1 %vm1344_vm2, %v35917_v29 }
 0x503   : > { %27611 = vmatpush3.xpose.msk.msra.mxu1 %vm1344_vm2, %v35918_v0  ;;  %27612 = vmatprep.mubr.msk.f32.mxu1 %vm30009_vm1, %v35908_v40 }
 0x504   : > { %27620 = vmatprep.subr.mxu1 %v35908_v40 }
 0x506   : > { %27613 = vmatmul.mubr.msk.f32.vlgmr.msra.gmra.mxu1 %vm1344_vm2, %v31013_v24  ;;  %v4936_v24 = vpop.permute.xlu1 %4935 }
 0x507   : > { %27621 = vmatpush3.xpose.msk.msra.mxu1 %vm1344_vm2, %v31127_v22  ;;  %27622 = vmatprep.mubr.msk.f32.mxu1 %vm30009_vm1, %v35908_v40 }
 0x508   : > { %27630 = vmatprep.subr.mxu1 %v35908_v40 }
 0x50a   : > { %27623 = vmatmul.mubr.msk.f32.vlgmr.msra.gmra.mxu1 %vm1344_vm2, %v31169_v38  ;;  %v5094_v22 = vpop.permute.xlu1 %5093 }
 0x50b   : > { %27631 = vmatpush3.xpose.msk.msra.mxu1 %vm1344_vm2, %v31180_v46  ;;  %27632 = vmatprep.mubr.msk.f32.mxu1 %vm30009_vm1, %v35908_v40 }
 0x50c   : > { %27640 = vmatprep.subr.mxu1 %v35908_v40 }
 0x50e   : > { %27633 = vmatmul.mubr.msk.f32.vlgmr.msra.gmra.mxu1 %vm1344_vm2, %v4624_v21  ;;  %v5092_v38 = vpop.permute.xlu1 %5091 }
 0x50f   : > { %27641 = vmatpush3.xpose.msk.msra.mxu1 %vm1344_vm2, %v4782_v49  ;;  %27642 = vmatprep.mubr.msk.f32.mxu1 %vm30009_vm1, %v35908_v40 }
 0x510   : > { %27650 = vmatprep.subr.mxu1 %v35908_v40 }
 0x512   : > { %27643 = vmatmul.mubr.msk.f32.vlgmr.msra.gmra.mxu1 %vm1344_vm2, %v4780_v43 }
 0x513   : > { %27651 = vmatpush3.xpose.msk.msra.mxu1 %vm1344_vm2, %v4938_v41  ;;  %27652 = vmatprep.mubr.msk.f32.mxu1 %vm30009_vm1, %v35908_v40 }
 0x514   : > { %27660 = vmatprep.subr.mxu1 %v35908_v40 }
 0x516   : > { %27653 = vmatmul.mubr.msk.f32.vlgmr.msra.gmra.mxu1 %vm1344_vm2, %v4936_v24 }
 0x517   : > { %27661 = vmatpush3.xpose.msk.msra.mxu1 %vm1344_vm2, %v5094_v22  ;;  %27662 = vmatprep.mubr.msk.f32.mxu1 %vm30009_vm1, %v35908_v40 }
 0x518   : > { %27670 = vmatprep.subr.mxu1 %v35908_v40 }
 0x51a   : > { %27663 = vmatmul.mubr.msk.f32.vlgmr.msra.gmra.mxu1 %vm1344_vm2, %v5092_v38 }
 0x51b   : > { %27672 = vmatprep.mubr.msk.f32.mxu1 %vm30009_vm1, %v35908_v40 }
 0x52c   : > { %v31267_v50 = vpop.f32.mrf.mxu0 }
 0x52e   : > { %v27509_v46 = vpop.f32.mrf.mxu0 }
 0x530   : > { %v31269_v33 = vpop.f32.mrf.mxu1 }
 0x532   : > { %v27514_v32 = vpop.f32.mrf.mxu1 }
 0x534   : > { %v31271_v25 = vpop.f32.mrf.mxu0 }
 0x536   : > { %v27519_v48 = vpop.f32.mrf.mxu0 }
 0x538   : > { %v31273_v57 = vpop.f32.mrf.mxu1 }
 0x53a   : > { %v27524_v30 = vpop.f32.mrf.mxu1 }
 0x53c   : > { %v31275_v42 = vpop.f32.mrf.mxu0 }
 0x53d   : > { %35919 = vst [vmem:[#allocation57_spill] sm:$0xff] %v31275_v42 }
 0x53e   : > { %v27529_v13 = vpop.f32.mrf.mxu0 }
 0x540   : > { %v31277_v31 = vpop.f32.mrf.mxu1 }
 0x541   : > { %35920 = vst [vmem:[#allocation59_spill] sm:$0xff] %v31277_v31 }
 0x542   : > { %v27534_v55 = vpop.f32.mrf.mxu1 }
 0x549   : > { %v31279_v19 = vpop.f32.mrf.mxu0 }
 0x54a   : > { %35921 = vst [vmem:[#allocation47_spill] sm:$0xff] %v31279_v19 }
 0x54b   : > { %v27539_v28 = vpop.f32.mrf.mxu0 }
 0x54d   : > { %v31281_v21 = vpop.f32.mrf.mxu0 }
 0x54e   : > { %35922 = vst [vmem:[#allocation54_spill] sm:$0xff] %v31281_v21 }
 0x54f   : > { %v27549_v20 = vpop.f32.mrf.mxu0 }
 0x551   : > { %v31283_v45 = vpop.f32.mrf.mxu0 }
 0x552   : > { %35923 = vst [vmem:[#allocation55_spill] sm:$0xff] %v31283_v45 }
 0x553   : > { %v27559_v49 = vpop.f32.mrf.mxu0 }
 0x575   : > { %v31285_v47 = vpop.f32.mrf.mxu1 }
 0x576   : > { %35924 = vst [vmem:[#allocation56_spill] sm:$0xff] %v31285_v47 }
 0x577   : > { %v27544_v6 = vpop.f32.mrf.mxu1 }
 0x57e   : > { %v31287_v52 = vpop.f32.mrf.mxu0 }
 0x57f   : > { %35925 = vst [vmem:[#allocation58_spill] sm:$0xff] %v31287_v52 }
 0x580   : > { %v27569_v43 = vpop.f32.mrf.mxu0 }
 0x582   : > { %v31289_v29 = vpop.f32.mrf.mxu0 }
 0x583   : > { %35926 = vst [vmem:[#allocation60_spill] sm:$0xff] %v31289_v29 }
 0x584   : > { %v27579_v0 = vpop.f32.mrf.mxu0 }
 0x586   : > { %v3995_v41 = vpop.f32.mrf.mxu0 }
 0x587   : > { %v31291_v24 = vmul.f32 0.35355338, %v3995_v41 }
 0x588   : > { %v27589_v22 = vpop.f32.mrf.mxu0 }
 0x589   : > { %v5185_v38 = vsel %vm1344_vm2, %v31291_v24, -inf }
 0x58a   : > { %5186 = vmax.xlane.f32.xlu0 %v5185_v38  ;;  %v4151_v46 = vpop.f32.mrf.mxu0 }
 0x58b   : > { %v31295_v32 = vmul.f32 0.35355338, %v4151_v46 }
 0x58c   : > { %v27599_v48 = vpop.f32.mrf.mxu0 }
 0x58d   : > { %v5191_v30 = vsel %vm1344_vm2, %v31295_v32, -inf }
 0x58e   : > { %5192 = vmax.xlane.f32.xlu0 %v5191_v30  ;;  %v4307_v13 = vpop.f32.mrf.mxu0 }
 0x590   : > { %v27609_v55 = vpop.f32.mrf.mxu0 }
 0x592   : > { %v4463_v28 = vpop.f32.mrf.mxu0 }
 0x594   : > { %v27619_v20 = vpop.f32.mrf.mxu0 }
 0x596   : > { %v4619_v49 = vpop.f32.mrf.mxu0 }
 0x598   : > { %v27629_v6 = vpop.f32.mrf.mxu0 }
 0x59a   : > { %v4775_v43 = vpop.f32.mrf.mxu0 }
 0x59c   : > { %v27639_v0 = vpop.f32.mrf.mxu0 }
 0x59e   : > { %v4931_v41 = vpop.f32.mrf.mxu0 }
 0x5a0   : > { %v27649_v22 = vpop.f32.mrf.mxu0 }
 0x5a2   : > { %v5087_v23 = vpop.f32.mrf.mxu0 }
 0x5a4   : > { %v27659_v38 = vpop.f32.mrf.mxu0 }
 0x5ae   : > { %v31299_v29 = vpop.f32.mrf.mxu1 }
 0x5af   : > { %35927 = vst [vmem:[#allocation61_spill] sm:$0xff] %v31299_v29 }
 0x5b0   : > { %v27554_v46 = vpop.f32.mrf.mxu1 }
 0x5b2   : > { %v31301_v48 = vpop.f32.mrf.mxu1 }
 0x5b3   : > { %35928 = vst [vmem:[#allocation62_spill] sm:$0xff] %v31301_v48  ;;  %v31313_v48 = vmul.f32 0.35355338, %v4307_v13 }
 0x5b4   : > { %v27564_v52 = vpop.f32.mrf.mxu1 }
 0x5b6   : > { %v31303_v45 = vpop.f32.mrf.mxu1 }
 0x5b7   : > { %35929 = vst [vmem:[#allocation63_spill] sm:$0xff] %v31303_v45  ;;  %v31327_v45 = vmul.f32 0.35355338, %v4619_v49 }
 0x5b8   : > { %v27574_v30 = vpop.f32.mrf.mxu1 }
 0x5b9   : > { %v5209_v49 = vsel %vm1344_vm2, %v31327_v45, -inf }
 0x5ba   : > { %v31305_v55 = vpop.f32.mrf.mxu1 }
 0x5bb   : > { %35930 = vst [vmem:[#allocation64_spill] sm:$0xff] %v31305_v55  ;;  %v31319_v55 = vmul.f32 0.35355338, %v4463_v28 }
 0x5bc   : > { %v27584_v20 = vpop.f32.mrf.mxu1 }
 0x5bd   : > { %v5203_v28 = vsel %vm1344_vm2, %v31319_v55, -inf }
 0x5be   : > { %v4073_v21 = vpop.f32.mrf.mxu1 }
 0x5bf   : > { %v31307_v6 = vmul.f32 0.35355338, %v4073_v21 }
 0x5c0   : > { %v27594_v0 = vpop.f32.mrf.mxu1 }
 0x5c1   : > { %v5188_v22 = vsel %vm1344_vm2, %v31307_v6, -inf }
 0x5c2   : > { %5189 = vmax.xlane.f32.xlu1 %v5188_v22  ;;  %v4229_v38 = vpop.f32.mrf.mxu1  ;;  %v5197_v22 = vsel %vm1344_vm2, %v31313_v48, -inf }
 0x5c3   : > { %v31311_v29 = vmul.f32 0.35355338, %v4229_v38 }
 0x5c4   : > { %v27604_v46 = vpop.f32.mrf.mxu1 }
 0x5c5   : > { %v5194_v52 = vsel %vm1344_vm2, %v31311_v29, -inf }
 0x5c6   : > { %v4385_v30 = vpop.f32.mrf.mxu1  ;;  %5195 = vmax.xlane.f32.xlu0 %v5194_v52 }
 0x5c7   : > { %v31317_v20 = vmul.f32 0.35355338, %v4385_v30 }
 0x5c8   : > { %v27614_v21 = vpop.f32.mrf.mxu1 }
 0x5c9   : > { %v5200_v0 = vsel %vm1344_vm2, %v31317_v20, -inf }
 0x5ca   : > { %5201 = vmax.xlane.f32.xlu1 %v5200_v0  ;;  %v4541_v38 = vpop.f32.mrf.mxu1  ;;  %5198 = vmax.xlane.f32.xlu0 %v5197_v22  ;;  %v31335_v0 = vmul.f32 0.35355338, %v4775_v43 }
 0x5cb   : > { %v31325_v13 = vmul.f32 0.35355338, %v4541_v38 }
 0x5cc   : > { %v27624_v46 = vpop.f32.mrf.mxu1 }
 0x5cd   : > { %v5206_v52 = vsel %vm1344_vm2, %v31325_v13, -inf }
 0x5ce   : > { %5207 = vmax.xlane.f32.xlu1 %v5206_v52  ;;  %v4697_v30 = vpop.f32.mrf.mxu1  ;;  %5204 = vmax.xlane.f32.xlu0 %v5203_v28  ;;  %v31343_v52 = vmul.f32 0.35355338, %v4931_v41 }
 0x5cf   : > { %v31333_v21 = vmul.f32 0.35355338, %v4697_v30 }
 0x5d0   : > { %v27634_v47 = vpop.f32.mrf.mxu1 }
 0x5d1   : > { %v5212_v22 = vsel %vm1344_vm2, %v31333_v21, -inf  ;;  %v5215_v47 = vsel %vm1344_vm2, %v31335_v0, -inf }
 0x5d2   : > { %5213 = vmax.xlane.f32.xlu1 %v5212_v22  ;;  %v4853_v38 = vpop.f32.mrf.mxu1  ;;  %5210 = vmax.xlane.f32.xlu0 %v5209_v49  ;;  %v31351_v22 = vmul.f32 0.35355338, %v5087_v23  ;;  %v35931_v23 = vld [vmem:[#allocation39_spill] sm:$0xff] }
 0x5d3   : > { %v31341_v46 = vmul.f32 0.35355338, %v4853_v38 }
 0x5d4   : > { %v27644_v19 = vpop.f32.mrf.mxu1 }
 0x5d5   : > { %v5218_v28 = vsel %vm1344_vm2, %v31341_v46, -inf  ;;  %v5221_v19 = vsel %vm1344_vm2, %v31343_v52, -inf }
 0x5d6   : > { %5219 = vmax.xlane.f32.xlu1 %v5218_v28  ;;  %v5009_v43 = vpop.f32.mrf.mxu1  ;;  %5216 = vmax.xlane.f32.xlu0 %v5215_v47 }
 0x5d7   : > { %v31349_v30 = vmul.f32 0.35355338, %v5009_v43 }
 0x5d8   : > { %v27654_v31 = vpop.f32.mrf.mxu1 }
 0x5d9   : > { %v5224_v49 = vsel %vm1344_vm2, %v31349_v30, -inf  ;;  %v5227_v31 = vsel %vm1344_vm2, %v31351_v22, -inf }
 0x5da   : > { %5225 = vmax.xlane.f32.xlu1 %v5224_v49  ;;  %v5165_v41 = vpop.f32.mrf.mxu1  ;;  %5222 = vmax.xlane.f32.xlu0 %v5221_v19 }
 0x5db   : > { %v31357_v38 = vmul.f32 0.35355338, %v5165_v41 }
 0x5dc   : > { %v27664_v42 = vpop.f32.mrf.mxu1 }
 0x5dd   : > { %v5230_v28 = vsel %vm1344_vm2, %v31357_v38, -inf }
 0x5de   : > { %5231 = vmax.xlane.f32.xlu1 %v5230_v28  ;;  %5228 = vmax.xlane.f32.xlu0 %v5227_v31 }
 0x5ef   : > { %5439 = vrot.lane.b32.xlu1 %v35931_v23, %s30010_s15 }
 0x5f4   : > { %5516 = vrot.lane.b32.xlu0 %v30833_v37, %s30010_s15 }
 0x5f8   : > { %5593 = vrot.lane.b32.xlu0 %v30831_v14, %s30010_s15 }
 0x5fc   : > { %5670 = vrot.lane.b32.xlu0 %v30837_v15, %s30010_s15 }
 0x600   : > { %5747 = vrot.lane.b32.xlu0 %v30835_v44, %s30010_s15 }
 0x604   : > { %5824 = vrot.lane.b32.xlu0 %v30841_v18, %s30010_s15 }
 0x608   : > { %5901 = vrot.lane.b32.xlu0 %v30839_v17, %s30010_s15 }
 0x60c   : > { %5978 = vrot.lane.b32.xlu0 %v30849_v27, %s30010_s15 }
 0x610   : > { %6055 = vrot.lane.b32.xlu0 %v30845_v16, %s30010_s15 }
 0x613   : > { %v5187_v42 = vpop.xlane.xlu0 %5186 }
 0x614   : > { %6132 = vrot.lane.b32.xlu0 %v30859_v54, %s30010_s15  ;;  %v5233_v47 = vsub.f32 %v31291_v24, %v5187_v42 }
 0x616   : > { %v5249_v49 = vmul.f32 1.442695, %v5233_v47 }
 0x617   : > { %v5193_v43 = vpop.xlane.xlu0 %5192 }
 0x618   : > { %v5235_v19 = vsub.f32 %v31295_v32, %v5193_v43  ;;  %29257 = vpow2.f32 %v5249_v49 }
 0x61a   : > { %v5253_v41 = vmul.f32 1.442695, %v5235_v19 }
 0x61c   : > { %29259 = vpow2.f32 %v5253_v41 }
 0x625   : > { %v31385_v28 = vpop.eup %29257 }
 0x626   : > { %v5281_v31 = vsel %vm1344_vm2, %v31385_v28, 0.0 }
 0x629   : > { %v31389_v27 = vpop.eup %29259 }
 0x62a   : > { %v5287_v54 = vsel %vm1344_vm2, %v31389_v27, 0.0 }
 0x633   : > { %5282 = vadd.xlane.f32.xlu0 %v5281_v31 }
 0x637   : > { %5288 = vadd.xlane.f32.xlu0 %v5287_v54 }
 0x64b   : > { %v5190_v24 = vpop.xlane.xlu1 %5189 }
 0x64c   : > { %v5234_v42 = vsub.f32 %v31307_v6, %v5190_v24 }
 0x64e   : > { %v5251_v47 = vmul.f32 1.442695, %v5234_v42 }
 0x64f   : > { %v5196_v32 = vpop.xlane.xlu0 %5195 }
 0x650   : > { %29261 = vpow2.f32 %v5251_v47  ;;  %v5236_v43 = vsub.f32 %v31311_v29, %v5196_v32 }
 0x652   : > { %v5255_v49 = vmul.f32 1.442695, %v5236_v43 }
 0x653   : > { %v5202_v19 = vpop.xlane.xlu1 %5201  ;;  %v5199_v41 = vpop.xlane.xlu0 %5198 }
 0x654   : > { %29263 = vpow2.f32 %v5255_v49  ;;  %v5238_v17 = vsub.f32 %v31317_v20, %v5202_v19  ;;  %v5237_v31 = vsub.f32 %v31313_v48, %v5199_v41 }
 0x656   : > { %v5259_v18 = vmul.f32 1.442695, %v5238_v17  ;;  %v5257_v44 = vmul.f32 1.442695, %v5237_v31 }
 0x657   : > { %v5208_v15 = vpop.xlane.xlu1 %5207  ;;  %v5205_v54 = vpop.xlane.xlu0 %5204 }
 0x658   : > { %29265 = vpow2.f32 %v5259_v18  ;;  %v5240_v6 = vsub.f32 %v31325_v13, %v5208_v15  ;;  %v5239_v24 = vsub.f32 %v31319_v55, %v5205_v54 }
 0x659   : > { %29267 = vpow2.f32 %v5257_v44 }
 0x65a   : > { %v5263_v42 = vmul.f32 1.442695, %v5240_v6  ;;  %v5261_v29 = vmul.f32 1.442695, %v5239_v24 }
 0x65b   : > { %v5214_v47 = vpop.xlane.xlu1 %5213  ;;  %v5211_v32 = vpop.xlane.xlu0 %5210 }
 0x65c   : > { %29269 = vpow2.f32 %v5263_v42  ;;  %v5242_v43 = vsub.f32 %v31333_v21, %v5214_v47  ;;  %v5241_v20 = vsub.f32 %v31327_v45, %v5211_v32 }
 0x65d   : > { %v31401_v48 = vpop.eup %29261  ;;  %29271 = vpow2.f32 %v5261_v29 }
 0x65e   : > { %v5267_v17 = vmul.f32 1.442695, %v5242_v43  ;;  %v5265_v49 = vmul.f32 1.442695, %v5241_v20  ;;  %v5284_v15 = vsel %vm1344_vm2, %v31401_v48, 0.0 }
 0x65f   : > { %v5220_v18 = vpop.xlane.xlu1 %5219  ;;  %5285 = vadd.xlane.f32.xlu1 %v5284_v15  ;;  %v5217_v44 = vpop.xlane.xlu0 %5216 }
 0x660   : > { %29273 = vpow2.f32 %v5267_v17  ;;  %v5244_v55 = vsub.f32 %v31341_v46, %v5220_v18  ;;  %v5243_v13 = vsub.f32 %v31335_v0, %v5217_v44 }
 0x661   : > { %v31407_v19 = vpop.eup %29263  ;;  %29275 = vpow2.f32 %v5265_v49 }
 0x662   : > { %v5271_v45 = vmul.f32 1.442695, %v5244_v55  ;;  %v5269_v21 = vmul.f32 1.442695, %v5243_v13  ;;  %v5290_v41 = vsel %vm1344_vm2, %v31407_v19, 0.0 }
 0x663   : > { %v5226_v31 = vpop.xlane.xlu1 %5225  ;;  %5291 = vadd.xlane.f32.xlu1 %v5290_v41  ;;  %v5223_v54 = vpop.xlane.xlu0 %5222 }
 0x664   : > { %29277 = vpow2.f32 %v5271_v45  ;;  %v5246_v6 = vsub.f32 %v31349_v30, %v5226_v31  ;;  %v5245_v24 = vsub.f32 %v31343_v52, %v5223_v54 }
 0x665   : > { %v31413_v42 = vpop.eup %29265  ;;  %29279 = vpow2.f32 %v5269_v21 }
 0x666   : > { %v31415_v0 = vpop.eup %29267  ;;  %v5275_v46 = vmul.f32 1.442695, %v5246_v6  ;;  %v5273_v29 = vmul.f32 1.442695, %v5245_v24  ;;  %v5296_v47 = vsel %vm1344_vm2, %v31413_v42, 0.0 }
 0x667   : > { %v5232_v32 = vpop.xlane.xlu1 %5231  ;;  %5297 = vadd.xlane.f32.xlu1 %v5296_v47  ;;  %v5293_v43 = vsel %vm1344_vm2, %v31415_v0, 0.0  ;;  %v5229_v20 = vpop.xlane.xlu0 %5228 }
 0x668   : > { %29281 = vpow2.f32 %v5275_v46  ;;  %v5248_v30 = vsub.f32 %v31357_v38, %v5232_v32  ;;  %5294 = vadd.xlane.f32.xlu0 %v5293_v43  ;;  %v5247_v52 = vsub.f32 %v31351_v22, %v5229_v20 }
 0x669   : > { %v31423_v17 = vpop.eup %29269  ;;  %29283 = vpow2.f32 %v5273_v29 }
 0x66a   : > { %v31425_v49 = vpop.eup %29271  ;;  %v5277_v15 = vmul.f32 1.442695, %v5247_v52  ;;  %v5302_v18 = vsel %vm1344_vm2, %v31423_v17, 0.0  ;;  %v5279_v44 = vmul.f32 1.442695, %v5248_v30 }
 0x66b   : > { %v5440_v55 = vpop.permute.xlu1 %5439  ;;  %5303 = vadd.xlane.f32.xlu1 %v5302_v18  ;;  %v5299_v13 = vsel %vm1344_vm2, %v31425_v49, 0.0  ;;  %v5517_v52 = vpop.permute.xlu0 %5516 }
 0x66c   : > { %5300 = vadd.xlane.f32.xlu0 %v5299_v13  ;;  %27671 = vmatpush3.msra.mxu1 %v5440_v55  ;;  %29285 = vpow2.f32 %v5277_v15  ;;  %v35933_v55 = vld [vmem:[#allocation21_spill] sm:$0xff] }
 0x66d   : > { %v31431_v38 = vpop.eup %29273  ;;  %27680 = vmatprep.subr.mxu1 %v35908_v40  ;;  %29287 = vpow2.f32 %v5279_v44  ;;  %v35932_v44 = vld [vmem:[#allocation22_spill] sm:$0xff] }
 0x66e   : > { %v31434_v22 = vpop.eup %29275  ;;  %v5308_v45 = vsel %vm1344_vm2, %v31431_v38, 0.0 }
 0x66f   : > { %5309 = vadd.xlane.f32.xlu1 %v5308_v45  ;;  %v5305_v21 = vsel %vm1344_vm2, %v31434_v22, 0.0  ;;  %v31464_v15 = vpop.permute.xlu0 %5593  ;;  %v35934_v45 = vld [vmem:[#allocation26_spill] sm:$0xff] }
 0x670   : > { %5306 = vadd.xlane.f32.xlu0 %v5305_v21  ;;  %v35935_v21 = vld [vmem:[#allocation24_spill] sm:$0xff] }
 0x671   : > { %v31440_v41 = vpop.eup %29277 }
 0x672   : > { %v31442_v31 = vpop.eup %29279  ;;  %v5314_v54 = vsel %vm1344_vm2, %v31440_v41, 0.0 }
 0x673   : > { %5315 = vadd.xlane.f32.xlu1 %v5314_v54  ;;  %v5311_v6 = vsel %vm1344_vm2, %v31442_v31, 0.0  ;;  %v5671_v18 = vpop.permute.xlu0 %5670 }
 0x674   : > { %5312 = vadd.xlane.f32.xlu0 %v5311_v6  ;;  %v35936_v6 = vld [vmem:[#allocation25_spill] sm:$0xff] }
 0x675   : > { %v31448_v24 = vpop.eup %29281 }
 0x676   : > { %v31450_v46 = vpop.eup %29283  ;;  %v5320_v29 = vsel %vm1344_vm2, %v31448_v24, 0.0 }
 0x677   : > { %5321 = vadd.xlane.f32.xlu1 %v5320_v29  ;;  %v5317_v47 = vsel %vm1344_vm2, %v31450_v46, 0.0  ;;  %v31478_v13 = vpop.permute.xlu0 %5747  ;;  %v35937_v29 = vld [vmem:[#allocation23_spill] sm:$0xff] }
 0x678   : > { %5318 = vadd.xlane.f32.xlu0 %v5317_v47  ;;  %v35938_v47 = vld [vmem:[#allocation30_spill] sm:$0xff] }
 0x679   : > { %v31456_v32 = vpop.eup %29285 }
 0x67a   : > { %v5323_v43 = vsel %vm1344_vm2, %v31456_v32, 0.0  ;;  %v31460_v20 = vpop.eup %29287 }
 0x67b   : > { %5324 = vadd.xlane.f32.xlu1 %v5323_v43  ;;  %v5326_v30 = vsel %vm1344_vm2, %v31460_v20, 0.0  ;;  %v31486_v54 = vpop.permute.xlu0 %5824 }
 0x67f   : > { %5327 = vadd.xlane.f32.xlu1 %v5326_v30  ;;  %v31494_v43 = vpop.permute.xlu0 %5901  ;;  %v35939_v30 = vld [vmem:[#allocation28_spill] sm:$0xff] }
 0x68e   : > { %6286 = vrot.lane.b32.xlu0 %v30871_v35, %s30010_s15 }
 0x690   : > { %6209 = vrot.lane.b32.xlu1 %v35911_v39, %s30010_s15 }
 0x692   : > { %6363 = vrot.lane.b32.xlu0 %v35912_v34, %s30010_s15 }
 0x694   : > { %7059 = vrot.lane.b32.xlu1 %v35932_v44, %s30011_s23  ;;  %v31502_v44 = vpop.permute.xlu0 %5978 }
 0x696   : > { %6440 = vrot.lane.b32.xlu0 %v30847_v26, %s30010_s15 }
 0x698   : > { %7057 = vrot.lane.b32.xlu1 %v35933_v55, %s30011_s23  ;;  %v35941_v55 = vld [vmem:[#allocation27_spill] sm:$0xff] }
 0x69a   : > { %6517 = vrot.lane.b32.xlu0 %v35913_v51, %s30010_s15 }
 0x69c   : > { %7215 = vrot.lane.b32.xlu1 %v35934_v45, %s30011_s23  ;;  %v35940_v45 = vld [vmem:[#allocation29_spill] sm:$0xff] }
 0x69e   : > { %6981 = vrot.lane.b32.xlu0 %v35935_v21, %s30011_s23 }
 0x6a0   : > { %7213 = vrot.lane.b32.xlu1 %v35936_v6, %s30011_s23  ;;  %v35942_v6 = vld [vmem:[#allocation32_spill] sm:$0xff] }
 0x6a2   : > { %6979 = vrot.lane.b32.xlu0 %v35937_v29, %s30011_s23 }
 0x6a4   : > { %7371 = vrot.lane.b32.xlu1 %v35938_v47, %s30011_s23  ;;  %v31510_v47 = vpop.permute.xlu0 %6055 }
 0x6a6   : > { %7137 = vrot.lane.b32.xlu0 %v35939_v30, %s30011_s23  ;;  %v35943_v30 = vld [vmem:[#allocation31_spill] sm:$0xff] }
 0x6a8   : > { %7369 = vrot.lane.b32.xlu1 %v35940_v45, %s30011_s23  ;;  %v31518_v45 = vpop.permute.xlu0 %6132 }
 0x6aa   : > { %7135 = vrot.lane.b32.xlu0 %v35941_v55, %s30011_s23 }
 0x6ac   : > { %7527 = vrot.lane.b32.xlu1 %v30679_v56, %s30011_s23 }
 0x6ae   : > { %7293 = vrot.lane.b32.xlu0 %v35942_v6, %s30011_s23 }
 0x6b0   : > { %7525 = vrot.lane.b32.xlu1 %v30677_v53, %s30011_s23 }
 0x6b2   : > { %7291 = vrot.lane.b32.xlu0 %v35943_v30, %s30011_s23 }
 0x6b4   : > { %7683 = vrot.lane.b32.xlu1 %v30698_v1, %s30011_s23 }
 0x6b6   : > { %7449 = vrot.lane.b32.xlu0 %v30688_v59, %s30011_s23 }
 0x6b8   : > { %7681 = vrot.lane.b32.xlu1 %v30696_v36, %s30011_s23 }
 0x6ba   : > { %7447 = vrot.lane.b32.xlu0 %v30686_v58, %s30011_s23 }
 0x6bc   : > { %v5283_v53 = vpop.xlane.xlu0 %5282  ;;  %7839 = vrot.lane.b32.xlu1 %v30717_v63, %s30011_s23 }
 0x6bd   : > { %29289 = vrcp.f32 %v5283_v53 }
 0x6be   : > { %7605 = vrot.lane.b32.xlu0 %v30707_v60, %s30011_s23 }
 0x6c0   : > { %v5289_v1 = vpop.xlane.xlu0 %5288  ;;  %7837 = vrot.lane.b32.xlu1 %v30715_v61, %s30011_s23 }
 0x6c1   : > { %29291 = vrcp.f32 %v5289_v1 }
 0x6c2   : > { %7603 = vrot.lane.b32.xlu0 %v30705_v62, %s30011_s23 }
 0x6c4   : > { %7995 = vrot.lane.b32.xlu1 %v30739_v4, %s30011_s23 }
 0x6c6   : > { %7761 = vrot.lane.b32.xlu0 %v30727_v2, %s30011_s23 }
 0x6c8   : > { %7993 = vrot.lane.b32.xlu1 %v30737_v3, %s30011_s23 }
 0x6ca   : > { %v29290_v53 = vpop.eup %29289  ;;  %7759 = vrot.lane.b32.xlu0 %v30725_v10, %s30011_s23 }
 0x6cb   : > { %v5330_v63 = vmul.f32 %v29290_v53, %v31385_v28 }
 0x6cc   : > { %8151 = vrot.lane.b32.xlu1 %v30761_v8, %s30011_s23 }
 0x6cd   : > { %27668 = vmatmul.mubr.msk.f32.vlgmr.msra.gmra.mxu0 %vm1344_vm2, %v5330_v63 }
 0x6ce   : > { %v29292_v1 = vpop.eup %29291  ;;  %7917 = vrot.lane.b32.xlu0 %v30749_v7, %s30011_s23  ;;  %27676 = vmatpush3.msra.mxu0 %v5517_v52 }
 0x6cf   : > { %27677 = vmatprep.mubr.msk.f32.mxu0 %vm30009_vm1, %v35908_v40  ;;  %27685 = vmatprep.subr.mxu0 %v35908_v40  ;;  %v5334_v3 = vmul.f32 %v29292_v1, %v31389_v27 }
 0x6d0   : > { %8149 = vrot.lane.b32.xlu1 %v30759_v11, %s30011_s23 }
 0x6d1   : > { %27678 = vmatmul.mubr.msk.f32.vlgmr.msra.gmra.mxu0 %vm1344_vm2, %v5334_v3 }
 0x6d2   : > { %7915 = vrot.lane.b32.xlu0 %v30747_v5, %s30011_s23  ;;  %27686 = vmatpush3.msra.mxu0 %v5671_v18 }
 0x6d3   : > { %27687 = vmatprep.mubr.msk.f32.mxu0 %vm30009_vm1, %v35908_v40  ;;  %27695 = vmatprep.subr.mxu0 %v35908_v40 }
 0x6d6   : > { %8073 = vrot.lane.b32.xlu0 %v30771_v12, %s30011_s23 }
 0x6da   : > { %8071 = vrot.lane.b32.xlu0 %v30769_v9, %s30011_s23 }
 0x6de   : > { %8495 = vrot.lane.b32.xlu0 %v35931_v23, %s30011_s23 }
 0x6e8   : > { %v5286_v63 = vpop.xlane.xlu1 %5285 }
 0x6e9   : > { %29293 = vrcp.f32 %v5286_v63 }
 0x6ec   : > { %v5292_v3 = vpop.xlane.xlu1 %5291 }
 0x6ed   : > { %29295 = vrcp.f32 %v5292_v3 }
 0x6f0   : > { %v5298_v27 = vpop.xlane.xlu1 %5297 }
 0x6f1   : > { %29297 = vrcp.f32 %v5298_v27  ;;  %v5295_v28 = vpop.xlane.xlu0 %5294 }
 0x6f2   : > { %29299 = vrcp.f32 %v5295_v28 }
 0x6f4   : > { %v5304_v52 = vpop.xlane.xlu1 %5303 }
 0x6f5   : > { %29301 = vrcp.f32 %v5304_v52  ;;  %v5301_v18 = vpop.xlane.xlu0 %5300 }
 0x6f6   : > { %v29294_v53 = vpop.eup %29293  ;;  %29303 = vrcp.f32 %v5301_v18 }
 0x6f7   : > { %v5332_v1 = vmul.f32 %v29294_v53, %v31401_v48 }
 0x6f8   : > { %v5310_v11 = vpop.xlane.xlu1 %5309 }
 0x6f9   : > { %29305 = vrcp.f32 %v5310_v11  ;;  %v5307_v8 = vpop.xlane.xlu0 %5306  ;;  %27673 = vmatmul.mubr.msk.f32.vlgmr.msra.gmra.mxu1 %vm1344_vm2, %v5332_v1 }
 0x6fa   : > { %v29296_v23 = vpop.eup %29295  ;;  %29307 = vrcp.f32 %v5307_v8  ;;  %27681 = vmatpush3.msra.mxu1 %v31464_v15  ;;  %27682 = vmatprep.mubr.msk.f32.mxu1 %vm30009_vm1, %v35908_v40 }
 0x6fb   : > { %27690 = vmatprep.subr.mxu1 %v35908_v40  ;;  %v5336_v63 = vmul.f32 %v29296_v23, %v31407_v19 }
 0x6fc   : > { %v5316_v3 = vpop.xlane.xlu1 %5315 }
 0x6fd   : > { %29309 = vrcp.f32 %v5316_v3  ;;  %v5313_v27 = vpop.xlane.xlu0 %5312  ;;  %27683 = vmatmul.mubr.msk.f32.vlgmr.msra.gmra.mxu1 %vm1344_vm2, %v5336_v63 }
 0x6fe   : > { %v29298_v11 = vpop.eup %29297  ;;  %29311 = vrcp.f32 %v5313_v27  ;;  %27691 = vmatpush3.msra.mxu1 %v31478_v13  ;;  %27692 = vmatprep.mubr.msk.f32.mxu1 %vm30009_vm1, %v35908_v40 }
 0x6ff   : > { %v29300_v8 = vpop.eup %29299  ;;  %27700 = vmatprep.subr.mxu1 %v35908_v40  ;;  %v5340_v48 = vmul.f32 %v29298_v11, %v31413_v42 }
 0x700   : > { %v5322_v15 = vpop.xlane.xlu1 %5321  ;;  %v5338_v23 = vmul.f32 %v29300_v8, %v31415_v0 }
 0x701   : > { %29313 = vrcp.f32 %v5322_v15  ;;  %v5319_v19 = vpop.xlane.xlu0 %5318  ;;  %27693 = vmatmul.mubr.msk.f32.vlgmr.msra.gmra.mxu1 %vm1344_vm2, %v5340_v48  ;;  %v856_v15 = vld [vmem:[#allocation7] sm:$0xff] }
 0x702   : > { %v29302_v28 = vpop.eup %29301  ;;  %29315 = vrcp.f32 %v5319_v19  ;;  %27688 = vmatmul.mubr.msk.f32.vlgmr.msra.gmra.mxu0 %vm1344_vm2, %v5338_v23  ;;  %27701 = vmatpush3.msra.mxu1 %v31494_v43 }
 0x703   : > { %v29304_v13 = vpop.eup %29303  ;;  %27696 = vmatpush3.msra.mxu0 %v31486_v54  ;;  %27697 = vmatprep.mubr.msk.f32.mxu0 %vm30009_vm1, %v35908_v40  ;;  %v5344_v42 = vmul.f32 %v29302_v28, %v31423_v17 }
 0x704   : > { %27702 = vmatprep.mubr.msk.f32.mxu1 %vm30009_vm1, %v35908_v40  ;;  %27705 = vmatprep.subr.mxu0 %v35908_v40  ;;  %v5342_v0 = vmul.f32 %v29304_v13, %v31425_v49  ;;  %v5325_v52 = vpop.xlane.xlu1 %5324 }
 0x705   : > { %27710 = vmatprep.subr.mxu1 %v35908_v40  ;;  %v6287_v18 = vpop.permute.xlu0 %6286  ;;  %27703 = vmatmul.mubr.msk.f32.vlgmr.msra.gmra.mxu1 %vm1344_vm2, %v5344_v42  ;;  %29317 = vrcp.f32 %v5325_v52 }
 0x706   : > { %v29306_v43 = vpop.eup %29305  ;;  %27698 = vmatmul.mubr.msk.f32.vlgmr.msra.gmra.mxu0 %vm1344_vm2, %v5342_v0  ;;  %27711 = vmatpush3.msra.mxu1 %v31510_v47 }
 0x707   : > { %v29308_v17 = vpop.eup %29307  ;;  %27706 = vmatpush3.msra.mxu0 %v31502_v44  ;;  %27707 = vmatprep.mubr.msk.f32.mxu0 %vm30009_vm1, %v35908_v40  ;;  %v5348_v49 = vmul.f32 %v29306_v43, %v31431_v38 }
 0x708   : > { %27712 = vmatprep.mubr.msk.f32.mxu1 %vm30009_vm1, %v35908_v40  ;;  %27715 = vmatprep.subr.mxu0 %v35908_v40  ;;  %v5346_v54 = vmul.f32 %v29308_v17, %v31434_v22  ;;  %v5328_v53 = vpop.xlane.xlu1 %5327 }
 0x709   : > { %v6364_v1 = vpop.permute.xlu0 %6363  ;;  %27713 = vmatmul.mubr.msk.f32.vlgmr.msra.gmra.mxu1 %vm1344_vm2, %v5348_v49  ;;  %27720 = vmatprep.subr.mxu1 %v35908_v40  ;;  %29319 = vrcp.f32 %v5328_v53  ;;  %v35946_v49 = vld [vmem:[#allocation47_spill] sm:$0xff]  ;;  %v35947_v53 = vld [vmem:[#allocation56_spill] sm:$0xff] }
 0x70a   : > { %v29310_v47 = vpop.eup %29309  ;;  %27708 = vmatmul.mubr.msk.f32.vlgmr.msra.gmra.mxu0 %vm1344_vm2, %v5346_v54  ;;  %27722 = vmatprep.mubr.msk.f32.mxu1 %vm30009_vm1, %v35908_v40 }
 0x70b   : > { %v29312_v38 = vpop.eup %29311  ;;  %27716 = vmatpush3.msra.mxu0 %v31518_v45  ;;  %27717 = vmatprep.mubr.msk.f32.mxu0 %vm30009_vm1, %v35908_v40  ;;  %v5352_v22 = vmul.f32 %v29310_v47, %v31440_v41 }
 0x70c   : > { %27725 = vmatprep.subr.mxu0 %v35908_v40  ;;  %v5350_v44 = vmul.f32 %v29312_v38, %v31442_v31  ;;  %v6210_v63 = vpop.permute.xlu1 %6209  ;;  %v35949_v38 = vld [vmem:[#allocation61_spill] sm:$0xff] }
 0x70d   : > { %v6441_v3 = vpop.permute.xlu0 %6440  ;;  %27721 = vmatpush3.msra.mxu1 %v6210_v63 }
 0x70e   : > { %v29314_v27 = vpop.eup %29313  ;;  %27718 = vmatmul.mubr.msk.f32.vlgmr.msra.gmra.mxu0 %vm1344_vm2, %v5350_v44  ;;  %27723 = vmatmul.mubr.msk.f32.vlgmr.msra.gmra.mxu1 %vm1344_vm2, %v5352_v22  ;;  %v35950_v22 = vld [vmem:[#allocation55_spill] sm:$0xff] }
 0x70f   : > { %v29316_v11 = vpop.eup %29315  ;;  %27726 = vmatpush3.msra.mxu0 %v6287_v18  ;;  %27730 = vmatprep.subr.mxu1 %v35908_v40  ;;  %v5356_v45 = vmul.f32 %v29314_v27, %v31448_v24  ;;  %v35952_v27 = vld [vmem:[#allocation58_spill] sm:$0xff] }
 0x710   : > { %27727 = vmatprep.mubr.msk.f32.mxu0 %vm30009_vm1, %v35908_v40  ;;  %v5354_v41 = vmul.f32 %v29316_v11, %v31450_v46  ;;  %27731 = vmatpush3.msra.mxu1 %v6364_v1  ;;  %v7060_v31 = vpop.permute.xlu1 %7059  ;;  %v857_v46 = vld [vmem:[#allocation7 + $0x8] sm:$0xff]  ;;  %v35948_v1 = vld [vmem:[#allocation54_spill] sm:$0xff] }
 0x711   : > { %27735 = vmatprep.subr.mxu0 %v35908_v40  ;;  %v6518_v8 = vpop.permute.xlu0 %6517  ;;  %27732 = vmatprep.mubr.msk.f32.mxu1 %vm30009_vm1, %v35908_v40 }
 0x712   : > { %27728 = vmatmul.mubr.msk.f32.vlgmr.msra.gmra.mxu0 %vm1344_vm2, %v5354_v41  ;;  %v29318_v48 = vpop.eup %29317  ;;  %27740 = vmatprep.subr.mxu1 %v35908_v40 }
 0x713   : > { %27736 = vmatpush3.msra.mxu0 %v6441_v3  ;;  %27733 = vmatmul.mubr.msk.f32.vlgmr.msra.gmra.mxu1 %vm1344_vm2, %v5356_v45  ;;  %v5358_v24 = vmul.f32 %v29318_v48, %v31456_v32  ;;  %v35951_v3 = vld [vmem:[#allocation62_spill] sm:$0xff]  ;;  %v35953_v45 = vld [vmem:[#allocation63_spill] sm:$0xff]  ;;  %v35955_v48 = vld [vmem:[#allocation64_spill] sm:$0xff] }
 0x714   : > { %27737 = vmatprep.mubr.msk.f32.mxu0 %vm30009_vm1, %v35908_v40  ;;  %27741 = vmatpush3.msra.mxu1 %v6518_v8  ;;  %v7058_v23 = vpop.permute.xlu1 %7057 }
 0x715   : > { %v31628_v19 = vpop.permute.xlu0 %6981  ;;  %27742 = vmatprep.mubr.msk.f32.mxu1 %vm30009_vm1, %v35908_v40  ;;  %27771 = vmatprep.subr.mxu1 %v856_v15 }
 0x716   : > { %27738 = vmatmul.mubr.msk.f32.vlgmr.msra.gmra.mxu0 %vm1344_vm2, %v5358_v24  ;;  %v29320_v28 = vpop.eup %29319  ;;  %27745 = vmatprep.subr.mxu0 %v857_v46 }
 0x717   : > { %v5360_v13 = vmul.f32 %v29320_v28, %v31460_v20  ;;  %27746 = vmatpush3.msra.mxu0 %v857_v46 }
 0x718   : > { %v7216_v42 = vpop.permute.xlu1 %7215  ;;  %27797 = vmatprep.subr.mxu0 %v35908_v40 }
 0x719   : > { %v31634_v0 = vpop.permute.xlu0 %6979  ;;  %27743 = vmatmul.mubr.msk.f32.vlgmr.msra.gmra.mxu1 %vm1344_vm2, %v5360_v13 }
 0x71a   : > { %27773 = vmatprep.mubr.msk.f32.mxu1 %vm1344_vm2, %v31267_v50  ;;  %27772 = vmatpush3.msra.mxu1 %v856_v15  ;;  %v35944_v50 = vld [vmem:[#allocation57_spill] sm:$0xff] }
 0x71b   : > { %27802 = vmatprep.subr.mxu1 %v35908_v40 }
 0x71c   : > { %v7214_v32 = vpop.permute.xlu1 %7213 }
 0x71d   : > { %v31641_v52 = vpop.permute.xlu0 %7137  ;;  %27774 = vmatmul.mubr.msk.f32.vlgmr.msra.gmra.mxu1 %vm1344_vm2, %v31269_v33  ;;  %v35945_v33 = vld [vmem:[#allocation59_spill] sm:$0xff] }
 0x71e   : > { %27803 = vmatpush3.xpose.msk.msra.mxu1 %vm1344_vm2, %v7060_v31  ;;  %27776 = vmatprep.mubr.msk.f32.mxu1 %vm1344_vm2, %v31271_v25  ;;  %v35954_v31 = vld [vmem:[#allocation60_spill] sm:$0xff] }
 0x71f   : > { %27812 = vmatprep.subr.mxu1 %v35908_v40 }
 0x720   : > { %v7372_v20 = vpop.permute.xlu1 %7371 }
 0x721   : > { %v31649_v18 = vpop.permute.xlu0 %7135  ;;  %27777 = vmatmul.mubr.msk.f32.gmra.mxu1 %vm1344_vm2, %v31273_v57 }
 0x722   : > { %27779 = vmatprep.mubr.msk.f32.mxu1 %vm1344_vm2, %v35944_v50 }
 0x724   : > { %v7370_v43 = vpop.permute.xlu1 %7369 }
 0x725   : > { %v31655_v17 = vpop.permute.xlu0 %7293  ;;  %27780 = vmatmul.mubr.msk.f32.gmra.mxu1 %vm1344_vm2, %v35945_v33 }
 0x726   : > { %27782 = vmatprep.mubr.msk.f32.mxu1 %vm1344_vm2, %v35946_v49 }
 0x728   : > { %v7528_v25 = vpop.permute.xlu1 %7527 }
 0x729   : > { %v31661_v54 = vpop.permute.xlu0 %7291  ;;  %27783 = vmatmul.mubr.msk.f32.gmra.mxu1 %vm1344_vm2, %v35947_v53 }
 0x72a   : > { %27785 = vmatprep.mubr.msk.f32.mxu1 %vm1344_vm2, %v35948_v1 }
 0x72c   : > { %v7526_v57 = vpop.permute.xlu1 %7525 }
 0x72d   : > { %v31667_v47 = vpop.permute.xlu0 %7449  ;;  %27786 = vmatmul.mubr.msk.f32.gmra.mxu1 %vm1344_vm2, %v35949_v38 }
 0x72e   : > { %27788 = vmatprep.mubr.msk.f32.mxu1 %vm1344_vm2, %v35950_v22 }
 0x730   : > { %v7684_v44 = vpop.permute.xlu1 %7683 }
 0x731   : > { %v31673_v63 = vpop.permute.xlu0 %7447  ;;  %27789 = vmatmul.mubr.msk.f32.gmra.mxu1 %vm1344_vm2, %v35951_v3 }
 0x732   : > { %27791 = vmatprep.mubr.msk.f32.mxu1 %vm1344_vm2, %v35952_v27 }
 0x734   : > { %v7682_v11 = vpop.permute.xlu1 %7681 }
 0x735   : > { %v31679_v41 = vpop.permute.xlu0 %7605  ;;  %27792 = vmatmul.mubr.msk.f32.gmra.mxu1 %vm1344_vm2, %v35953_v45 }
 0x736   : > { %27794 = vmatprep.mubr.msk.f32.mxu1 %vm1344_vm2, %v35954_v31 }
 0x738   : > { %v7840_v15 = vpop.permute.xlu1 %7839 }
 0x739   : > { %v31685_v8 = vpop.permute.xlu0 %7603  ;;  %27795 = vmatmul.mubr.msk.f32.gmra.mxu1 %vm1344_vm2, %v35955_v48 }
 0x73a   : > { %27804 = vmatprep.mubr.msk.f32.mxu1 %vm30009_vm1, %v35908_v40 }
 0x73c   : > { %v7838_v46 = vpop.permute.xlu1 %7837 }
 0x73d   : > { %v31691_v24 = vpop.permute.xlu0 %7761  ;;  %27805 = vmatmul.mubr.msk.f32.vlgmr.msra.gmra.mxu1 %vm1344_vm2, %v7058_v23 }
 0x73e   : > { %27813 = vmatpush3.xpose.msk.msra.mxu1 %vm1344_vm2, %v7216_v42  ;;  %27814 = vmatprep.mubr.msk.f32.mxu1 %vm30009_vm1, %v35908_v40 }
 0x73f   : > { %27822 = vmatprep.subr.mxu1 %v35908_v40 }
 0x740   : > { %v7996_v13 = vpop.permute.xlu1 %7995 }
 0x741   : > { %v31698_v28 = vpop.permute.xlu0 %7759  ;;  %27815 = vmatmul.mubr.msk.f32.vlgmr.msra.gmra.mxu1 %vm1344_vm2, %v7214_v32 }
 0x742   : > { %27823 = vmatpush3.xpose.msk.msra.mxu1 %vm1344_vm2, %v7372_v20  ;;  %27824 = vmatprep.mubr.msk.f32.mxu1 %vm30009_vm1, %v35908_v40 }
 0x743   : > { %27832 = vmatprep.subr.mxu1 %v35908_v40 }
 0x744   : > { %v7994_v32 = vpop.permute.xlu1 %7993 }
 0x745   : > { %v31705_v23 = vpop.permute.xlu0 %7917  ;;  %27825 = vmatmul.mubr.msk.f32.vlgmr.msra.gmra.mxu1 %vm1344_vm2, %v7370_v43 }
 0x746   : > { %27833 = vmatpush3.xpose.msk.msra.mxu1 %vm1344_vm2, %v7528_v25  ;;  %27834 = vmatprep.mubr.msk.f32.mxu1 %vm30009_vm1, %v35908_v40 }
 0x747   : > { %27842 = vmatprep.subr.mxu1 %v35908_v40 }
 0x748   : > { %v8152_v50 = vpop.permute.xlu1 %8151 }
 0x749   : > { %v31712_v42 = vpop.permute.xlu0 %7915  ;;  %27835 = vmatmul.mubr.msk.f32.vlgmr.msra.gmra.mxu1 %vm1344_vm2, %v7526_v57 }
 0x74a   : > { %27843 = vmatpush3.xpose.msk.msra.mxu1 %vm1344_vm2, %v7684_v44  ;;  %27844 = vmatprep.mubr.msk.f32.mxu1 %vm30009_vm1, %v35908_v40 }
 0x74b   : > { %27852 = vmatprep.subr.mxu1 %v35908_v40 }
 0x74c   : > { %v8150_v33 = vpop.permute.xlu1 %8149 }
 0x74d   : > { %v31719_v20 = vpop.permute.xlu0 %8073  ;;  %27845 = vmatmul.mubr.msk.f32.vlgmr.msra.gmra.mxu1 %vm1344_vm2, %v7682_v11 }
 0x74e   : > { %27853 = vmatpush3.xpose.msk.msra.mxu1 %vm1344_vm2, %v7840_v15  ;;  %27854 = vmatprep.mubr.msk.f32.mxu1 %vm30009_vm1, %v35908_v40 }
 0x74f   : > { %27862 = vmatprep.subr.mxu1 %v35908_v40 }
 0x751   : > { %27855 = vmatmul.mubr.msk.f32.vlgmr.msra.gmra.mxu1 %vm1344_vm2, %v7838_v46  ;;  %v31730_v43 = vpop.permute.xlu0 %8071 }
 0x752   : > { %27863 = vmatpush3.xpose.msk.msra.mxu1 %vm1344_vm2, %v7996_v13  ;;  %27864 = vmatprep.mubr.msk.f32.mxu1 %vm30009_vm1, %v35908_v40 }
 0x753   : > { %27872 = vmatprep.subr.mxu1 %v35908_v40 }
 0x755   : > { %27865 = vmatmul.mubr.msk.f32.vlgmr.msra.gmra.mxu1 %vm1344_vm2, %v7994_v32  ;;  %v8496_v49 = vpop.permute.xlu0 %8495 }
 0x756   : > { %27873 = vmatpush3.xpose.msk.msra.mxu1 %vm1344_vm2, %v8152_v50  ;;  %27874 = vmatprep.mubr.msk.f32.mxu1 %vm30009_vm1, %v35908_v40 }
 0x757   : > { %27882 = vmatprep.subr.mxu1 %v35908_v40 }
 0x759   : > { %27875 = vmatmul.mubr.msk.f32.vlgmr.msra.gmra.mxu1 %vm1344_vm2, %v8150_v33 }
 0x75a   : > { %27883 = vmatpush3.msra.mxu1 %v8496_v49  ;;  %27884 = vmatprep.mubr.msk.f32.mxu1 %vm30009_vm1, %v35908_v40 }
 0x75b   : > { %27892 = vmatprep.subr.mxu1 %v35908_v40 }
 0x78d   : > { %v5434_v25 = vpop.f32.mrf.mxu0 }
 0x78e   : > { %27747 = vmatprep.mubr.msk.f32.mxu0 %vm1344_vm2, %v5434_v25 }
 0x78f   : > { %v27669_v53 = vpop.f32.mrf.mxu0 }
 0x791   : > { %v5588_v1 = vpop.f32.mrf.mxu0 }
 0x793   : > { %v27679_v57 = vpop.f32.mrf.mxu0 }
 0x7b9   : > { %v5511_v38 = vpop.f32.mrf.mxu1 }
 0x7ba   : > { %27748 = vmatmul.mubr.msk.f32.vlgmr.msra.gmra.mxu0 %vm1344_vm2, %v5511_v38 }
 0x7bb   : > { %27798 = vmatpush3.xpose.msk.msra.mxu0 %vm1344_vm2, %v31628_v19  ;;  %v27674_v22 = vpop.f32.mrf.mxu1  ;;  %27750 = vmatprep.mubr.msk.f32.mxu0 %vm1344_vm2, %v5588_v1 }
 0x7bc   : > { %27807 = vmatprep.subr.mxu0 %v35908_v40 }
 0x7bd   : > { %v5665_v44 = vpop.f32.mrf.mxu1 }
 0x7be   : > { %27751 = vmatmul.mubr.msk.f32.gmra.mxu0 %vm1344_vm2, %v5665_v44 }
 0x7bf   : > { %v27684_v3 = vpop.f32.mrf.mxu1 }
 0x7c1   : > { %v5819_v27 = vpop.f32.mrf.mxu1 }
 0x7c2   : > { %v5742_v11 = vpop.f32.mrf.mxu0 }
 0x7c3   : > { %27753 = vmatprep.mubr.msk.f32.mxu0 %vm1344_vm2, %v5742_v11  ;;  %v27694_v45 = vpop.f32.mrf.mxu1 }
 0x7c4   : > { %v27689_v31 = vpop.f32.mrf.mxu0  ;;  %27754 = vmatmul.mubr.msk.f32.gmra.mxu0 %vm1344_vm2, %v5819_v27 }
 0x7c5   : > { %v5973_v48 = vpop.f32.mrf.mxu1 }
 0x7c6   : > { %v5896_v15 = vpop.f32.mrf.mxu0 }
 0x7c7   : > { %27756 = vmatprep.mubr.msk.f32.mxu0 %vm1344_vm2, %v5896_v15  ;;  %v27704_v19 = vpop.f32.mrf.mxu1 }
 0x7c8   : > { %v27699_v46 = vpop.f32.mrf.mxu0  ;;  %27757 = vmatmul.mubr.msk.f32.gmra.mxu0 %vm1344_vm2, %v5973_v48 }
 0x7c9   : > { %v6127_v13 = vpop.f32.mrf.mxu1 }
 0x7ca   : > { %v6050_v32 = vpop.f32.mrf.mxu0 }
 0x7cb   : > { %27759 = vmatprep.mubr.msk.f32.mxu0 %vm1344_vm2, %v6050_v32  ;;  %v27714_v50 = vpop.f32.mrf.mxu1 }
 0x7cc   : > { %v27709_v33 = vpop.f32.mrf.mxu0  ;;  %27760 = vmatmul.mubr.msk.f32.gmra.mxu0 %vm1344_vm2, %v6127_v13 }
 0x7ce   : > { %v6204_v49 = vpop.f32.mrf.mxu0  ;;  %v6281_v25 = vpop.f32.mrf.mxu1 }
 0x7cf   : > { %27762 = vmatprep.mubr.msk.f32.mxu0 %vm1344_vm2, %v6204_v49 }
 0x7d0   : > { %v27719_v53 = vpop.f32.mrf.mxu0  ;;  %27763 = vmatmul.mubr.msk.f32.gmra.mxu0 %vm1344_vm2, %v6281_v25  ;;  %v27724_v1 = vpop.f32.mrf.mxu1 }
 0x7d2   : > { %v6358_v57 = vpop.f32.mrf.mxu0 }
 0x7d3   : > { %27765 = vmatprep.mubr.msk.f32.mxu0 %vm1344_vm2, %v6358_v57  ;;  %v6435_v38 = vpop.f32.mrf.mxu1 }
 0x7d4   : > { %v27729_v22 = vpop.f32.mrf.mxu0  ;;  %27766 = vmatmul.mubr.msk.f32.gmra.mxu0 %vm1344_vm2, %v6435_v38 }
 0x7d5   : > { %v27734_v44 = vpop.f32.mrf.mxu1 }
 0x7d6   : > { %v6512_v3 = vpop.f32.mrf.mxu0 }
 0x7d7   : > { %27768 = vmatprep.mubr.msk.f32.mxu0 %vm1344_vm2, %v6512_v3 }
 0x7d8   : > { %v27739_v27 = vpop.f32.mrf.mxu0 }
 0x7d9   : > { %v6589_v11 = vpop.f32.mrf.mxu1 }
 0x7da   : > { %27769 = vmatmul.mubr.msk.f32.gmra.mxu0 %vm1344_vm2, %v6589_v11 }
 0x7db   : > { %v27744_v45 = vpop.f32.mrf.mxu1  ;;  %27799 = vmatprep.mubr.msk.f32.mxu0 %vm30009_vm1, %v35908_v40 }
 0x7dd   : > { %v31763_v31 = vpop.f32.mrf.mxu1 }
 0x7de   : > { %27800 = vmatmul.mubr.msk.f32.vlgmr.msra.gmra.mxu0 %vm1344_vm2, %v31634_v0 }
 0x7df   : > { %27808 = vmatpush3.xpose.msk.msra.mxu0 %vm1344_vm2, %v31641_v52  ;;  %v31769_v48 = vpop.f32.mrf.mxu1  ;;  %27809 = vmatprep.mubr.msk.f32.mxu0 %vm30009_vm1, %v35908_v40 }
 0x7e0   : > { %35956 = vst [vmem:[#allocation24_spill] sm:$0xff] %v31769_v48  ;;  %27817 = vmatprep.subr.mxu0 %v35908_v40 }
 0x7e1   : > { %v31774_v15 = vpop.f32.mrf.mxu1 }
 0x7e2   : > { %27810 = vmatmul.mubr.msk.f32.vlgmr.msra.gmra.mxu0 %vm1344_vm2, %v31649_v18 }
 0x7e3   : > { %27818 = vmatpush3.xpose.msk.msra.mxu0 %vm1344_vm2, %v31655_v17  ;;  %v31780_v19 = vpop.f32.mrf.mxu1  ;;  %27819 = vmatprep.mubr.msk.f32.mxu0 %vm30009_vm1, %v35908_v40 }
 0x7e4   : > { %35957 = vst [vmem:[#allocation23_spill] sm:$0xff] %v31780_v19  ;;  %27827 = vmatprep.subr.mxu0 %v35908_v40 }
 0x7e5   : > { %v31785_v0 = vpop.f32.mrf.mxu1 }
 0x7e6   : > { %27820 = vmatmul.mubr.msk.f32.vlgmr.msra.gmra.mxu0 %vm1344_vm2, %v31661_v54 }
 0x7e7   : > { %27828 = vmatpush3.xpose.msk.msra.mxu0 %vm1344_vm2, %v31667_v47  ;;  %v31791_v52 = vpop.f32.mrf.mxu1  ;;  %27829 = vmatprep.mubr.msk.f32.mxu0 %vm30009_vm1, %v35908_v40 }
 0x7e8   : > { %35958 = vst [vmem:[#allocation27_spill] sm:$0xff] %v31791_v52  ;;  %27837 = vmatprep.subr.mxu0 %v35908_v40 }
 0x7e9   : > { %v31796_v18 = vpop.f32.mrf.mxu1 }
 0x7ea   : > { %27830 = vmatmul.mubr.msk.f32.vlgmr.msra.gmra.mxu0 %vm1344_vm2, %v31673_v63 }
 0x7eb   : > { %27838 = vmatpush3.xpose.msk.msra.mxu0 %vm1344_vm2, %v31679_v41  ;;  %v31802_v17 = vpop.f32.mrf.mxu1  ;;  %27839 = vmatprep.mubr.msk.f32.mxu0 %vm30009_vm1, %v35908_v40 }
 0x7ec   : > { %35959 = vst [vmem:[#allocation32_spill] sm:$0xff] %v31802_v17  ;;  %27847 = vmatprep.subr.mxu0 %v35908_v40 }
 0x7ed   : > { %v31807_v54 = vpop.f32.mrf.mxu1 }
 0x7ee   : > { %27840 = vmatmul.mubr.msk.f32.vlgmr.msra.gmra.mxu0 %vm1344_vm2, %v31685_v8 }
 0x7ef   : > { %27848 = vmatpush3.xpose.msk.msra.mxu0 %vm1344_vm2, %v31691_v24  ;;  %v31813_v47 = vpop.f32.mrf.mxu1  ;;  %27849 = vmatprep.mubr.msk.f32.mxu0 %vm30009_vm1, %v35908_v40 }
 0x7f0   : > { %35960 = vst [vmem:[#allocation31_spill] sm:$0xff] %v31813_v47  ;;  %27857 = vmatprep.subr.mxu0 %v35908_v40 }
 0x7f1   : > { %v31818_v63 = vpop.f32.mrf.mxu1 }
 0x7f2   : > { %35961 = vst [vmem:[#allocation57_spill] sm:$0xff] %v31818_v63  ;;  %27850 = vmatmul.mubr.msk.f32.vlgmr.msra.gmra.mxu0 %vm1344_vm2, %v31698_v28 }
 0x7f3   : > { %27858 = vmatpush3.xpose.msk.msra.mxu0 %vm1344_vm2, %v31705_v23  ;;  %v31824_v41 = vpop.f32.mrf.mxu1  ;;  %27859 = vmatprep.mubr.msk.f32.mxu0 %vm30009_vm1, %v35908_v40 }
 0x7f4   : > { %35962 = vst [vmem:[#allocation59_spill] sm:$0xff] %v31824_v41  ;;  %27867 = vmatprep.subr.mxu0 %v35908_v40 }
 0x7f5   : > { %v31829_v8 = vpop.f32.mrf.mxu1 }
 0x7f6   : > { %35963 = vst [vmem:[#allocation47_spill] sm:$0xff] %v31829_v8  ;;  %27860 = vmatmul.mubr.msk.f32.vlgmr.msra.gmra.mxu0 %vm1344_vm2, %v31712_v42 }
 0x7f7   : > { %27868 = vmatpush3.xpose.msk.msra.mxu0 %vm1344_vm2, %v31719_v20  ;;  %v31835_v24 = vpop.f32.mrf.mxu1  ;;  %27869 = vmatprep.mubr.msk.f32.mxu0 %vm30009_vm1, %v35908_v40 }
 0x7f8   : > { %35964 = vst [vmem:[#allocation56_spill] sm:$0xff] %v31835_v24  ;;  %27877 = vmatprep.subr.mxu0 %v35908_v40 }
 0x7f9   : > { %v31840_v28 = vpop.f32.mrf.mxu1 }
 0x7fa   : > { %35965 = vst [vmem:[#allocation54_spill] sm:$0xff] %v31840_v28  ;;  %27870 = vmatmul.mubr.msk.f32.vlgmr.msra.gmra.mxu0 %vm1344_vm2, %v31730_v43 }
 0x7fb   : > { %v31844_v23 = vpop.f32.mrf.mxu1  ;;  %27879 = vmatprep.mubr.msk.f32.mxu0 %vm30009_vm1, %v35908_v40 }
 0x7fc   : > { %35966 = vst [vmem:[#allocation61_spill] sm:$0xff] %v31844_v23 }
 0x7fd   : > { %v7131_v42 = vpop.f32.mrf.mxu1 }
 0x7fe   : > { %v8228_v46 = vmul.f32 0.35355338, %v7131_v42 }
 0x7ff   : > { %v27806_v20 = vpop.f32.mrf.mxu1 }
 0x800   : > { %v8246_v13 = vsel %vm1344_vm2, %v8228_v46, -inf }
 0x801   : > { %8247 = vmax.xlane.f32.xlu1 %v8246_v13  ;;  %v7287_v32 = vpop.f32.mrf.mxu1  ;;  %v35967_v13 = vld [vmem:[#allocation40_spill] sm:$0xff] }
 0x802   : > { %v8230_v50 = vmul.f32 0.35355338, %v7287_v32 }
 0x803   : > { %v27816_v33 = vpop.f32.mrf.mxu1 }
 0x804   : > { %v8252_v49 = vsel %vm1344_vm2, %v8230_v50, -inf }
 0x805   : > { %8253 = vmax.xlane.f32.xlu0 %v8252_v49  ;;  %v7443_v25 = vpop.f32.mrf.mxu1 }
 0x806   : > { %v8232_v53 = vmul.f32 0.35355338, %v7443_v25 }
 0x807   : > { %v27826_v43 = vpop.f32.mrf.mxu1 }
 0x808   : > { %v8258_v1 = vsel %vm1344_vm2, %v8232_v53, -inf }
 0x809   : > { %8259 = vmax.xlane.f32.xlu0 %v8258_v1  ;;  %v7599_v57 = vpop.f32.mrf.mxu1 }
 0x80a   : > { %v8234_v38 = vmul.f32 0.35355338, %v7599_v57 }
 0x80b   : > { %v27836_v22 = vpop.f32.mrf.mxu1 }
 0x80c   : > { %v8264_v44 = vsel %vm1344_vm2, %v8234_v38, -inf }
 0x80d   : > { %8265 = vmax.xlane.f32.xlu0 %v8264_v44  ;;  %v7755_v3 = vpop.f32.mrf.mxu1 }
 0x80e   : > { %v31852_v27 = vmul.f32 0.35355338, %v7755_v3 }
 0x80f   : > { %v27846_v11 = vpop.f32.mrf.mxu1 }
 0x810   : > { %v8270_v45 = vsel %vm1344_vm2, %v31852_v27, -inf }
 0x811   : > { %8271 = vmax.xlane.f32.xlu0 %v8270_v45  ;;  %v7911_v42 = vpop.f32.mrf.mxu1 }
 0x812   : > { %v31856_v20 = vmul.f32 0.35355338, %v7911_v42  ;;  %8419 = vrot.lane.b32.xlu1 %v35967_v13, %s30011_s23 }
 0x813   : > { %v27856_v32 = vpop.f32.mrf.mxu1 }
 0x814   : > { %v8276_v33 = vsel %vm1344_vm2, %v31856_v20, -inf }
 0x815   : > { %8277 = vmax.xlane.f32.xlu0 %v8276_v33  ;;  %v8067_v49 = vpop.f32.mrf.mxu1 }
 0x816   : > { %v31862_v25 = vmul.f32 0.35355338, %v8067_v49 }
 0x817   : > { %v27866_v43 = vpop.f32.mrf.mxu1 }
 0x818   : > { %v8282_v1 = vsel %vm1344_vm2, %v31862_v25, -inf }
 0x819   : > { %8283 = vmax.xlane.f32.xlu0 %v8282_v1  ;;  %v8223_v57 = vpop.f32.mrf.mxu1 }
 0x81a   : > { %v31866_v22 = vmul.f32 0.35355338, %v8223_v57 }
 0x81b   : > { %v27876_v44 = vpop.f32.mrf.mxu1 }
 0x81c   : > { %v8288_v3 = vsel %vm1344_vm2, %v31866_v22, -inf }
 0x81d   : > { %8289 = vmax.xlane.f32.xlu0 %v8288_v3 }
 0x87a   : > { %v31870_v11 = vpop.f32.mrf.mxu0 }
 0x87c   : > { %v31872_v45 = vpop.f32.mrf.mxu0 }
 0x87d   : > { %35968 = vst [vmem:[#allocation55_spill] sm:$0xff] %v31872_v45 }
 0x87e   : > { %v31874_v42 = vpop.f32.mrf.mxu0 }
 0x880   : > { %v31876_v32 = vpop.f32.mrf.mxu0 }
 0x881   : > { %35969 = vst [vmem:[#allocation62_spill] sm:$0xff] %v31876_v32 }
 0x884   : > { %v31878_v33 = vpop.f32.mrf.mxu0 }
 0x886   : > { %v31880_v49 = vpop.f32.mrf.mxu0 }
 0x887   : > { %35970 = vst [vmem:[#allocation58_spill] sm:$0xff] %v31880_v49 }
 0x888   : > { %v31882_v43 = vpop.f32.mrf.mxu0 }
 0x88a   : > { %v31884_v1 = vpop.f32.mrf.mxu0  ;;  %v8248_v57 = vpop.xlane.xlu1 %8247 }
 0x88b   : > { %35971 = vst [vmem:[#allocation63_spill] sm:$0xff] %v31884_v1  ;;  %v8292_v44 = vsub.f32 %v8228_v46, %v8248_v57 }
 0x88c   : > { %v31886_v23 = vpop.f32.mrf.mxu0 }
 0x88d   : > { %v8309_v3 = vmul.f32 1.442695, %v8292_v44 }
 0x88e   : > { %v31888_v24 = vpop.f32.mrf.mxu0  ;;  %v8420_v41 = vpop.permute.xlu1 %8419 }
 0x88f   : > { %35972 = vst [vmem:[#allocation60_spill] sm:$0xff] %v31888_v24  ;;  %v8254_v47 = vpop.xlane.xlu0 %8253  ;;  %29321 = vpow2.f32 %v8309_v3  ;;  %27878 = vmatpush3.msra.mxu0 %v8420_v41 }
 0x890   : > { %v8294_v17 = vsub.f32 %v8230_v50, %v8254_v47  ;;  %v31890_v52 = vpop.f32.mrf.mxu0  ;;  %27887 = vmatprep.subr.mxu0 %v35908_v40 }
 0x891   : > { %35973 = vst [vmem:[#allocation64_spill] sm:$0xff] %v31890_v52 }
 0x892   : > { %v8313_v49 = vmul.f32 1.442695, %v8294_v17  ;;  %v31893_v19 = vpop.f32.mrf.mxu0 }
 0x893   : > { %35974 = vst [vmem:[#allocation40_spill] sm:$0xff] %v31893_v19  ;;  %v8260_v1 = vpop.xlane.xlu0 %8259 }
 0x894   : > { %v31895_v32 = vpop.f32.mrf.mxu0  ;;  %29323 = vpow2.f32 %v8313_v49  ;;  %v8296_v46 = vsub.f32 %v8232_v53, %v8260_v1 }
 0x895   : > { %35975 = vst [vmem:[#allocation65_spill] sm:$0xff] %v31895_v32 }
 0x896   : > { %v31897_v44 = vpop.f32.mrf.mxu0  ;;  %v8317_v24 = vmul.f32 1.442695, %v8296_v46 }
 0x897   : > { %v8266_v57 = vpop.xlane.xlu0 %8265  ;;  %35976 = vst [vmem:[#allocation66_spill] sm:$0xff] %v31897_v44 }
 0x898   : > { %v8298_v48 = vsub.f32 %v8234_v38, %v8266_v57  ;;  %29325 = vpow2.f32 %v8317_v24 }
 0x89a   : > { %v31899_v3 = vpop.f32.mrf.mxu0  ;;  %v8321_v17 = vmul.f32 1.442695, %v8298_v48 }
 0x89b   : > { %35977 = vst [vmem:[#allocation67_spill] sm:$0xff] %v31899_v3  ;;  %v8272_v47 = vpop.xlane.xlu0 %8271 }
 0x89c   : > { %v31901_v50 = vpop.eup %29321  ;;  %v31903_v41 = vpop.f32.mrf.mxu0  ;;  %v8300_v19 = vsub.f32 %v31852_v27, %v8272_v47  ;;  %29327 = vpow2.f32 %v8321_v17 }
 0x89d   : > { %35978 = vst [vmem:[#allocation68_spill] sm:$0xff] %v31903_v41  ;;  %v8342_v49 = vsel %vm1344_vm2, %v31901_v50, 0.0 }
 0x89e   : > { %8343 = vadd.xlane.f32.xlu0 %v8342_v49  ;;  %v7053_v53 = vpop.f32.mrf.mxu0  ;;  %v8325_v57 = vmul.f32 1.442695, %v8300_v19 }
 0x89f   : > { %v8278_v1 = vpop.xlane.xlu0 %8277  ;;  %v31908_v44 = vmul.f32 0.35355338, %v7053_v53 }
 0x8a0   : > { %v8302_v38 = vsub.f32 %v31856_v20, %v8278_v1  ;;  %v27801_v46 = vpop.f32.mrf.mxu0  ;;  %29329 = vpow2.f32 %v8325_v57 }
 0x8a1   : > { %v8243_v41 = vsel %vm1344_vm2, %v31908_v44, -inf  ;;  %v31913_v24 = vpop.eup %29323 }
 0x8a2   : > { %8244 = vmax.xlane.f32.xlu0 %v8243_v41  ;;  %v7209_v48 = vpop.f32.mrf.mxu0  ;;  %v8329_v47 = vmul.f32 1.442695, %v8302_v38  ;;  %v8348_v20 = vsel %vm1344_vm2, %v31913_v24, 0.0 }
 0x8a3   : > { %v8284_v27 = vpop.xlane.xlu0 %8283  ;;  %v31915_v49 = vmul.f32 0.35355338, %v7209_v48 }
 0x8a4   : > { %v27811_v45 = vpop.f32.mrf.mxu0  ;;  %v8304_v53 = vsub.f32 %v31862_v25, %v8284_v27  ;;  %29331 = vpow2.f32 %v8329_v47 }
 0x8a5   : > { %v8249_v38 = vsel %vm1344_vm2, %v31915_v49, -inf  ;;  %v31927_v25 = vpop.eup %29325 }
 0x8a6   : > { %v7365_v17 = vpop.f32.mrf.mxu0  ;;  %8349 = vadd.xlane.f32.xlu0 %v8348_v20  ;;  %v8333_v41 = vmul.f32 1.442695, %v8304_v53 }
 0x8a7   : > { %v8290_v19 = vpop.xlane.xlu0 %8289  ;;  %v31920_v1 = vmul.f32 0.35355338, %v7365_v17 }
 0x8a8   : > { %v27821_v46 = vpop.f32.mrf.mxu0  ;;  %v8306_v28 = vsub.f32 %v31866_v22, %v8290_v19  ;;  %29333 = vpow2.f32 %v8333_v41  ;;  %v8354_v22 = vsel %vm1344_vm2, %v31927_v25, 0.0 }
 0x8a9   : > { %v8255_v45 = vsel %vm1344_vm2, %v31920_v1, -inf  ;;  %v31935_v20 = vpop.eup %29327 }
 0x8aa   : > { %8256 = vmax.xlane.f32.xlu1 %v8255_v45  ;;  %v7521_v57 = vpop.f32.mrf.mxu0  ;;  %8250 = vmax.xlane.f32.xlu0 %v8249_v38  ;;  %v8337_v47 = vmul.f32 1.442695, %v8306_v28  ;;  %v8360_v28 = vsel %vm1344_vm2, %v31935_v20, 0.0 }
 0x8ab   : > { %v31929_v48 = vmul.f32 0.35355338, %v7521_v57 }
 0x8ac   : > { %v27831_v27 = vpop.f32.mrf.mxu0  ;;  %29335 = vpow2.f32 %v8337_v47 }
 0x8ad   : > { %v8261_v53 = vsel %vm1344_vm2, %v31929_v48, -inf  ;;  %v31943_v41 = vpop.eup %29329 }
 0x8ae   : > { %8262 = vmax.xlane.f32.xlu1 %v8261_v53  ;;  %v7677_v17 = vpop.f32.mrf.mxu0  ;;  %8355 = vadd.xlane.f32.xlu0 %v8354_v22  ;;  %v8366_v47 = vsel %vm1344_vm2, %v31943_v41, 0.0 }
 0x8af   : > { %v31937_v19 = vmul.f32 0.35355338, %v7677_v17 }
 0x8b0   : > { %v27841_v46 = vpop.f32.mrf.mxu0 }
 0x8b1   : > { %v8267_v45 = vsel %vm1344_vm2, %v31937_v19, -inf  ;;  %v31947_v53 = vpop.eup %29331 }
 0x8b2   : > { %8268 = vmax.xlane.f32.xlu1 %v8267_v45  ;;  %v7833_v38 = vpop.f32.mrf.mxu0  ;;  %8361 = vadd.xlane.f32.xlu0 %v8360_v28  ;;  %v8372_v28 = vsel %vm1344_vm2, %v31947_v53, 0.0 }
 0x8b3   : > { %v31945_v57 = vmul.f32 0.35355338, %v7833_v38 }
 0x8b4   : > { %v27851_v27 = vpop.f32.mrf.mxu0 }
 0x8b5   : > { %v8273_v22 = vsel %vm1344_vm2, %v31945_v57, -inf  ;;  %v31959_v38 = vpop.eup %29333 }
 0x8b6   : > { %8274 = vmax.xlane.f32.xlu1 %v8273_v22  ;;  %v7989_v17 = vpop.f32.mrf.mxu0  ;;  %8367 = vadd.xlane.f32.xlu0 %v8366_v47 }
 0x8b7   : > { %v31953_v46 = vmul.f32 0.35355338, %v7989_v17 }
 0x8b8   : > { %v27861_v3 = vpop.f32.mrf.mxu0 }
 0x8b9   : > { %v8279_v45 = vsel %vm1344_vm2, %v31953_v46, -inf  ;;  %v8378_v3 = vsel %vm1344_vm2, %v31959_v38, 0.0  ;;  %v31967_v47 = vpop.eup %29335 }
 0x8ba   : > { %8280 = vmax.xlane.f32.xlu1 %v8279_v45  ;;  %v8145_v27 = vpop.f32.mrf.mxu0  ;;  %8373 = vadd.xlane.f32.xlu0 %v8372_v28  ;;  %v8384_v17 = vsel %vm1344_vm2, %v31967_v47, 0.0  ;;  %v35980_v45 = vld [vmem:[#allocation43_spill] sm:$0xff]  ;;  %v35981_v28 = vld [vmem:[#allocation46_spill] sm:$0xff] }
 0x8bb   : > { %v31961_v8 = vmul.f32 0.35355338, %v8145_v27  ;;  %v35982_v27 = vld [vmem:[#allocation45_spill] sm:$0xff] }
 0x8bc   : > { %v27871_v32 = vpop.f32.mrf.mxu0 }
 0x8bd   : > { %v8285_v22 = vsel %vm1344_vm2, %v31961_v8, -inf  ;;  %v35979_v32 = vld [vmem:[#allocation44_spill] sm:$0xff] }
 0x8be   : > { %8286 = vmax.xlane.f32.xlu1 %v8285_v22  ;;  %8379 = vadd.xlane.f32.xlu0 %v8378_v3  ;;  %v35983_v22 = vld [vmem:[#allocation49_spill] sm:$0xff]  ;;  %v35984_v3 = vld [vmem:[#allocation51_spill] sm:$0xff] }
 0x8c2   : > { %8385 = vadd.xlane.f32.xlu1 %v8384_v17 }
 0x8d3   : > { %9103 = vrot.lane.b32.xlu1 %v30845_v16, %s30011_s23 }
 0x8d4   : > { %8571 = vrot.lane.b32.xlu0 %v30833_v37, %s30011_s23 }
 0x8d8   : > { %8647 = vrot.lane.b32.xlu0 %v30831_v14, %s30011_s23 }
 0x8dc   : > { %8723 = vrot.lane.b32.xlu0 %v35979_v32, %s30011_s23 }
 0x8e0   : > { %8799 = vrot.lane.b32.xlu0 %v35980_v45, %s30011_s23 }
 0x8e4   : > { %8875 = vrot.lane.b32.xlu0 %v35981_v28, %s30011_s23 }
 0x8e8   : > { %8951 = vrot.lane.b32.xlu0 %v35982_v27, %s30011_s23 }
 0x8ec   : > { %9027 = vrot.lane.b32.xlu0 %v35983_v22, %s30011_s23 }
 0x8f0   : > { %9179 = vrot.lane.b32.xlu0 %v35984_v3, %s30011_s23 }
 0x8f4   : > { %9255 = vrot.lane.b32.xlu0 %v35911_v39, %s30011_s23 }
 0x8f8   : > { %9331 = vrot.lane.b32.xlu0 %v30871_v35, %s30011_s23 }
 0x8fc   : > { %9407 = vrot.lane.b32.xlu0 %v35912_v34, %s30011_s23 }
 0x927   : > { %v8344_v17 = vpop.xlane.xlu0 %8343 }
 0x928   : > { %29337 = vrcp.f32 %v8344_v17 }
 0x92b   : > { %v8245_v16 = vpop.xlane.xlu0 %8244 }
 0x92c   : > { %v8291_v27 = vsub.f32 %v31908_v44, %v8245_v16 }
 0x92e   : > { %v8307_v14 = vmul.f32 1.442695, %v8291_v27 }
 0x92f   : > { %v8350_v28 = vpop.xlane.xlu0 %8349 }
 0x930   : > { %29339 = vpow2.f32 %v8307_v14 }
 0x933   : > { %v8257_v22 = vpop.xlane.xlu1 %8256  ;;  %v8251_v45 = vpop.xlane.xlu0 %8250 }
 0x934   : > { %v8295_v3 = vsub.f32 %v31920_v1, %v8257_v22  ;;  %v8293_v39 = vsub.f32 %v31915_v49, %v8251_v45 }
 0x935   : > { %v29338_v32 = vpop.eup %29337 }
 0x936   : > { %v8390_v35 = vmul.f32 %v29338_v32, %v31901_v50  ;;  %v8311_v37 = vmul.f32 1.442695, %v8293_v39  ;;  %v8315_v63 = vmul.f32 1.442695, %v8295_v3 }
 0x937   : > { %v8263_v34 = vpop.xlane.xlu1 %8262  ;;  %v8356_v52 = vpop.xlane.xlu0 %8355 }
 0x938   : > { %v8297_v17 = vsub.f32 %v31929_v48, %v8263_v34  ;;  %27885 = vmatmul.mubr.msk.f32.vlgmr.msra.gmra.mxu1 %vm1344_vm2, %v8390_v35  ;;  %29341 = vpow2.f32 %v8311_v37 }
 0x939   : > { %27894 = vmatprep.mubr.msk.f32.mxu1 %vm30009_vm1, %v35908_v40  ;;  %29343 = vpow2.f32 %v8315_v63 }
 0x93a   : > { %v8319_v14 = vmul.f32 1.442695, %v8297_v17  ;;  %29345 = vrcp.f32 %v8350_v28 }
 0x93b   : > { %v8269_v16 = vpop.xlane.xlu1 %8268  ;;  %v8362_v44 = vpop.xlane.xlu0 %8361 }
 0x93c   : > { %v8299_v49 = vsub.f32 %v31937_v19, %v8269_v16  ;;  %29347 = vpow2.f32 %v8319_v14 }
 0x93d   : > { %v32004_v1 = vpop.eup %29339 }
 0x93e   : > { %v8339_v39 = vsel %vm1344_vm2, %v32004_v1, 0.0  ;;  %v8323_v34 = vmul.f32 1.442695, %v8299_v49 }
 0x93f   : > { %v8275_v50 = vpop.xlane.xlu1 %8274  ;;  %8340 = vadd.xlane.f32.xlu1 %v8339_v39  ;;  %v8368_v37 = vpop.xlane.xlu0 %8367 }
 0x940   : > { %v8301_v35 = vsub.f32 %v31945_v57, %v8275_v50  ;;  %29349 = vpow2.f32 %v8323_v34 }
 0x941   : > { %29351 = vrcp.f32 %v8356_v52 }
 0x942   : > { %v8327_v63 = vmul.f32 1.442695, %v8301_v35 }
 0x943   : > { %v8281_v48 = vpop.xlane.xlu1 %8280  ;;  %v8374_v32 = vpop.xlane.xlu0 %8373 }
 0x944   : > { %v8303_v45 = vsub.f32 %v31953_v46, %v8281_v48  ;;  %29353 = vpow2.f32 %v8327_v63 }
 0x945   : > { %v32010_v19 = vpop.eup %29341 }
 0x946   : > { %v8331_v28 = vmul.f32 1.442695, %v8303_v45  ;;  %v8345_v22 = vsel %vm1344_vm2, %v32010_v19, 0.0  ;;  %v32014_v17 = vpop.eup %29343 }
 0x947   : > { %v8287_v27 = vpop.xlane.xlu1 %8286  ;;  %v8380_v3 = vpop.xlane.xlu0 %8379  ;;  %8346 = vadd.xlane.f32.xlu1 %v8345_v22  ;;  %v8351_v46 = vsel %vm1344_vm2, %v32014_v17, 0.0 }
 0x948   : > { %v8305_v57 = vsub.f32 %v31961_v8, %v8287_v27  ;;  %v29346_v16 = vpop.eup %29345  ;;  %29355 = vpow2.f32 %v8331_v28 }
 0x949   : > { %v32021_v52 = vpop.eup %29347  ;;  %v8394_v39 = vmul.f32 %v29346_v16, %v31913_v24 }
 0x94a   : > { %v8335_v14 = vmul.f32 1.442695, %v8305_v57  ;;  %v8357_v34 = vsel %vm1344_vm2, %v32021_v52, 0.0 }
 0x94b   : > { %v32019_v49 = vpop.permute.xlu0 %8571  ;;  %8352 = vadd.xlane.f32.xlu1 %v8351_v46 }
 0x94c   : > { %29357 = vpow2.f32 %v8335_v14 }
 0x94d   : > { %29359 = vrcp.f32 %v8362_v44  ;;  %v32026_v50 = vpop.eup %29349 }
 0x94e   : > { %v29352_v35 = vpop.eup %29351  ;;  %29361 = vrcp.f32 %v8368_v37  ;;  %v8363_v24 = vsel %vm1344_vm2, %v32026_v50, 0.0 }
 0x94f   : > { %v8648_v8 = vpop.permute.xlu0 %8647  ;;  %8358 = vadd.xlane.f32.xlu1 %v8357_v34  ;;  %v8398_v48 = vmul.f32 %v29352_v35, %v31927_v25  ;;  %29363 = vrcp.f32 %v8374_v32  ;;  %v32051_v25 = vpop.xlane.xlu1 %8385 }
 0x950   : > { %27893 = vmatpush3.msra.mxu1 %v8648_v8  ;;  %29365 = vrcp.f32 %v8380_v3 }
 0x951   : > { %27895 = vmatmul.mubr.msk.f32.vlgmr.msra.gmra.mxu1 %vm1344_vm2, %v8394_v39  ;;  %27902 = vmatprep.subr.mxu1 %v35908_v40  ;;  %v32036_v63 = vpop.eup %29353 }
 0x952   : > { %27904 = vmatprep.mubr.msk.f32.mxu1 %vm30009_vm1, %v35908_v40  ;;  %v8369_v45 = vsel %vm1344_vm2, %v32036_v63, 0.0 }
 0x953   : > { %v32034_v44 = vpop.permute.xlu0 %8723  ;;  %8364 = vadd.xlane.f32.xlu1 %v8363_v24  ;;  %v9104_v8 = vpop.permute.xlu1 %9103 }
 0x955   : > { %v32041_v27 = vpop.eup %29355 }
 0x956   : > { %v8375_v57 = vsel %vm1344_vm2, %v32041_v27, 0.0 }
 0x957   : > { %v8800_v28 = vpop.permute.xlu0 %8799  ;;  %8370 = vadd.xlane.f32.xlu1 %v8369_v45 }
 0x958   : > { %27903 = vmatpush3.msra.mxu1 %v8800_v28 }
 0x959   : > { %v32043_v22 = vpop.eup %29357  ;;  %27905 = vmatmul.mubr.msk.f32.vlgmr.msra.gmra.mxu1 %vm1344_vm2, %v8398_v48  ;;  %27912 = vmatprep.subr.mxu1 %v35908_v40 }
 0x95a   : > { %v8381_v37 = vsel %vm1344_vm2, %v32043_v22, 0.0  ;;  %27914 = vmatprep.mubr.msk.f32.mxu1 %vm30009_vm1, %v35908_v40  ;;  %v29360_v16 = vpop.eup %29359 }
 0x95b   : > { %8382 = vadd.xlane.f32.xlu0 %v8381_v37  ;;  %v32055_v14 = vpop.permute.xlu0 %8875  ;;  %8376 = vadd.xlane.f32.xlu1 %v8375_v57  ;;  %v8402_v46 = vmul.f32 %v29360_v16, %v31935_v20  ;;  %v29362_v34 = vpop.eup %29361  ;;  %v35985_v37 = vld [vmem:[#allocation22_spill] sm:$0xff]  ;;  %v35987_v57 = vld [vmem:[#allocation21_spill] sm:$0xff] }
 0x95c   : > { %v8406_v32 = vmul.f32 %v29362_v34, %v31943_v41  ;;  %v29364_v24 = vpop.eup %29363  ;;  %v35990_v16 = vld [vmem:[#allocation30_spill] sm:$0xff] }
 0x95d   : > { %v8410_v48 = vmul.f32 %v29364_v24, %v31947_v53  ;;  %v29366_v3 = vpop.eup %29365 }
 0x95e   : > { %v8414_v28 = vmul.f32 %v29366_v3, %v31959_v38  ;;  %v35988_v38 = vld [vmem:[#allocation26_spill] sm:$0xff] }
 0x95f   : > { %v8952_v39 = vpop.permute.xlu0 %8951 }
 0x960   : > { %27913 = vmatpush3.msra.mxu1 %v8952_v39 }
 0x961   : > { %27915 = vmatmul.mubr.msk.f32.vlgmr.msra.gmra.mxu1 %vm1344_vm2, %v8402_v46  ;;  %27922 = vmatprep.subr.mxu1 %v35908_v40  ;;  %v35991_v46 = vld [vmem:[#allocation29_spill] sm:$0xff] }
 0x962   : > { %27923 = vmatpush3.msra.mxu1 %v9104_v8  ;;  %27924 = vmatprep.mubr.msk.f32.mxu1 %vm30009_vm1, %v35908_v40 }
 0x963   : > { %v32063_v35 = vpop.permute.xlu0 %9027  ;;  %27932 = vmatprep.subr.mxu1 %v35908_v40 }
 0x965   : > { %27925 = vmatmul.mubr.msk.f32.vlgmr.msra.gmra.mxu1 %vm1344_vm2, %v8406_v32 }
 0x966   : > { %27934 = vmatprep.mubr.msk.f32.mxu1 %vm30009_vm1, %v35908_v40 }
 0x967   : > { %v32069_v20 = vpop.permute.xlu0 %9179 }
 0x96b   : > { %v9256_v45 = vpop.permute.xlu0 %9255 }
 0x96c   : > { %27933 = vmatpush3.msra.mxu1 %v9256_v45  ;;  %9483 = vrot.lane.b32.xlu1 %v30847_v26, %s30011_s23 }
 0x96d   : > { %27935 = vmatmul.mubr.msk.f32.vlgmr.msra.gmra.mxu1 %vm1344_vm2, %v8410_v48  ;;  %27942 = vmatprep.subr.mxu1 %v35908_v40 }
 0x96e   : > { %27944 = vmatprep.mubr.msk.f32.mxu1 %vm30009_vm1, %v35908_v40 }
 0x96f   : > { %v32078_v41 = vpop.permute.xlu0 %9331 }
 0x970   : > { %9846 = vrot.lane.b32.xlu1 %v35935_v21, %s30012_s7  ;;  %v35986_v21 = vld [vmem:[#allocation28_spill] sm:$0xff] }
 0x971   : > { %9559 = vrot.lane.b32.xlu0 %v35913_v51, %s30011_s23 }
 0x973   : > { %v9408_v53 = vpop.permute.xlu0 %9407 }
 0x974   : > { %27943 = vmatpush3.msra.mxu1 %v9408_v53  ;;  %9924 = vrot.lane.b32.xlu1 %v35985_v37, %s30012_s7 }
 0x975   : > { %9844 = vrot.lane.b32.xlu0 %v35937_v29, %s30012_s7  ;;  %27945 = vmatmul.mubr.msk.f32.vlgmr.msra.gmra.mxu1 %vm1344_vm2, %v8414_v28  ;;  %v35989_v29 = vld [vmem:[#allocation25_spill] sm:$0xff] }
 0x976   : > { %27952 = vmatprep.subr.mxu1 %v35908_v40  ;;  %27954 = vmatprep.mubr.msk.f32.mxu1 %vm30009_vm1, %v35908_v40 }
 0x978   : > { %10002 = vrot.lane.b32.xlu1 %v35986_v21, %s30012_s7 }
 0x979   : > { %9922 = vrot.lane.b32.xlu0 %v35987_v57, %s30012_s7 }
 0x97c   : > { %10080 = vrot.lane.b32.xlu1 %v35988_v38, %s30012_s7 }
 0x97d   : > { %10000 = vrot.lane.b32.xlu0 %v35941_v55, %s30012_s7  ;;  %v35992_v55 = vld [vmem:[#allocation33_spill] sm:$0xff] }
 0x980   : > { %10158 = vrot.lane.b32.xlu1 %v35942_v6, %s30012_s7 }
 0x981   : > { %10078 = vrot.lane.b32.xlu0 %v35989_v29, %s30012_s7 }
 0x984   : > { %10236 = vrot.lane.b32.xlu1 %v35990_v16, %s30012_s7 }
 0x985   : > { %10156 = vrot.lane.b32.xlu0 %v35943_v30, %s30012_s7 }
 0x988   : > { %10314 = vrot.lane.b32.xlu1 %v30688_v59, %s30012_s7  ;;  %v35993_v59 = vld [vmem:[#allocation34_spill] sm:$0xff] }
 0x989   : > { %10234 = vrot.lane.b32.xlu0 %v35991_v46, %s30012_s7 }
 0x98c   : > { %10392 = vrot.lane.b32.xlu1 %v30679_v56, %s30012_s7  ;;  %v35994_v56 = vld [vmem:[#allocation35_spill] sm:$0xff] }
 0x98d   : > { %10312 = vrot.lane.b32.xlu0 %v30686_v58, %s30012_s7  ;;  %v35995_v58 = vld [vmem:[#allocation36_spill] sm:$0xff] }
 0x990   : > { %10470 = vrot.lane.b32.xlu1 %v30707_v60, %s30012_s7 }
 0x991   : > { %10390 = vrot.lane.b32.xlu0 %v35992_v55, %s30012_s7 }
 0x994   : > { %10468 = vrot.lane.b32.xlu1 %v30705_v62, %s30012_s7  ;;  %v35997_v62 = vld [vmem:[#allocation37_spill] sm:$0xff] }
 0x995   : > { %10548 = vrot.lane.b32.xlu0 %v35993_v59, %s30012_s7 }
 0x998   : > { %10626 = vrot.lane.b32.xlu1 %v30727_v2, %s30012_s7 }
 0x999   : > { %10546 = vrot.lane.b32.xlu0 %v30696_v36, %s30012_s7  ;;  %v35996_v36 = vld [vmem:[#allocation38_spill] sm:$0xff] }
 0x99c   : > { %10624 = vrot.lane.b32.xlu1 %v30725_v10, %s30012_s7 }
 0x99d   : > { %10704 = vrot.lane.b32.xlu0 %v35994_v56, %s30012_s7 }
 0x9a0   : > { %10782 = vrot.lane.b32.xlu1 %v30749_v7, %s30012_s7 }
 0x9a1   : > { %10702 = vrot.lane.b32.xlu0 %v30715_v61, %s30012_s7 }
 0x9a4   : > { %10780 = vrot.lane.b32.xlu1 %v30747_v5, %s30012_s7 }
 0x9a5   : > { %10860 = vrot.lane.b32.xlu0 %v30739_v4, %s30012_s7 }
 0x9a8   : > { %10938 = vrot.lane.b32.xlu1 %v30771_v12, %s30012_s7 }
 0x9a9   : > { %10858 = vrot.lane.b32.xlu0 %v35995_v58, %s30012_s7 }
 0x9ac   : > { %10936 = vrot.lane.b32.xlu1 %v30769_v9, %s30012_s7 }
 0x9ad   : > { %11016 = vrot.lane.b32.xlu0 %v35996_v36, %s30012_s7 }
 0x9b0   : > { %11284 = vrot.lane.b32.xlu1 %v35967_v13, %s30012_s7 }
 0x9b1   : > { %11014 = vrot.lane.b32.xlu0 %v35997_v62, %s30012_s7 }
 0x9c8   : > { %v8341_v60 = vpop.xlane.xlu1 %8340 }
 0x9c9   : > { %29367 = vrcp.f32 %v8341_v60 }
 0x9d0   : > { %v8347_v61 = vpop.xlane.xlu1 %8346 }
 0x9d1   : > { %29369 = vrcp.f32 %v8347_v61 }
 0x9d4   : > { %v8353_v10 = vpop.xlane.xlu1 %8352 }
 0x9d5   : > { %29371 = vrcp.f32 %v8353_v10 }
 0x9d6   : > { %v29368_v2 = vpop.eup %29367  ;;  %29373 = vrcp.f32 %v32051_v25 }
 0x9d7   : > { %v8388_v4 = vmul.f32 %v29368_v2, %v32004_v1 }
 0x9d8   : > { %v8359_v5 = vpop.xlane.xlu1 %8358 }
 0x9d9   : > { %27880 = vmatmul.mubr.msk.f32.vlgmr.msra.gmra.mxu0 %vm1344_vm2, %v8388_v4  ;;  %29375 = vrcp.f32 %v8359_v5 }
 0x9da   : > { %27888 = vmatpush3.msra.mxu0 %v32019_v49  ;;  %27889 = vmatprep.mubr.msk.f32.mxu0 %vm30009_vm1, %v35908_v40 }
 0x9db   : > { %27897 = vmatprep.subr.mxu0 %v35908_v40 }
 0x9dc   : > { %v8365_v7 = vpop.xlane.xlu1 %8364 }
 0x9dd   : > { %29377 = vrcp.f32 %v8365_v7 }
 0x9de   : > { %v29370_v9 = vpop.eup %29369 }
 0x9df   : > { %v8392_v12 = vmul.f32 %v29370_v9, %v32010_v19 }
 0x9e0   : > { %v8371_v6 = vpop.xlane.xlu1 %8370 }
 0x9e1   : > { %29379 = vrcp.f32 %v8371_v6  ;;  %27890 = vmatmul.mubr.msk.f32.vlgmr.msra.gmra.mxu0 %vm1344_vm2, %v8392_v12 }
 0x9e2   : > { %v29372_v30 = vpop.eup %29371  ;;  %27898 = vmatpush3.msra.mxu0 %v32034_v44  ;;  %27899 = vmatprep.mubr.msk.f32.mxu0 %vm30009_vm1, %v35908_v40 }
 0x9e3   : > { %v8396_v13 = vmul.f32 %v29372_v30, %v32014_v17  ;;  %27907 = vmatprep.subr.mxu0 %v35908_v40  ;;  %v29374_v49 = vpop.eup %29373 }
 0x9e4   : > { %v8383_v1 = vpop.xlane.xlu0 %8382  ;;  %v8377_v25 = vpop.xlane.xlu1 %8376  ;;  %v8418_v44 = vmul.f32 %v29374_v49, %v31967_v47 }
 0x9e5   : > { %29381 = vrcp.f32 %v8377_v25  ;;  %27900 = vmatmul.mubr.msk.f32.vlgmr.msra.gmra.mxu0 %vm1344_vm2, %v8396_v13 }
 0x9e6   : > { %v29376_v19 = vpop.eup %29375  ;;  %27908 = vmatpush3.msra.mxu0 %v32055_v14  ;;  %27909 = vmatprep.mubr.msk.f32.mxu0 %vm30009_vm1, %v35908_v40  ;;  %29383 = vrcp.f32 %v8383_v1 }
 0x9e7   : > { %v8400_v39 = vmul.f32 %v29376_v19, %v32021_v52  ;;  %27917 = vmatprep.subr.mxu0 %v35908_v40 }
 0x9e8   : > { %v9560_v17 = vpop.permute.xlu0 %9559  ;;  %v9484_v34 = vpop.permute.xlu1 %9483 }
 0x9e9   : > { %27953 = vmatpush3.msra.mxu1 %v9560_v17  ;;  %27910 = vmatmul.mubr.msk.f32.vlgmr.msra.gmra.mxu0 %vm1344_vm2, %v8400_v39 }
 0x9ea   : > { %27955 = vmatmul.mubr.msk.f32.vlgmr.msra.gmra.mxu1 %vm1344_vm2, %v8418_v44  ;;  %v29378_v8 = vpop.eup %29377  ;;  %27918 = vmatpush3.msra.mxu0 %v32063_v35 }
 0x9eb   : > { %27919 = vmatprep.mubr.msk.f32.mxu0 %vm30009_vm1, %v35908_v40  ;;  %v8404_v47 = vmul.f32 %v29378_v8, %v32026_v50  ;;  %27927 = vmatprep.subr.mxu0 %v35908_v40 }
 0x9ec   : > { %27983 = vmatprep.subr.mxu1 %v35908_v40  ;;  %v9845_v52 = vpop.permute.xlu0 %9844  ;;  %v9847_v14 = vpop.permute.xlu1 %9846  ;;  %27985 = vmatprep.mubr.msk.f32.mxu1 %vm30009_vm1, %v35908_v40 }
 0x9ed   : > { %27920 = vmatmul.mubr.msk.f32.vlgmr.msra.gmra.mxu0 %vm1344_vm2, %v8404_v47  ;;  %27984 = vmatpush3.xpose.msk.msra.mxu1 %vm1344_vm2, %v9847_v14 }
 0x9ee   : > { %v29380_v32 = vpop.eup %29379  ;;  %27928 = vmatpush3.msra.mxu0 %v32069_v20  ;;  %27929 = vmatprep.mubr.msk.f32.mxu0 %vm30009_vm1, %v35908_v40 }
 0x9ef   : > { %v8408_v50 = vmul.f32 %v29380_v32, %v32036_v63  ;;  %27937 = vmatprep.subr.mxu0 %v35908_v40  ;;  %27988 = vmatprep.subr.mxu1 %v35908_v40 }
 0x9f0   : > { %v9923_v35 = vpop.permute.xlu0 %9922  ;;  %v9925_v24 = vpop.permute.xlu1 %9924  ;;  %27986 = vmatmul.mubr.msk.f32.vlgmr.msra.gmra.mxu1 %vm1344_vm2, %v9845_v52 }
 0x9f1   : > { %27930 = vmatmul.mubr.msk.f32.vlgmr.msra.gmra.mxu0 %vm1344_vm2, %v8408_v50  ;;  %27989 = vmatpush3.xpose.msk.msra.mxu1 %vm1344_vm2, %v9925_v24 }
 0x9f2   : > { %v29382_v48 = vpop.eup %29381  ;;  %27938 = vmatpush3.msra.mxu0 %v32078_v41  ;;  %27990 = vmatprep.mubr.msk.f32.mxu1 %vm30009_vm1, %v35908_v40  ;;  %v858_v41 = vld [vmem:[#allocation7 + $0x10] sm:$0xff] }
 0x9f3   : > { %v8412_v63 = vmul.f32 %v29382_v48, %v32041_v27  ;;  %27939 = vmatprep.mubr.msk.f32.mxu0 %vm30009_vm1, %v35908_v40  ;;  %27947 = vmatprep.subr.mxu0 %v35908_v40  ;;  %v29384_v45 = vpop.eup %29383 }
 0x9f4   : > { %v10001_v20 = vpop.permute.xlu0 %10000  ;;  %v10003_v3 = vpop.permute.xlu1 %10002  ;;  %27991 = vmatmul.mubr.msk.f32.vlgmr.msra.gmra.mxu1 %vm1344_vm2, %v9923_v35  ;;  %27993 = vmatprep.subr.mxu1 %v35908_v40  ;;  %v8416_v27 = vmul.f32 %v29384_v45, %v32043_v22 }
 0x9f5   : > { %27940 = vmatmul.mubr.msk.f32.vlgmr.msra.gmra.mxu0 %vm1344_vm2, %v8412_v63  ;;  %27994 = vmatpush3.xpose.msk.msra.mxu1 %vm1344_vm2, %v10003_v3 }
 0x9f6   : > { %27948 = vmatpush3.msra.mxu0 %v9484_v34  ;;  %27995 = vmatprep.mubr.msk.f32.mxu1 %vm30009_vm1, %v35908_v40 }
 0x9f7   : > { %27949 = vmatprep.mubr.msk.f32.mxu0 %vm30009_vm1, %v35908_v40  ;;  %27998 = vmatprep.subr.mxu1 %v35908_v40 }
 0x9f8   : > { %v32209_v53 = vpop.f32.mrf.mxu1  ;;  %v10079_v28 = vpop.permute.xlu0 %10078  ;;  %27996 = vmatmul.mubr.msk.f32.vlgmr.msra.gmra.mxu1 %vm1344_vm2, %v10001_v20  ;;  %27957 = vmatprep.subr.mxu0 %v858_v41 }
 0x9f9   : > { %v10081_v37 = vpop.permute.xlu1 %10080  ;;  %27950 = vmatmul.mubr.msk.f32.vlgmr.msra.gmra.mxu0 %vm1344_vm2, %v8416_v27  ;;  %28000 = vmatprep.mubr.msk.f32.mxu1 %vm30009_vm1, %v35908_v40 }
 0x9fa   : > { %27999 = vmatpush3.xpose.msk.msra.mxu1 %vm1344_vm2, %v10081_v37  ;;  %v27886_v21 = vpop.f32.mrf.mxu1  ;;  %27958 = vmatpush3.msra.mxu0 %v858_v41 }
 0x9fb   : > { %28003 = vmatprep.subr.mxu1 %v35908_v40  ;;  %28023 = vmatprep.subr.mxu0 %v35908_v40 }
 0x9fc   : > { %v10157_v22 = vpop.permute.xlu0 %10156 }
 0x9fd   : > { %v10159_v57 = vpop.permute.xlu1 %10158  ;;  %28001 = vmatmul.mubr.msk.f32.vlgmr.msra.gmra.mxu1 %vm1344_vm2, %v10079_v28 }
 0x9fe   : > { %28004 = vmatpush3.xpose.msk.msra.mxu1 %vm1344_vm2, %v10159_v57  ;;  %28005 = vmatprep.mubr.msk.f32.mxu1 %vm30009_vm1, %v35908_v40 }
 0x9ff   : > { %28008 = vmatprep.subr.mxu1 %v35908_v40 }
 0xa00   : > { %v10235_v38 = vpop.permute.xlu0 %10234 }
 0xa01   : > { %v10237_v29 = vpop.permute.xlu1 %10236  ;;  %28006 = vmatmul.mubr.msk.f32.vlgmr.msra.gmra.mxu1 %vm1344_vm2, %v10157_v22 }
 0xa02   : > { %28009 = vmatpush3.xpose.msk.msra.mxu1 %vm1344_vm2, %v10237_v29  ;;  %28010 = vmatprep.mubr.msk.f32.mxu1 %vm30009_vm1, %v35908_v40 }
 0xa03   : > { %28013 = vmatprep.subr.mxu1 %v35908_v40 }
 0xa04   : > { %v10313_v16 = vpop.permute.xlu0 %10312 }
 0xa05   : > { %v10315_v46 = vpop.permute.xlu1 %10314  ;;  %28011 = vmatmul.mubr.msk.f32.vlgmr.msra.gmra.mxu1 %vm1344_vm2, %v10235_v38 }
 0xa06   : > { %28014 = vmatpush3.xpose.msk.msra.mxu1 %vm1344_vm2, %v10315_v46  ;;  %28015 = vmatprep.mubr.msk.f32.mxu1 %vm30009_vm1, %v35908_v40 }
 0xa07   : > { %28018 = vmatprep.subr.mxu1 %v35908_v40 }
 0xa08   : > { %v10391_v55 = vpop.permute.xlu0 %10390 }
 0xa09   : > { %v10393_v59 = vpop.permute.xlu1 %10392  ;;  %28016 = vmatmul.mubr.msk.f32.vlgmr.msra.gmra.mxu1 %vm1344_vm2, %v10313_v16 }
 0xa0a   : > { %28019 = vmatpush3.xpose.msk.msra.mxu1 %vm1344_vm2, %v10393_v59  ;;  %28020 = vmatprep.mubr.msk.f32.mxu1 %vm30009_vm1, %v35908_v40 }
 0xa0b   : > { %28028 = vmatprep.subr.mxu1 %v35908_v40 }
 0xa0c   : > { %v10549_v56 = vpop.permute.xlu0 %10548 }
 0xa0d   : > { %28021 = vmatmul.mubr.msk.f32.vlgmr.msra.gmra.mxu1 %vm1344_vm2, %v10391_v55  ;;  %v10471_v39 = vpop.permute.xlu1 %10470 }
 0xa0e   : > { %28029 = vmatpush3.xpose.msk.msra.mxu1 %vm1344_vm2, %v10549_v56  ;;  %28030 = vmatprep.mubr.msk.f32.mxu1 %vm30009_vm1, %v35908_v40 }
 0xa0f   : > { %28038 = vmatprep.subr.mxu1 %v35908_v40 }
 0xa10   : > { %v10547_v58 = vpop.permute.xlu0 %10546 }
 0xa11   : > { %v8719_v36 = vpop.f32.mrf.mxu1  ;;  %28031 = vmatmul.mubr.msk.f32.vlgmr.msra.gmra.mxu1 %vm1344_vm2, %v10547_v58  ;;  %v10469_v34 = vpop.permute.xlu1 %10468 }
 0xa12   : > { %28040 = vmatprep.mubr.msk.f32.mxu1 %vm30009_vm1, %v35908_v40 }
 0xa13   : > { %v27896_v62 = vpop.f32.mrf.mxu1 }
 0xa14   : > { %v10705_v60 = vpop.permute.xlu0 %10704 }
 0xa15   : > { %28039 = vmatpush3.xpose.msk.msra.mxu1 %vm1344_vm2, %v10705_v60  ;;  %v10627_v14 = vpop.permute.xlu1 %10626 }
 0xa16   : > { %28048 = vmatprep.subr.mxu1 %v35908_v40 }
 0xa18   : > { %v10703_v61 = vpop.permute.xlu0 %10702 }
 0xa19   : > { %v8871_v10 = vpop.f32.mrf.mxu1  ;;  %28041 = vmatmul.mubr.msk.f32.vlgmr.msra.gmra.mxu1 %vm1344_vm2, %v10703_v61  ;;  %v10625_v63 = vpop.permute.xlu1 %10624 }
 0xa1a   : > { %28050 = vmatprep.mubr.msk.f32.mxu1 %vm30009_vm1, %v35908_v40 }
 0xa1b   : > { %v27906_v2 = vpop.f32.mrf.mxu1 }
 0xa1c   : > { %v10861_v4 = vpop.permute.xlu0 %10860 }
 0xa1d   : > { %28049 = vmatpush3.xpose.msk.msra.mxu1 %vm1344_vm2, %v10861_v4  ;;  %v10783_v28 = vpop.permute.xlu1 %10782 }
 0xa1e   : > { %28058 = vmatprep.subr.mxu1 %v35908_v40 }
 0xa20   : > { %v10859_v5 = vpop.permute.xlu0 %10858 }
 0xa21   : > { %v9023_v7 = vpop.f32.mrf.mxu1  ;;  %28051 = vmatmul.mubr.msk.f32.vlgmr.msra.gmra.mxu1 %vm1344_vm2, %v10859_v5  ;;  %v10781_v59 = vpop.permute.xlu1 %10780 }
 0xa22   : > { %28060 = vmatprep.mubr.msk.f32.mxu1 %vm30009_vm1, %v35908_v40 }
 0xa23   : > { %v27916_v9 = vpop.f32.mrf.mxu1 }
 0xa24   : > { %v11017_v12 = vpop.permute.xlu0 %11016 }
 0xa25   : > { %v9175_v6 = vpop.f32.mrf.mxu1  ;;  %28059 = vmatpush3.xpose.msk.msra.mxu1 %vm1344_vm2, %v11017_v12  ;;  %v10939_v4 = vpop.permute.xlu1 %10938 }
 0xa26   : > { %28068 = vmatprep.subr.mxu1 %v35908_v40 }
 0xa27   : > { %v27926_v30 = vpop.f32.mrf.mxu1 }
 0xa28   : > { %v11015_v13 = vpop.permute.xlu0 %11014 }
 0xa29   : > { %28061 = vmatmul.mubr.msk.f32.vlgmr.msra.gmra.mxu1 %vm1344_vm2, %v11015_v13  ;;  %v10937_v13 = vpop.permute.xlu1 %10936 }
 0xa2a   : > { %28070 = vmatprep.mubr.msk.f32.mxu1 %vm30009_vm1, %v35908_v40 }
 0xa2d   : > { %v9327_v1 = vpop.f32.mrf.mxu1 }
 0xa2f   : > { %v27936_v49 = vpop.f32.mrf.mxu1 }
 0xa35   : > { %v9479_v25 = vpop.f32.mrf.mxu1 }
 0xa37   : > { %v27946_v19 = vpop.f32.mrf.mxu1 }
 0xa99   : > { %v8491_v44 = vpop.f32.mrf.mxu0 }
 0xa9a   : > { %27959 = vmatprep.mubr.msk.f32.mxu0 %vm1344_vm2, %v8491_v44 }
 0xa9b   : > { %v27881_v17 = vpop.f32.mrf.mxu0  ;;  %27960 = vmatmul.mubr.msk.f32.vlgmr.msra.gmra.mxu0 %vm1344_vm2, %v32209_v53 }
 0xa9c   : > { %28024 = vmatpush3.xpose.msk.msra.mxu0 %vm1344_vm2, %v10471_v39  ;;  %v11285_v17 = vpop.permute.xlu1 %11284 }
 0xa9d   : > { %28033 = vmatprep.subr.mxu0 %v35908_v40 }
 0xaa1   : > { %v8643_v8 = vpop.f32.mrf.mxu0 }
 0xaa2   : > { %27962 = vmatprep.mubr.msk.f32.mxu0 %vm1344_vm2, %v8643_v8 }
 0xaa3   : > { %v27891_v47 = vpop.f32.mrf.mxu0  ;;  %27963 = vmatmul.mubr.msk.f32.gmra.mxu0 %vm1344_vm2, %v8719_v36 }
 0xaa5   : > { %v8795_v52 = vpop.f32.mrf.mxu0 }
 0xaa6   : > { %27965 = vmatprep.mubr.msk.f32.mxu0 %vm1344_vm2, %v8795_v52 }
 0xaa7   : > { %v27901_v32 = vpop.f32.mrf.mxu0  ;;  %27966 = vmatmul.mubr.msk.f32.gmra.mxu0 %vm1344_vm2, %v8871_v10 }
 0xaa9   : > { %v8947_v50 = vpop.f32.mrf.mxu0 }
 0xaaa   : > { %v9631_v35 = vpop.f32.mrf.mxu1  ;;  %27968 = vmatprep.mubr.msk.f32.mxu0 %vm1344_vm2, %v8947_v50 }
 0xaab   : > { %v27911_v24 = vpop.f32.mrf.mxu0  ;;  %27969 = vmatmul.mubr.msk.f32.gmra.mxu0 %vm1344_vm2, %v9023_v7 }
 0xaac   : > { %v27956_v48 = vpop.f32.mrf.mxu1 }
 0xaad   : > { %v9099_v20 = vpop.f32.mrf.mxu0 }
 0xaae   : > { %27971 = vmatprep.mubr.msk.f32.mxu0 %vm1344_vm2, %v9099_v20 }
 0xaaf   : > { %v27921_v45 = vpop.f32.mrf.mxu0  ;;  %27972 = vmatmul.mubr.msk.f32.gmra.mxu0 %vm1344_vm2, %v9175_v6 }
 0xab0   : > { %v9918_v3 = vpop.f32.mrf.mxu1 }
 0xab1   : > { %v32277_v41 = vmul.f32 0.35355338, %v9918_v3  ;;  %v9251_v27 = vpop.f32.mrf.mxu0 }
 0xab2   : > { %27974 = vmatprep.mubr.msk.f32.mxu0 %vm1344_vm2, %v9251_v27  ;;  %v27987_v53 = vpop.f32.mrf.mxu1 }
 0xab3   : > { %v27931_v37 = vpop.f32.mrf.mxu0  ;;  %27975 = vmatmul.mubr.msk.f32.gmra.mxu0 %vm1344_vm2, %v9327_v1  ;;  %v11108_v21 = vsel %vm1344_vm2, %v32277_v41, -inf }
 0xab4   : > { %11109 = vmax.xlane.f32.xlu1 %v11108_v21  ;;  %v9996_v22 = vpop.f32.mrf.mxu1 }
 0xab5   : > { %v32283_v57 = vmul.f32 0.35355338, %v9996_v22  ;;  %v9403_v38 = vpop.f32.mrf.mxu0 }
 0xab6   : > { %27977 = vmatprep.mubr.msk.f32.mxu0 %vm1344_vm2, %v9403_v38  ;;  %v27992_v29 = vpop.f32.mrf.mxu1 }
 0xab7   : > { %v27941_v16 = vpop.f32.mrf.mxu0  ;;  %27978 = vmatmul.mubr.msk.f32.gmra.mxu0 %vm1344_vm2, %v9479_v25  ;;  %v11111_v46 = vsel %vm1344_vm2, %v32283_v57, -inf }
 0xab8   : > { %11112 = vmax.xlane.f32.xlu0 %v11111_v46  ;;  %v10074_v55 = vpop.f32.mrf.mxu1 }
 0xab9   : > { %v32289_v56 = vmul.f32 0.35355338, %v10074_v55  ;;  %v9555_v58 = vpop.f32.mrf.mxu0 }
 0xaba   : > { %27980 = vmatprep.mubr.msk.f32.mxu0 %vm1344_vm2, %v9555_v58  ;;  %v27997_v36 = vpop.f32.mrf.mxu1 }
 0xabb   : > { %v27951_v62 = vpop.f32.mrf.mxu0  ;;  %27981 = vmatmul.mubr.msk.f32.gmra.mxu0 %vm1344_vm2, %v9631_v35  ;;  %v11114_v60 = vsel %vm1344_vm2, %v32289_v56, -inf }
 0xabc   : > { %11115 = vmax.xlane.f32.xlu0 %v11114_v60  ;;  %28025 = vmatprep.mubr.msk.f32.mxu0 %vm30009_vm1, %v35908_v40 }
 0xabd   : > { %v10152_v61 = vpop.f32.mrf.mxu1 }
 0xabe   : > { %v32297_v10 = vmul.f32 0.35355338, %v10152_v61 }
 0xabf   : > { %v28002_v2 = vpop.f32.mrf.mxu1  ;;  %28026 = vmatmul.mubr.msk.f32.vlgmr.msra.gmra.mxu0 %vm1344_vm2, %v10469_v34 }
 0xac0   : > { %v11117_v5 = vsel %vm1344_vm2, %v32297_v10, -inf  ;;  %28034 = vmatpush3.xpose.msk.msra.mxu0 %vm1344_vm2, %v10627_v14  ;;  %28035 = vmatprep.mubr.msk.f32.mxu0 %vm30009_vm1, %v35908_v40 }
 0xac1   : > { %11118 = vmax.xlane.f32.xlu1 %v11117_v5  ;;  %v10230_v7 = vpop.f32.mrf.mxu1  ;;  %28043 = vmatprep.subr.mxu0 %v35908_v40 }
 0xac2   : > { %v32303_v9 = vmul.f32 0.35355338, %v10230_v7 }
 0xac3   : > { %v28007_v12 = vpop.f32.mrf.mxu1  ;;  %28036 = vmatmul.mubr.msk.f32.vlgmr.msra.gmra.mxu0 %vm1344_vm2, %v10625_v63 }
 0xac4   : > { %v11120_v6 = vsel %vm1344_vm2, %v32303_v9, -inf  ;;  %28044 = vmatpush3.xpose.msk.msra.mxu0 %vm1344_vm2, %v10783_v28  ;;  %28045 = vmatprep.mubr.msk.f32.mxu0 %vm30009_vm1, %v35908_v40 }
 0xac5   : > { %11121 = vmax.xlane.f32.xlu0 %v11120_v6  ;;  %v10308_v30 = vpop.f32.mrf.mxu1  ;;  %28053 = vmatprep.subr.mxu0 %v35908_v40 }
 0xac6   : > { %v32312_v1 = vmul.f32 0.35355338, %v10308_v30 }
 0xac7   : > { %v28012_v49 = vpop.f32.mrf.mxu1  ;;  %28046 = vmatmul.mubr.msk.f32.vlgmr.msra.gmra.mxu0 %vm1344_vm2, %v10781_v59 }
 0xac8   : > { %v11123_v25 = vsel %vm1344_vm2, %v32312_v1, -inf  ;;  %28054 = vmatpush3.xpose.msk.msra.mxu0 %vm1344_vm2, %v10939_v4  ;;  %28055 = vmatprep.mubr.msk.f32.mxu0 %vm30009_vm1, %v35908_v40 }
 0xac9   : > { %11124 = vmax.xlane.f32.xlu1 %v11123_v25  ;;  %v10386_v19 = vpop.f32.mrf.mxu1  ;;  %28063 = vmatprep.subr.mxu0 %v35908_v40 }
 0xaca   : > { %v32321_v44 = vmul.f32 0.35355338, %v10386_v19 }
 0xacb   : > { %v28017_v39 = vpop.f32.mrf.mxu1  ;;  %28056 = vmatmul.mubr.msk.f32.vlgmr.msra.gmra.mxu0 %vm1344_vm2, %v10937_v13 }
 0xacc   : > { %v11126_v34 = vsel %vm1344_vm2, %v32321_v44, -inf  ;;  %28064 = vmatpush3.msra.mxu0 %v11285_v17  ;;  %28065 = vmatprep.mubr.msk.f32.mxu0 %vm30009_vm1, %v35908_v40 }
 0xacd   : > { %11127 = vmax.xlane.f32.xlu0 %v11126_v34  ;;  %v10464_v8 = vpop.f32.mrf.mxu1  ;;  %28073 = vmatprep.subr.mxu0 %v35908_v40 }
 0xace   : > { %v32329_v47 = vmul.f32 0.35355338, %v10464_v8 }
 0xacf   : > { %v28022_v52 = vpop.f32.mrf.mxu1 }
 0xad0   : > { %v11129_v14 = vsel %vm1344_vm2, %v32329_v47, -inf }
 0xad1   : > { %11130 = vmax.xlane.f32.xlu1 %v11129_v14  ;;  %v10620_v32 = vpop.f32.mrf.mxu1 }
 0xad2   : > { %v32336_v50 = vmul.f32 0.35355338, %v10620_v32 }
 0xad3   : > { %v28032_v35 = vpop.f32.mrf.mxu1 }
 0xad4   : > { %v11135_v24 = vsel %vm1344_vm2, %v32336_v50, -inf }
 0xad5   : > { %11136 = vmax.xlane.f32.xlu1 %v11135_v24 }
 0xad9   : > { %v10776_v48 = vpop.f32.mrf.mxu1 }
 0xada   : > { %v32340_v63 = vmul.f32 0.35355338, %v10776_v48 }
 0xadb   : > { %v28042_v20 = vpop.f32.mrf.mxu1 }
 0xadc   : > { %v11141_v45 = vsel %vm1344_vm2, %v32340_v63, -inf  ;;  %v6916_v20 = vadd.f32 %v31774_v15, %v31874_v42 }
 0xadd   : > { %11142 = vmax.xlane.f32.xlu1 %v11141_v45 }
 0xae1   : > { %v10932_v3 = vpop.f32.mrf.mxu1 }
 0xae2   : > { %v32344_v27 = vmul.f32 0.35355338, %v10932_v3 }
 0xae3   : > { %v28052_v53 = vpop.f32.mrf.mxu1 }
 0xae4   : > { %v11147_v28 = vsel %vm1344_vm2, %v32344_v27, -inf }
 0xae5   : > { %11148 = vmax.xlane.f32.xlu1 %v11147_v28 }
 0xae9   : > { %v11088_v37 = vpop.f32.mrf.mxu1 }
 0xaea   : > { %v32348_v21 = vmul.f32 0.35355338, %v11088_v37 }
 0xaeb   : > { %v28062_v22 = vpop.f32.mrf.mxu1 }
 0xaec   : > { %v11153_v38 = vsel %vm1344_vm2, %v32348_v21, -inf  ;;  %v6926_v22 = vadd.f32 %v31785_v0, %v31878_v33 }
 0xaed   : > { %11154 = vmax.xlane.f32.xlu1 %v11153_v38 }
 0xb3d   : > { %v11110_v29 = vpop.xlane.xlu1 %11109 }
 0xb3e   : > { %v11156_v16 = vsub.f32 %v32277_v41, %v11110_v29 }
 0xb40   : > { %v11172_v46 = vmul.f32 1.442695, %v11156_v16 }
 0xb41   : > { %v11113_v55 = vpop.xlane.xlu0 %11112 }
 0xb42   : > { %29385 = vpow2.f32 %v11172_v46  ;;  %v11157_v59 = vsub.f32 %v32283_v57, %v11113_v55 }
 0xb44   : > { %v11174_v58 = vmul.f32 1.442695, %v11157_v59  ;;  %v6936_v59 = vadd.f32 %v31796_v18, %v31882_v43 }
 0xb45   : > { %v11116_v36 = vpop.xlane.xlu0 %11115 }
 0xb46   : > { %29387 = vpow2.f32 %v11174_v58  ;;  %v11158_v62 = vsub.f32 %v32289_v56, %v11116_v36 }
 0xb48   : > { %v11176_v60 = vmul.f32 1.442695, %v11158_v62 }
 0xb4a   : > { %v11119_v61 = vpop.xlane.xlu1 %11118  ;;  %29389 = vpow2.f32 %v11176_v60  ;;  %v6946_v60 = vadd.f32 %v31807_v54, %v31886_v23 }
 0xb4b   : > { %v11159_v2 = vsub.f32 %v32297_v10, %v11119_v61 }
 0xb4d   : > { %v11178_v4 = vmul.f32 1.442695, %v11159_v2 }
 0xb4e   : > { %v11122_v5 = vpop.xlane.xlu0 %11121 }
 0xb4f   : > { %29391 = vpow2.f32 %v11178_v4  ;;  %v11160_v41 = vsub.f32 %v32303_v9, %v11122_v5  ;;  %v32357_v7 = vpop.eup %29385 }
 0xb50   : > { %v11204_v57 = vsel %vm1344_vm2, %v32357_v7, 0.0 }
 0xb51   : > { %v11180_v12 = vmul.f32 1.442695, %v11160_v41  ;;  %11205 = vadd.xlane.f32.xlu0 %v11204_v57  ;;  %v35999_v57 = vld [vmem:[#allocation57_spill] sm:$0xff] }
 0xb52   : > { %v11125_v6 = vpop.xlane.xlu1 %11124 }
 0xb53   : > { %29393 = vpow2.f32 %v11180_v12  ;;  %v11161_v56 = vsub.f32 %v32312_v1, %v11125_v6  ;;  %v32362_v30 = vpop.eup %29387  ;;  %v6906_v1 = vadd.f32 %v31763_v31, %v31870_v11  ;;  %v35998_v12 = vld [vmem:[#allocation64_spill] sm:$0xff] }
 0xb54   : > { %v11207_v10 = vsel %vm1344_vm2, %v32362_v30, 0.0  ;;  %v6956_v6 = vadd.f32 %v35999_v57, %v35998_v12  ;;  %v36007_v12 = vld [vmem:[#allocation46_spill] sm:$0xff]  ;;  %v36008_v57 = vld [vmem:[#allocation49_spill] sm:$0xff] }
 0xb55   : > { %v11182_v13 = vmul.f32 1.442695, %v11161_v56  ;;  %11208 = vadd.xlane.f32.xlu1 %v11207_v10 }
 0xb56   : > { %v11128_v49 = vpop.xlane.xlu0 %11127 }
 0xb57   : > { %29395 = vpow2.f32 %v11182_v13  ;;  %v11162_v9 = vsub.f32 %v32321_v44, %v11128_v49  ;;  %v32367_v25 = vpop.eup %29389  ;;  %v36001_v13 = vld [vmem:[#allocation47_spill] sm:$0xff] }
 0xb58   : > { %v11210_v39 = vsel %vm1344_vm2, %v32367_v25, 0.0 }
 0xb59   : > { %v11184_v19 = vmul.f32 1.442695, %v11162_v9  ;;  %11211 = vadd.xlane.f32.xlu0 %v11210_v39 }
 0xb5a   : > { %v11131_v17 = vpop.xlane.xlu1 %11130 }
 0xb5b   : > { %29397 = vpow2.f32 %v11184_v19  ;;  %v11163_v34 = vsub.f32 %v32329_v47, %v11131_v17  ;;  %v27961_v8 = vpop.f32.mrf.mxu0  ;;  %v36002_v17 = vld [vmem:[#allocation67_spill] sm:$0xff] }
 0xb5c   : > { %v32374_v52 = vpop.eup %29391  ;;  %v32376_v14 = vadd.f32 %v27961_v8, %v6906_v1 }
 0xb5d   : > { %v11186_v44 = vmul.f32 1.442695, %v11163_v34  ;;  %v11213_v32 = vsel %vm1344_vm2, %v32374_v52, 0.0  ;;  %v32385_v48 = vpop.f32.mrf.mxu0  ;;  %v36003_v34 = vld [vmem:[#allocation54_spill] sm:$0xff] }
 0xb5e   : > { %11214 = vadd.xlane.f32.xlu1 %v11213_v32  ;;  %v11137_v35 = vpop.xlane.xlu1 %11136  ;;  %v6976_v8 = vadd.f32 %v36003_v34, %v36002_v17 }
 0xb5f   : > { %29399 = vpow2.f32 %v11186_v44  ;;  %v11165_v24 = vsub.f32 %v32336_v50, %v11137_v35 }
 0xb60   : > { %v32381_v31 = vpop.eup %29393 }
 0xb61   : > { %v11190_v11 = vmul.f32 1.442695, %v11165_v24  ;;  %v11216_v47 = vsel %vm1344_vm2, %v32381_v31, 0.0 }
 0xb62   : > { %11217 = vadd.xlane.f32.xlu0 %v11216_v47 }
 0xb63   : > { %29401 = vpow2.f32 %v11190_v11  ;;  %v27964_v3 = vpop.f32.mrf.mxu0 }
 0xb64   : > { %v32389_v45 = vpop.eup %29395  ;;  %v32391_v53 = vadd.f32 %v27964_v3, %v6916_v20 }
 0xb65   : > { %v11219_v50 = vsel %vm1344_vm2, %v32389_v45, 0.0  ;;  %v32395_v28 = vpop.f32.mrf.mxu0 }
 0xb66   : > { %11220 = vadd.xlane.f32.xlu1 %v11219_v50  ;;  %v11143_v37 = vpop.xlane.xlu1 %11142 }
 0xb67   : > { %v11167_v38 = vsub.f32 %v32340_v63, %v11143_v37  ;;  %v27967_v15 = vpop.f32.mrf.mxu0 }
 0xb68   : > { %v32400_v29 = vpop.eup %29397  ;;  %v32402_v16 = vadd.f32 %v27967_v15, %v6926_v22 }
 0xb69   : > { %v11194_v42 = vmul.f32 1.442695, %v11167_v38  ;;  %v11222_v46 = vsel %vm1344_vm2, %v32400_v29, 0.0  ;;  %v32406_v55 = vpop.f32.mrf.mxu0 }
 0xb6a   : > { %11223 = vadd.xlane.f32.xlu0 %v11222_v46 }
 0xb6b   : > { %29403 = vpow2.f32 %v11194_v42  ;;  %v27970_v0 = vpop.f32.mrf.mxu0 }
 0xb6c   : > { %v32410_v58 = vpop.eup %29399  ;;  %v32412_v33 = vadd.f32 %v27970_v0, %v6936_v59  ;;  %v36004_v0 = vld [vmem:[#allocation42_spill] sm:$0xff] }
 0xb6d   : > { %v11225_v63 = vsel %vm1344_vm2, %v32410_v58, 0.0  ;;  %v32416_v36 = vpop.f32.mrf.mxu0 }
 0xb6e   : > { %11226 = vadd.xlane.f32.xlu1 %v11225_v63  ;;  %v11149_v62 = vpop.xlane.xlu1 %11148 }
 0xb6f   : > { %v11169_v61 = vsub.f32 %v32344_v27, %v11149_v62  ;;  %v27973_v18 = vpop.f32.mrf.mxu0  ;;  %v36000_v27 = vld [vmem:[#allocation65_spill] sm:$0xff] }
 0xb70   : > { %v32421_v2 = vpop.eup %29401  ;;  %v32423_v4 = vadd.f32 %v27973_v18, %v6946_v60  ;;  %v6966_v10 = vadd.f32 %v36001_v13, %v36000_v27  ;;  %v36005_v18 = vld [vmem:[#allocation44_spill] sm:$0xff]  ;;  %v36011_v27 = vld [vmem:[#allocation39_spill] sm:$0xff] }
 0xb71   : > { %v11198_v43 = vmul.f32 1.442695, %v11169_v61  ;;  %v11231_v5 = vsel %vm1344_vm2, %v32421_v2, 0.0  ;;  %v32427_v41 = vpop.f32.mrf.mxu0 }
 0xb72   : > { %11232 = vadd.xlane.f32.xlu1 %v11231_v5  ;;  %v36006_v5 = vld [vmem:[#allocation43_spill] sm:$0xff] }
 0xb73   : > { %29405 = vpow2.f32 %v11198_v43  ;;  %v27976_v56 = vpop.f32.mrf.mxu0 }
 0xb74   : > { %v32431_v54 = vadd.f32 %v27976_v56, %v6956_v6  ;;  %v36009_v6 = vld [vmem:[#allocation51_spill] sm:$0xff]  ;;  %v36010_v56 = vld [vmem:[#allocation53_spill] sm:$0xff] }
 0xb75   : > { %v32433_v23 = vpop.f32.mrf.mxu0 }
 0xb76   : > { %v11155_v13 = vpop.xlane.xlu1 %11154 }
 0xb77   : > { %v27979_v9 = vpop.f32.mrf.mxu0 }
 0xb78   : > { %v32437_v49 = vpop.eup %29403  ;;  %v32439_v19 = vadd.f32 %v27979_v9, %v6966_v10  ;;  %v11171_v10 = vsub.f32 %v32348_v21, %v11155_v13 }
 0xb79   : > { %v11237_v39 = vsel %vm1344_vm2, %v32437_v49, 0.0  ;;  %v32443_v1 = vpop.f32.mrf.mxu0 }
 0xb7a   : > { %11238 = vadd.xlane.f32.xlu1 %v11237_v39  ;;  %v11202_v9 = vmul.f32 1.442695, %v11171_v10 }
 0xb7b   : > { %v27982_v44 = vpop.f32.mrf.mxu0 }
 0xb7c   : > { %v32447_v32 = vadd.f32 %v27982_v44, %v6976_v8  ;;  %29407 = vpow2.f32 %v11202_v9  ;;  %v36012_v8 = vld [vmem:[#allocation41_spill] sm:$0xff] }
 0xb7d   : > { %v32449_v35 = vpop.f32.mrf.mxu0  ;;  %v36013_v44 = vld [vmem:[#allocation45_spill] sm:$0xff] }
 0xb7f   : > { %v10542_v11 = vpop.f32.mrf.mxu0 }
 0xb80   : > { %v32451_v24 = vpop.eup %29405  ;;  %v32453_v47 = vmul.f32 0.35355338, %v10542_v11  ;;  %v36014_v11 = vld [vmem:[#allocation48_spill] sm:$0xff] }
 0xb81   : > { %v11243_v20 = vsel %vm1344_vm2, %v32451_v24, 0.0  ;;  %v28027_v3 = vpop.f32.mrf.mxu0 }
 0xb82   : > { %11244 = vadd.xlane.f32.xlu0 %v11243_v20  ;;  %v11132_v22 = vsel %vm1344_vm2, %v32453_v47, -inf  ;;  %v36015_v20 = vld [vmem:[#allocation50_spill] sm:$0xff] }
 0xb83   : > { %v10698_v50 = vpop.f32.mrf.mxu0 }
 0xb84   : > { %v32457_v37 = vmul.f32 0.35355338, %v10698_v50 }
 0xb85   : > { %v28037_v38 = vpop.f32.mrf.mxu0 }
 0xb86   : > { %11133 = vmax.xlane.f32.xlu0 %v11132_v22  ;;  %v11138_v46 = vsel %vm1344_vm2, %v32457_v37, -inf }
 0xb87   : > { %v10854_v15 = vpop.f32.mrf.mxu0 }
 0xb88   : > { %v32461_v42 = vmul.f32 0.35355338, %v10854_v15 }
 0xb89   : > { %v28047_v59 = vpop.f32.mrf.mxu0  ;;  %v32488_v39 = vpop.eup %29407 }
 0xb8a   : > { %11139 = vmax.xlane.f32.xlu0 %v11138_v46  ;;  %v11144_v60 = vsel %vm1344_vm2, %v32461_v42, -inf  ;;  %v11249_v17 = vsel %vm1344_vm2, %v32488_v39, 0.0 }
 0xb8b   : > { %11436 = vrot.lane.b32.xlu1 %v36004_v0, %s30012_s7  ;;  %v11010_v63 = vpop.f32.mrf.mxu0 }
 0xb8c   : > { %v32467_v62 = vmul.f32 0.35355338, %v11010_v63 }
 0xb8d   : > { %v28057_v61 = vpop.f32.mrf.mxu0 }
 0xb8e   : > { %11145 = vmax.xlane.f32.xlu0 %v11144_v60  ;;  %v11150_v43 = vsel %vm1344_vm2, %v32467_v62, -inf }
 0xb8f   : > { %11588 = vrot.lane.b32.xlu1 %v36005_v18, %s30012_s7 }
 0xb92   : > { %11151 = vmax.xlane.f32.xlu0 %v11150_v43 }
 0xb93   : > { %11664 = vrot.lane.b32.xlu1 %v36006_v5, %s30012_s7 }
 0xb97   : > { %11740 = vrot.lane.b32.xlu1 %v36007_v12, %s30012_s7 }
 0xb9b   : > { %11892 = vrot.lane.b32.xlu1 %v36008_v57, %s30012_s7 }
 0xb9f   : > { %12044 = vrot.lane.b32.xlu1 %v36009_v6, %s30012_s7 }
 0xba3   : > { %12196 = vrot.lane.b32.xlu1 %v36010_v56, %s30012_s7 }
 0xba8   : > { %11360 = vrot.lane.b32.xlu0 %v36011_v27, %s30012_s7 }
 0xbc7   : > { %11250 = vadd.xlane.f32.xlu0 %v11249_v17 }
 0xbda   : > { %v11206_v34 = vpop.xlane.xlu0 %11205 }
 0xbdb   : > { %29409 = vrcp.f32 %v11206_v34 }
 0xbdd   : > { %11512 = vrot.lane.b32.xlu0 %v36012_v8, %s30012_s7 }
 0xbde   : > { %v11209_v50 = vpop.xlane.xlu1 %11208 }
 0xbe1   : > { %11816 = vrot.lane.b32.xlu0 %v36013_v44, %s30012_s7 }
 0xbe2   : > { %v11212_v38 = vpop.xlane.xlu0 %11211 }
 0xbe3   : > { %29411 = vrcp.f32 %v11212_v38 }
 0xbe5   : > { %11968 = vrot.lane.b32.xlu0 %v36014_v11, %s30012_s7 }
 0xbe7   : > { %v32504_v22 = vpop.xlane.xlu1 %11214 }
 0xbe8   : > { %v29410_v21 = vpop.eup %29409 }
 0xbe9   : > { %12120 = vrot.lane.b32.xlu0 %v36015_v20, %s30012_s7  ;;  %v11253_v3 = vmul.f32 %v29410_v21, %v32357_v7 }
 0xbeb   : > { %28066 = vmatmul.mubr.msk.f32.vlgmr.msra.gmra.mxu0 %vm1344_vm2, %v11253_v3  ;;  %v11218_v46 = vpop.xlane.xlu0 %11217 }
 0xbec   : > { %28075 = vmatprep.mubr.msk.f32.mxu0 %vm30009_vm1, %v35908_v40  ;;  %29413 = vrcp.f32 %v11218_v46 }
 0xbef   : > { %v32506_v15 = vpop.xlane.xlu1 %11220 }
 0xbf0   : > { %v29412_v60 = vpop.eup %29411 }
 0xbf1   : > { %v11257_v61 = vmul.f32 %v29412_v60, %v32367_v25 }
 0xbf3   : > { %v11224_v63 = vpop.xlane.xlu0 %11223 }
 0xbf4   : > { %29415 = vrcp.f32 %v11224_v63 }
 0xbf5   : > { %29417 = vrcp.f32 %v11209_v50 }
 0xbf7   : > { %v32508_v59 = vpop.xlane.xlu1 %11226 }
 0xbf9   : > { %v29414_v43 = vpop.eup %29413 }
 0xbfa   : > { %v11261_v5 = vmul.f32 %v29414_v43, %v32381_v31 }
 0xbfb   : > { %v32510_v0 = vpop.xlane.xlu1 %11232 }
 0xc01   : > { %v29416_v56 = vpop.eup %29415 }
 0xc02   : > { %v11265_v31 = vmul.f32 %v29416_v56, %v32400_v29 }
 0xc03   : > { %v32512_v7 = vpop.xlane.xlu1 %11238 }
 0xc07   : > { %v11437_v18 = vpop.permute.xlu1 %11436 }
 0xc08   : > { %28074 = vmatpush3.msra.mxu0 %v11437_v18  ;;  %v36016_v18 = vld [vmem:[#allocation52_spill] sm:$0xff] }
 0xc09   : > { %28076 = vmatmul.mubr.msk.f32.vlgmr.msra.gmra.mxu0 %vm1344_vm2, %v11257_v61  ;;  %28083 = vmatprep.subr.mxu0 %v35908_v40 }
 0xc0a   : > { %28085 = vmatprep.mubr.msk.f32.mxu0 %vm30009_vm1, %v35908_v40 }
 0xc0b   : > { %v11589_v12 = vpop.permute.xlu1 %11588  ;;  %v32520_v57 = vpop.xlane.xlu0 %11244 }
 0xc0c   : > { %28084 = vmatpush3.msra.mxu0 %v11589_v12 }
 0xc0d   : > { %28086 = vmatmul.mubr.msk.f32.vlgmr.msra.gmra.mxu0 %vm1344_vm2, %v11261_v5  ;;  %28093 = vmatprep.subr.mxu0 %v35908_v40 }
 0xc0e   : > { %28095 = vmatprep.mubr.msk.f32.mxu0 %vm30009_vm1, %v35908_v40 }
 0xc0f   : > { %v11665_v25 = vpop.permute.xlu1 %11664  ;;  %v11134_v6 = vpop.xlane.xlu0 %11133 }
 0xc10   : > { %v11164_v27 = vsub.f32 %v32453_v47, %v11134_v6 }
 0xc12   : > { %v11188_v13 = vmul.f32 1.442695, %v11164_v27 }
 0xc13   : > { %v11741_v10 = vpop.permute.xlu1 %11740  ;;  %v11140_v9 = vpop.xlane.xlu0 %11139 }
 0xc14   : > { %29419 = vpow2.f32 %v11188_v13  ;;  %v11166_v17 = vsub.f32 %v32457_v37, %v11140_v9  ;;  %28094 = vmatpush3.msra.mxu0 %v11741_v10  ;;  %v29418_v37 = vpop.eup %29417 }
 0xc15   : > { %28096 = vmatmul.mubr.msk.f32.vlgmr.msra.gmra.mxu0 %vm1344_vm2, %v11265_v31  ;;  %28103 = vmatprep.subr.mxu0 %v35908_v40  ;;  %v11255_v3 = vmul.f32 %v29418_v37, %v32362_v30 }
 0xc16   : > { %v11192_v34 = vmul.f32 1.442695, %v11166_v17  ;;  %28105 = vmatprep.mubr.msk.f32.mxu0 %vm30009_vm1, %v35908_v40 }
 0xc17   : > { %v11893_v8 = vpop.permute.xlu1 %11892  ;;  %v11146_v44 = vpop.xlane.xlu0 %11145 }
 0xc18   : > { %29421 = vpow2.f32 %v11192_v34  ;;  %v11168_v47 = vsub.f32 %v32461_v42, %v11146_v44  ;;  %28104 = vmatpush3.msra.mxu0 %v11893_v8 }
 0xc19   : > { %28113 = vmatprep.subr.mxu0 %v35908_v40 }
 0xc1a   : > { %v11196_v29 = vmul.f32 1.442695, %v11168_v47 }
 0xc1b   : > { %v11152_v11 = vpop.xlane.xlu0 %11151  ;;  %v12045_v27 = vpop.permute.xlu1 %12044 }
 0xc1c   : > { %29423 = vpow2.f32 %v11196_v29  ;;  %v11170_v21 = vsub.f32 %v32467_v62, %v11152_v11 }
 0xc1e   : > { %v11200_v20 = vmul.f32 1.442695, %v11170_v21 }
 0xc1f   : > { %v11361_v50 = vpop.permute.xlu0 %11360  ;;  %v12197_v10 = vpop.permute.xlu1 %12196 }
 0xc20   : > { %29425 = vpow2.f32 %v11200_v20  ;;  %28069 = vmatpush3.msra.mxu1 %v11361_v50  ;;  %v859_v20 = vld [vmem:[#allocation7 + $0x18] sm:$0xff] }
 0xc21   : > { %v32537_v38 = vpop.eup %29419  ;;  %28071 = vmatmul.mubr.msk.f32.vlgmr.msra.gmra.mxu1 %vm1344_vm2, %v11255_v3  ;;  %28078 = vmatprep.subr.mxu1 %v35908_v40  ;;  %29427 = vrcp.f32 %v32504_v22 }
 0xc22   : > { %v11228_v42 = vsel %vm1344_vm2, %v32537_v38, 0.0  ;;  %28080 = vmatprep.mubr.msk.f32.mxu1 %vm30009_vm1, %v35908_v40  ;;  %29429 = vrcp.f32 %v32506_v15 }
 0xc23   : > { %11229 = vadd.xlane.f32.xlu0 %v11228_v42  ;;  %29431 = vrcp.f32 %v32508_v59 }
 0xc24   : > { %29433 = vrcp.f32 %v32510_v0 }
 0xc25   : > { %v32545_v62 = vpop.eup %29421  ;;  %29435 = vrcp.f32 %v32512_v7 }
 0xc26   : > { %v11234_v30 = vsel %vm1344_vm2, %v32545_v62, 0.0  ;;  %29437 = vrcp.f32 %v32520_v57 }
 0xc27   : > { %11235 = vadd.xlane.f32.xlu0 %v11234_v30 }
 0xc29   : > { %v32549_v46 = vpop.eup %29423 }
 0xc2a   : > { %v11240_v63 = vsel %vm1344_vm2, %v32549_v46, 0.0 }
 0xc2b   : > { %11241 = vadd.xlane.f32.xlu0 %v11240_v63 }
 0xc2d   : > { %v32553_v60 = vpop.eup %29425 }
 0xc2e   : > { %v11246_v61 = vsel %vm1344_vm2, %v32553_v60, 0.0  ;;  %v29428_v5 = vpop.eup %29427 }
 0xc2f   : > { %11247 = vadd.xlane.f32.xlu1 %v11246_v61  ;;  %v11259_v12 = vmul.f32 %v29428_v5, %v32374_v52  ;;  %v29430_v6 = vpop.eup %29429 }
 0xc30   : > { %v29432_v15 = vpop.eup %29431 }
 0xc31   : > { %v11267_v52 = vmul.f32 %v29432_v15, %v32410_v58  ;;  %v29434_v0 = vpop.eup %29433 }
 0xc40   : > { %12348 = vrot.lane.b32.xlu1 %v30847_v26, %s30012_s7 }
 0xc41   : > { %12272 = vrot.lane.b32.xlu0 %v36016_v18, %s30012_s7 }
 0xc45   : > { %12424 = vrot.lane.b32.xlu0 %v35913_v51, %s30012_s7  ;;  %v11263_v51 = vmul.f32 %v29430_v6, %v32389_v45  ;;  %v11271_v45 = vmul.f32 %v29434_v0, %v32421_v2 }
 0xc50   : > { %v11251_v43 = vpop.xlane.xlu0 %11250 }
 0xc51   : > { %29439 = vrcp.f32 %v11251_v43 }
 0xc54   : > { %v11513_v26 = vpop.permute.xlu0 %11512 }
 0xc55   : > { %28079 = vmatpush3.msra.mxu1 %v11513_v26 }
 0xc56   : > { %28081 = vmatmul.mubr.msk.f32.vlgmr.msra.gmra.mxu1 %vm1344_vm2, %v11259_v12  ;;  %28088 = vmatprep.subr.mxu1 %v35908_v40 }
 0xc57   : > { %28089 = vmatpush3.msra.mxu1 %v11665_v25  ;;  %28090 = vmatprep.mubr.msk.f32.mxu1 %vm30009_vm1, %v35908_v40  ;;  %v29436_v25 = vpop.eup %29435 }
 0xc58   : > { %v11817_v22 = vpop.permute.xlu0 %11816  ;;  %28098 = vmatprep.subr.mxu1 %v35908_v40  ;;  %v11275_v58 = vmul.f32 %v29436_v25, %v32437_v49  ;;  %v29438_v49 = vpop.eup %29437 }
 0xc59   : > { %v11279_v17 = vmul.f32 %v29438_v49, %v32451_v24  ;;  %v860_v49 = vld [vmem:[%s35689_s8] sm:$0x3] }
 0xc5a   : > { %28091 = vmatmul.mubr.msk.f32.vlgmr.msra.gmra.mxu1 %vm1344_vm2, %v11263_v51 }
 0xc5b   : > { %28099 = vmatpush3.msra.mxu1 %v11817_v22  ;;  %28100 = vmatprep.mubr.msk.f32.mxu1 %vm30009_vm1, %v35908_v40 }
 0xc5c   : > { %v11969_v59 = vpop.permute.xlu0 %11968  ;;  %28108 = vmatprep.subr.mxu1 %v35908_v40 }
 0xc5e   : > { %28101 = vmatmul.mubr.msk.f32.vlgmr.msra.gmra.mxu1 %vm1344_vm2, %v11267_v52  ;;  %v29440_v44 = vpop.eup %29439 }
 0xc5f   : > { %28109 = vmatpush3.msra.mxu1 %v11969_v59  ;;  %28110 = vmatprep.mubr.msk.f32.mxu1 %vm30009_vm1, %v35908_v40  ;;  %v11283_v29 = vmul.f32 %v29440_v44, %v32488_v39  ;;  %v36019_v44 = vld [vmem:[#allocation20_spill] sm:$0xff] }
 0xc60   : > { %v12121_v7 = vpop.permute.xlu0 %12120  ;;  %28118 = vmatprep.subr.mxu1 %v35908_v40 }
 0xc62   : > { %28111 = vmatmul.mubr.msk.f32.vlgmr.msra.gmra.mxu1 %vm1344_vm2, %v11271_v45 }
 0xc63   : > { %28119 = vmatpush3.msra.mxu1 %v12121_v7  ;;  %28120 = vmatprep.mubr.msk.f32.mxu1 %vm30009_vm1, %v35908_v40 }
 0xc64   : > { %28128 = vmatprep.subr.mxu1 %v35908_v40 }
 0xc66   : > { %28121 = vmatmul.mubr.msk.f32.vlgmr.msra.gmra.mxu1 %vm1344_vm2, %v11275_v58 }
 0xc67   : > { %28130 = vmatprep.mubr.msk.f32.mxu1 %vm30009_vm1, %v35908_v40 }
 0xcab   : > { %v11356_v2 = vpop.f32.mrf.mxu0 }
 0xcac   : > { %v11230_v56 = vpop.xlane.xlu0 %11229 }
 0xcad   : > { %29441 = vrcp.f32 %v11230_v56  ;;  %v28067_v13 = vpop.f32.mrf.mxu0 }
 0xcb0   : > { %v11236_v31 = vpop.xlane.xlu0 %11235 }
 0xcb1   : > { %29443 = vrcp.f32 %v11236_v31 }
 0xcb4   : > { %v11242_v9 = vpop.xlane.xlu0 %11241 }
 0xcb5   : > { %29445 = vrcp.f32 %v11242_v9 }
 0xcb8   : > { %v11248_v34 = vpop.xlane.xlu1 %11247  ;;  %v12273_v8 = vpop.permute.xlu0 %12272 }
 0xcb9   : > { %29447 = vrcp.f32 %v11248_v34  ;;  %28129 = vmatpush3.msra.mxu1 %v12273_v8  ;;  %v36018_v34 = vld [vmem:[#allocation24_spill] sm:$0xff] }
 0xcba   : > { %v29442_v57 = vpop.eup %29441  ;;  %28131 = vmatmul.mubr.msk.f32.vlgmr.msra.gmra.mxu1 %vm1344_vm2, %v11279_v17  ;;  %28138 = vmatprep.subr.mxu1 %v35908_v40  ;;  %v36017_v17 = vld [vmem:[#allocation55_spill] sm:$0xff] }
 0xcbb   : > { %v11269_v47 = vmul.f32 %v29442_v57, %v32537_v38  ;;  %28140 = vmatprep.mubr.msk.f32.mxu1 %vm30009_vm1, %v35908_v40  ;;  %v6901_v8 = vadd.f32 %v36018_v34, %v36017_v17  ;;  %v32639_v57 = vrot.slane %v860_v49, %v36019_v44  ;;  %v29806_v17 = vld [vmem:[%s30246_s6 + $0x20] sm:$0xff] }
 0xcbc   : > { %v12425_v11 = vpop.permute.xlu0 %12424  ;;  %v12349_v3 = vpop.permute.xlu1 %12348 }
 0xcbd   : > { %28106 = vmatmul.mubr.msk.f32.vlgmr.msra.gmra.mxu0 %vm1344_vm2, %v11269_v47  ;;  %28139 = vmatpush3.msra.mxu1 %v12425_v11 }
 0xcbe   : > { %v29444_v24 = vpop.eup %29443  ;;  %28114 = vmatpush3.msra.mxu0 %v12045_v27  ;;  %28141 = vmatmul.mubr.msk.f32.vlgmr.msra.gmra.mxu1 %vm1344_vm2, %v11283_v29  ;;  %v9828_v29 = vadd.f32 %v32385_v48, %v6901_v8  ;;  %v36022_v48 = vld [vmem:[#allocation62_spill] sm:$0xff] }
 0xcbf   : > { %v11273_v37 = vmul.f32 %v29444_v24, %v32545_v62  ;;  %28115 = vmatprep.mubr.msk.f32.mxu0 %vm30009_vm1, %v35908_v40  ;;  %28123 = vmatprep.subr.mxu0 %v35908_v40 }
 0xcc1   : > { %28116 = vmatmul.mubr.msk.f32.vlgmr.msra.gmra.mxu0 %vm1344_vm2, %v11273_v37 }
 0xcc2   : > { %v29446_v21 = vpop.eup %29445  ;;  %28124 = vmatpush3.msra.mxu0 %v12197_v10  ;;  %28125 = vmatprep.mubr.msk.f32.mxu0 %vm30009_vm1, %v35908_v40 }
 0xcc3   : > { %v11277_v39 = vmul.f32 %v29446_v21, %v32549_v46  ;;  %28133 = vmatprep.subr.mxu0 %v35908_v40 }
 0xcc5   : > { %28126 = vmatmul.mubr.msk.f32.vlgmr.msra.gmra.mxu0 %vm1344_vm2, %v11277_v39  ;;  %v29801_v39 = vld [vmem:[%s30246_s6 + $0x8] sm:$0xff] }
 0xcc6   : > { %v29448_v50 = vpop.eup %29447  ;;  %28134 = vmatpush3.msra.mxu0 %v12349_v3  ;;  %28135 = vmatprep.mubr.msk.f32.mxu0 %vm30009_vm1, %v35908_v40 }
 0xcc7   : > { %v11281_v38 = vmul.f32 %v29448_v50, %v32553_v60  ;;  %28143 = vmatprep.subr.mxu0 %v859_v20  ;;  %v29802_v50 = vld [vmem:[%s30246_s6] sm:$0xff] }
 0xcc9   : > { %v11508_v42 = vpop.f32.mrf.mxu0  ;;  %28136 = vmatmul.mubr.msk.f32.vlgmr.msra.gmra.mxu0 %vm1344_vm2, %v11281_v38 }
 0xcca   : > { %28145 = vmatprep.mubr.msk.f32.mxu0 %vm1344_vm2, %v11356_v2  ;;  %28144 = vmatpush3.msra.mxu0 %v859_v20 }
 0xccb   : > { %v28077_v62 = vpop.f32.mrf.mxu0 }
 0xccc   : > { %v36023_v62 = vld [vmem:[#allocation23_spill] sm:$0xff] }
 0xccd   : > { %v11660_v30 = vpop.f32.mrf.mxu0 }
 0xccf   : > { %v28087_v46 = vpop.f32.mrf.mxu0 }
 0xcd5   : > { %v11812_v63 = vpop.f32.mrf.mxu0 }
 0xcd7   : > { %v28097_v61 = vpop.f32.mrf.mxu0 }
 0xce1   : > { %v11432_v18 = vpop.f32.mrf.mxu1 }
 0xce2   : > { %28146 = vmatmul.mubr.msk.f32.vlgmr.msra.gmra.mxu0 %vm1344_vm2, %v11432_v18 }
 0xce3   : > { %v28072_v43 = vpop.f32.mrf.mxu1  ;;  %28148 = vmatprep.mubr.msk.f32.mxu0 %vm1344_vm2, %v11508_v42 }
 0xce4   : > { %v36024_v43 = vld [vmem:[#allocation58_spill] sm:$0xff] }
 0xd16   : > { %v11584_v5 = vpop.f32.mrf.mxu1 }
 0xd17   : > { %28149 = vmatmul.mubr.msk.f32.gmra.mxu0 %vm1344_vm2, %v11584_v5  ;;  %v36025_v5 = vld [vmem:[#allocation27_spill] sm:$0xff] }
 0xd18   : > { %v28082_v60 = vpop.f32.mrf.mxu1  ;;  %28151 = vmatprep.mubr.msk.f32.mxu0 %vm1344_vm2, %v11660_v30  ;;  %v6911_v30 = vadd.f32 %v36023_v62, %v36022_v48 }
 0xd19   : > { %v6921_v60 = vadd.f32 %v36025_v5, %v36024_v43 }
 0xd1a   : > { %v11736_v12 = vpop.f32.mrf.mxu1 }
 0xd1b   : > { %28152 = vmatmul.mubr.msk.f32.gmra.mxu0 %vm1344_vm2, %v11736_v12 }
 0xd1c   : > { %v28092_v26 = vpop.f32.mrf.mxu1  ;;  %28154 = vmatprep.mubr.msk.f32.mxu0 %vm1344_vm2, %v11812_v63  ;;  %v9830_v63 = vadd.f32 %v32395_v28, %v6911_v30 }
 0xd1e   : > { %v11888_v6 = vpop.f32.mrf.mxu1 }
 0xd1f   : > { %28155 = vmatmul.mubr.msk.f32.gmra.mxu0 %vm1344_vm2, %v11888_v6 }
 0xd20   : > { %v28102_v51 = vpop.f32.mrf.mxu1 }
 0xd21   : > { %v9832_v51 = vadd.f32 %v32406_v55, %v6921_v60 }
 0xd22   : > { %v12040_v22 = vpop.f32.mrf.mxu1 }
 0xd24   : > { %v28112_v15 = vpop.f32.mrf.mxu1 }
 0xd26   : > { %v12192_v52 = vpop.f32.mrf.mxu1 }
 0xd28   : > { %v28122_v59 = vpop.f32.mrf.mxu1 }
 0xd29   : > { %v36027_v59 = vld [vmem:[#allocation63_spill] sm:$0xff] }
 0xd7a   : > { %v12344_v0 = vpop.f32.mrf.mxu1 }
 0xd7c   : > { %v28132_v45 = vpop.f32.mrf.mxu1 }
 0xd7d   : > { %v11964_v7 = vpop.f32.mrf.mxu0 }
 0xd7e   : > { %v12496_v25 = vpop.f32.mrf.mxu1  ;;  %28157 = vmatprep.mubr.msk.f32.mxu0 %vm1344_vm2, %v11964_v7  ;;  %v29804_v7 = vld [vmem:[%s30246_s6 + $0x10] sm:$0xff] }
 0xd7f   : > { %v28107_v58 = vpop.f32.mrf.mxu0  ;;  %28158 = vmatmul.mubr.msk.f32.gmra.mxu0 %vm1344_vm2, %v12040_v22  ;;  %v29803_v22 = vld [vmem:[%s30246_s6 + $0x18] sm:$0xff] }
 0xd80   : > { %v28142_v2 = vpop.f32.mrf.mxu1 }
 0xd81   : > { %v12116_v56 = vpop.f32.mrf.mxu0 }
 0xd82   : > { %28160 = vmatprep.mubr.msk.f32.mxu0 %vm1344_vm2, %v12116_v56 }
 0xd83   : > { %v28117_v27 = vpop.f32.mrf.mxu0  ;;  %28161 = vmatmul.mubr.msk.f32.gmra.mxu0 %vm1344_vm2, %v12192_v52 }
 0xd85   : > { %v12268_v13 = vpop.f32.mrf.mxu0 }
 0xd86   : > { %28163 = vmatprep.mubr.msk.f32.mxu0 %vm1344_vm2, %v12268_v13 }
 0xd87   : > { %v28127_v31 = vpop.f32.mrf.mxu0  ;;  %28164 = vmatmul.mubr.msk.f32.gmra.mxu0 %vm1344_vm2, %v12344_v0 }
 0xd89   : > { %v12420_v10 = vpop.f32.mrf.mxu0 }
 0xd8a   : > { %28166 = vmatprep.mubr.msk.f32.mxu0 %vm1344_vm2, %v12420_v10 }
 0xd8b   : > { %v28137_v9 = vpop.f32.mrf.mxu0  ;;  %28167 = vmatmul.mubr.msk.f32.gmra.mxu0 %vm1344_vm2, %v12496_v25 }
 0xda2   : > { %v28147_v47 = vpop.f32.mrf.mxu0 }
 0xda3   : > { %v12694_v11 = vadd.f32 %v28147_v47, %v32376_v14 }
 0xda4   : > { %v12614_v24 = vpop.f32.mrf.mxu0 }
 0xda5   : > { %v12714_v37 = vadd.f32 %v32639_v57, %v12694_v11  ;;  %v12693_v21 = vadd.f32 %v12614_v24, %v9828_v29  ;;  %v29807_v29 = vld [vmem:[%s30246_s6 + $0x38] sm:$0xff] }
 0xda7   : > { %v32645_v20 = vadd.f32 %v29801_v39, %v12714_v37  ;;  %v12713_v3 = vadd.f32 %v32639_v57, %v12693_v21  ;;  %v29808_v37 = vld [vmem:[%s30246_s6 + $0x30] sm:$0xff] }
 0xda9   : > { %36020 = vst [vmem:[#allocation22_spill] sm:$0xff] %v32645_v20  ;;  %v32649_v38 = vadd.f32 %v29802_v50, %v12713_v3  ;;  %v12748_v42 = vsel %vm578_vm0, %v32645_v20, 0.0  ;;  %v36034_v50 = vld [vmem:[#allocation60_spill] sm:$0xff] }
 0xdaa   : > { %12749 = vadd.xlane.f32.xlu0 %v12748_v42  ;;  %v36035_v42 = vld [vmem:[#allocation31_spill] sm:$0xff] }
 0xdab   : > { %36021 = vst [vmem:[#allocation28_spill] sm:$0xff] %v32649_v38  ;;  %v12745_v14 = vsel %vm578_vm0, %v32649_v38, 0.0 }
 0xdac   : > { %12746 = vadd.xlane.f32.xlu1 %v12745_v14  ;;  %v6941_v14 = vadd.f32 %v36035_v42, %v36034_v50 }
 0xdae   : > { %v9836_v62 = vadd.f32 %v32427_v41, %v6941_v14 }
 0xdd7   : > { %v28150_v46 = vpop.f32.mrf.mxu0 }
 0xdd8   : > { %v12696_v61 = vadd.f32 %v28150_v46, %v32391_v53  ;;  %v36028_v53 = vld [vmem:[#allocation32_spill] sm:$0xff] }
 0xdd9   : > { %v12624_v18 = vpop.f32.mrf.mxu0  ;;  %v6931_v0 = vadd.f32 %v36028_v53, %v36027_v59  ;;  %v29810_v53 = vld [vmem:[%s30246_s6 + $0x40] sm:$0xff] }
 0xdda   : > { %v12716_v12 = vadd.f32 %v32639_v57, %v12696_v61  ;;  %v12695_v26 = vadd.f32 %v12624_v18, %v9830_v63  ;;  %v36036_v63 = vld [vmem:[#allocation40_spill] sm:$0xff]  ;;  %v36037_v61 = vld [vmem:[#allocation59_spill] sm:$0xff] }
 0xddb   : > { %v28153_v6 = vpop.f32.mrf.mxu0  ;;  %v9834_v56 = vadd.f32 %v32416_v36, %v6931_v0  ;;  %v6951_v18 = vadd.f32 %v36037_v61, %v36036_v63 }
 0xddc   : > { %v32664_v15 = vadd.f32 %v29803_v22, %v12716_v12  ;;  %v12715_v52 = vadd.f32 %v32639_v57, %v12695_v26  ;;  %v12698_v28 = vadd.f32 %v28153_v6, %v32402_v16  ;;  %v29805_v16 = vld [vmem:[%s30246_s6 + $0x28] sm:$0xff]  ;;  %v36039_v22 = vld [vmem:[#allocation66_spill] sm:$0xff] }
 0xddd   : > { %v12634_v45 = vpop.f32.mrf.mxu0  ;;  %v9838_v12 = vadd.f32 %v32433_v23, %v6951_v18  ;;  %v29809_v26 = vld [vmem:[%s30246_s6 + $0x48] sm:$0xff]  ;;  %v29815_v18 = vld [vmem:[%s30246_s6 + $0x78] sm:$0xff] }
 0xdde   : > { %36026 = vst [vmem:[#allocation21_spill] sm:$0xff] %v32664_v15  ;;  %v32671_v25 = vadd.f32 %v29804_v7, %v12715_v52  ;;  %v12718_v58 = vadd.f32 %v32639_v57, %v12698_v28  ;;  %v12697_v2 = vadd.f32 %v12634_v45, %v9832_v51  ;;  %v12754_v55 = vsel %vm578_vm0, %v32664_v15, 0.0 }
 0xddf   : > { %12755 = vadd.xlane.f32.xlu1 %v12754_v55  ;;  %v28156_v27 = vpop.f32.mrf.mxu0  ;;  %v29811_v55 = vld [vmem:[%s30246_s6 + $0x58] sm:$0xff] }
 0xde0   : > { %36029 = vst [vmem:[#allocation26_spill] sm:$0xff] %v32671_v25  ;;  %v32678_v13 = vadd.f32 %v29805_v16, %v12718_v58  ;;  %v12717_v31 = vadd.f32 %v32639_v57, %v12697_v2  ;;  %v12700_v10 = vadd.f32 %v28156_v27, %v32412_v33  ;;  %v12751_v9 = vsel %vm578_vm0, %v32671_v25, 0.0 }
 0xde1   : > { %12752 = vadd.xlane.f32.xlu0 %v12751_v9  ;;  %v12644_v49 = vpop.f32.mrf.mxu0  ;;  %v36044_v9 = vld [vmem:[#allocation61_spill] sm:$0xff] }
 0xde2   : > { %36030 = vst [vmem:[#allocation25_spill] sm:$0xff] %v32678_v13  ;;  %v32685_v34 = vadd.f32 %v29806_v17, %v12717_v31  ;;  %v12720_v36 = vadd.f32 %v32639_v57, %v12700_v10  ;;  %v12699_v8 = vadd.f32 %v12644_v49, %v9834_v56  ;;  %v12760_v47 = vsel %vm578_vm0, %v32678_v13, 0.0  ;;  %v36043_v10 = vld [vmem:[#allocation68_spill] sm:$0xff] }
 0xde3   : > { %12761 = vadd.xlane.f32.xlu1 %v12760_v47  ;;  %v6971_v49 = vadd.f32 %v36044_v9, %v36043_v10 }
 0xde4   : > { %36031 = vst [vmem:[#allocation30_spill] sm:$0xff] %v32685_v34  ;;  %v32691_v11 = vadd.f32 %v29807_v29, %v12720_v36  ;;  %v12719_v33 = vadd.f32 %v32639_v57, %v12699_v8  ;;  %v12757_v24 = vsel %vm578_vm0, %v32685_v34, 0.0  ;;  %v29812_v36 = vld [vmem:[%s30246_s6 + $0x50] sm:$0xff] }
 0xde5   : > { %12758 = vadd.xlane.f32.xlu0 %v12757_v24 }
 0xde6   : > { %36032 = vst [vmem:[#allocation29_spill] sm:$0xff] %v32691_v11  ;;  %v32697_v21 = vadd.f32 %v29808_v37, %v12719_v33  ;;  %v12766_v39 = vsel %vm578_vm0, %v32691_v11, 0.0 }
 0xde7   : > { %12767 = vadd.xlane.f32.xlu1 %v12766_v39  ;;  %v29813_v39 = vld [vmem:[%s30246_s6 + $0x68] sm:$0xff] }
 0xde8   : > { %36033 = vst [vmem:[#allocation33_spill] sm:$0xff] %v32697_v21  ;;  %v12763_v3 = vsel %vm578_vm0, %v32697_v21, 0.0 }
 0xde9   : > { %12764 = vadd.xlane.f32.xlu0 %v12763_v3 }
 0xe33   : > { %v12750_v59 = vpop.xlane.xlu0 %12749 }
 0xe34   : > { %v12794_v17 = vmul.f32 0.03125, %v12750_v59 }
 0xe3f   : > { %v28159_v48 = vpop.f32.mrf.mxu0 }
 0xe40   : > { %v12702_v30 = vadd.f32 %v28159_v48, %v32423_v4  ;;  %v36040_v4 = vld [vmem:[#allocation56_spill] sm:$0xff]  ;;  %v32749_v48 = vsub.f32 %v32645_v20, %v12794_v17 }
 0xe41   : > { %v12654_v46 = vpop.f32.mrf.mxu0  ;;  %v6961_v52 = vadd.f32 %v36040_v4, %v36039_v22 }
 0xe42   : > { %v12722_v43 = vadd.f32 %v32639_v57, %v12702_v30  ;;  %v12701_v5 = vadd.f32 %v12654_v46, %v9836_v62  ;;  %v29814_v62 = vld [vmem:[%s30246_s6 + $0x60] sm:$0xff] }
 0xe43   : > { %v28162_v60 = vpop.f32.mrf.mxu0  ;;  %v9840_v58 = vadd.f32 %v32443_v1, %v6961_v52 }
 0xe44   : > { %v32712_v6 = vadd.f32 %v29809_v26, %v12722_v43  ;;  %v12721_v51 = vadd.f32 %v32639_v57, %v12701_v5  ;;  %v12704_v41 = vadd.f32 %v28162_v60, %v32431_v54  ;;  %v12747_v54 = vpop.xlane.xlu1 %12746 }
 0xe45   : > { %v12664_v28 = vpop.f32.mrf.mxu0  ;;  %v12793_v24 = vmul.f32 0.03125, %v12747_v54 }
 0xe46   : > { %36038 = vst [vmem:[#allocation34_spill] sm:$0xff] %v32712_v6  ;;  %v32719_v0 = vadd.f32 %v29810_v53, %v12721_v51  ;;  %v12724_v45 = vadd.f32 %v32639_v57, %v12704_v41  ;;  %v12703_v23 = vadd.f32 %v12664_v28, %v9838_v12  ;;  %v12772_v7 = vsel %vm578_vm0, %v32712_v6, 0.0  ;;  %v29816_v12 = vld [vmem:[%s30246_s6 + $0x70] sm:$0xff]  ;;  %s30013_s6 = smov [#allocation10]  }
 0xe47   : > { %12773 = vadd.xlane.f32.xlu1 %v12772_v7  ;;  %v28165_v2 = vpop.f32.mrf.mxu0  ;;  %v12826_v41 = vmul.f32 %v32749_v48, %v32749_v48  ;;  %s29930_s16 = sshll.u32 %s30013_s6, 4  ;;  %s29931_s16 = int_to_ptr.vmem [resolvable:$false] %s29930_s16 }
 0xe48   : > { %36041 = vst [vmem:[#allocation35_spill] sm:$0xff] %v32719_v0  ;;  %v32726_v56 = vadd.f32 %v29811_v55, %v12724_v45  ;;  %v12723_v27 = vadd.f32 %v32639_v57, %v12703_v23  ;;  %v12706_v16 = vadd.f32 %v28165_v2, %v32439_v19  ;;  %v12769_v31 = vsel %vm578_vm0, %v32719_v0, 0.0  ;;  %p29933_p13 = scmp.lt.s32.totalorder %s35633_s25, %s29931_s16 }
 0xe49   : > { %12770 = vadd.xlane.f32.xlu0 %v12769_v31  ;;  %v12674_v1 = vpop.f32.mrf.mxu0  ;;  %v9842_v19 = vadd.f32 %v32449_v35, %v6971_v49  ;;  %v12844_v4 = vsel %vm578_vm0, %v12826_v41, 0.0 }
 0xe4a   : > { %36042 = vst [vmem:[#allocation36_spill] sm:$0xff] %v32726_v56  ;;  %v32735_v8 = vadd.f32 %v29812_v36, %v12723_v27  ;;  %v12726_v47 = vadd.f32 %v32639_v57, %v12706_v16  ;;  %v12705_v29 = vadd.f32 %v12674_v1, %v9840_v58  ;;  %v12778_v33 = vsel %vm578_vm0, %v32726_v56, 0.0 }
 0xe4b   : > { %12779 = vadd.xlane.f32.xlu1 %v12778_v33  ;;  %v28168_v37 = vpop.f32.mrf.mxu0 }
 0xe4c   : > { %36045 = vst [vmem:[#allocation38_spill] sm:$0xff] %v32735_v8  ;;  %v32742_v3 = vadd.f32 %v29813_v39, %v12726_v47  ;;  %v12725_v50 = vadd.f32 %v32639_v57, %v12705_v29  ;;  %v12708_v42 = vadd.f32 %v28168_v37, %v32447_v32  ;;  %v12775_v14 = vsel %vm578_vm0, %v32735_v8, 0.0 }
 0xe4d   : > { %12776 = vadd.xlane.f32.xlu0 %v12775_v14  ;;  %v12684_v35 = vpop.f32.mrf.mxu0  ;;  %v32758_v32 = vsub.f32 %v32649_v38, %v12793_v24  ;;  %v26198_v14 = vld [vmem:[%s35686_s5 + $0x38] sm:$0xff] }
 0xe4e   : > { %36046 = vst [vmem:[#allocation37_spill] sm:$0xff] %v32742_v3  ;;  %v32752_v30 = vadd.f32 %v29814_v62, %v12725_v50  ;;  %v12728_v46 = vadd.f32 %v32639_v57, %v12708_v42  ;;  %v12707_v63 = vadd.f32 %v12684_v35, %v9842_v19  ;;  %v12784_v61 = vsel %vm578_vm0, %v32742_v3, 0.0  ;;  %v26194_v42 = vld [vmem:[%s35685_s4 + $0x38] sm:$0xff]  ;;  %v26193_v35 = vld [vmem:[%s35685_s4 + $0x30] sm:$0xff]  ;;  %28201 = vmatprep.subr.mxu0 %v26198_v14 }
 0xe4f   : > { %12785 = vadd.xlane.f32.xlu1 %v12784_v61  ;;  %28169 = vmatprep.subr.mxu1 %v26194_v42  ;;  %v26197_v62 = vld [vmem:[%s35686_s5 + $0x30] sm:$0xff] }
 0xe50   : > { %36047 = vst [vmem:[#allocation64_spill] sm:$0xff] %v32752_v30  ;;  %v32761_v43 = vadd.f32 %v29815_v18, %v12728_v46  ;;  %v12727_v5 = vadd.f32 %v32639_v57, %v12707_v63  ;;  %v12781_v60 = vsel %vm578_vm0, %v32752_v30, 0.0  ;;  %v12825_v57 = vmul.f32 %v32758_v32, %v32758_v32  ;;  %28170 = vmatpush3.msra.mxu1 %v26194_v42  ;;  %v26192_v18 = vld [vmem:[%s35685_s4 + $0x28] sm:$0xff] }
 0xe51   : > { %12782 = vadd.xlane.f32.xlu0 %v12781_v60  ;;  %28202 = vmatpush3.msra.mxu0 %v26198_v14  ;;  %v26191_v60 = vld [vmem:[%s35685_s4 + $0x20] sm:$0xff] }
 0xe52   : > { %36048 = vst [vmem:[#allocation57_spill] sm:$0xff] %v32761_v43  ;;  %v32767_v26 = vadd.f32 %v29816_v12, %v12727_v5  ;;  %v12790_v51 = vsel %vm578_vm0, %v32761_v43, 0.0  ;;  %v12841_v52 = vsel %vm578_vm0, %v12825_v57, 0.0  ;;  %28171 = vmatprep.subr.mxu1 %v26193_v35  ;;  %28203 = vmatprep.subr.mxu0 %v26197_v62  ;;  %v26196_v5 = vld [vmem:[%s35686_s5 + $0x28] sm:$0xff]  ;;  %v26195_v12 = vld [vmem:[%s35686_s5 + $0x20] sm:$0xff] }
 0xe53   : > { %12791 = vadd.xlane.f32.xlu1 %v12790_v51  ;;  %28172 = vmatpush3.msra.mxu1 %v26193_v35 }
 0xe54   : > { %36049 = vst [vmem:[#allocation65_spill] sm:$0xff] %v32767_v26  ;;  %v12787_v22 = vsel %vm578_vm0, %v32767_v26, 0.0  ;;  %28204 = vmatpush3.msra.mxu0 %v26197_v62  ;;  %28173 = vmatprep.subr.mxu1 %v26192_v18 }
 0xe55   : > { %12788 = vadd.xlane.f32.xlu0 %v12787_v22  ;;  %28205 = vmatprep.subr.mxu0 %v26196_v5 }
 0xe56   : > { %28174 = vmatpush3.msra.mxu1 %v26192_v18  ;;  %28206 = vmatpush3.msra.mxu0 %v26196_v5 }
 0xe57   : > { %12845 = vadd.xlane.f32.xlu1 %v12844_v4  ;;  %28175 = vmatprep.subr.mxu1 %v26191_v60 }
 0xe58   : > { %28207 = vmatprep.subr.mxu0 %v26195_v12  ;;  %28176 = vmatpush3.msra.mxu1 %v26191_v60 }
 0xe59   : > { %12842 = vadd.xlane.f32.xlu0 %v12841_v52  ;;  %28208 = vmatpush3.msra.mxu0 %v26195_v12 }
 0xe5a   : > { %28265 = vmatprep.subr.mxu0 %v35908_v40 }
 0xe68   : > { %v12756_v28 = vpop.xlane.xlu1 %12755 }
 0xe69   : > { %v12796_v59 = vmul.f32 0.03125, %v12756_v28 }
 0xe6a   : > { %v12753_v53 = vpop.xlane.xlu0 %12752 }
 0xe6b   : > { %v32780_v45 = vsub.f32 %v32664_v15, %v12796_v59  ;;  %v12795_v23 = vmul.f32 0.03125, %v12753_v53 }
 0xe6c   : > { %v12762_v7 = vpop.xlane.xlu1 %12761 }
 0xe6d   : > { %v32783_v58 = vsub.f32 %v32671_v25, %v12795_v23  ;;  %v12798_v2 = vmul.f32 0.03125, %v12762_v7  ;;  %v12828_v54 = vmul.f32 %v32780_v45, %v32780_v45 }
 0xe6e   : > { %v12759_v55 = vpop.xlane.xlu0 %12758 }
 0xe6f   : > { %v32788_v27 = vsub.f32 %v32678_v13, %v12798_v2  ;;  %v12797_v16 = vmul.f32 0.03125, %v12759_v55  ;;  %v12850_v31 = vsel %vm578_vm0, %v12828_v54, 0.0  ;;  %v12827_v10 = vmul.f32 %v32783_v58, %v32783_v58 }
 0xe70   : > { %v12768_v9 = vpop.xlane.xlu1 %12767  ;;  %12851 = vadd.xlane.f32.xlu1 %v12850_v31 }
 0xe71   : > { %v32794_v49 = vsub.f32 %v32685_v34, %v12797_v16  ;;  %v12800_v17 = vmul.f32 0.03125, %v12768_v9  ;;  %v12847_v1 = vsel %vm578_vm0, %v12827_v10, 0.0  ;;  %v12830_v36 = vmul.f32 %v32788_v27, %v32788_v27 }
 0xe72   : > { %12848 = vadd.xlane.f32.xlu0 %v12847_v1  ;;  %v12765_v47 = vpop.xlane.xlu0 %12764 }
 0xe73   : > { %v32800_v29 = vsub.f32 %v32691_v11, %v12800_v17  ;;  %v12799_v33 = vmul.f32 0.03125, %v12765_v47  ;;  %v12856_v19 = vsel %vm578_vm0, %v12830_v36, 0.0  ;;  %v12829_v24 = vmul.f32 %v32794_v49, %v32794_v49 }
 0xe74   : > { %12857 = vadd.xlane.f32.xlu1 %v12856_v19 }
 0xe75   : > { %v32806_v37 = vsub.f32 %v32697_v21, %v12799_v33  ;;  %v12853_v39 = vsel %vm578_vm0, %v12829_v24, 0.0  ;;  %v12832_v50 = vmul.f32 %v32800_v29, %v32800_v29 }
 0xe76   : > { %12854 = vadd.xlane.f32.xlu0 %v12853_v39 }
 0xe77   : > { %v12862_v46 = vsel %vm578_vm0, %v12832_v50, 0.0  ;;  %v12831_v63 = vmul.f32 %v32806_v37, %v32806_v37 }
 0xe78   : > { %12863 = vadd.xlane.f32.xlu1 %v12862_v46 }
 0xe79   : > { %v12859_v61 = vsel %vm578_vm0, %v12831_v63, 0.0 }
 0xe7a   : > { %12860 = vadd.xlane.f32.xlu0 %v12859_v61 }
 0xed0   : > { %v12774_v51 = vpop.xlane.xlu1 %12773 }
 0xed1   : > { %v12802_v41 = vmul.f32 0.03125, %v12774_v51 }
 0xed2   : > { %v12771_v22 = vpop.xlane.xlu0 %12770 }
 0xed3   : > { %v32841_v57 = vsub.f32 %v32712_v6, %v12802_v41  ;;  %v12801_v4 = vmul.f32 0.03125, %v12771_v22 }
 0xed4   : > { %v12780_v52 = vpop.xlane.xlu1 %12779 }
 0xed5   : > { %v32844_v28 = vsub.f32 %v32719_v0, %v12801_v4  ;;  %v12804_v59 = vmul.f32 0.03125, %v12780_v52  ;;  %v12834_v53 = vmul.f32 %v32841_v57, %v32841_v57 }
 0xed6   : > { %v12777_v23 = vpop.xlane.xlu0 %12776 }
 0xed7   : > { %v32849_v7 = vsub.f32 %v32726_v56, %v12804_v59  ;;  %v12803_v2 = vmul.f32 0.03125, %v12777_v23  ;;  %v12868_v54 = vsel %vm578_vm0, %v12834_v53, 0.0  ;;  %v12833_v55 = vmul.f32 %v32844_v28, %v32844_v28 }
 0xed8   : > { %v12786_v16 = vpop.xlane.xlu1 %12785  ;;  %12869 = vadd.xlane.f32.xlu1 %v12868_v54 }
 0xed9   : > { %v32855_v31 = vsub.f32 %v32735_v8, %v12803_v2  ;;  %v12806_v10 = vmul.f32 0.03125, %v12786_v16  ;;  %v12865_v9 = vsel %vm578_vm0, %v12833_v55, 0.0  ;;  %v12836_v17 = vmul.f32 %v32849_v7, %v32849_v7  ;;  %v36050_v2 = vld [vmem:[#allocation19_spill] sm:$0xff] }
 0xeda   : > { %12866 = vadd.xlane.f32.xlu0 %v12865_v9  ;;  %v12783_v1 = vpop.xlane.xlu0 %12782  ;;  %v32889_v54 = vsub.s32 1, %v36050_v2  ;;  %v29817_v55 = vld [vmem:[%s35683_s2] sm:$0x3] }
 0xedb   : > { %v32861_v36 = vsub.f32 %v32742_v3, %v12806_v10  ;;  %v12805_v47 = vmul.f32 0.03125, %v12783_v1  ;;  %v12874_v33 = vsel %vm578_vm0, %v12836_v17, 0.0  ;;  %v12835_v19 = vmul.f32 %v32855_v31, %v32855_v31  ;;  %v29818_v1 = vld [vmem:[%s35684_s3] sm:$0x3] }
 0xedc   : > { %v12792_v24 = vpop.xlane.xlu1 %12791  ;;  %12875 = vadd.xlane.f32.xlu1 %v12874_v33  ;;  %36051 = vst [vmem:[#allocation47_spill] sm:$0xff] %v32889_v54  ;;  %v32895_v16 = vrot.slane %v29817_v55, %v32889_v54 }
 0xedd   : > { %v32867_v39 = vsub.f32 %v32752_v30, %v12805_v47  ;;  %v12808_v50 = vmul.f32 0.03125, %v12792_v24  ;;  %v12871_v42 = vsel %vm578_vm0, %v12835_v19, 0.0  ;;  %v12838_v14 = vmul.f32 %v32861_v36, %v32861_v36 }
 0xede   : > { %12872 = vadd.xlane.f32.xlu0 %v12871_v42  ;;  %v12789_v35 = vpop.xlane.xlu0 %12788  ;;  %v32902_v47 = vrot.slane %v29818_v1, %v32889_v54 }
 0xedf   : > { %v32873_v62 = vsub.f32 %v32761_v43, %v12808_v50  ;;  %v12807_v46 = vmul.f32 0.03125, %v12789_v35  ;;  %v12880_v63 = vsel %vm578_vm0, %v12838_v14, 0.0  ;;  %v12837_v61 = vmul.f32 %v32867_v39, %v32867_v39 }
 0xee0   : > { %12881 = vadd.xlane.f32.xlu1 %v12880_v63  ;;  %v12846_v18 = vpop.xlane.xlu1 %12845 }
 0xee1   : > { %v32879_v5 = vsub.f32 %v32767_v26, %v12807_v46  ;;  %v12890_v60 = vmul.f32 0.03125, %v12846_v18  ;;  %v12877_v12 = vsel %vm578_vm0, %v12837_v61, 0.0  ;;  %v12840_v51 = vmul.f32 %v32873_v62, %v32873_v62  ;;  %v32912_v46 = vld [vmem:[%s35682_s1] sm:$0xff] }
 0xee2   : > { %12878 = vadd.xlane.f32.xlu0 %v12877_v12  ;;  %v12843_v41 = vpop.xlane.xlu0 %12842 }
 0xee3   : > { %v12906_v22 = vadd.f32 1e-05, %v12890_v60  ;;  %v12889_v4 = vmul.f32 0.03125, %v12843_v41  ;;  %v12886_v52 = vsel %vm578_vm0, %v12840_v51, 0.0  ;;  %v12839_v59 = vmul.f32 %v32879_v5, %v32879_v5 }
 0xee4   : > { %12887 = vadd.xlane.f32.xlu1 %v12886_v52 }
 0xee5   : > { %29449 = vrsqrt.f32 %v12906_v22  ;;  %v12905_v53 = vadd.f32 1e-05, %v12889_v4  ;;  %v12883_v23 = vsel %vm578_vm0, %v12839_v59, 0.0 }
 0xee6   : > { %12884 = vadd.xlane.f32.xlu0 %v12883_v23 }
 0xee7   : > { %29451 = vrsqrt.f32 %v12905_v53 }
 0xef2   : > { %v29450_v10 = vpop.eup %29449 }
 0xef3   : > { %v12938_v9 = vmul.f32 %v29450_v10, %v32749_v48 }
 0xef4   : > { %v29452_v17 = vpop.eup %29451 }
 0xef5   : > { %v12958_v33 = vmul.f32 %v32895_v16, %v12938_v9  ;;  %v12937_v19 = vmul.f32 %v29452_v17, %v32758_v32  ;;  %v13023_v9 = vld [vmem:[#allocation5 + $0x38] sm:$0xff]  ;;  %v13022_v17 = vld [vmem:[#allocation5 + $0x30] sm:$0xff] }
 0xef6   : > { %28233 = vmatprep.subr.mxu1 %v13023_v9 }
 0xef7   : > { %v12957_v24 = vmul.f32 %v32895_v16, %v12937_v19  ;;  %v12978_v50 = vadd.f32 %v32902_v47, %v12958_v33  ;;  %v13021_v33 = vld [vmem:[#allocation5 + $0x28] sm:$0xff] }
 0xef9   : > { %v12852_v42 = vpop.xlane.xlu1 %12851  ;;  %v12977_v14 = vadd.f32 %v32902_v47, %v12957_v24  ;;  %v32918_v32 = vadd.f32 %v32912_v46, %v12978_v50  ;;  %v13020_v24 = vld [vmem:[#allocation5 + $0x20] sm:$0xff] }
 0xefa   : > { %v12892_v48 = vmul.f32 0.03125, %v12852_v42 }
 0xefb   : > { %v12849_v35 = vpop.xlane.xlu0 %12848  ;;  %v32915_v63 = vadd.f32 %v32912_v46, %v12977_v14 }
 0xefc   : > { %v12908_v61 = vadd.f32 1e-05, %v12892_v48  ;;  %v12891_v18 = vmul.f32 0.03125, %v12849_v35 }
 0xefd   : > { %v12858_v60 = vpop.xlane.xlu1 %12857  ;;  %28177 = vmatprep.mubr.msk.f32.mxu1 %vm578_vm0, %v32915_v63  ;;  %28209 = vmatprep.mubr.msk.f32.mxu0 %vm578_vm0, %v32915_v63 }
 0xefe   : > { %29453 = vrsqrt.f32 %v12908_v61  ;;  %v12907_v12 = vadd.f32 1e-05, %v12891_v18  ;;  %v12894_v51 = vmul.f32 0.03125, %v12858_v60  ;;  %28178 = vmatmul.mubr.msk.f32.vlgmr.msra.gmra.mxu1 %vm578_vm0, %v32918_v32  ;;  %28210 = vmatmul.mubr.msk.f32.vlgmr.msra.gmra.mxu0 %vm578_vm0, %v32918_v32 }
 0xeff   : > { %v12855_v41 = vpop.xlane.xlu0 %12854  ;;  %28234 = vmatpush3.msra.mxu1 %v13023_v9 }
 0xf00   : > { %29455 = vrsqrt.f32 %v12907_v12  ;;  %v12910_v22 = vadd.f32 1e-05, %v12894_v51  ;;  %v12893_v4 = vmul.f32 0.03125, %v12855_v41  ;;  %28235 = vmatprep.subr.mxu1 %v13022_v17 }
 0xf01   : > { %v12864_v52 = vpop.xlane.xlu1 %12863  ;;  %28236 = vmatpush3.msra.mxu1 %v13022_v17 }
 0xf02   : > { %29457 = vrsqrt.f32 %v12910_v22  ;;  %v12909_v59 = vadd.f32 1e-05, %v12893_v4  ;;  %v12896_v53 = vmul.f32 0.03125, %v12864_v52  ;;  %28237 = vmatprep.subr.mxu1 %v13021_v33 }
 0xf03   : > { %v12861_v23 = vpop.xlane.xlu0 %12860  ;;  %28238 = vmatpush3.msra.mxu1 %v13021_v33 }
 0xf04   : > { %29459 = vrsqrt.f32 %v12909_v59  ;;  %v12912_v2 = vadd.f32 1e-05, %v12896_v53  ;;  %v12895_v55 = vmul.f32 0.03125, %v12861_v23  ;;  %28239 = vmatprep.subr.mxu1 %v13020_v24 }
 0xf05   : > { %28240 = vmatpush3.msra.mxu1 %v13020_v24 }
 0xf06   : > { %29461 = vrsqrt.f32 %v12912_v2  ;;  %v12911_v10 = vadd.f32 1e-05, %v12895_v55  ;;  %28275 = vmatprep.subr.mxu1 %v35908_v40 }
 0xf08   : > { %29463 = vrsqrt.f32 %v12911_v10 }
 0xf0b   : > { %v29454_v1 = vpop.eup %29453 }
 0xf0c   : > { %v12940_v19 = vmul.f32 %v29454_v1, %v32780_v45 }
 0xf0d   : > { %v29456_v50 = vpop.eup %29455 }
 0xf0e   : > { %v12939_v42 = vmul.f32 %v29456_v50, %v32783_v58  ;;  %v12960_v14 = vmul.f32 %v32895_v16, %v12940_v19 }
 0xf0f   : > { %v29458_v48 = vpop.eup %29457 }
 0xf10   : > { %v12942_v35 = vmul.f32 %v29458_v48, %v32788_v27  ;;  %v12959_v61 = vmul.f32 %v32895_v16, %v12939_v42  ;;  %v12980_v45 = vadd.f32 %v32902_v47, %v12960_v14 }
 0xf11   : > { %v29460_v18 = vpop.eup %29459 }
 0xf12   : > { %v12979_v60 = vadd.f32 %v32902_v47, %v12959_v61  ;;  %v12941_v12 = vmul.f32 %v29460_v18, %v32794_v49  ;;  %v12962_v58 = vmul.f32 %v32895_v16, %v12942_v35  ;;  %v32944_v52 = vadd.f32 %v32912_v46, %v12980_v45 }
 0xf13   : > { %v29462_v51 = vpop.eup %29461 }
 0xf14   : > { %v12944_v41 = vmul.f32 %v29462_v51, %v32800_v29  ;;  %v32940_v22 = vadd.f32 %v32912_v46, %v12979_v60  ;;  %v12961_v27 = vmul.f32 %v32895_v16, %v12941_v12  ;;  %v12982_v59 = vadd.f32 %v32902_v47, %v12962_v58 }
 0xf15   : > { %v29464_v4 = vpop.eup %29463 }
 0xf16   : > { %28180 = vmatprep.mubr.msk.f32.mxu1 %vm578_vm0, %v32940_v22  ;;  %28212 = vmatprep.mubr.msk.f32.mxu0 %vm578_vm0, %v32940_v22  ;;  %v12981_v49 = vadd.f32 %v32902_v47, %v12961_v27  ;;  %v12943_v29 = vmul.f32 %v29464_v4, %v32806_v37  ;;  %v12964_v53 = vmul.f32 %v32895_v16, %v12944_v41 }
 0xf17   : > { %28181 = vmatmul.mubr.msk.f32.gmra.mxu1 %vm578_vm0, %v32944_v52  ;;  %28213 = vmatmul.mubr.msk.f32.gmra.mxu0 %vm578_vm0, %v32944_v52  ;;  %v32963_v55 = vadd.f32 %v32912_v46, %v12982_v59 }
 0xf18   : > { %v32959_v23 = vadd.f32 %v32912_v46, %v12981_v49  ;;  %v12963_v2 = vmul.f32 %v32895_v16, %v12943_v29  ;;  %v12984_v10 = vadd.f32 %v32902_v47, %v12964_v53 }
 0xf1a   : > { %28183 = vmatprep.mubr.msk.f32.mxu1 %vm578_vm0, %v32959_v23  ;;  %28215 = vmatprep.mubr.msk.f32.mxu0 %vm578_vm0, %v32959_v23  ;;  %v12983_v37 = vadd.f32 %v32902_v47, %v12963_v2  ;;  %v32979_v17 = vadd.f32 %v32912_v46, %v12984_v10 }
 0xf1b   : > { %28184 = vmatmul.mubr.msk.f32.gmra.mxu1 %vm578_vm0, %v32963_v55  ;;  %28216 = vmatmul.mubr.msk.f32.gmra.mxu0 %vm578_vm0, %v32963_v55 }
 0xf1c   : > { %v32976_v9 = vadd.f32 %v32912_v46, %v12983_v37 }
 0xf1e   : > { %28186 = vmatprep.mubr.msk.f32.mxu1 %vm578_vm0, %v32976_v9  ;;  %28218 = vmatprep.mubr.msk.f32.mxu0 %vm578_vm0, %v32976_v9 }
 0xf1f   : > { %28187 = vmatmul.mubr.msk.f32.gmra.mxu1 %vm578_vm0, %v32979_v17  ;;  %28219 = vmatmul.mubr.msk.f32.gmra.mxu0 %vm578_vm0, %v32979_v17 }
 0xf61   : > { %v12870_v1 = vpop.xlane.xlu1 %12869 }
 0xf62   : > { %v12898_v33 = vmul.f32 0.03125, %v12870_v1 }
 0xf63   : > { %v12867_v19 = vpop.xlane.xlu0 %12866 }
 0xf64   : > { %v12914_v24 = vadd.f32 1e-05, %v12898_v33  ;;  %v12897_v50 = vmul.f32 0.03125, %v12867_v19 }
 0xf65   : > { %v12876_v42 = vpop.xlane.xlu1 %12875 }
 0xf66   : > { %29465 = vrsqrt.f32 %v12914_v24  ;;  %v12913_v14 = vadd.f32 1e-05, %v12897_v50  ;;  %v12900_v48 = vmul.f32 0.03125, %v12876_v42 }
 0xf67   : > { %v12873_v35 = vpop.xlane.xlu0 %12872 }
 0xf68   : > { %29467 = vrsqrt.f32 %v12913_v14  ;;  %v12916_v61 = vadd.f32 1e-05, %v12900_v48  ;;  %v12899_v18 = vmul.f32 0.03125, %v12873_v35 }
 0xf69   : > { %v12882_v45 = vpop.xlane.xlu1 %12881 }
 0xf6a   : > { %29469 = vrsqrt.f32 %v12916_v61  ;;  %v12915_v60 = vadd.f32 1e-05, %v12899_v18  ;;  %v12902_v12 = vmul.f32 0.03125, %v12882_v45 }
 0xf6b   : > { %v12879_v58 = vpop.xlane.xlu0 %12878 }
 0xf6c   : > { %29471 = vrsqrt.f32 %v12915_v60  ;;  %v12918_v51 = vadd.f32 1e-05, %v12902_v12  ;;  %v12901_v41 = vmul.f32 0.03125, %v12879_v58 }
 0xf6d   : > { %v12888_v27 = vpop.xlane.xlu1 %12887 }
 0xf6e   : > { %29473 = vrsqrt.f32 %v12918_v51  ;;  %v12917_v4 = vadd.f32 1e-05, %v12901_v41  ;;  %v12904_v59 = vmul.f32 0.03125, %v12888_v27 }
 0xf6f   : > { %v12885_v49 = vpop.xlane.xlu0 %12884 }
 0xf70   : > { %29475 = vrsqrt.f32 %v12917_v4  ;;  %v12920_v29 = vadd.f32 1e-05, %v12904_v59  ;;  %v12903_v53 = vmul.f32 0.03125, %v12885_v49 }
 0xf72   : > { %29477 = vrsqrt.f32 %v12920_v29  ;;  %v12919_v2 = vadd.f32 1e-05, %v12903_v53 }
 0xf73   : > { %v29466_v10 = vpop.eup %29465 }
 0xf74   : > { %v12946_v37 = vmul.f32 %v29466_v10, %v32841_v57  ;;  %29479 = vrsqrt.f32 %v12919_v2 }
 0xf75   : > { %v29468_v1 = vpop.eup %29467 }
 0xf76   : > { %v12945_v33 = vmul.f32 %v29468_v1, %v32844_v28  ;;  %v12966_v19 = vmul.f32 %v32895_v16, %v12946_v37 }
 0xf77   : > { %v29470_v24 = vpop.eup %29469 }
 0xf78   : > { %v12948_v50 = vmul.f32 %v29470_v24, %v32849_v7  ;;  %v12965_v42 = vmul.f32 %v32895_v16, %v12945_v33  ;;  %v12986_v48 = vadd.f32 %v32902_v47, %v12966_v19 }
 0xf79   : > { %v29472_v14 = vpop.eup %29471 }
 0xf7a   : > { %v12985_v35 = vadd.f32 %v32902_v47, %v12965_v42  ;;  %v12947_v61 = vmul.f32 %v29472_v14, %v32855_v31  ;;  %v12968_v57 = vmul.f32 %v32895_v16, %v12948_v50  ;;  %v13002_v7 = vadd.f32 %v32912_v46, %v12986_v48 }
 0xf7b   : > { %v29474_v18 = vpop.eup %29473 }
 0xf7c   : > { %v12950_v45 = vmul.f32 %v29474_v18, %v32861_v36  ;;  %v13001_v28 = vadd.f32 %v32912_v46, %v12985_v35  ;;  %v12967_v60 = vmul.f32 %v32895_v16, %v12947_v61  ;;  %v12988_v58 = vadd.f32 %v32902_v47, %v12968_v57 }
 0xf7d   : > { %v29476_v12 = vpop.eup %29475 }
 0xf7e   : > { %28189 = vmatprep.mubr.msk.f32.mxu1 %vm578_vm0, %v13001_v28  ;;  %28221 = vmatprep.mubr.msk.f32.mxu0 %vm578_vm0, %v13001_v28  ;;  %v12987_v31 = vadd.f32 %v32902_v47, %v12967_v60  ;;  %v12949_v51 = vmul.f32 %v29476_v12, %v32867_v39  ;;  %v12970_v36 = vmul.f32 %v32895_v16, %v12950_v45 }
 0xf7f   : > { %v29478_v41 = vpop.eup %29477  ;;  %28190 = vmatmul.mubr.msk.f32.gmra.mxu1 %vm578_vm0, %v13002_v7  ;;  %28222 = vmatmul.mubr.msk.f32.gmra.mxu0 %vm578_vm0, %v13002_v7  ;;  %v13004_v29 = vadd.f32 %v32912_v46, %v12988_v58 }
 0xf80   : > { %v12952_v27 = vmul.f32 %v29478_v41, %v32873_v62  ;;  %v13003_v4 = vadd.f32 %v32912_v46, %v12987_v31  ;;  %v12969_v59 = vmul.f32 %v32895_v16, %v12949_v51  ;;  %v12990_v53 = vadd.f32 %v32902_v47, %v12970_v36 }
 0xf81   : > { %v29480_v49 = vpop.eup %29479 }
 0xf82   : > { %28192 = vmatprep.mubr.msk.f32.mxu1 %vm578_vm0, %v13003_v4  ;;  %28224 = vmatprep.mubr.msk.f32.mxu0 %vm578_vm0, %v13003_v4  ;;  %v12989_v39 = vadd.f32 %v32902_v47, %v12969_v59  ;;  %v12951_v2 = vmul.f32 %v29480_v49, %v32879_v5  ;;  %v12972_v10 = vmul.f32 %v32895_v16, %v12952_v27 }
 0xf83   : > { %28193 = vmatmul.mubr.msk.f32.gmra.mxu1 %vm578_vm0, %v13004_v29  ;;  %28225 = vmatmul.mubr.msk.f32.gmra.mxu0 %vm578_vm0, %v13004_v29  ;;  %v13006_v1 = vadd.f32 %v32912_v46, %v12990_v53 }
 0xf84   : > { %v13005_v62 = vadd.f32 %v32912_v46, %v12989_v39  ;;  %v12971_v37 = vmul.f32 %v32895_v16, %v12951_v2  ;;  %v12992_v33 = vadd.f32 %v32902_v47, %v12972_v10 }
 0xf86   : > { %28195 = vmatprep.mubr.msk.f32.mxu1 %vm578_vm0, %v13005_v62  ;;  %28227 = vmatprep.mubr.msk.f32.mxu0 %vm578_vm0, %v13005_v62  ;;  %v12991_v5 = vadd.f32 %v32902_v47, %v12971_v37  ;;  %v13008_v24 = vadd.f32 %v32912_v46, %v12992_v33 }
 0xf87   : > { %28196 = vmatmul.mubr.msk.f32.gmra.mxu1 %vm578_vm0, %v13006_v1  ;;  %28228 = vmatmul.mubr.msk.f32.gmra.mxu0 %vm578_vm0, %v13006_v1 }
 0xf88   : > { %v13007_v19 = vadd.f32 %v32912_v46, %v12991_v5 }
 0xf8a   : > { %28198 = vmatprep.mubr.msk.f32.mxu1 %vm578_vm0, %v13007_v19  ;;  %28230 = vmatprep.mubr.msk.f32.mxu0 %vm578_vm0, %v13007_v19 }
 0xf8b   : > { %28199 = vmatmul.mubr.msk.f32.gmra.mxu1 %vm578_vm0, %v13008_v24  ;;  %28231 = vmatmul.mubr.msk.f32.gmra.mxu0 %vm578_vm0, %v13008_v24 }
 0xf8c   : > { %28241 = vmatprep.mubr.msk.f32.mxu1 %vm578_vm0, %v32915_v63  ;;  %28267 = vmatprep.mubr.msk.f32.mxu0 %vm30009_vm1, %v35908_v40 }
 0xf8f   : > { %28242 = vmatmul.mubr.msk.f32.vlgmr.msra.gmra.mxu1 %vm578_vm0, %v32918_v32 }
 0xf90   : > { %28244 = vmatprep.mubr.msk.f32.mxu1 %vm578_vm0, %v32940_v22 }
 0xf93   : > { %28245 = vmatmul.mubr.msk.f32.gmra.mxu1 %vm578_vm0, %v32944_v52 }
 0xf94   : > { %28247 = vmatprep.mubr.msk.f32.mxu1 %vm578_vm0, %v32959_v23 }
 0xf97   : > { %28248 = vmatmul.mubr.msk.f32.gmra.mxu1 %vm578_vm0, %v32963_v55 }
 0xf98   : > { %28250 = vmatprep.mubr.msk.f32.mxu1 %vm578_vm0, %v32976_v9 }
 0xf9b   : > { %28251 = vmatmul.mubr.msk.f32.gmra.mxu1 %vm578_vm0, %v32979_v17 }
 0xf9c   : > { %28253 = vmatprep.mubr.msk.f32.mxu1 %vm578_vm0, %v13001_v28 }
 0xf9f   : > { %28254 = vmatmul.mubr.msk.f32.gmra.mxu1 %vm578_vm0, %v13002_v7 }
 0xfa0   : > { %28256 = vmatprep.mubr.msk.f32.mxu1 %vm578_vm0, %v13003_v4 }
 0xfa3   : > { %28257 = vmatmul.mubr.msk.f32.gmra.mxu1 %vm578_vm0, %v13004_v29 }
 0xfa4   : > { %28259 = vmatprep.mubr.msk.f32.mxu1 %vm578_vm0, %v13005_v62 }
 0xfa7   : > { %28260 = vmatmul.mubr.msk.f32.gmra.mxu1 %vm578_vm0, %v13006_v1 }
 0xfa8   : > { %28262 = vmatprep.mubr.msk.f32.mxu1 %vm578_vm0, %v13007_v19 }
 0xfab   : > { %28263 = vmatmul.mubr.msk.f32.gmra.mxu1 %vm578_vm0, %v13008_v24 }
 0xfac   : > { %28277 = vmatprep.mubr.msk.f32.mxu1 %vm30009_vm1, %v35908_v40 }
 0xfbe   : > { %v33065_v16 = vpop.f32.mrf.mxu1  ;;  %v33067_v47 = vpop.f32.mrf.mxu0 }
 0xfbf   : > { %36052 = vst [vmem:[#allocation67_spill] sm:$0xff] %v33067_v47  ;;  %16169 = vrot.lane.b32.xlu1 %v33067_v47, %s30010_s15 }
 0xfc0   : > { %v33071_v46 = vpop.f32.mrf.mxu0  ;;  %v33077_v63 = vpop.f32.mrf.mxu1 }
 0xfc1   : > { %36053 = vst [vmem:[#allocation54_spill] sm:$0xff] %v33071_v46  ;;  %16091 = vrot.lane.b32.xlu0 %v33071_v46, %s30010_s15  ;;  %28266 = vmatpush3.xpose.msk.msra.mxu0 %vm1344_vm2, %v33071_v46  ;;  %36054 = vst [vmem:[#allocation42_spill] sm:$0xff] %v33077_v63 }
 0xfc2   : > { %28270 = vmatprep.subr.mxu0 %v35908_v40 }
 0xfc3   : > { %16089 = vrot.lane.b32.xlu1 %v33077_v63, %s30010_s15 }
 0xfc4   : > { %28268 = vmatmul.mubr.msk.f32.vlgmr.msra.gmra.mxu0 %vm1344_vm2, %v33077_v63 }
 0xfc5   : > { %28271 = vmatpush3.xpose.msk.msra.mxu0 %vm1344_vm2, %v33067_v47  ;;  %28272 = vmatprep.mubr.msk.f32.mxu0 %vm30009_vm1, %v35908_v40 }
 0xfc6   : > { %28280 = vmatprep.subr.mxu0 %v35908_v40 }
 0xfc8   : > { %28273 = vmatmul.mubr.msk.f32.vlgmr.msra.gmra.mxu0 %vm1344_vm2, %v33065_v16 }
 0xfc9   : > { %28282 = vmatprep.mubr.msk.f32.mxu0 %vm30009_vm1, %v35908_v40 }
 0xfd7   : > { %v33093_v32 = vpop.f32.mrf.mxu1  ;;  %v33095_v22 = vpop.f32.mrf.mxu0 }
 0xfd8   : > { %28281 = vmatpush3.xpose.msk.msra.mxu0 %vm1344_vm2, %v33095_v22 }
 0xfd9   : > { %v33099_v52 = vpop.f32.mrf.mxu1  ;;  %v33101_v23 = vpop.f32.mrf.mxu0  ;;  %28290 = vmatprep.subr.mxu0 %v35908_v40 }
 0xfda   : > { %28276 = vmatpush3.xpose.msk.msra.mxu1 %vm1344_vm2, %v33101_v23 }
 0xfdb   : > { %v33106_v55 = vpop.f32.mrf.mxu1  ;;  %v33108_v9 = vpop.f32.mrf.mxu0  ;;  %28283 = vmatmul.mubr.msk.f32.vlgmr.msra.gmra.mxu0 %vm1344_vm2, %v33093_v32  ;;  %28285 = vmatprep.subr.mxu1 %v35908_v40 }
 0xfdc   : > { %28291 = vmatpush3.xpose.msk.msra.mxu0 %vm1344_vm2, %v33108_v9  ;;  %28292 = vmatprep.mubr.msk.f32.mxu0 %vm30009_vm1, %v35908_v40 }
 0xfdd   : > { %v33117_v17 = vpop.f32.mrf.mxu1  ;;  %v33119_v50 = vpop.f32.mrf.mxu0  ;;  %28278 = vmatmul.mubr.msk.f32.vlgmr.msra.gmra.mxu1 %vm1344_vm2, %v33099_v52  ;;  %28300 = vmatprep.subr.mxu0 %v35908_v40 }
 0xfde   : > { %28286 = vmatpush3.xpose.msk.msra.mxu1 %vm1344_vm2, %v33119_v50  ;;  %28287 = vmatprep.mubr.msk.f32.mxu1 %vm30009_vm1, %v35908_v40 }
 0xfdf   : > { %v33128_v42 = vpop.f32.mrf.mxu0  ;;  %28293 = vmatmul.mubr.msk.f32.vlgmr.msra.gmra.mxu0 %vm1344_vm2, %v33106_v55  ;;  %28295 = vmatprep.subr.mxu1 %v35908_v40  ;;  %v33133_v14 = vpop.f32.mrf.mxu1 }
 0xfe0   : > { %28301 = vmatpush3.xpose.msk.msra.mxu0 %vm1344_vm2, %v33128_v42  ;;  %28302 = vmatprep.mubr.msk.f32.mxu0 %vm30009_vm1, %v35908_v40 }
 0xfe1   : > { %v33139_v48 = vpop.f32.mrf.mxu0  ;;  %28288 = vmatmul.mubr.msk.f32.vlgmr.msra.gmra.mxu1 %vm1344_vm2, %v33117_v17  ;;  %28310 = vmatprep.subr.mxu0 %v35908_v40  ;;  %v33151_v35 = vpop.f32.mrf.mxu1 }
 0xfe2   : > { %28296 = vmatpush3.xpose.msk.msra.mxu1 %vm1344_vm2, %v33139_v48  ;;  %28297 = vmatprep.mubr.msk.f32.mxu1 %vm30009_vm1, %v35908_v40 }
 0xfe3   : > { %28303 = vmatmul.mubr.msk.f32.vlgmr.msra.gmra.mxu0 %vm1344_vm2, %v33133_v14  ;;  %28305 = vmatprep.subr.mxu1 %v35908_v40 }
 0xfe4   : > { %28312 = vmatprep.mubr.msk.f32.mxu0 %vm30009_vm1, %v35908_v40 }
 0xfe5   : > { %28298 = vmatmul.mubr.msk.f32.vlgmr.msra.gmra.mxu1 %vm1344_vm2, %v33151_v35 }
 0xfe6   : > { %28307 = vmatprep.mubr.msk.f32.mxu1 %vm30009_vm1, %v35908_v40 }
0x103f   : > { %v33159_v61 = vpop.f32.mrf.mxu1  ;;  %v33161_v57 = vpop.f32.mrf.mxu0 }
0x1040   : > { %28311 = vmatpush3.xpose.msk.msra.mxu0 %vm1344_vm2, %v33161_v57 }
0x1041   : > { %v33165_v18 = vpop.f32.mrf.mxu1  ;;  %v33167_v45 = vpop.f32.mrf.mxu0  ;;  %28320 = vmatprep.subr.mxu0 %v35908_v40 }
0x1042   : > { %28306 = vmatpush3.xpose.msk.msra.mxu1 %vm1344_vm2, %v33167_v45 }
0x1043   : > { %v33172_v28 = vpop.f32.mrf.mxu1  ;;  %v33174_v60 = vpop.f32.mrf.mxu0  ;;  %28313 = vmatmul.mubr.msk.f32.vlgmr.msra.gmra.mxu0 %vm1344_vm2, %v33159_v61  ;;  %28315 = vmatprep.subr.mxu1 %v35908_v40 }
0x1044   : > { %36055 = vst [vmem:[#allocation44_spill] sm:$0xff] %v33172_v28  ;;  %28321 = vmatpush3.xpose.msk.msra.mxu0 %vm1344_vm2, %v33174_v60  ;;  %28322 = vmatprep.mubr.msk.f32.mxu0 %vm30009_vm1, %v35908_v40 }
0x1045   : > { %v33183_v12 = vpop.f32.mrf.mxu1  ;;  %v33185_v7 = vpop.f32.mrf.mxu0  ;;  %28308 = vmatmul.mubr.msk.f32.vlgmr.msra.gmra.mxu1 %vm1344_vm2, %v33165_v18  ;;  %28330 = vmatprep.subr.mxu0 %v35908_v40 }
0x1046   : > { %28316 = vmatpush3.xpose.msk.msra.mxu1 %vm1344_vm2, %v33185_v7  ;;  %28317 = vmatprep.mubr.msk.f32.mxu1 %vm30009_vm1, %v35908_v40 }
0x1047   : > { %v33194_v58 = vpop.f32.mrf.mxu1  ;;  %v33196_v31 = vpop.f32.mrf.mxu0  ;;  %28323 = vmatmul.mubr.msk.f32.vlgmr.msra.gmra.mxu0 %vm1344_vm2, %v33172_v28  ;;  %28325 = vmatprep.subr.mxu1 %v35908_v40 }
0x1048   : > { %36056 = vst [vmem:[#allocation43_spill] sm:$0xff] %v33194_v58  ;;  %36057 = vst [vmem:[#allocation46_spill] sm:$0xff] %v33196_v31  ;;  %28331 = vmatpush3.xpose.msk.msra.mxu0 %vm1344_vm2, %v33196_v31  ;;  %28332 = vmatprep.mubr.msk.f32.mxu0 %vm30009_vm1, %v35908_v40 }
0x1049   : > { %v33205_v51 = vpop.f32.mrf.mxu1  ;;  %v33207_v41 = vpop.f32.mrf.mxu0  ;;  %28318 = vmatmul.mubr.msk.f32.vlgmr.msra.gmra.mxu1 %vm1344_vm2, %v33183_v12  ;;  %28340 = vmatprep.subr.mxu0 %v35908_v40 }
0x104a   : > { %36058 = vst [vmem:[#allocation49_spill] sm:$0xff] %v33205_v51  ;;  %28326 = vmatpush3.xpose.msk.msra.mxu1 %vm1344_vm2, %v33207_v41  ;;  %28327 = vmatprep.mubr.msk.f32.mxu1 %vm30009_vm1, %v35908_v40 }
0x104b   : > { %v33216_v36 = vpop.f32.mrf.mxu1  ;;  %v33218_v27 = vpop.f32.mrf.mxu0  ;;  %28333 = vmatmul.mubr.msk.f32.vlgmr.msra.gmra.mxu0 %vm1344_vm2, %v33194_v58  ;;  %28335 = vmatprep.subr.mxu1 %v35908_v40 }
0x104c   : > { %36059 = vst [vmem:[#allocation51_spill] sm:$0xff] %v33216_v36  ;;  %36060 = vst [vmem:[#allocation53_spill] sm:$0xff] %v33218_v27  ;;  %28341 = vmatpush3.xpose.msk.msra.mxu0 %vm1344_vm2, %v33218_v27  ;;  %28342 = vmatprep.mubr.msk.f32.mxu0 %vm30009_vm1, %v35908_v40 }
0x104d   : > { %v33227_v4 = vpop.f32.mrf.mxu1  ;;  %v33229_v59 = vpop.f32.mrf.mxu0  ;;  %28328 = vmatmul.mubr.msk.f32.vlgmr.msra.gmra.mxu1 %vm1344_vm2, %v33205_v51  ;;  %28350 = vmatprep.subr.mxu0 %v35908_v40 }
0x104e   : > { %36061 = vst [vmem:[#allocation39_spill] sm:$0xff] %v33227_v4  ;;  %36062 = vst [vmem:[#allocation41_spill] sm:$0xff] %v33229_v59  ;;  %28336 = vmatpush3.xpose.msk.msra.mxu1 %vm1344_vm2, %v33229_v59  ;;  %28337 = vmatprep.mubr.msk.f32.mxu1 %vm30009_vm1, %v35908_v40 }
0x104f   : > { %v33238_v49 = vpop.f32.mrf.mxu1  ;;  %28343 = vmatmul.mubr.msk.f32.vlgmr.msra.gmra.mxu0 %vm1344_vm2, %v33216_v36  ;;  %28345 = vmatprep.subr.mxu1 %v35908_v40 }
0x1050   : > { %36063 = vst [vmem:[#allocation45_spill] sm:$0xff] %v33238_v49  ;;  %28351 = vmatpush3.msra.mxu0 %v33238_v49  ;;  %28352 = vmatprep.mubr.msk.f32.mxu0 %vm30009_vm1, %v35908_v40 }
0x1051   : > { %v33246_v29 = vpop.f32.mrf.mxu1  ;;  %28338 = vmatmul.mubr.msk.f32.vlgmr.msra.gmra.mxu1 %vm1344_vm2, %v33227_v4  ;;  %28360 = vmatprep.subr.mxu0 %v35908_v40 }
0x1052   : > { %36064 = vst [vmem:[#allocation48_spill] sm:$0xff] %v33246_v29  ;;  %28346 = vmatpush3.msra.mxu1 %v33246_v29  ;;  %28347 = vmatprep.mubr.msk.f32.mxu1 %vm30009_vm1, %v35908_v40 }
0x1053   : > { %28355 = vmatprep.subr.mxu1 %v35908_v40  ;;  %v33255_v53 = vpop.f32.mrf.mxu1 }
0x1054   : > { %36065 = vst [vmem:[#allocation50_spill] sm:$0xff] %v33255_v53 }
0x1055   : > { %v33257_v39 = vpop.f32.mrf.mxu1 }
0x1056   : > { %36066 = vst [vmem:[#allocation52_spill] sm:$0xff] %v33257_v39 }
0x1057   : > { %v33259_v2 = vpop.f32.mrf.mxu1 }
0x1058   : > { %36067 = vst [vmem:[#allocation55_spill] sm:$0xff] %v33259_v2 }
0x1059   : > { %v33261_v10 = vpop.f32.mrf.mxu1 }
0x105a   : > { %36068 = vst [vmem:[#allocation24_spill] sm:$0xff] %v33261_v10 }
0x105b   : > { %v33263_v62 = vpop.f32.mrf.mxu1 }
0x105c   : > { %36069 = vst [vmem:[#allocation62_spill] sm:$0xff] %v33263_v62 }
0x105d   : > { %v33265_v37 = vpop.f32.mrf.mxu1 }
0x105e   : > { %36070 = vst [vmem:[#allocation23_spill] sm:$0xff] %v33265_v37 }
0x105f   : > { %v33267_v1 = vpop.f32.mrf.mxu1 }
0x1060   : > { %36071 = vst [vmem:[#allocation58_spill] sm:$0xff] %v33267_v1 }
0x1061   : > { %v33269_v33 = vpop.f32.mrf.mxu1 }
0x1062   : > { %36072 = vst [vmem:[#allocation27_spill] sm:$0xff] %v33269_v33 }
0x1063   : > { %v33273_v44 = vpop.f32.mrf.mxu1 }
0x1064   : > { %36073 = vst [vmem:[#allocation63_spill] sm:$0xff] %v33273_v44 }
0x1065   : > { %v33279_v8 = vpop.f32.mrf.mxu1 }
0x1066   : > { %36074 = vst [vmem:[#allocation32_spill] sm:$0xff] %v33279_v8 }
0x1067   : > { %v33283_v0 = vpop.f32.mrf.mxu1 }
0x1068   : > { %36075 = vst [vmem:[#allocation60_spill] sm:$0xff] %v33283_v0  ;;  %v33323_v0 = vpop.permute.xlu0 %16091 }
0x1069   : > { %36080 = vst [vmem:[#allocation56_spill] sm:$0xff] %v33323_v0 }
0x1084   : > { %v13585_v5 = vpop.f32.mrf.mxu0 }
0x1085   : > { %v33271_v19 = vmul.f32 0.35355338, %v13585_v5  ;;  %v33285_v5 = vpop.f32.mrf.mxu1 }
0x1086   : > { %v28269_v24 = vpop.f32.mrf.mxu0  ;;  %36076 = vst [vmem:[#allocation31_spill] sm:$0xff] %v33285_v5 }
0x1087   : > { %v14745_v26 = vsel %vm1344_vm2, %v33271_v19, -inf  ;;  %v33287_v24 = vpop.f32.mrf.mxu1 }
0x1088   : > { %14746 = vmax.xlane.f32.xlu0 %v14745_v26  ;;  %v13661_v43 = vpop.f32.mrf.mxu0  ;;  %36077 = vst [vmem:[#allocation40_spill] sm:$0xff] %v33287_v24 }
0x1089   : > { %v33277_v30 = vmul.f32 0.35355338, %v13661_v43  ;;  %v33289_v6 = vpop.f32.mrf.mxu1 }
0x108a   : > { %v28274_v3 = vpop.f32.mrf.mxu0  ;;  %36078 = vst [vmem:[#allocation59_spill] sm:$0xff] %v33289_v6 }
0x108b   : > { %v14748_v56 = vsel %vm1344_vm2, %v33277_v30, -inf }
0x108c   : > { %14749 = vmax.xlane.f32.xlu1 %v14748_v56 }
0x109b   : > { %v13813_v21 = vpop.f32.mrf.mxu0 }
0x109c   : > { %v33291_v26 = vmul.f32 0.35355338, %v13813_v21 }
0x109d   : > { %v13737_v43 = vpop.f32.mrf.mxu1  ;;  %v28284_v11 = vpop.f32.mrf.mxu0 }
0x109e   : > { %v33293_v3 = vmul.f32 0.35355338, %v13737_v43  ;;  %v14754_v34 = vsel %vm1344_vm2, %v33291_v26, -inf }
0x109f   : > { %14755 = vmax.xlane.f32.xlu1 %v14754_v34  ;;  %v28279_v56 = vpop.f32.mrf.mxu1  ;;  %v13965_v13 = vpop.f32.mrf.mxu0 }
0x10a0   : > { %v33297_v25 = vmul.f32 0.35355338, %v13965_v13  ;;  %v14751_v15 = vsel %vm1344_vm2, %v33293_v3, -inf }
0x10a1   : > { %v28294_v38 = vpop.f32.mrf.mxu0  ;;  %14752 = vmax.xlane.f32.xlu0 %v14751_v15  ;;  %v13889_v20 = vpop.f32.mrf.mxu1 }
0x10a2   : > { %v33301_v21 = vmul.f32 0.35355338, %v13889_v20  ;;  %v14760_v11 = vsel %vm1344_vm2, %v33297_v25, -inf }
0x10a3   : > { %14761 = vmax.xlane.f32.xlu1 %v14760_v11  ;;  %v28289_v43 = vpop.f32.mrf.mxu1  ;;  %v14117_v54 = vpop.f32.mrf.mxu0 }
0x10a4   : > { %v33305_v47 = vmul.f32 0.35355338, %v14117_v54  ;;  %v14757_v13 = vsel %vm1344_vm2, %v33301_v21, -inf }
0x10a5   : > { %v28304_v34 = vpop.f32.mrf.mxu0  ;;  %14758 = vmax.xlane.f32.xlu0 %v14757_v13  ;;  %v14041_v56 = vpop.f32.mrf.mxu1 }
0x10a6   : > { %v33309_v63 = vmul.f32 0.35355338, %v14041_v56  ;;  %v14766_v20 = vsel %vm1344_vm2, %v33305_v47, -inf  ;;  %v33319_v56 = vpop.permute.xlu1 %16169 }
0x10a7   : > { %14767 = vmax.xlane.f32.xlu1 %v14766_v20  ;;  %v28299_v38 = vpop.f32.mrf.mxu1  ;;  %36079 = vst [vmem:[#allocation66_spill] sm:$0xff] %v33319_v56 }
0x10a8   : > { %v14763_v15 = vsel %vm1344_vm2, %v33309_v63, -inf }
0x10a9   : > { %14764 = vmax.xlane.f32.xlu0 %v14763_v15 }
0x10aa   : > { %v33327_v6 = vpop.permute.xlu1 %16089 }
0x10ab   : > { %36081 = vst [vmem:[#allocation68_spill] sm:$0xff] %v33327_v6 }
0x1103   : > { %v33315_v11 = vpop.f32.mrf.mxu0 }
0x1105   : > { %v14193_v54 = vpop.f32.mrf.mxu1  ;;  %v28314_v43 = vpop.f32.mrf.mxu0 }
0x1107   : > { %v28309_v46 = vpop.f32.mrf.mxu1  ;;  %v33317_v29 = vpop.f32.mrf.mxu0 }
0x1109   : > { %v14345_v13 = vpop.f32.mrf.mxu1  ;;  %v28324_v34 = vpop.f32.mrf.mxu0 }
0x110b   : > { %v28319_v49 = vpop.f32.mrf.mxu1  ;;  %v33321_v24 = vpop.f32.mrf.mxu0 }
0x110d   : > { %v14497_v20 = vpop.f32.mrf.mxu1  ;;  %v28334_v38 = vpop.f32.mrf.mxu0 }
0x110f   : > { %v28329_v44 = vpop.f32.mrf.mxu1  ;;  %v33325_v15 = vpop.f32.mrf.mxu0 }
0x1110   : > { %v33333_v44 = vmul.f32 0.35355338, %v14193_v54 }
0x1111   : > { %v14649_v43 = vpop.f32.mrf.mxu1  ;;  %v28344_v46 = vpop.f32.mrf.mxu0 }
0x1112   : > { %v14747_v5 = vpop.xlane.xlu0 %14746 }
0x1113   : > { %v14793_v8 = vsub.f32 %v33271_v19, %v14747_v5  ;;  %v28339_v34 = vpop.f32.mrf.mxu1  ;;  %v33341_v19 = vmul.f32 0.35355338, %v14345_v13 }
0x1115   : > { %v14809_v33 = vmul.f32 1.442695, %v14793_v8  ;;  %v14750_v56 = vpop.xlane.xlu1 %14749  ;;  %v14775_v13 = vsel %vm1344_vm2, %v33341_v19, -inf }
0x1116   : > { %v14794_v49 = vsub.f32 %v33277_v30, %v14750_v56 }
0x1117   : > { %29481 = vpow2.f32 %v14809_v33 }
0x1118   : > { %v14811_v4 = vmul.f32 1.442695, %v14794_v49 }
0x111a   : > { %29483 = vpow2.f32 %v14811_v4  ;;  %v14769_v4 = vsel %vm1344_vm2, %v33333_v44, -inf }
0x1124   : > { %v33331_v38 = vpop.eup %29481 }
0x1125   : > { %v14841_v6 = vsel %vm1344_vm2, %v33331_v38, 0.0 }
0x1126   : > { %14842 = vadd.xlane.f32.xlu0 %v14841_v6 }
0x1127   : > { %v33337_v46 = vpop.eup %29483 }
0x1128   : > { %v14756_v0 = vpop.xlane.xlu1 %14755  ;;  %v14844_v8 = vsel %vm1344_vm2, %v33337_v46, 0.0 }
0x1129   : > { %v14796_v30 = vsub.f32 %v33291_v26, %v14756_v0  ;;  %14845 = vadd.xlane.f32.xlu1 %v14844_v8 }
0x112a   : > { %14770 = vmax.xlane.f32.xlu0 %v14769_v4  ;;  %v14753_v33 = vpop.xlane.xlu0 %14752 }
0x112b   : > { %v14815_v5 = vmul.f32 1.442695, %v14796_v30  ;;  %v14795_v54 = vsub.f32 %v33293_v3, %v14753_v33 }
0x112c   : > { %v14762_v6 = vpop.xlane.xlu1 %14761 }
0x112d   : > { %29485 = vpow2.f32 %v14815_v5  ;;  %v14813_v56 = vmul.f32 1.442695, %v14795_v54  ;;  %v14798_v34 = vsub.f32 %v33297_v25, %v14762_v6  ;;  %v33358_v54 = vmul.f32 0.35355338, %v14497_v20 }
0x112e   : > { %14776 = vmax.xlane.f32.xlu0 %v14775_v13  ;;  %v14759_v49 = vpop.xlane.xlu0 %14758  ;;  %v33373_v20 = vmul.f32 0.35355338, %v33315_v11 }
0x112f   : > { %29487 = vpow2.f32 %v14813_v56  ;;  %v14819_v0 = vmul.f32 1.442695, %v14798_v34  ;;  %v14797_v26 = vsub.f32 %v33301_v21, %v14759_v49  ;;  %v14781_v34 = vsel %vm1344_vm2, %v33358_v54, -inf }
0x1130   : > { %v14768_v8 = vpop.xlane.xlu1 %14767 }
0x1131   : > { %29489 = vpow2.f32 %v14819_v0  ;;  %v14817_v4 = vmul.f32 1.442695, %v14797_v26  ;;  %v14800_v30 = vsub.f32 %v33305_v47, %v14768_v8  ;;  %v33377_v0 = vmul.f32 0.35355338, %v14649_v43 }
0x1132   : > { %v33382_v8 = vmul.f32 0.35355338, %v33317_v29 }
0x1133   : > { %v14823_v3 = vmul.f32 1.442695, %v14800_v30  ;;  %29491 = vpow2.f32 %v14817_v4  ;;  %v14772_v4 = vsel %vm1344_vm2, %v33373_v20, -inf  ;;  %v14787_v11 = vsel %vm1344_vm2, %v33377_v0, -inf }
0x1134   : > { %v33389_v30 = vmul.f32 0.35355338, %v33321_v24  ;;  %v14778_v43 = vsel %vm1344_vm2, %v33382_v8, -inf  ;;  %v14765_v24 = vpop.xlane.xlu0 %14764 }
0x1135   : > { %29493 = vpow2.f32 %v14823_v3  ;;  %v33394_v3 = vmul.f32 0.35355338, %v33325_v15  ;;  %v14799_v15 = vsub.f32 %v33309_v63, %v14765_v24 }
0x1136   : > { %v14784_v29 = vsel %vm1344_vm2, %v33389_v30, -inf }
0x113a   : > { %v33352_v33 = vpop.eup %29485 }
0x113b   : > { %v14850_v25 = vsel %vm1344_vm2, %v33352_v33, 0.0 }
0x113c   : > { %v33356_v5 = vpop.eup %29487  ;;  %14851 = vadd.xlane.f32.xlu1 %v14850_v25  ;;  %v14790_v25 = vsel %vm1344_vm2, %v33394_v3, -inf }
0x113d   : > { %v14847_v21 = vsel %vm1344_vm2, %v33356_v5, 0.0 }
0x113e   : > { %v33362_v6 = vpop.eup %29489  ;;  %14848 = vadd.xlane.f32.xlu0 %v14847_v21  ;;  %v14821_v21 = vmul.f32 1.442695, %v14799_v15 }
0x113f   : > { %v14856_v47 = vsel %vm1344_vm2, %v33362_v6, 0.0 }
0x1140   : > { %14857 = vadd.xlane.f32.xlu1 %v14856_v47  ;;  %v33366_v56 = vpop.eup %29491  ;;  %29495 = vpow2.f32 %v14821_v21 }
0x1141   : > { %v14853_v26 = vsel %vm1344_vm2, %v33366_v56, 0.0 }
0x1142   : > { %v33370_v13 = vpop.eup %29493  ;;  %14782 = vmax.xlane.f32.xlu0 %v14781_v34 }
0x1143   : > { %v14862_v49 = vsel %vm1344_vm2, %v33370_v13, 0.0 }
0x1144   : > { %14863 = vadd.xlane.f32.xlu1 %v14862_v49 }
0x1146   : > { %14854 = vadd.xlane.f32.xlu0 %v14853_v26 }
0x1148   : > { %14773 = vmax.xlane.f32.xlu1 %v14772_v4 }
0x114a   : > { %14788 = vmax.xlane.f32.xlu0 %v14787_v11 }
0x114c   : > { %14779 = vmax.xlane.f32.xlu1 %v14778_v43 }
0x114d   : > { %v33425_v47 = vpop.eup %29495 }
0x114e   : > { %v14859_v34 = vsel %vm1344_vm2, %v33425_v47, 0.0 }
0x1150   : > { %14785 = vmax.xlane.f32.xlu1 %v14784_v29 }
0x1154   : > { %14791 = vmax.xlane.f32.xlu1 %v14790_v25 }
0x1160   : > { %16167 = vrot.lane.b32.xlu0 %v33065_v16, %s30010_s15 }
0x1164   : > { %16325 = vrot.lane.b32.xlu0 %v33095_v22, %s30010_s15 }
0x1165   : > { %16247 = vrot.lane.b32.xlu1 %v33101_v23, %s30010_s15 }
0x1168   : > { %16323 = vrot.lane.b32.xlu0 %v33093_v32, %s30010_s15 }
0x1169   : > { %16245 = vrot.lane.b32.xlu1 %v33099_v52, %s30010_s15 }
0x116c   : > { %16481 = vrot.lane.b32.xlu0 %v33108_v9, %s30010_s15 }
0x116d   : > { %16403 = vrot.lane.b32.xlu1 %v33119_v50, %s30010_s15 }
0x1170   : > { %16479 = vrot.lane.b32.xlu0 %v33106_v55, %s30010_s15 }
0x1171   : > { %16401 = vrot.lane.b32.xlu1 %v33117_v17, %s30010_s15 }
0x1174   : > { %16637 = vrot.lane.b32.xlu0 %v33128_v42, %s30010_s15 }
0x1175   : > { %16559 = vrot.lane.b32.xlu1 %v33139_v48, %s30010_s15 }
0x1179   : > { %16557 = vrot.lane.b32.xlu1 %v33151_v35, %s30010_s15 }
0x1193   : > { %14860 = vadd.xlane.f32.xlu0 %v14859_v34 }
0x11af   : > { %v14843_v49 = vpop.xlane.xlu0 %14842 }
0x11b0   : > { %29497 = vrcp.f32 %v14843_v49 }
0x11b2   : > { %v14846_v26 = vpop.xlane.xlu1 %14845 }
0x11b3   : > { %29499 = vrcp.f32 %v14846_v26  ;;  %v14771_v4 = vpop.xlane.xlu0 %14770 }
0x11b4   : > { %v14801_v11 = vsub.f32 %v33333_v44, %v14771_v4 }
0x11b6   : > { %v14825_v43 = vmul.f32 1.442695, %v14801_v11 }
0x11b7   : > { %v14777_v29 = vpop.xlane.xlu0 %14776 }
0x11b8   : > { %29501 = vpow2.f32 %v14825_v43  ;;  %v14803_v63 = vsub.f32 %v33341_v19, %v14777_v29 }
0x11ba   : > { %v14829_v25 = vmul.f32 1.442695, %v14803_v63 }
0x11bc   : > { %29503 = vpow2.f32 %v14829_v25 }
0x11bd   : > { %v29498_v24 = vpop.eup %29497 }
0x11be   : > { %v14890_v15 = vmul.f32 %v29498_v24, %v33331_v38 }
0x11c0   : > { %v29500_v21 = vpop.eup %29499  ;;  %28348 = vmatmul.mubr.msk.f32.vlgmr.msra.gmra.mxu1 %vm1344_vm2, %v14890_v15 }
0x11c1   : > { %v14892_v34 = vmul.f32 %v29500_v21, %v33337_v46  ;;  %28356 = vmatpush3.msra.mxu1 %v33257_v39  ;;  %28357 = vmatprep.mubr.msk.f32.mxu1 %vm30009_vm1, %v35908_v40 }
0x11c2   : > { %28365 = vmatprep.subr.mxu1 %v35908_v40 }
0x11c3   : > { %28353 = vmatmul.mubr.msk.f32.vlgmr.msra.gmra.mxu0 %vm1344_vm2, %v14892_v34 }
0x11c4   : > { %28361 = vmatpush3.msra.mxu0 %v33255_v53  ;;  %28362 = vmatprep.mubr.msk.f32.mxu0 %vm30009_vm1, %v35908_v40 }
0x11c5   : > { %v33442_v38 = vpop.eup %29501  ;;  %v14852_v44 = vpop.xlane.xlu1 %14851  ;;  %28370 = vmatprep.subr.mxu0 %v35908_v40 }
0x11c6   : > { %29505 = vrcp.f32 %v14852_v44  ;;  %v14865_v46 = vsel %vm1344_vm2, %v33442_v38, 0.0 }
0x11c7   : > { %14866 = vadd.xlane.f32.xlu0 %v14865_v46  ;;  %v14849_v19 = vpop.xlane.xlu0 %14848 }
0x11c8   : > { %29507 = vrcp.f32 %v14849_v19 }
0x11c9   : > { %v33447_v49 = vpop.eup %29503  ;;  %v14858_v26 = vpop.xlane.xlu1 %14857 }
0x11ca   : > { %29509 = vrcp.f32 %v14858_v26  ;;  %v14871_v4 = vsel %vm1344_vm2, %v33447_v49, 0.0 }
0x11cb   : > { %14872 = vadd.xlane.f32.xlu0 %v14871_v4  ;;  %v14783_v11 = vpop.xlane.xlu0 %14782 }
0x11cc   : > { %v14805_v43 = vsub.f32 %v33358_v54, %v14783_v11 }
0x11cd   : > { %v14864_v29 = vpop.xlane.xlu1 %14863 }
0x11ce   : > { %v14833_v63 = vmul.f32 1.442695, %v14805_v43  ;;  %29511 = vrcp.f32 %v14864_v29 }
0x11cf   : > { %v14855_v25 = vpop.xlane.xlu0 %14854 }
0x11d0   : > { %29513 = vpow2.f32 %v14833_v63 }
0x11d1   : > { %29515 = vrcp.f32 %v14855_v25  ;;  %v14774_v24 = vpop.xlane.xlu1 %14773 }
0x11d2   : > { %v14802_v15 = vsub.f32 %v33373_v20, %v14774_v24 }
0x11d3   : > { %v29506_v21 = vpop.eup %29505  ;;  %v14789_v34 = vpop.xlane.xlu0 %14788 }
0x11d4   : > { %v14896_v44 = vmul.f32 %v29506_v21, %v33352_v33  ;;  %v14827_v46 = vmul.f32 1.442695, %v14802_v15  ;;  %v14807_v19 = vsub.f32 %v33377_v0, %v14789_v34 }
0x11d5   : > { %v29508_v26 = vpop.eup %29507  ;;  %v14780_v4 = vpop.xlane.xlu1 %14779 }
0x11d6   : > { %v14894_v54 = vmul.f32 %v29508_v26, %v33356_v5  ;;  %29517 = vpow2.f32 %v14827_v46  ;;  %v14837_v11 = vmul.f32 1.442695, %v14807_v19  ;;  %v14804_v43 = vsub.f32 %v33382_v8, %v14780_v4  ;;  %28363 = vmatmul.mubr.msk.f32.vlgmr.msra.gmra.mxu0 %vm1344_vm2, %v14896_v44 }
0x11d7   : > { %v29510_v29 = vpop.eup %29509  ;;  %28371 = vmatpush3.msra.mxu0 %v33259_v2  ;;  %28372 = vmatprep.mubr.msk.f32.mxu0 %vm30009_vm1, %v35908_v40 }
0x11d8   : > { %v14900_v33 = vmul.f32 %v29510_v29, %v33362_v6  ;;  %29519 = vpow2.f32 %v14837_v11  ;;  %v14831_v20 = vmul.f32 1.442695, %v14804_v43  ;;  %28358 = vmatmul.mubr.msk.f32.vlgmr.msra.gmra.mxu1 %vm1344_vm2, %v14894_v54  ;;  %28380 = vmatprep.subr.mxu0 %v35908_v40  ;;  %v33511_v29 = vpop.permute.xlu0 %16167 }
0x11d9   : > { %28366 = vmatpush3.msra.mxu1 %v33261_v10  ;;  %v14786_v5 = vpop.xlane.xlu1 %14785  ;;  %28367 = vmatprep.mubr.msk.f32.mxu1 %vm30009_vm1, %v35908_v40 }
0x11da   : > { %29521 = vpow2.f32 %v14831_v20  ;;  %v14806_v0 = vsub.f32 %v33389_v30, %v14786_v5  ;;  %28373 = vmatmul.mubr.msk.f32.vlgmr.msra.gmra.mxu0 %vm1344_vm2, %v14900_v33  ;;  %28375 = vmatprep.subr.mxu1 %v35908_v40 }
0x11db   : > { %v29512_v6 = vpop.eup %29511  ;;  %28381 = vmatpush3.msra.mxu0 %v33263_v62  ;;  %28382 = vmatprep.mubr.msk.f32.mxu0 %vm30009_vm1, %v35908_v40 }
0x11dc   : > { %v14904_v8 = vmul.f32 %v29512_v6, %v33370_v13  ;;  %v14835_v63 = vmul.f32 1.442695, %v14806_v0  ;;  %28390 = vmatprep.subr.mxu0 %v35908_v40  ;;  %v33515_v33 = vpop.permute.xlu0 %16325 }
0x11dd   : > { %v33475_v25 = vpop.eup %29513  ;;  %v14792_v24 = vpop.xlane.xlu1 %14791 }
0x11de   : > { %v29516_v15 = vpop.eup %29515  ;;  %29523 = vpow2.f32 %v14835_v63  ;;  %v14808_v30 = vsub.f32 %v33394_v3, %v14792_v24  ;;  %28383 = vmatmul.mubr.msk.f32.vlgmr.msra.gmra.mxu0 %vm1344_vm2, %v14904_v8  ;;  %v14877_v21 = vsel %vm1344_vm2, %v33475_v25, 0.0  ;;  %v36082_v63 = vld [vmem:[#allocation39_spill] sm:$0xff] }
0x11df   : > { %v14898_v34 = vmul.f32 %v29516_v15, %v33366_v56  ;;  %28391 = vmatpush3.msra.mxu0 %v33267_v1  ;;  %14878 = vadd.xlane.f32.xlu0 %v14877_v21 }
0x11e0   : > { %v14839_v13 = vmul.f32 1.442695, %v14808_v30  ;;  %28392 = vmatprep.mubr.msk.f32.mxu0 %vm30009_vm1, %v35908_v40  ;;  %28400 = vmatprep.subr.mxu0 %v35908_v40  ;;  %v33523_v20 = vpop.permute.xlu0 %16323  ;;  %v36083_v30 = vld [vmem:[#allocation27_spill] sm:$0xff] }
0x11e1   : > { %28368 = vmatmul.mubr.msk.f32.vlgmr.msra.gmra.mxu1 %vm1344_vm2, %v14898_v34  ;;  %v33563_v21 = vpop.permute.xlu1 %16247 }
0x11e2   : > { %29525 = vpow2.f32 %v14839_v13  ;;  %28376 = vmatpush3.msra.mxu1 %v33265_v37  ;;  %28377 = vmatprep.mubr.msk.f32.mxu1 %vm30009_vm1, %v35908_v40 }
0x11e3   : > { %v33490_v3 = vpop.eup %29517  ;;  %28385 = vmatprep.subr.mxu1 %v35908_v40 }
0x11e4   : > { %v14868_v56 = vsel %vm1344_vm2, %v33490_v3, 0.0  ;;  %v33531_v5 = vpop.permute.xlu0 %16481 }
0x11e5   : > { %v33495_v44 = vpop.eup %29519  ;;  %14869 = vadd.xlane.f32.xlu1 %v14868_v56  ;;  %v33565_v13 = vpop.permute.xlu1 %16245 }
0x11e6   : > { %v14883_v46 = vsel %vm1344_vm2, %v33495_v44, 0.0 }
0x11e7   : > { %v33499_v19 = vpop.eup %29521  ;;  %14884 = vadd.xlane.f32.xlu0 %v14883_v46 }
0x11e8   : > { %v14874_v26 = vsel %vm1344_vm2, %v33499_v19, 0.0  ;;  %v33539_v0 = vpop.permute.xlu0 %16479 }
0x11e9   : > { %14875 = vadd.xlane.f32.xlu1 %v14874_v26  ;;  %v33567_v46 = vpop.permute.xlu1 %16403 }
0x11eb   : > { %v33503_v4 = vpop.eup %29523 }
0x11ec   : > { %v14880_v54 = vsel %vm1344_vm2, %v33503_v4, 0.0  ;;  %v33547_v6 = vpop.permute.xlu0 %16637 }
0x11ed   : > { %14881 = vadd.xlane.f32.xlu1 %v14880_v54  ;;  %v33569_v26 = vpop.permute.xlu1 %16401 }
0x11ef   : > { %v33507_v11 = vpop.eup %29525 }
0x11f0   : > { %v14886_v43 = vsel %vm1344_vm2, %v33507_v11, 0.0 }
0x11f1   : > { %14887 = vadd.xlane.f32.xlu1 %v14886_v43 }
0x11fd   : > { %16635 = vrot.lane.b32.xlu0 %v33133_v14, %s30010_s15 }
0x1201   : > { %16793 = vrot.lane.b32.xlu0 %v33161_v57, %s30010_s15 }
0x1202   : > { %16715 = vrot.lane.b32.xlu1 %v33167_v45, %s30010_s15 }
0x1205   : > { %16791 = vrot.lane.b32.xlu0 %v33159_v61, %s30010_s15 }
0x1206   : > { %16713 = vrot.lane.b32.xlu1 %v33165_v18, %s30010_s15 }
0x1209   : > { %16949 = vrot.lane.b32.xlu0 %v33174_v60, %s30010_s15 }
0x120a   : > { %16871 = vrot.lane.b32.xlu1 %v33185_v7, %s30010_s15 }
0x120d   : > { %16947 = vrot.lane.b32.xlu0 %v33172_v28, %s30010_s15  ;;  %v36088_v28 = vld [vmem:[#allocation63_spill] sm:$0xff] }
0x120e   : > { %16869 = vrot.lane.b32.xlu1 %v33183_v12, %s30010_s15 }
0x1211   : > { %17105 = vrot.lane.b32.xlu0 %v33196_v31, %s30010_s15 }
0x1212   : > { %17027 = vrot.lane.b32.xlu1 %v33207_v41, %s30010_s15 }
0x1215   : > { %17103 = vrot.lane.b32.xlu0 %v33194_v58, %s30010_s15  ;;  %v36086_v58 = vld [vmem:[#allocation59_spill] sm:$0xff] }
0x1216   : > { %17025 = vrot.lane.b32.xlu1 %v33205_v51, %s30010_s15 }
0x1219   : > { %17261 = vrot.lane.b32.xlu0 %v33218_v27, %s30010_s15 }
0x121a   : > { %17183 = vrot.lane.b32.xlu1 %v33229_v59, %s30010_s15 }
0x121c   : > { %v14861_v8 = vpop.xlane.xlu0 %14860 }
0x121d   : > { %29527 = vrcp.f32 %v14861_v8  ;;  %17259 = vrot.lane.b32.xlu0 %v33216_v36, %s30010_s15  ;;  %v36084_v8 = vld [vmem:[#allocation32_spill] sm:$0xff] }
0x121e   : > { %17181 = vrot.lane.b32.xlu1 %v36082_v63, %s30010_s15 }
0x122a   : > { %v29528_v24 = vpop.eup %29527 }
0x122b   : > { %v14902_v15 = vmul.f32 %v29528_v24, %v33425_v47 }
0x122d   : > { %28378 = vmatmul.mubr.msk.f32.vlgmr.msra.gmra.mxu1 %vm1344_vm2, %v14902_v15  ;;  %v33578_v15 = vpop.permute.xlu1 %16559 }
0x122e   : > { %28386 = vmatpush3.msra.mxu1 %v36083_v30  ;;  %28387 = vmatprep.mubr.msk.f32.mxu1 %vm30009_vm1, %v35908_v40 }
0x122f   : > { %28395 = vmatprep.subr.mxu1 %v35908_v40 }
0x1250   : > { %v14867_v34 = vpop.xlane.xlu0 %14866 }
0x1251   : > { %29529 = vrcp.f32 %v14867_v34  ;;  %v36085_v34 = vld [vmem:[#allocation31_spill] sm:$0xff] }
0x1254   : > { %v14873_v56 = vpop.xlane.xlu0 %14872 }
0x1255   : > { %29531 = vrcp.f32 %v14873_v56  ;;  %v33585_v56 = vpop.permute.xlu1 %16557 }
0x125e   : > { %v29530_v47 = vpop.eup %29529 }
0x125f   : > { %v14906_v54 = vmul.f32 %v29530_v47, %v33442_v38 }
0x1261   : > { %28388 = vmatmul.mubr.msk.f32.vlgmr.msra.gmra.mxu1 %vm1344_vm2, %v14906_v54 }
0x1262   : > { %v29532_v43 = vpop.eup %29531  ;;  %28396 = vmatpush3.msra.mxu1 %v36084_v8  ;;  %28397 = vmatprep.mubr.msk.f32.mxu1 %vm30009_vm1, %v35908_v40 }
0x1263   : > { %v14910_v24 = vmul.f32 %v29532_v43, %v33447_v49  ;;  %28405 = vmatprep.subr.mxu1 %v35908_v40 }
0x1265   : > { %28398 = vmatmul.mubr.msk.f32.vlgmr.msra.gmra.mxu1 %vm1344_vm2, %v14910_v24 }
0x1266   : > { %28406 = vmatpush3.msra.mxu1 %v36085_v34  ;;  %28407 = vmatprep.mubr.msk.f32.mxu1 %vm30009_vm1, %v35908_v40 }
0x1267   : > { %28415 = vmatprep.subr.mxu1 %v35908_v40 }
0x1268   : > { %v14879_v38 = vpop.xlane.xlu0 %14878 }
0x1269   : > { %29533 = vrcp.f32 %v14879_v38 }
0x126e   : > { %v14870_v47 = vpop.xlane.xlu1 %14869 }
0x126f   : > { %29535 = vrcp.f32 %v14870_v47 }
0x1270   : > { %v14885_v49 = vpop.xlane.xlu0 %14884 }
0x1271   : > { %29537 = vrcp.f32 %v14885_v49 }
0x1272   : > { %v14876_v54 = vpop.xlane.xlu1 %14875 }
0x1273   : > { %29539 = vrcp.f32 %v14876_v54 }
0x1274   : > { %v33588_v27 = vpop.permute.xlu0 %16635 }
0x1276   : > { %v29534_v43 = vpop.eup %29533  ;;  %v14882_v36 = vpop.xlane.xlu1 %14881 }
0x1277   : > { %v14914_v24 = vmul.f32 %v29534_v43, %v33475_v25  ;;  %29541 = vrcp.f32 %v14882_v36 }
0x1278   : > { %v33597_v25 = vpop.permute.xlu0 %16793 }
0x1279   : > { %28408 = vmatmul.mubr.msk.f32.vlgmr.msra.gmra.mxu1 %vm1344_vm2, %v14914_v24 }
0x127a   : > { %28416 = vmatpush3.msra.mxu1 %v36086_v58  ;;  %v14888_v38 = vpop.xlane.xlu1 %14887  ;;  %28417 = vmatprep.mubr.msk.f32.mxu1 %vm30009_vm1, %v35908_v40 }
0x127b   : > { %29543 = vrcp.f32 %v14888_v38  ;;  %28425 = vmatprep.subr.mxu1 %v35908_v40 }
0x127c   : > { %v29536_v47 = vpop.eup %29535 }
0x127d   : > { %v14908_v49 = vmul.f32 %v29536_v47, %v33490_v3 }
0x127e   : > { %v29538_v54 = vpop.eup %29537  ;;  %v16716_v31 = vpop.permute.xlu1 %16715 }
0x127f   : > { %v14918_v36 = vmul.f32 %v29538_v54, %v33495_v44  ;;  %28393 = vmatmul.mubr.msk.f32.vlgmr.msra.gmra.mxu0 %vm1344_vm2, %v14908_v49  ;;  %v36089_v44 = vld [vmem:[#allocation56_spill] sm:$0xff] }
0x1280   : > { %v29540_v43 = vpop.eup %29539  ;;  %v33600_v24 = vpop.f32.mrf.mxu1  ;;  %28401 = vmatpush3.msra.mxu0 %v36088_v28  ;;  %28402 = vmatprep.mubr.msk.f32.mxu0 %vm30009_vm1, %v35908_v40 }
0x1281   : > { %36087 = vst [vmem:[#allocation61_spill] sm:$0xff] %v33600_v24  ;;  %v14912_v38 = vmul.f32 %v29540_v43, %v33499_v19  ;;  %28418 = vmatmul.mubr.msk.f32.vlgmr.msra.gmra.mxu1 %vm1344_vm2, %v14918_v36  ;;  %28410 = vmatprep.subr.mxu0 %v35908_v40  ;;  %v36091_v19 = vld [vmem:[#allocation60_spill] sm:$0xff]  ;;  %v33620_v43 = vpop.permute.xlu0 %16791 }
0x1282   : > { %v28349_v3 = vpop.f32.mrf.mxu1  ;;  %28426 = vmatpush3.xpose.msk.msra.mxu1 %vm1344_vm2, %v36089_v44  ;;  %v16714_v47 = vpop.permute.xlu1 %16713  ;;  %28427 = vmatprep.mubr.msk.f32.mxu1 %vm30009_vm1, %v35908_v40  ;;  %v36092_v44 = vld [vmem:[#allocation68_spill] sm:$0xff] }
0x1283   : > { %v33612_v49 = vpop.f32.mrf.mxu0  ;;  %28403 = vmatmul.mubr.msk.f32.vlgmr.msra.gmra.mxu0 %vm1344_vm2, %v14912_v38  ;;  %28435 = vmatprep.subr.mxu1 %v35908_v40 }
0x1284   : > { %36090 = vst [vmem:[#allocation19_spill] sm:$0xff] %v33612_v49  ;;  %v29542_v54 = vpop.eup %29541  ;;  %28411 = vmatpush3.msra.mxu0 %v36091_v19  ;;  %28412 = vmatprep.mubr.msk.f32.mxu0 %vm30009_vm1, %v35908_v40 }
0x1285   : > { %v14916_v36 = vmul.f32 %v29542_v54, %v33503_v4  ;;  %v28354_v3 = vpop.f32.mrf.mxu0  ;;  %28428 = vmatmul.mubr.msk.f32.vlgmr.msra.gmra.mxu1 %vm1344_vm2, %v36092_v44  ;;  %28420 = vmatprep.subr.mxu0 %v35908_v40  ;;  %v36093_v54 = vld [vmem:[#allocation40_spill] sm:$0xff]  ;;  %v36094_v44 = vld [vmem:[#allocation66_spill] sm:$0xff] }
0x1286   : > { %28436 = vmatpush3.xpose.msk.msra.mxu1 %vm1344_vm2, %v33563_v21  ;;  %v16872_v38 = vpop.permute.xlu1 %16871  ;;  %28437 = vmatprep.mubr.msk.f32.mxu1 %vm30009_vm1, %v35908_v40 }
0x1287   : > { %28413 = vmatmul.mubr.msk.f32.vlgmr.msra.gmra.mxu0 %vm1344_vm2, %v14916_v36  ;;  %28445 = vmatprep.subr.mxu1 %v35908_v40  ;;  %v16950_v36 = vpop.permute.xlu0 %16949 }
0x1288   : > { %v29544_v4 = vpop.eup %29543  ;;  %28421 = vmatpush3.msra.mxu0 %v36093_v54  ;;  %28422 = vmatprep.mubr.msk.f32.mxu0 %vm30009_vm1, %v35908_v40 }
0x1289   : > { %v14920_v3 = vmul.f32 %v29544_v4, %v33507_v11  ;;  %28438 = vmatmul.mubr.msk.f32.vlgmr.msra.gmra.mxu1 %vm1344_vm2, %v33565_v13  ;;  %28430 = vmatprep.subr.mxu0 %v35908_v40 }
0x128a   : > { %28446 = vmatpush3.xpose.msk.msra.mxu1 %vm1344_vm2, %v33567_v46  ;;  %v16870_v21 = vpop.permute.xlu1 %16869  ;;  %28447 = vmatprep.mubr.msk.f32.mxu1 %vm30009_vm1, %v35908_v40 }
0x128b   : > { %28423 = vmatmul.mubr.msk.f32.vlgmr.msra.gmra.mxu0 %vm1344_vm2, %v14920_v3  ;;  %28455 = vmatprep.subr.mxu1 %v35908_v40  ;;  %v16948_v13 = vpop.permute.xlu0 %16947 }
0x128c   : > { %28431 = vmatpush3.xpose.msk.msra.mxu0 %vm1344_vm2, %v36094_v44  ;;  %28432 = vmatprep.mubr.msk.f32.mxu0 %vm30009_vm1, %v35908_v40 }
0x128d   : > { %28448 = vmatmul.mubr.msk.f32.vlgmr.msra.gmra.mxu1 %vm1344_vm2, %v33569_v26  ;;  %28440 = vmatprep.subr.mxu0 %v35908_v40 }
0x128e   : > { %28456 = vmatpush3.xpose.msk.msra.mxu1 %vm1344_vm2, %v33578_v15  ;;  %v17028_v11 = vpop.permute.xlu1 %17027  ;;  %28457 = vmatprep.mubr.msk.f32.mxu1 %vm30009_vm1, %v35908_v40 }
0x128f   : > { %28433 = vmatmul.mubr.msk.f32.vlgmr.msra.gmra.mxu0 %vm1344_vm2, %v33511_v29  ;;  %28465 = vmatprep.subr.mxu1 %v35908_v40 }
0x1290   : > { %28441 = vmatpush3.xpose.msk.msra.mxu0 %vm1344_vm2, %v33515_v33  ;;  %28442 = vmatprep.mubr.msk.f32.mxu0 %vm30009_vm1, %v35908_v40  ;;  %v17106_v33 = vpop.permute.xlu0 %17105 }
0x1291   : > { %28458 = vmatmul.mubr.msk.f32.vlgmr.msra.gmra.mxu1 %vm1344_vm2, %v33585_v56  ;;  %28450 = vmatprep.subr.mxu0 %v35908_v40 }
0x1292   : > { %28466 = vmatpush3.xpose.msk.msra.mxu1 %vm1344_vm2, %v16716_v31  ;;  %28467 = vmatprep.mubr.msk.f32.mxu1 %vm30009_vm1, %v35908_v40  ;;  %v17026_v29 = vpop.permute.xlu1 %17025 }
0x1293   : > { %28443 = vmatmul.mubr.msk.f32.vlgmr.msra.gmra.mxu0 %vm1344_vm2, %v33523_v20  ;;  %28475 = vmatprep.subr.mxu1 %v35908_v40 }
0x1294   : > { %28451 = vmatpush3.xpose.msk.msra.mxu0 %vm1344_vm2, %v33531_v5  ;;  %28452 = vmatprep.mubr.msk.f32.mxu0 %vm30009_vm1, %v35908_v40  ;;  %v17104_v15 = vpop.permute.xlu0 %17103 }
0x1295   : > { %28468 = vmatmul.mubr.msk.f32.vlgmr.msra.gmra.mxu1 %vm1344_vm2, %v16714_v47  ;;  %28460 = vmatprep.subr.mxu0 %v35908_v40 }
0x1296   : > { %28476 = vmatpush3.xpose.msk.msra.mxu1 %vm1344_vm2, %v16872_v38  ;;  %v33678_v31 = vpop.f32.mrf.mxu0  ;;  %28477 = vmatprep.mubr.msk.f32.mxu1 %vm30009_vm1, %v35908_v40  ;;  %v17184_v46 = vpop.permute.xlu1 %17183 }
0x1297   : > { %36095 = vst [vmem:[#allocation59_spill] sm:$0xff] %v33678_v31  ;;  %28453 = vmatmul.mubr.msk.f32.vlgmr.msra.gmra.mxu0 %vm1344_vm2, %v33539_v0  ;;  %28485 = vmatprep.subr.mxu1 %v35908_v40 }
0x1298   : > { %28461 = vmatpush3.xpose.msk.msra.mxu0 %vm1344_vm2, %v33547_v6  ;;  %v33687_v20 = vpop.f32.mrf.mxu1  ;;  %v28364_v5 = vpop.f32.mrf.mxu0  ;;  %28462 = vmatprep.mubr.msk.f32.mxu0 %vm30009_vm1, %v35908_v40 }
0x1299   : > { %36096 = vst [vmem:[#allocation56_spill] sm:$0xff] %v33687_v20  ;;  %28478 = vmatmul.mubr.msk.f32.vlgmr.msra.gmra.mxu1 %vm1344_vm2, %v16870_v21  ;;  %28470 = vmatprep.subr.mxu0 %v35908_v40 }
0x129a   : > { %28486 = vmatpush3.xpose.msk.msra.mxu1 %vm1344_vm2, %v17028_v11  ;;  %v28359_v26 = vpop.f32.mrf.mxu1  ;;  %28487 = vmatprep.mubr.msk.f32.mxu1 %vm30009_vm1, %v35908_v40  ;;  %v33696_v0 = vpop.f32.mrf.mxu0 }
0x129b   : > { %36097 = vst [vmem:[#allocation68_spill] sm:$0xff] %v33696_v0  ;;  %28463 = vmatmul.mubr.msk.f32.vlgmr.msra.gmra.mxu0 %vm1344_vm2, %v33588_v27  ;;  %28495 = vmatprep.subr.mxu1 %v35908_v40  ;;  %v17182_v56 = vpop.permute.xlu1 %17181 }
0x129c   : > { %28471 = vmatpush3.xpose.msk.msra.mxu0 %vm1344_vm2, %v33597_v25  ;;  %28472 = vmatprep.mubr.msk.f32.mxu0 %vm30009_vm1, %v35908_v40  ;;  %v28374_v6 = vpop.f32.mrf.mxu0 }
0x129d   : > { %28488 = vmatmul.mubr.msk.f32.vlgmr.msra.gmra.mxu1 %vm1344_vm2, %v17026_v29  ;;  %28480 = vmatprep.subr.mxu0 %v35908_v40 }
0x129e   : > { %28496 = vmatpush3.xpose.msk.msra.mxu1 %vm1344_vm2, %v17184_v46  ;;  %28497 = vmatprep.mubr.msk.f32.mxu1 %vm30009_vm1, %v35908_v40  ;;  %v33710_v27 = vpop.f32.mrf.mxu0 }
0x129f   : > { %36098 = vst [vmem:[#allocation40_spill] sm:$0xff] %v33710_v27  ;;  %28473 = vmatmul.mubr.msk.f32.vlgmr.msra.gmra.mxu0 %vm1344_vm2, %v33620_v43  ;;  %28505 = vmatprep.subr.mxu1 %v35908_v40  ;;  %v17262_v43 = vpop.permute.xlu0 %17261 }
0x12a0   : > { %28481 = vmatpush3.xpose.msk.msra.mxu0 %vm1344_vm2, %v16950_v36  ;;  %28482 = vmatprep.mubr.msk.f32.mxu0 %vm30009_vm1, %v35908_v40  ;;  %v28384_v47 = vpop.f32.mrf.mxu0 }
0x12a1   : > { %v33718_v25 = vpop.f32.mrf.mxu1  ;;  %28498 = vmatmul.mubr.msk.f32.vlgmr.msra.gmra.mxu1 %vm1344_vm2, %v17182_v56  ;;  %28490 = vmatprep.subr.mxu0 %v35908_v40 }
0x12a2   : > { %36099 = vst [vmem:[#allocation66_spill] sm:$0xff] %v33718_v25  ;;  %28507 = vmatprep.mubr.msk.f32.mxu1 %vm30009_vm1, %v35908_v40 }
0x12a3   : > { %v28369_v38 = vpop.f32.mrf.mxu1  ;;  %28483 = vmatmul.mubr.msk.f32.vlgmr.msra.gmra.mxu0 %vm1344_vm2, %v16948_v13  ;;  %v17260_v4 = vpop.permute.xlu0 %17259 }
0x12a4   : > { %28491 = vmatpush3.xpose.msk.msra.mxu0 %vm1344_vm2, %v17106_v33  ;;  %28492 = vmatprep.mubr.msk.f32.mxu0 %vm30009_vm1, %v35908_v40 }
0x12a5   : > { %28500 = vmatprep.subr.mxu0 %v35908_v40 }
0x12a7   : > { %28493 = vmatmul.mubr.msk.f32.vlgmr.msra.gmra.mxu0 %vm1344_vm2, %v17104_v15 }
0x12a8   : > { %28501 = vmatpush3.xpose.msk.msra.mxu0 %vm1344_vm2, %v17262_v43  ;;  %28502 = vmatprep.mubr.msk.f32.mxu0 %vm30009_vm1, %v35908_v40 }
0x12a9   : > { %28510 = vmatprep.subr.mxu0 %v35908_v40 }
0x12ab   : > { %28503 = vmatmul.mubr.msk.f32.vlgmr.msra.gmra.mxu0 %vm1344_vm2, %v17260_v4 }
0x12ac   : > { %28512 = vmatprep.mubr.msk.f32.mxu0 %vm30009_vm1, %v35908_v40 }
0x12ed   : > { %v33737_v3 = vpop.f32.mrf.mxu1 }
0x12ee   : > { %36100 = vst [vmem:[#allocation69_spill] sm:$0xff] %v33737_v3 }
0x12ef   : > { %v28379_v21 = vpop.f32.mrf.mxu1 }
0x1321   : > { %v33739_v36 = vpop.f32.mrf.mxu1 }
0x1322   : > { %36101 = vst [vmem:[#allocation70_spill] sm:$0xff] %v33739_v36 }
0x1323   : > { %v28389_v44 = vpop.f32.mrf.mxu1 }
0x1325   : > { %v33741_v11 = vpop.f32.mrf.mxu1 }
0x1326   : > { %36102 = vst [vmem:[#allocation71_spill] sm:$0xff] %v33741_v11 }
0x1327   : > { %v28399_v13 = vpop.f32.mrf.mxu1 }
0x1339   : > { %v33743_v29 = vpop.f32.mrf.mxu1 }
0x133a   : > { %36103 = vst [vmem:[#allocation72_spill] sm:$0xff] %v33743_v29 }
0x133b   : > { %v28409_v33 = vpop.f32.mrf.mxu1 }
0x133f   : > { %v33745_v5 = vpop.f32.mrf.mxu0 }
0x1340   : > { %36104 = vst [vmem:[#allocation73_spill] sm:$0xff] %v33745_v5 }
0x1341   : > { %v28394_v46 = vpop.f32.mrf.mxu0  ;;  %v33747_v26 = vpop.f32.mrf.mxu1 }
0x1342   : > { %36105 = vst [vmem:[#allocation74_spill] sm:$0xff] %v33747_v26 }
0x1343   : > { %v33749_v6 = vpop.f32.mrf.mxu0  ;;  %v28419_v15 = vpop.f32.mrf.mxu1 }
0x1344   : > { %36106 = vst [vmem:[#allocation75_spill] sm:$0xff] %v33749_v6 }
0x1345   : > { %v28404_v56 = vpop.f32.mrf.mxu0  ;;  %v16163_v47 = vpop.f32.mrf.mxu1 }
0x1346   : > { %v33751_v38 = vmul.f32 0.35355338, %v16163_v47 }
0x1347   : > { %v33753_v43 = vpop.f32.mrf.mxu0  ;;  %v28429_v4 = vpop.f32.mrf.mxu1 }
0x1348   : > { %36107 = vst [vmem:[#allocation76_spill] sm:$0xff] %v33753_v43  ;;  %v17353_v21 = vsel %vm1344_vm2, %v33751_v38, -inf }
0x1349   : > { %v28414_v44 = vpop.f32.mrf.mxu0  ;;  %17354 = vmax.xlane.f32.xlu1 %v17353_v21  ;;  %v16319_v13 = vpop.f32.mrf.mxu1 }
0x134a   : > { %v33761_v5 = vmul.f32 0.35355338, %v16319_v13 }
0x134b   : > { %v33757_v33 = vpop.f32.mrf.mxu0  ;;  %v28439_v46 = vpop.f32.mrf.mxu1 }
0x134c   : > { %36108 = vst [vmem:[#allocation77_spill] sm:$0xff] %v33757_v33 }
0x134d   : > { %v28424_v26 = vpop.f32.mrf.mxu0  ;;  %v16475_v29 = vpop.f32.mrf.mxu1 }
0x134e   : > { %v33767_v26 = vmul.f32 0.35355338, %v16475_v29 }
0x134f   : > { %v16241_v6 = vpop.f32.mrf.mxu0  ;;  %v28449_v15 = vpop.f32.mrf.mxu1 }
0x1350   : > { %v33759_v56 = vmul.f32 0.35355338, %v16241_v6  ;;  %v17359_v15 = vsel %vm1344_vm2, %v33761_v5, -inf }
0x1351   : > { %v28434_v47 = vpop.f32.mrf.mxu0  ;;  %v16631_v11 = vpop.f32.mrf.mxu1 }
0x1352   : > { %v17356_v4 = vsel %vm1344_vm2, %v33759_v56, -inf }
0x1353   : > { %17357 = vmax.xlane.f32.xlu0 %v17356_v4  ;;  %v16397_v44 = vpop.f32.mrf.mxu0  ;;  %v28459_v21 = vpop.f32.mrf.mxu1 }
0x1354   : > { %v33765_v43 = vmul.f32 0.35355338, %v16397_v44  ;;  %v33775_v44 = vmul.f32 0.35355338, %v16631_v11 }
0x1355   : > { %v28444_v33 = vpop.f32.mrf.mxu0  ;;  %v16787_v46 = vpop.f32.mrf.mxu1 }
0x1356   : > { %v17362_v6 = vsel %vm1344_vm2, %v33765_v43, -inf  ;;  %v17365_v33 = vsel %vm1344_vm2, %v33767_v26, -inf  ;;  %v17371_v11 = vsel %vm1344_vm2, %v33775_v44, -inf }
0x1357   : > { %v16553_v13 = vpop.f32.mrf.mxu0  ;;  %17363 = vmax.xlane.f32.xlu1 %v17362_v6  ;;  %17360 = vmax.xlane.f32.xlu0 %v17359_v15  ;;  %v28469_v47 = vpop.f32.mrf.mxu1 }
0x1358   : > { %v33773_v36 = vmul.f32 0.35355338, %v16553_v13  ;;  %v33783_v13 = vmul.f32 0.35355338, %v16787_v46 }
0x1359   : > { %v28454_v4 = vpop.f32.mrf.mxu0  ;;  %v16943_v21 = vpop.f32.mrf.mxu1 }
0x135a   : > { %v17368_v29 = vsel %vm1344_vm2, %v33773_v36, -inf  ;;  %v17377_v46 = vsel %vm1344_vm2, %v33783_v13, -inf }
0x135b   : > { %17369 = vmax.xlane.f32.xlu1 %v17368_v29  ;;  %17366 = vmax.xlane.f32.xlu0 %v17365_v33  ;;  %v16709_v27 = vpop.f32.mrf.mxu0  ;;  %v28479_v3 = vpop.f32.mrf.mxu1 }
0x135c   : > { %v33781_v0 = vmul.f32 0.35355338, %v16709_v27  ;;  %v33791_v27 = vmul.f32 0.35355338, %v16943_v21 }
0x135d   : > { %v28464_v6 = vpop.f32.mrf.mxu0  ;;  %v17099_v15 = vpop.f32.mrf.mxu1 }
0x135e   : > { %v17374_v47 = vsel %vm1344_vm2, %v33781_v0, -inf }
0x135f   : > { %17372 = vmax.xlane.f32.xlu0 %v17371_v11  ;;  %v28489_v4 = vpop.f32.mrf.mxu1  ;;  %17375 = vmax.xlane.f32.xlu1 %v17374_v47  ;;  %v16865_v25 = vpop.f32.mrf.mxu0 }
0x1360   : > { %v33789_v29 = vmul.f32 0.35355338, %v16865_v25  ;;  %v33799_v4 = vmul.f32 0.35355338, %v17099_v15  ;;  %v17383_v25 = vsel %vm1344_vm2, %v33791_v27, -inf }
0x1361   : > { %v28474_v33 = vpop.f32.mrf.mxu0  ;;  %v17255_v3 = vpop.f32.mrf.mxu1 }
0x1362   : > { %v17380_v6 = vsel %vm1344_vm2, %v33789_v29, -inf }
0x1363   : > { %17378 = vmax.xlane.f32.xlu0 %v17377_v46  ;;  %v28499_v31 = vpop.f32.mrf.mxu1  ;;  %17381 = vmax.xlane.f32.xlu1 %v17380_v6  ;;  %v17021_v20 = vpop.f32.mrf.mxu0 }
0x1364   : > { %v33797_v11 = vmul.f32 0.35355338, %v17021_v20  ;;  %v33807_v31 = vmul.f32 0.35355338, %v17255_v3  ;;  %v17389_v20 = vsel %vm1344_vm2, %v33799_v4, -inf  ;;  %v36109_v3 = vld [vmem:[#allocation45_spill] sm:$0xff] }
0x1365   : > { %v28484_v47 = vpop.f32.mrf.mxu0 }
0x1366   : > { %v17386_v21 = vsel %vm1344_vm2, %v33797_v11, -inf }
0x1367   : > { %17384 = vmax.xlane.f32.xlu0 %v17383_v25  ;;  %17387 = vmax.xlane.f32.xlu1 %v17386_v21  ;;  %v17177_v33 = vpop.f32.mrf.mxu0  ;;  %v17395_v25 = vsel %vm1344_vm2, %v33807_v31, -inf }
0x1368   : > { %v33805_v49 = vmul.f32 0.35355338, %v17177_v33  ;;  %v36110_v33 = vld [vmem:[#allocation48_spill] sm:$0xff] }
0x1369   : > { %v28494_v46 = vpop.f32.mrf.mxu0 }
0x136a   : > { %v17392_v15 = vsel %vm1344_vm2, %v33805_v49, -inf }
0x136b   : > { %17390 = vmax.xlane.f32.xlu0 %v17389_v20  ;;  %17393 = vmax.xlane.f32.xlu1 %v17392_v15  ;;  %v17333_v6 = vpop.f32.mrf.mxu0 }
0x136c   : > { %v33813_v47 = vmul.f32 0.35355338, %v17333_v6 }
0x136d   : > { %v28504_v24 = vpop.f32.mrf.mxu0 }
0x136e   : > { %v17398_v21 = vsel %vm1344_vm2, %v33813_v47, -inf }
0x136f   : > { %17396 = vmax.xlane.f32.xlu0 %v17395_v25  ;;  %17399 = vmax.xlane.f32.xlu1 %v17398_v21 }
0x1380   : > { %17607 = vrot.lane.b32.xlu1 %v36109_v3, %s30010_s15 }
0x1384   : > { %17684 = vrot.lane.b32.xlu1 %v33257_v39, %s30010_s15 }
0x1385   : > { %17530 = vrot.lane.b32.xlu0 %v36110_v33, %s30010_s15 }
0x1388   : > { %17761 = vrot.lane.b32.xlu1 %v33255_v53, %s30010_s15 }
0x138c   : > { %17838 = vrot.lane.b32.xlu1 %v33261_v10, %s30010_s15 }
0x1390   : > { %17915 = vrot.lane.b32.xlu1 %v33259_v2, %s30010_s15 }
0x1394   : > { %17992 = vrot.lane.b32.xlu1 %v33265_v37, %s30010_s15 }
0x1398   : > { %18069 = vrot.lane.b32.xlu1 %v33263_v62, %s30010_s15 }
0x139c   : > { %18146 = vrot.lane.b32.xlu1 %v36083_v30, %s30010_s15 }
0x13a0   : > { %18223 = vrot.lane.b32.xlu1 %v33267_v1, %s30010_s15 }
0x13d2   : > { %v17355_v24 = vpop.xlane.xlu1 %17354 }
0x13d3   : > { %v17401_v46 = vsub.f32 %v33751_v38, %v17355_v24 }
0x13d5   : > { %v17417_v20 = vmul.f32 1.442695, %v17401_v46 }
0x13d7   : > { %29545 = vpow2.f32 %v17417_v20 }
0x13dc   : > { %v17358_v15 = vpop.xlane.xlu0 %17357 }
0x13dd   : > { %v17402_v6 = vsub.f32 %v33759_v56, %v17358_v15 }
0x13df   : > { %v17419_v25 = vmul.f32 1.442695, %v17402_v6 }
0x13e0   : > { %v17364_v21 = vpop.xlane.xlu1 %17363  ;;  %v17361_v37 = vpop.xlane.xlu0 %17360 }
0x13e1   : > { %29547 = vpow2.f32 %v17419_v25  ;;  %v17404_v62 = vsub.f32 %v33765_v43, %v17364_v21  ;;  %v17403_v2 = vsub.f32 %v33761_v5, %v17361_v37 }
0x13e3   : > { %v17423_v30 = vmul.f32 1.442695, %v17404_v62  ;;  %v17421_v10 = vmul.f32 1.442695, %v17403_v2 }
0x13e4   : > { %v33843_v53 = vpop.eup %29545  ;;  %v17370_v39 = vpop.xlane.xlu1 %17369 }
0x13e5   : > { %v17367_v1 = vpop.xlane.xlu0 %17366  ;;  %29549 = vpow2.f32 %v17423_v30  ;;  %v17406_v38 = vsub.f32 %v33773_v36, %v17370_v39  ;;  %v17449_v56 = vsel %vm1344_vm2, %v33843_v53, 0.0 }
0x13e6   : > { %v17405_v24 = vsub.f32 %v33767_v26, %v17367_v1  ;;  %29551 = vpow2.f32 %v17421_v10  ;;  %17450 = vadd.xlane.f32.xlu0 %v17449_v56 }
0x13e7   : > { %v17427_v46 = vmul.f32 1.442695, %v17406_v38 }
0x13e8   : > { %v17425_v43 = vmul.f32 1.442695, %v17405_v24  ;;  %v17376_v20 = vpop.xlane.xlu1 %17375 }
0x13e9   : > { %v17373_v37 = vpop.xlane.xlu0 %17372  ;;  %29553 = vpow2.f32 %v17427_v46  ;;  %v17408_v2 = vsub.f32 %v33781_v0, %v17376_v20 }
0x13ea   : > { %v17407_v62 = vsub.f32 %v33775_v44, %v17373_v37  ;;  %29555 = vpow2.f32 %v17425_v43 }
0x13eb   : > { %v17431_v30 = vmul.f32 1.442695, %v17408_v2 }
0x13ec   : > { %v17429_v5 = vmul.f32 1.442695, %v17407_v62  ;;  %v17382_v39 = vpop.xlane.xlu1 %17381 }
0x13ed   : > { %v17379_v36 = vpop.xlane.xlu0 %17378  ;;  %29557 = vpow2.f32 %v17431_v30  ;;  %v17410_v1 = vsub.f32 %v33789_v29, %v17382_v39 }
0x13ee   : > { %v17409_v10 = vsub.f32 %v33783_v13, %v17379_v36  ;;  %v33853_v26 = vpop.eup %29547  ;;  %29559 = vpow2.f32 %v17429_v5 }
0x13ef   : > { %v17435_v15 = vmul.f32 1.442695, %v17410_v1  ;;  %v17452_v0 = vsel %vm1344_vm2, %v33853_v26, 0.0 }
0x13f0   : > { %v17433_v6 = vmul.f32 1.442695, %v17409_v10  ;;  %v17388_v25 = vpop.xlane.xlu1 %17387  ;;  %17453 = vadd.xlane.f32.xlu1 %v17452_v0 }
0x13f1   : > { %v17385_v44 = vpop.xlane.xlu0 %17384  ;;  %29561 = vpow2.f32 %v17435_v15  ;;  %v17412_v21 = vsub.f32 %v33797_v11, %v17388_v25 }
0x13f2   : > { %v17411_v38 = vsub.f32 %v33791_v27, %v17385_v44  ;;  %v33859_v24 = vpop.eup %29549  ;;  %29563 = vpow2.f32 %v17433_v6 }
0x13f3   : > { %v33861_v13 = vpop.eup %29551  ;;  %v17439_v29 = vmul.f32 1.442695, %v17412_v21  ;;  %v17458_v46 = vsel %vm1344_vm2, %v33859_v24, 0.0 }
0x13f4   : > { %v17437_v56 = vmul.f32 1.442695, %v17411_v38  ;;  %v17394_v43 = vpop.xlane.xlu1 %17393  ;;  %17459 = vadd.xlane.f32.xlu1 %v17458_v46  ;;  %v17455_v20 = vsel %vm1344_vm2, %v33861_v13, 0.0 }
0x13f5   : > { %v17391_v37 = vpop.xlane.xlu0 %17390  ;;  %29565 = vpow2.f32 %v17439_v29  ;;  %v17414_v11 = vsub.f32 %v33805_v49, %v17394_v43  ;;  %17456 = vadd.xlane.f32.xlu0 %v17455_v20 }
0x13f6   : > { %v17413_v27 = vsub.f32 %v33799_v4, %v17391_v37  ;;  %v33869_v2 = vpop.eup %29553  ;;  %29567 = vpow2.f32 %v17437_v56 }
0x13f7   : > { %v33871_v62 = vpop.eup %29555  ;;  %v17443_v30 = vmul.f32 1.442695, %v17414_v11  ;;  %v17464_v39 = vsel %vm1344_vm2, %v33869_v2, 0.0 }
0x13f8   : > { %v17441_v5 = vmul.f32 1.442695, %v17413_v27  ;;  %v17400_v36 = vpop.xlane.xlu1 %17399  ;;  %17465 = vadd.xlane.f32.xlu1 %v17464_v39  ;;  %v17461_v1 = vsel %vm1344_vm2, %v33871_v62, 0.0 }
0x13f9   : > { %v17397_v10 = vpop.xlane.xlu0 %17396  ;;  %29569 = vpow2.f32 %v17443_v30  ;;  %v17416_v49 = vsub.f32 %v33813_v47, %v17400_v36  ;;  %17462 = vadd.xlane.f32.xlu0 %v17461_v1  ;;  %v36111_v1 = vld [vmem:[#allocation54_spill] sm:$0xff] }
0x13fa   : > { %v33878_v4 = vpop.eup %29557  ;;  %29571 = vpow2.f32 %v17441_v5 }
0x13fb   : > { %v33880_v15 = vpop.eup %29559  ;;  %v17447_v6 = vmul.f32 1.442695, %v17416_v49  ;;  %v17470_v0 = vsel %vm1344_vm2, %v33878_v4, 0.0  ;;  %v36112_v49 = vld [vmem:[#allocation42_spill] sm:$0xff] }
0x13fc   : > { %v17608_v25 = vpop.permute.xlu1 %17607  ;;  %17471 = vadd.xlane.f32.xlu1 %v17470_v0  ;;  %v17467_v44 = vsel %vm1344_vm2, %v33880_v15, 0.0 }
0x13fd   : > { %v17531_v21 = vpop.permute.xlu0 %17530  ;;  %29573 = vpow2.f32 %v17447_v6  ;;  %17468 = vadd.xlane.f32.xlu0 %v17467_v44  ;;  %28511 = vmatpush3.msra.mxu0 %v17608_v25  ;;  %v17415_v6 = vsub.f32 %v33807_v31, %v17397_v10 }
0x13fe   : > { %28506 = vmatpush3.msra.mxu1 %v17531_v21  ;;  %v33886_v47 = vpop.eup %29561  ;;  %28520 = vmatprep.subr.mxu0 %v35908_v40 }
0x13ff   : > { %28515 = vmatprep.subr.mxu1 %v35908_v40  ;;  %v33889_v38 = vpop.eup %29563  ;;  %v17476_v29 = vsel %vm1344_vm2, %v33886_v47, 0.0  ;;  %v17445_v0 = vmul.f32 1.442695, %v17415_v6 }
0x1400   : > { %17477 = vadd.xlane.f32.xlu1 %v17476_v29  ;;  %v17473_v56 = vsel %vm1344_vm2, %v33889_v38, 0.0  ;;  %v17685_v10 = vpop.permute.xlu1 %17684 }
0x1401   : > { %17474 = vadd.xlane.f32.xlu0 %v17473_v56  ;;  %29575 = vpow2.f32 %v17445_v0  ;;  %v36113_v56 = vld [vmem:[#allocation67_spill] sm:$0xff] }
0x1402   : > { %v33896_v46 = vpop.eup %29565 }
0x1403   : > { %v33898_v43 = vpop.eup %29567  ;;  %v17482_v20 = vsel %vm1344_vm2, %v33896_v46, 0.0 }
0x1404   : > { %17483 = vadd.xlane.f32.xlu1 %v17482_v20  ;;  %v17479_v37 = vsel %vm1344_vm2, %v33898_v43, 0.0  ;;  %v17762_v44 = vpop.permute.xlu1 %17761 }
0x1405   : > { %17480 = vadd.xlane.f32.xlu0 %v17479_v37 }
0x1406   : > { %v33904_v11 = vpop.eup %29569 }
0x1407   : > { %v33906_v27 = vpop.eup %29571  ;;  %v17488_v30 = vsel %vm1344_vm2, %v33904_v11, 0.0 }
0x1408   : > { %17489 = vadd.xlane.f32.xlu1 %v17488_v30  ;;  %v17485_v5 = vsel %vm1344_vm2, %v33906_v27, 0.0  ;;  %v33955_v21 = vpop.permute.xlu1 %17838 }
0x1409   : > { %17486 = vadd.xlane.f32.xlu0 %v17485_v5 }
0x140a   : > { %v33912_v39 = vpop.eup %29573 }
0x140b   : > { %v17494_v36 = vsel %vm1344_vm2, %v33912_v39, 0.0 }
0x140c   : > { %v17916_v29 = vpop.permute.xlu1 %17915 }
0x140d   : > { %17495 = vadd.xlane.f32.xlu0 %v17494_v36 }
0x140e   : > { %v33943_v25 = vpop.eup %29575 }
0x140f   : > { %v17491_v31 = vsel %vm1344_vm2, %v33943_v25, 0.0 }
0x1410   : > { %v33969_v20 = vpop.permute.xlu1 %17992 }
0x1414   : > { %v33975_v37 = vpop.permute.xlu1 %18069 }
0x1418   : > { %v33981_v30 = vpop.permute.xlu1 %18146 }
0x1419   : > { %18377 = vrot.lane.b32.xlu1 %v36088_v28, %s30010_s15 }
0x141c   : > { %v33985_v36 = vpop.permute.xlu1 %18223 }
0x141d   : > { %18454 = vrot.lane.b32.xlu1 %v36085_v34, %s30010_s15 }
0x1421   : > { %18531 = vrot.lane.b32.xlu1 %v36091_v19, %s30010_s15 }
0x1423   : > { %18300 = vrot.lane.b32.xlu0 %v36084_v8, %s30010_s15 }
0x1425   : > { %18608 = vrot.lane.b32.xlu1 %v36086_v58, %s30010_s15 }
0x1427   : > { %19149 = vrot.lane.b32.xlu0 %v36111_v1, %s30011_s23 }
0x142b   : > { %19147 = vrot.lane.b32.xlu0 %v36112_v49, %s30011_s23 }
0x142f   : > { %19305 = vrot.lane.b32.xlu0 %v33101_v23, %s30011_s23 }
0x1433   : > { %19303 = vrot.lane.b32.xlu0 %v33099_v52, %s30011_s23 }
0x1437   : > { %19461 = vrot.lane.b32.xlu0 %v33119_v50, %s30011_s23 }
0x143b   : > { %19459 = vrot.lane.b32.xlu0 %v33117_v17, %s30011_s23 }
0x143f   : > { %19617 = vrot.lane.b32.xlu0 %v33139_v48, %s30011_s23 }
0x1443   : > { %19615 = vrot.lane.b32.xlu0 %v33151_v35, %s30011_s23 }
0x1447   : > { %19773 = vrot.lane.b32.xlu0 %v33167_v45, %s30011_s23 }
0x1449   : > { %17492 = vadd.xlane.f32.xlu1 %v17491_v31 }
0x144b   : > { %19771 = vrot.lane.b32.xlu0 %v33165_v18, %s30011_s23 }
0x144f   : > { %19929 = vrot.lane.b32.xlu0 %v33185_v7, %s30011_s23 }
0x1453   : > { %19927 = vrot.lane.b32.xlu0 %v33183_v12, %s30011_s23 }
0x1457   : > { %20085 = vrot.lane.b32.xlu0 %v33207_v41, %s30011_s23 }
0x145a   : > { %18685 = vrot.lane.b32.xlu1 %v36093_v54, %s30010_s15  ;;  %s29932_s15 = scalar_lea.vmem %s29931_s16, 4096 }
0x145b   : > { %20083 = vrot.lane.b32.xlu0 %v33205_v51, %s30011_s23  ;;  %p29934_p0 = scmp.lt.s32.totalorder %s29932_s15, %s29926_s26 }
0x145d   : > { %p29935_p2 = por %p29934_p0, %p29933_p13 }
0x145e   : > { %19227 = vrot.lane.b32.xlu1 %v36113_v56, %s30011_s23 }
0x145f   : > { %20241 = vrot.lane.b32.xlu0 %v33229_v59, %s30011_s23  ;;  %p29936_p10 = pnand %p29935_p2, %p29929_p9 }
0x1462   : > { %19225 = vrot.lane.b32.xlu1 %v33065_v16, %s30011_s23 }
0x1463   : > { %20239 = vrot.lane.b32.xlu0 %v36082_v63, %s30011_s23 }
0x1466   : > { %19383 = vrot.lane.b32.xlu1 %v33095_v22, %s30011_s23 }
0x146a   : > { %19381 = vrot.lane.b32.xlu1 %v33093_v32, %s30011_s23 }
0x146e   : > { %19539 = vrot.lane.b32.xlu1 %v33108_v9, %s30011_s23 }
0x146f   : > { %v17451_v5 = vpop.xlane.xlu0 %17450 }
0x1470   : > { %29577 = vrcp.f32 %v17451_v5 }
0x1472   : > { %19537 = vrot.lane.b32.xlu1 %v33106_v55, %s30011_s23 }
0x1476   : > { %19695 = vrot.lane.b32.xlu1 %v33128_v42, %s30011_s23 }
0x1479   : > { %v17454_v6 = vpop.xlane.xlu1 %17453 }
0x147a   : > { %29579 = vrcp.f32 %v17454_v6  ;;  %19693 = vrot.lane.b32.xlu1 %v33133_v14, %s30011_s23 }
0x147d   : > { %v29578_v0 = vpop.eup %29577  ;;  %v17460_v31 = vpop.xlane.xlu1 %17459 }
0x147e   : > { %v17498_v63 = vmul.f32 %v29578_v0, %v33843_v53  ;;  %29581 = vrcp.f32 %v17460_v31  ;;  %v17457_v59 = vpop.xlane.xlu0 %17456  ;;  %19851 = vrot.lane.b32.xlu1 %v33161_v57, %s30011_s23 }
0x147f   : > { %29583 = vrcp.f32 %v17457_v59 }
0x1480   : > { %28508 = vmatmul.mubr.msk.f32.vlgmr.msra.gmra.mxu1 %vm1344_vm2, %v17498_v63 }
0x1481   : > { %28516 = vmatpush3.msra.mxu1 %v17685_v10  ;;  %v17466_v5 = vpop.xlane.xlu1 %17465  ;;  %28517 = vmatprep.mubr.msk.f32.mxu1 %vm30009_vm1, %v35908_v40 }
0x1482   : > { %29585 = vrcp.f32 %v17466_v5  ;;  %v17463_v6 = vpop.xlane.xlu0 %17462  ;;  %19849 = vrot.lane.b32.xlu1 %v33159_v61, %s30011_s23  ;;  %28525 = vmatprep.subr.mxu1 %v35908_v40  ;;  %v36114_v5 = vld [vmem:[#allocation44_spill] sm:$0xff] }
0x1483   : > { %29587 = vrcp.f32 %v17463_v6 }
0x1485   : > { %v17472_v53 = vpop.xlane.xlu1 %17471 }
0x1486   : > { %29589 = vrcp.f32 %v17472_v53  ;;  %v17469_v0 = vpop.xlane.xlu0 %17468  ;;  %20007 = vrot.lane.b32.xlu1 %v33174_v60, %s30011_s23 }
0x1487   : > { %v29580_v59 = vpop.eup %29579  ;;  %29591 = vrcp.f32 %v17469_v0 }
0x1488   : > { %v17500_v63 = vmul.f32 %v29580_v59, %v33853_v26 }
0x1489   : > { %v17478_v10 = vpop.xlane.xlu1 %17477 }
0x148a   : > { %29593 = vrcp.f32 %v17478_v10  ;;  %v17475_v31 = vpop.xlane.xlu0 %17474  ;;  %28513 = vmatmul.mubr.msk.f32.vlgmr.msra.gmra.mxu0 %vm1344_vm2, %v17500_v63  ;;  %20005 = vrot.lane.b32.xlu1 %v36114_v5, %s30011_s23  ;;  %v36115_v63 = vld [vmem:[#allocation46_spill] sm:$0xff] }
0x148b   : > { %v29582_v51 = vpop.eup %29581  ;;  %29595 = vrcp.f32 %v17475_v31  ;;  %28521 = vmatpush3.msra.mxu0 %v17762_v44  ;;  %28522 = vmatprep.mubr.msk.f32.mxu0 %vm30009_vm1, %v35908_v40 }
0x148c   : > { %v29584_v6 = vpop.eup %29583  ;;  %v17504_v53 = vmul.f32 %v29582_v51, %v33859_v24  ;;  %28530 = vmatprep.subr.mxu0 %v35908_v40 }
0x148d   : > { %v17502_v26 = vmul.f32 %v29584_v6, %v33861_v13  ;;  %v17484_v0 = vpop.xlane.xlu1 %17483 }
0x148e   : > { %29597 = vrcp.f32 %v17484_v0  ;;  %v17481_v59 = vpop.xlane.xlu0 %17480  ;;  %28523 = vmatmul.mubr.msk.f32.vlgmr.msra.gmra.mxu0 %vm1344_vm2, %v17504_v53  ;;  %20163 = vrot.lane.b32.xlu1 %v36115_v63, %s30011_s23 }
0x148f   : > { %v29586_v10 = vpop.eup %29585  ;;  %29599 = vrcp.f32 %v17481_v59  ;;  %28531 = vmatpush3.msra.mxu0 %v17916_v29  ;;  %28518 = vmatmul.mubr.msk.f32.vlgmr.msra.gmra.mxu1 %vm1344_vm2, %v17502_v26 }
0x1490   : > { %v29588_v44 = vpop.eup %29587  ;;  %v17508_v51 = vmul.f32 %v29586_v10, %v33869_v2  ;;  %28526 = vmatpush3.msra.mxu1 %v33955_v21  ;;  %28532 = vmatprep.mubr.msk.f32.mxu0 %vm30009_vm1, %v35908_v40  ;;  %v36116_v21 = vld [vmem:[#allocation43_spill] sm:$0xff] }
0x1491   : > { %v17506_v24 = vmul.f32 %v29588_v44, %v33871_v62  ;;  %28540 = vmatprep.subr.mxu0 %v35908_v40  ;;  %v17490_v13 = vpop.xlane.xlu1 %17489  ;;  %28527 = vmatprep.mubr.msk.f32.mxu1 %vm30009_vm1, %v35908_v40 }
0x1492   : > { %29601 = vrcp.f32 %v17490_v13  ;;  %28535 = vmatprep.subr.mxu1 %v35908_v40  ;;  %v17487_v29 = vpop.xlane.xlu0 %17486  ;;  %28533 = vmatmul.mubr.msk.f32.vlgmr.msra.gmra.mxu0 %vm1344_vm2, %v17508_v51 }
0x1493   : > { %v29590_v2 = vpop.eup %29589  ;;  %29603 = vrcp.f32 %v17487_v29  ;;  %28541 = vmatpush3.msra.mxu0 %v33975_v37  ;;  %20161 = vrot.lane.b32.xlu1 %v36116_v21, %s30011_s23 }
0x1494   : > { %v29592_v62 = vpop.eup %29591  ;;  %v17512_v31 = vmul.f32 %v29590_v2, %v33878_v4  ;;  %28528 = vmatmul.mubr.msk.f32.vlgmr.msra.gmra.mxu1 %vm1344_vm2, %v17506_v24  ;;  %28542 = vmatprep.mubr.msk.f32.mxu0 %vm30009_vm1, %v35908_v40  ;;  %v36117_v4 = vld [vmem:[#allocation53_spill] sm:$0xff] }
0x1495   : > { %v17510_v6 = vmul.f32 %v29592_v62, %v33880_v15  ;;  %28536 = vmatpush3.msra.mxu1 %v33969_v20  ;;  %28550 = vmatprep.subr.mxu0 %v35908_v40  ;;  %v18378_v53 = vpop.permute.xlu1 %18377  ;;  %v13025_v62 = vld [vmem:[#allocation7 + $0x20] sm:$0xff] }
0x1496   : > { %28537 = vmatprep.mubr.msk.f32.mxu1 %vm30009_vm1, %v35908_v40  ;;  %28545 = vmatprep.subr.mxu1 %v35908_v40  ;;  %v17496_v37 = vpop.xlane.xlu0 %17495 }
0x1497   : > { %v29594_v26 = vpop.eup %29593  ;;  %28543 = vmatmul.mubr.msk.f32.vlgmr.msra.gmra.mxu0 %vm1344_vm2, %v17512_v31  ;;  %20319 = vrot.lane.b32.xlu1 %v36117_v4, %s30011_s23  ;;  %29605 = vrcp.f32 %v17496_v37  ;;  %v36121_v37 = vld [vmem:[#allocation56_spill] sm:$0xff] }
0x1498   : > { %v29596_v0 = vpop.eup %29595  ;;  %v17516_v15 = vmul.f32 %v29594_v26, %v33886_v47  ;;  %28551 = vmatpush3.msra.mxu0 %v33985_v36  ;;  %28538 = vmatmul.mubr.msk.f32.vlgmr.msra.gmra.mxu1 %vm1344_vm2, %v17510_v6 }
0x1499   : > { %v17514_v20 = vmul.f32 %v29596_v0, %v33889_v38  ;;  %28546 = vmatpush3.msra.mxu1 %v33981_v30  ;;  %28552 = vmatprep.mubr.msk.f32.mxu0 %vm30009_vm1, %v35908_v40  ;;  %v18455_v59 = vpop.permute.xlu1 %18454  ;;  %v36118_v30 = vld [vmem:[#allocation51_spill] sm:$0xff] }
0x149a   : > { %28560 = vmatprep.subr.mxu0 %v35908_v40  ;;  %28547 = vmatprep.mubr.msk.f32.mxu1 %vm30009_vm1, %v35908_v40  ;;  %v18301_v47 = vpop.permute.xlu0 %18300  ;;  %v36120_v0 = vld [vmem:[#allocation19_spill] sm:$0xff] }
0x149b   : > { %v29598_v10 = vpop.eup %29597  ;;  %28555 = vmatprep.subr.mxu1 %v35908_v40  ;;  %28553 = vmatmul.mubr.msk.f32.vlgmr.msra.gmra.mxu0 %vm1344_vm2, %v17516_v15 }
0x149c   : > { %v29600_v36 = vpop.eup %29599  ;;  %v17520_v38 = vmul.f32 %v29598_v10, %v33896_v46  ;;  %28561 = vmatpush3.msra.mxu0 %v18378_v53  ;;  %20317 = vrot.lane.b32.xlu1 %v36118_v30, %s30011_s23  ;;  %v36119_v53 = vld [vmem:[#allocation61_spill] sm:$0xff]  ;;  %v36123_v10 = vld [vmem:[#allocation66_spill] sm:$0xff] }
0x149d   : > { %v17518_v44 = vmul.f32 %v29600_v36, %v33898_v43  ;;  %28548 = vmatmul.mubr.msk.f32.vlgmr.msra.gmra.mxu1 %vm1344_vm2, %v17514_v20  ;;  %28562 = vmatprep.mubr.msk.f32.mxu0 %vm30009_vm1, %v35908_v40  ;;  %v18532_v51 = vpop.permute.xlu1 %18531  ;;  %v36122_v20 = vld [vmem:[#allocation59_spill] sm:$0xff]  ;;  %v36124_v36 = vld [vmem:[#allocation68_spill] sm:$0xff] }
0x149e   : > { %28556 = vmatpush3.msra.mxu1 %v18301_v47  ;;  %28570 = vmatprep.subr.mxu0 %v35908_v40 }
0x149f   : > { %v29602_v24 = vpop.eup %29601  ;;  %28557 = vmatprep.mubr.msk.f32.mxu1 %vm30009_vm1, %v35908_v40  ;;  %28565 = vmatprep.subr.mxu1 %v35908_v40 }
0x14a0   : > { %v29604_v46 = vpop.eup %29603  ;;  %v17524_v13 = vmul.f32 %v29602_v24, %v33904_v11  ;;  %28563 = vmatmul.mubr.msk.f32.vlgmr.msra.gmra.mxu0 %vm1344_vm2, %v17520_v38  ;;  %v13026_v11 = vld [vmem:[#allocation7 + $0x28] sm:$0xff]  ;;  %v36125_v38 = vld [vmem:[#allocation69_spill] sm:$0xff] }
0x14a1   : > { %v17522_v43 = vmul.f32 %v29604_v46, %v33906_v27  ;;  %28558 = vmatmul.mubr.msk.f32.vlgmr.msra.gmra.mxu1 %vm1344_vm2, %v17518_v44  ;;  %28571 = vmatpush3.msra.mxu0 %v18532_v51  ;;  %v18609_v29 = vpop.permute.xlu1 %18608  ;;  %v36126_v51 = vld [vmem:[#allocation40_spill] sm:$0xff]  ;;  %v36128_v46 = vld [vmem:[#allocation73_spill] sm:$0xff] }
0x14a2   : > { %28566 = vmatpush3.msra.mxu1 %v18455_v59  ;;  %28572 = vmatprep.mubr.msk.f32.mxu0 %vm30009_vm1, %v35908_v40 }
0x14a3   : > { %28567 = vmatprep.mubr.msk.f32.mxu1 %vm30009_vm1, %v35908_v40  ;;  %28575 = vmatprep.subr.mxu1 %v35908_v40 }
0x14a4   : > { %28573 = vmatmul.mubr.msk.f32.vlgmr.msra.gmra.mxu0 %vm1344_vm2, %v17524_v13  ;;  %28580 = vmatprep.subr.mxu0 %v35908_v40  ;;  %v29606_v2 = vpop.eup %29605  ;;  %v36129_v13 = vld [vmem:[#allocation71_spill] sm:$0xff] }
0x14a5   : > { %28568 = vmatmul.mubr.msk.f32.vlgmr.msra.gmra.mxu1 %vm1344_vm2, %v17522_v43  ;;  %28582 = vmatprep.mubr.msk.f32.mxu0 %vm30009_vm1, %v35908_v40  ;;  %v17528_v31 = vmul.f32 %v29606_v2, %v33912_v39  ;;  %v36132_v2 = vld [vmem:[#allocation76_spill] sm:$0xff] }
0x14a6   : > { %28576 = vmatpush3.msra.mxu1 %v18609_v29  ;;  %28577 = vmatprep.mubr.msk.f32.mxu1 %vm30009_vm1, %v35908_v40  ;;  %v36130_v29 = vld [vmem:[#allocation75_spill] sm:$0xff] }
0x14a7   : > { %28585 = vmatprep.subr.mxu1 %v13026_v11 }
0x14d2   : > { %v17493_v27 = vpop.xlane.xlu1 %17492 }
0x14d3   : > { %29607 = vrcp.f32 %v17493_v27 }
0x14d6   : > { %v18686_v6 = vpop.permute.xlu1 %18685 }
0x14d7   : > { %28581 = vmatpush3.msra.mxu0 %v18686_v6  ;;  %v36134_v6 = vld [vmem:[#allocation77_spill] sm:$0xff] }
0x14d8   : > { %28583 = vmatmul.mubr.msk.f32.vlgmr.msra.gmra.mxu0 %vm1344_vm2, %v17528_v31  ;;  %28611 = vmatprep.subr.mxu0 %v13025_v62 }
0x14d9   : > { %28613 = vmatprep.mubr.msk.f32.mxu0 %vm1344_vm2, %v36119_v53  ;;  %28612 = vmatpush3.msra.mxu0 %v13025_v62  ;;  %v36133_v62 = vld [vmem:[#allocation74_spill] sm:$0xff] }
0x14da   : > { %v19228_v26 = vpop.permute.xlu1 %19227  ;;  %28642 = vmatprep.subr.mxu0 %v35908_v40 }
0x14dc   : > { %28614 = vmatmul.mubr.msk.f32.vlgmr.msra.gmra.mxu0 %vm1344_vm2, %v36120_v0 }
0x14dd   : > { %28643 = vmatpush3.xpose.msk.msra.mxu0 %vm1344_vm2, %v19228_v26  ;;  %28616 = vmatprep.mubr.msk.f32.mxu0 %vm1344_vm2, %v36121_v37 }
0x14de   : > { %v19226_v39 = vpop.permute.xlu1 %19225  ;;  %28652 = vmatprep.subr.mxu0 %v35908_v40 }
0x14e0   : > { %v29608_v15 = vpop.eup %29607  ;;  %28617 = vmatmul.mubr.msk.f32.gmra.mxu0 %vm1344_vm2, %v36122_v20 }
0x14e1   : > { %v17526_v59 = vmul.f32 %v29608_v15, %v33943_v25  ;;  %28619 = vmatprep.mubr.msk.f32.mxu0 %vm1344_vm2, %v36123_v10  ;;  %v36127_v25 = vld [vmem:[#allocation70_spill] sm:$0xff] }
0x14e2   : > { %v19384_v47 = vpop.permute.xlu1 %19383 }
0x14e3   : > { %28578 = vmatmul.mubr.msk.f32.vlgmr.msra.gmra.mxu1 %vm1344_vm2, %v17526_v59 }
0x14e4   : > { %28620 = vmatmul.mubr.msk.f32.gmra.mxu0 %vm1344_vm2, %v36124_v36  ;;  %28586 = vmatpush3.msra.mxu1 %v13026_v11  ;;  %v36131_v11 = vld [vmem:[#allocation72_spill] sm:$0xff] }
0x14e5   : > { %28622 = vmatprep.mubr.msk.f32.mxu0 %vm1344_vm2, %v36125_v38  ;;  %28637 = vmatprep.subr.mxu1 %v35908_v40  ;;  %v19150_v38 = vpop.permute.xlu0 %19149 }
0x14e6   : > { %v19382_v44 = vpop.permute.xlu1 %19381 }
0x14e8   : > { %28623 = vmatmul.mubr.msk.f32.gmra.mxu0 %vm1344_vm2, %v36126_v51 }
0x14e9   : > { %28625 = vmatprep.mubr.msk.f32.mxu0 %vm1344_vm2, %v36127_v25 }
0x14ea   : > { %v19540_v24 = vpop.permute.xlu1 %19539 }
0x14ec   : > { %28626 = vmatmul.mubr.msk.f32.gmra.mxu0 %vm1344_vm2, %v36128_v46 }
0x14ed   : > { %28628 = vmatprep.mubr.msk.f32.mxu0 %vm1344_vm2, %v36129_v13 }
0x14ee   : > { %v19538_v43 = vpop.permute.xlu1 %19537 }
0x14f0   : > { %28629 = vmatmul.mubr.msk.f32.gmra.mxu0 %vm1344_vm2, %v36130_v29 }
0x14f1   : > { %28631 = vmatprep.mubr.msk.f32.mxu0 %vm1344_vm2, %v36131_v11 }
0x14f2   : > { %v19696_v27 = vpop.permute.xlu1 %19695 }
0x14f4   : > { %28632 = vmatmul.mubr.msk.f32.gmra.mxu0 %vm1344_vm2, %v36132_v2 }
0x14f5   : > { %28634 = vmatprep.mubr.msk.f32.mxu0 %vm1344_vm2, %v36133_v62 }
0x14f6   : > { %v19694_v31 = vpop.permute.xlu1 %19693 }
0x14f8   : > { %28635 = vmatmul.mubr.msk.f32.gmra.mxu0 %vm1344_vm2, %v36134_v6 }
0x14f9   : > { %28644 = vmatprep.mubr.msk.f32.mxu0 %vm30009_vm1, %v35908_v40 }
0x14fa   : > { %v19852_v53 = vpop.permute.xlu1 %19851 }
0x14fc   : > { %28645 = vmatmul.mubr.msk.f32.vlgmr.msra.gmra.mxu0 %vm1344_vm2, %v19226_v39 }
0x14fd   : > { %28653 = vmatpush3.xpose.msk.msra.mxu0 %vm1344_vm2, %v19384_v47  ;;  %28654 = vmatprep.mubr.msk.f32.mxu0 %vm30009_vm1, %v35908_v40 }
0x14fe   : > { %v19850_v26 = vpop.permute.xlu1 %19849  ;;  %28662 = vmatprep.subr.mxu0 %v35908_v40 }
0x1500   : > { %28655 = vmatmul.mubr.msk.f32.vlgmr.msra.gmra.mxu0 %vm1344_vm2, %v19382_v44 }
0x1501   : > { %28663 = vmatpush3.xpose.msk.msra.mxu0 %vm1344_vm2, %v19540_v24  ;;  %28664 = vmatprep.mubr.msk.f32.mxu0 %vm30009_vm1, %v35908_v40 }
0x1502   : > { %v20008_v0 = vpop.permute.xlu1 %20007  ;;  %28672 = vmatprep.subr.mxu0 %v35908_v40 }
0x1504   : > { %28665 = vmatmul.mubr.msk.f32.vlgmr.msra.gmra.mxu0 %vm1344_vm2, %v19538_v43 }
0x1505   : > { %28673 = vmatpush3.xpose.msk.msra.mxu0 %vm1344_vm2, %v19696_v27  ;;  %28674 = vmatprep.mubr.msk.f32.mxu0 %vm30009_vm1, %v35908_v40 }
0x1506   : > { %v20006_v37 = vpop.permute.xlu1 %20005  ;;  %28682 = vmatprep.subr.mxu0 %v35908_v40 }
0x1508   : > { %28675 = vmatmul.mubr.msk.f32.vlgmr.msra.gmra.mxu0 %vm1344_vm2, %v19694_v31 }
0x1509   : > { %28683 = vmatpush3.xpose.msk.msra.mxu0 %vm1344_vm2, %v19852_v53  ;;  %28684 = vmatprep.mubr.msk.f32.mxu0 %vm30009_vm1, %v35908_v40 }
0x150a   : > { %v20164_v39 = vpop.permute.xlu1 %20163  ;;  %28692 = vmatprep.subr.mxu0 %v35908_v40 }
0x150c   : > { %28685 = vmatmul.mubr.msk.f32.vlgmr.msra.gmra.mxu0 %vm1344_vm2, %v19850_v26 }
0x150d   : > { %28693 = vmatpush3.xpose.msk.msra.mxu0 %vm1344_vm2, %v20008_v0  ;;  %28694 = vmatprep.mubr.msk.f32.mxu0 %vm30009_vm1, %v35908_v40 }
0x150e   : > { %v20162_v15 = vpop.permute.xlu1 %20161  ;;  %28702 = vmatprep.subr.mxu0 %v35908_v40 }
0x1510   : > { %28695 = vmatmul.mubr.msk.f32.vlgmr.msra.gmra.mxu0 %vm1344_vm2, %v20006_v37 }
0x1511   : > { %28703 = vmatpush3.xpose.msk.msra.mxu0 %vm1344_vm2, %v20164_v39  ;;  %28704 = vmatprep.mubr.msk.f32.mxu0 %vm30009_vm1, %v35908_v40 }
0x1512   : > { %v20320_v20 = vpop.permute.xlu1 %20319  ;;  %28712 = vmatprep.subr.mxu0 %v35908_v40 }
0x1514   : > { %28705 = vmatmul.mubr.msk.f32.vlgmr.msra.gmra.mxu0 %vm1344_vm2, %v20162_v15 }
0x1515   : > { %28713 = vmatpush3.xpose.msk.msra.mxu0 %vm1344_vm2, %v20320_v20  ;;  %28714 = vmatprep.mubr.msk.f32.mxu0 %vm30009_vm1, %v35908_v40 }
0x1516   : > { %v20318_v59 = vpop.permute.xlu1 %20317  ;;  %28722 = vmatprep.subr.mxu0 %v35908_v40 }
0x1518   : > { %28715 = vmatmul.mubr.msk.f32.vlgmr.msra.gmra.mxu0 %vm1344_vm2, %v20318_v59 }
0x1519   : > { %28724 = vmatprep.mubr.msk.f32.mxu0 %vm30009_vm1, %v35908_v40 }
0x1540   : > { %v17602_v10 = vpop.f32.mrf.mxu1 }
0x1541   : > { %28587 = vmatprep.mubr.msk.f32.mxu1 %vm1344_vm2, %v17602_v10 }
0x1542   : > { %v28509_v47 = vpop.f32.mrf.mxu1 }
0x154a   : > { %v17679_v36 = vpop.f32.mrf.mxu0 }
0x154b   : > { %28588 = vmatmul.mubr.msk.f32.vlgmr.msra.gmra.mxu1 %vm1344_vm2, %v17679_v36 }
0x154c   : > { %28638 = vmatpush3.xpose.msk.msra.mxu1 %vm1344_vm2, %v19150_v38  ;;  %v28514_v44 = vpop.f32.mrf.mxu0  ;;  %v19148_v38 = vpop.permute.xlu0 %19147 }
0x154d   : > { %28647 = vmatprep.subr.mxu1 %v35908_v40 }
0x154e   : > { %v17833_v51 = vpop.f32.mrf.mxu0 }
0x154f   : > { %v17756_v25 = vpop.f32.mrf.mxu1 }
0x1550   : > { %28590 = vmatprep.mubr.msk.f32.mxu1 %vm1344_vm2, %v17756_v25  ;;  %v28524_v24 = vpop.f32.mrf.mxu0  ;;  %v19306_v44 = vpop.permute.xlu0 %19305 }
0x1551   : > { %v28519_v46 = vpop.f32.mrf.mxu1  ;;  %28591 = vmatmul.mubr.msk.f32.gmra.mxu1 %vm1344_vm2, %v17833_v51 }
0x1552   : > { %v17987_v13 = vpop.f32.mrf.mxu0 }
0x1554   : > { %v17910_v43 = vpop.f32.mrf.mxu1  ;;  %v28534_v29 = vpop.f32.mrf.mxu0 }
0x1555   : > { %28593 = vmatprep.mubr.msk.f32.mxu1 %vm1344_vm2, %v17910_v43  ;;  %v19304_v51 = vpop.permute.xlu0 %19303 }
0x1556   : > { %v28529_v11 = vpop.f32.mrf.mxu1  ;;  %28594 = vmatmul.mubr.msk.f32.gmra.mxu1 %vm1344_vm2, %v17987_v13 }
0x1557   : > { %v18141_v27 = vpop.f32.mrf.mxu0 }
0x1558   : > { %v18064_v2 = vpop.f32.mrf.mxu1 }
0x1559   : > { %28596 = vmatprep.mubr.msk.f32.mxu1 %vm1344_vm2, %v18064_v2  ;;  %v28544_v62 = vpop.f32.mrf.mxu0  ;;  %v19462_v25 = vpop.permute.xlu0 %19461 }
0x155a   : > { %v28539_v31 = vpop.f32.mrf.mxu1  ;;  %28597 = vmatmul.mubr.msk.f32.gmra.mxu1 %vm1344_vm2, %v18141_v27 }
0x155b   : > { %v18295_v6 = vpop.f32.mrf.mxu0 }
0x155d   : > { %v18218_v53 = vpop.f32.mrf.mxu1  ;;  %v28554_v26 = vpop.f32.mrf.mxu0 }
0x155e   : > { %28599 = vmatprep.mubr.msk.f32.mxu1 %vm1344_vm2, %v18218_v53  ;;  %v19460_v24 = vpop.permute.xlu0 %19459 }
0x155f   : > { %v28549_v0 = vpop.f32.mrf.mxu1  ;;  %28600 = vmatmul.mubr.msk.f32.gmra.mxu1 %vm1344_vm2, %v18295_v6 }
0x1560   : > { %v18449_v37 = vpop.f32.mrf.mxu0 }
0x1561   : > { %v18372_v39 = vpop.f32.mrf.mxu1 }
0x1562   : > { %28602 = vmatprep.mubr.msk.f32.mxu1 %vm1344_vm2, %v18372_v39  ;;  %v28564_v15 = vpop.f32.mrf.mxu0  ;;  %v19618_v46 = vpop.permute.xlu0 %19617 }
0x1563   : > { %v28559_v20 = vpop.f32.mrf.mxu1  ;;  %28603 = vmatmul.mubr.msk.f32.gmra.mxu1 %vm1344_vm2, %v18449_v37 }
0x1564   : > { %v18603_v59 = vpop.f32.mrf.mxu0 }
0x1565   : > { %v18526_v10 = vpop.f32.mrf.mxu1 }
0x1566   : > { %28605 = vmatprep.mubr.msk.f32.mxu1 %vm1344_vm2, %v18526_v10  ;;  %v28574_v47 = vpop.f32.mrf.mxu0  ;;  %v19616_v13 = vpop.permute.xlu0 %19615 }
0x1567   : > { %v28569_v36 = vpop.f32.mrf.mxu1  ;;  %28606 = vmatmul.mubr.msk.f32.gmra.mxu1 %vm1344_vm2, %v18603_v59 }
0x156a   : > { %v19774_v29 = vpop.permute.xlu0 %19773 }
0x156e   : > { %v19772_v62 = vpop.permute.xlu0 %19771 }
0x1572   : > { %v19930_v37 = vpop.permute.xlu0 %19929 }
0x1576   : > { %v19928_v59 = vpop.permute.xlu0 %19927 }
0x1598   : > { %v18757_v43 = vpop.f32.mrf.mxu0 }
0x159a   : > { %v28584_v11 = vpop.f32.mrf.mxu0 }
0x159c   : > { %v34176_v27 = vpop.f32.mrf.mxu0 }
0x159d   : > { %36135 = vst [vmem:[#allocation54_spill] sm:$0xff] %v34176_v27 }
0x159e   : > { %v34178_v2 = vpop.f32.mrf.mxu0 }
0x159f   : > { %36136 = vst [vmem:[#allocation42_spill] sm:$0xff] %v34178_v2 }
0x15a0   : > { %v34180_v31 = vpop.f32.mrf.mxu0 }
0x15a1   : > { %36137 = vst [vmem:[#allocation67_spill] sm:$0xff] %v34180_v31 }
0x15a2   : > { %v34182_v6 = vpop.f32.mrf.mxu0 }
0x15a3   : > { %36138 = vst [vmem:[#allocation44_spill] sm:$0xff] %v34182_v6  ;;  %v18680_v53 = vpop.f32.mrf.mxu1 }
0x15a4   : > { %28608 = vmatprep.mubr.msk.f32.mxu1 %vm1344_vm2, %v18680_v53  ;;  %v34185_v26 = vpop.f32.mrf.mxu0 }
0x15a5   : > { %36139 = vst [vmem:[#allocation46_spill] sm:$0xff] %v34185_v26  ;;  %v28579_v0 = vpop.f32.mrf.mxu1  ;;  %28609 = vmatmul.mubr.msk.f32.gmra.mxu1 %vm1344_vm2, %v18757_v43 }
0x15a6   : > { %v34188_v39 = vpop.f32.mrf.mxu0  ;;  %28639 = vmatprep.mubr.msk.f32.mxu1 %vm30009_vm1, %v35908_v40 }
0x15a7   : > { %36140 = vst [vmem:[#allocation43_spill] sm:$0xff] %v34188_v39 }
0x15a8   : > { %v34192_v15 = vpop.f32.mrf.mxu0 }
0x15a9   : > { %36141 = vst [vmem:[#allocation53_spill] sm:$0xff] %v34192_v15  ;;  %28640 = vmatmul.mubr.msk.f32.vlgmr.msra.gmra.mxu1 %vm1344_vm2, %v19148_v38  ;;  %v20086_v38 = vpop.permute.xlu0 %20085 }
0x15aa   : > { %28648 = vmatpush3.xpose.msk.msra.mxu1 %vm1344_vm2, %v19306_v44  ;;  %v34196_v20 = vpop.f32.mrf.mxu0  ;;  %28649 = vmatprep.mubr.msk.f32.mxu1 %vm30009_vm1, %v35908_v40 }
0x15ab   : > { %36142 = vst [vmem:[#allocation61_spill] sm:$0xff] %v34196_v20  ;;  %28657 = vmatprep.subr.mxu1 %v35908_v40 }
0x15ac   : > { %v34201_v10 = vpop.f32.mrf.mxu0 }
0x15ad   : > { %36143 = vst [vmem:[#allocation19_spill] sm:$0xff] %v34201_v10  ;;  %28650 = vmatmul.mubr.msk.f32.vlgmr.msra.gmra.mxu1 %vm1344_vm2, %v19304_v51 }
0x15ae   : > { %28658 = vmatpush3.xpose.msk.msra.mxu1 %vm1344_vm2, %v19462_v25  ;;  %v34205_v47 = vpop.f32.mrf.mxu0  ;;  %28659 = vmatprep.mubr.msk.f32.mxu1 %vm30009_vm1, %v35908_v40 }
0x15af   : > { %36144 = vst [vmem:[#allocation56_spill] sm:$0xff] %v34205_v47  ;;  %28667 = vmatprep.subr.mxu1 %v35908_v40 }
0x15b0   : > { %v34210_v36 = vpop.f32.mrf.mxu0 }
0x15b1   : > { %36145 = vst [vmem:[#allocation59_spill] sm:$0xff] %v34210_v36  ;;  %28660 = vmatmul.mubr.msk.f32.vlgmr.msra.gmra.mxu1 %vm1344_vm2, %v19460_v24  ;;  %v20084_v24 = vpop.permute.xlu0 %20083 }
0x15b2   : > { %28668 = vmatpush3.xpose.msk.msra.mxu1 %vm1344_vm2, %v19618_v46  ;;  %v34214_v44 = vpop.f32.mrf.mxu0  ;;  %28669 = vmatprep.mubr.msk.f32.mxu1 %vm30009_vm1, %v35908_v40 }
0x15b3   : > { %36146 = vst [vmem:[#allocation66_spill] sm:$0xff] %v34214_v44  ;;  %28677 = vmatprep.subr.mxu1 %v35908_v40 }
0x15b4   : > { %v34219_v51 = vpop.f32.mrf.mxu0 }
0x15b5   : > { %36147 = vst [vmem:[#allocation68_spill] sm:$0xff] %v34219_v51  ;;  %28670 = vmatmul.mubr.msk.f32.vlgmr.msra.gmra.mxu1 %vm1344_vm2, %v19616_v13  ;;  %v20242_v11 = vpop.permute.xlu0 %20241 }
0x15b6   : > { %28678 = vmatpush3.xpose.msk.msra.mxu1 %vm1344_vm2, %v19774_v29  ;;  %v34223_v25 = vpop.f32.mrf.mxu0  ;;  %28679 = vmatprep.mubr.msk.f32.mxu1 %vm30009_vm1, %v35908_v40 }
0x15b7   : > { %36148 = vst [vmem:[#allocation69_spill] sm:$0xff] %v34223_v25  ;;  %28687 = vmatprep.subr.mxu1 %v35908_v40 }
0x15b8   : > { %v34228_v46 = vpop.f32.mrf.mxu0 }
0x15b9   : > { %36149 = vst [vmem:[#allocation40_spill] sm:$0xff] %v34228_v46  ;;  %28680 = vmatmul.mubr.msk.f32.vlgmr.msra.gmra.mxu1 %vm1344_vm2, %v19772_v62 }
0x15ba   : > { %28688 = vmatpush3.xpose.msk.msra.mxu1 %vm1344_vm2, %v19930_v37  ;;  %v34232_v43 = vpop.f32.mrf.mxu0  ;;  %28689 = vmatprep.mubr.msk.f32.mxu1 %vm30009_vm1, %v35908_v40 }
0x15bb   : > { %36150 = vst [vmem:[#allocation70_spill] sm:$0xff] %v34232_v43  ;;  %28697 = vmatprep.subr.mxu1 %v35908_v40 }
0x15bc   : > { %v19299_v13 = vpop.f32.mrf.mxu0 }
0x15bd   : > { %v20396_v29 = vmul.f32 0.35355338, %v19299_v13  ;;  %28690 = vmatmul.mubr.msk.f32.vlgmr.msra.gmra.mxu1 %vm1344_vm2, %v19928_v59 }
0x15be   : > { %28698 = vmatpush3.xpose.msk.msra.mxu1 %vm1344_vm2, %v20086_v38  ;;  %v28646_v53 = vpop.f32.mrf.mxu0  ;;  %28699 = vmatprep.mubr.msk.f32.mxu1 %vm30009_vm1, %v35908_v40  ;;  %v20240_v38 = vpop.permute.xlu0 %20239 }
0x15bf   : > { %v20414_v62 = vsel %vm1344_vm2, %v20396_v29, -inf  ;;  %28707 = vmatprep.subr.mxu1 %v35908_v40 }
0x15c0   : > { %20415 = vmax.xlane.f32.xlu1 %v20414_v62  ;;  %v19455_v0 = vpop.f32.mrf.mxu0 }
0x15c1   : > { %v20398_v37 = vmul.f32 0.35355338, %v19455_v0  ;;  %28700 = vmatmul.mubr.msk.f32.vlgmr.msra.gmra.mxu1 %vm1344_vm2, %v20084_v24 }
0x15c2   : > { %28708 = vmatpush3.xpose.msk.msra.mxu1 %vm1344_vm2, %v20242_v11  ;;  %v28656_v13 = vpop.f32.mrf.mxu0  ;;  %28709 = vmatprep.mubr.msk.f32.mxu1 %vm30009_vm1, %v35908_v40 }
0x15c3   : > { %v20420_v59 = vsel %vm1344_vm2, %v20398_v37, -inf  ;;  %28717 = vmatprep.subr.mxu1 %v35908_v40 }
0x15c4   : > { %20421 = vmax.xlane.f32.xlu0 %v20420_v59  ;;  %v19611_v53 = vpop.f32.mrf.mxu0 }
0x15c5   : > { %v20400_v20 = vmul.f32 0.35355338, %v19611_v53  ;;  %28710 = vmatmul.mubr.msk.f32.vlgmr.msra.gmra.mxu1 %vm1344_vm2, %v20240_v38 }
0x15c6   : > { %v28666_v62 = vpop.f32.mrf.mxu0  ;;  %28719 = vmatprep.mubr.msk.f32.mxu1 %vm30009_vm1, %v35908_v40 }
0x15c7   : > { %v20426_v24 = vsel %vm1344_vm2, %v20400_v20, -inf }
0x15c8   : > { %20427 = vmax.xlane.f32.xlu0 %v20426_v24  ;;  %v19767_v11 = vpop.f32.mrf.mxu0 }
0x15c9   : > { %v34253_v0 = vmul.f32 0.35355338, %v19767_v11 }
0x15ca   : > { %v28676_v13 = vpop.f32.mrf.mxu0 }
0x15cb   : > { %v20432_v39 = vsel %vm1344_vm2, %v34253_v0, -inf }
0x15cc   : > { %20433 = vmax.xlane.f32.xlu0 %v20432_v39  ;;  %v19923_v59 = vpop.f32.mrf.mxu0 }
0x15cd   : > { %v34257_v6 = vmul.f32 0.35355338, %v19923_v59 }
0x15ce   : > { %v28686_v53 = vpop.f32.mrf.mxu0 }
0x15cf   : > { %v20438_v38 = vsel %vm1344_vm2, %v34257_v6, -inf }
0x15d0   : > { %20439 = vmax.xlane.f32.xlu0 %v20438_v38  ;;  %v20079_v62 = vpop.f32.mrf.mxu0 }
0x15d1   : > { %v34261_v2 = vmul.f32 0.35355338, %v20079_v62  ;;  %20587 = vrot.lane.b32.xlu1 %v36110_v33, %s30011_s23 }
0x15d2   : > { %v28696_v24 = vpop.f32.mrf.mxu0 }
0x15d3   : > { %v20444_v11 = vsel %vm1344_vm2, %v34261_v2, -inf }
0x15d4   : > { %20445 = vmax.xlane.f32.xlu0 %v20444_v11  ;;  %v20235_v39 = vpop.f32.mrf.mxu0 }
0x15d5   : > { %v34267_v13 = vmul.f32 0.35355338, %v20235_v39 }
0x15d6   : > { %v28706_v59 = vpop.f32.mrf.mxu0 }
0x15d7   : > { %v20450_v53 = vsel %vm1344_vm2, %v34267_v13, -inf }
0x15d8   : > { %20451 = vmax.xlane.f32.xlu0 %v20450_v53  ;;  %v20391_v38 = vpop.f32.mrf.mxu0 }
0x15d9   : > { %v34271_v43 = vmul.f32 0.35355338, %v20391_v38 }
0x15da   : > { %v28716_v62 = vpop.f32.mrf.mxu0 }
0x15db   : > { %v20456_v46 = vsel %vm1344_vm2, %v34271_v43, -inf }
0x15dc   : > { %20457 = vmax.xlane.f32.xlu0 %v20456_v46 }
0x160b   : > { %v34275_v24 = vpop.f32.mrf.mxu1 }
0x160c   : > { %36151 = vst [vmem:[#allocation73_spill] sm:$0xff] %v34275_v24 }
0x160d   : > { %v34277_v25 = vpop.f32.mrf.mxu1 }
0x160e   : > { %36152 = vst [vmem:[#allocation71_spill] sm:$0xff] %v34277_v25 }
0x1611   : > { %v34279_v11 = vpop.f32.mrf.mxu1 }
0x1612   : > { %36153 = vst [vmem:[#allocation75_spill] sm:$0xff] %v34279_v11 }
0x1613   : > { %v34281_v39 = vpop.f32.mrf.mxu1 }
0x1614   : > { %36154 = vst [vmem:[#allocation72_spill] sm:$0xff] %v34281_v39 }
0x1616   : > { %v34283_v59 = vpop.f32.mrf.mxu1 }
0x1617   : > { %36155 = vst [vmem:[#allocation76_spill] sm:$0xff] %v34283_v59 }
0x1618   : > { %v34285_v51 = vpop.f32.mrf.mxu1 }
0x1619   : > { %36156 = vst [vmem:[#allocation74_spill] sm:$0xff] %v34285_v51 }
0x161a   : > { %v34287_v53 = vpop.f32.mrf.mxu1 }
0x161b   : > { %36157 = vst [vmem:[#allocation77_spill] sm:$0xff] %v34287_v53 }
0x161c   : > { %v34289_v44 = vpop.f32.mrf.mxu1 }
0x161d   : > { %36158 = vst [vmem:[#allocation78_spill] sm:$0xff] %v34289_v44 }
0x161f   : > { %v34291_v25 = vpop.f32.mrf.mxu1 }
0x1620   : > { %36159 = vst [vmem:[#allocation79_spill] sm:$0xff] %v34291_v25 }
0x1621   : > { %v34294_v15 = vpop.f32.mrf.mxu1 }
0x1622   : > { %36160 = vst [vmem:[#allocation80_spill] sm:$0xff] %v34294_v15 }
0x1623   : > { %v34296_v53 = vpop.f32.mrf.mxu1 }
0x1624   : > { %36161 = vst [vmem:[#allocation81_spill] sm:$0xff] %v34296_v53 }
0x1625   : > { %v34302_v44 = vpop.f32.mrf.mxu1 }
0x1626   : > { %36162 = vst [vmem:[#allocation82_spill] sm:$0xff] %v34302_v44 }
0x1649   : > { %v20416_v38 = vpop.xlane.xlu1 %20415 }
0x164a   : > { %v20460_v62 = vsub.f32 %v20396_v29, %v20416_v38 }
0x164c   : > { %v20477_v36 = vmul.f32 1.442695, %v20460_v62 }
0x164d   : > { %v20588_v46 = vpop.permute.xlu1 %20587  ;;  %v20422_v47 = vpop.xlane.xlu0 %20421 }
0x164e   : > { %29609 = vpow2.f32 %v20477_v36  ;;  %v20462_v10 = vsub.f32 %v20398_v37, %v20422_v47  ;;  %28718 = vmatpush3.msra.mxu1 %v20588_v46 }
0x164f   : > { %28727 = vmatprep.subr.mxu1 %v35908_v40 }
0x1650   : > { %v20481_v39 = vmul.f32 1.442695, %v20462_v10  ;;  %v34308_v10 = vpop.f32.mrf.mxu1 }
0x1651   : > { %v20428_v51 = vpop.xlane.xlu0 %20427  ;;  %36163 = vst [vmem:[#allocation83_spill] sm:$0xff] %v34308_v10 }
0x1652   : > { %29611 = vpow2.f32 %v20481_v39  ;;  %v20464_v29 = vsub.f32 %v20400_v20, %v20428_v51  ;;  %v34314_v51 = vpop.f32.mrf.mxu1 }
0x1653   : > { %36164 = vst [vmem:[#allocation84_spill] sm:$0xff] %v34314_v51 }
0x1654   : > { %v20485_v47 = vmul.f32 1.442695, %v20464_v29 }
0x1655   : > { %v34298_v38 = vpop.xlane.xlu0 %20433 }
0x1656   : > { %29613 = vpow2.f32 %v20485_v47 }
0x1659   : > { %v34310_v39 = vpop.xlane.xlu0 %20439 }
0x165b   : > { %v34300_v62 = vpop.eup %29609 }
0x165c   : > { %v20510_v36 = vsel %vm1344_vm2, %v34300_v62, 0.0 }
0x165d   : > { %20511 = vadd.xlane.f32.xlu0 %v20510_v36  ;;  %v20446_v46 = vpop.xlane.xlu0 %20445 }
0x165f   : > { %v34306_v37 = vpop.eup %29611 }
0x1660   : > { %v20516_v20 = vsel %vm1344_vm2, %v34306_v37, 0.0 }
0x1661   : > { %20517 = vadd.xlane.f32.xlu0 %v20516_v20  ;;  %v20452_v15 = vpop.xlane.xlu0 %20451 }
0x1662   : > { %v20472_v30 = vsub.f32 %v34267_v13, %v20452_v15 }
0x1663   : > { %v34324_v47 = vpop.eup %29613 }
0x1665   : > { %v34316_v44 = vpop.f32.mrf.mxu1  ;;  %v20458_v51 = vpop.xlane.xlu0 %20457 }
0x1666   : > { %36165 = vst [vmem:[#allocation85_spill] sm:$0xff] %v34316_v44  ;;  %v20522_v44 = vsel %vm1344_vm2, %v34324_v47, 0.0 }
0x1667   : > { %v34318_v29 = vpop.f32.mrf.mxu1 }
0x1668   : > { %36166 = vst [vmem:[#allocation86_spill] sm:$0xff] %v34318_v29 }
0x1669   : > { %v19221_v53 = vpop.f32.mrf.mxu1 }
0x166a   : > { %v34320_v36 = vmul.f32 0.35355338, %v19221_v53 }
0x166b   : > { %v28641_v25 = vpop.f32.mrf.mxu1 }
0x166c   : > { %v20411_v10 = vsel %vm1344_vm2, %v34320_v36, -inf  ;;  %v20474_v25 = vsub.f32 %v34271_v43, %v20458_v51 }
0x166d   : > { %v19377_v26 = vpop.f32.mrf.mxu1  ;;  %20412 = vmax.xlane.f32.xlu0 %v20411_v10 }
0x166e   : > { %v34326_v59 = vmul.f32 0.35355338, %v19377_v26  ;;  %v20505_v24 = vmul.f32 1.442695, %v20474_v25 }
0x166f   : > { %v28651_v20 = vpop.f32.mrf.mxu1 }
0x1670   : > { %v20417_v10 = vsel %vm1344_vm2, %v34326_v59, -inf  ;;  %29615 = vpow2.f32 %v20505_v24 }
0x1671   : > { %v19533_v29 = vpop.f32.mrf.mxu1  ;;  %20523 = vadd.xlane.f32.xlu0 %v20522_v44 }
0x1672   : > { %v34330_v53 = vmul.f32 0.35355338, %v19533_v29 }
0x1673   : > { %v28661_v31 = vpop.f32.mrf.mxu1 }
0x1674   : > { %v20423_v11 = vsel %vm1344_vm2, %v34330_v53, -inf }
0x1675   : > { %20424 = vmax.xlane.f32.xlu1 %v20423_v11  ;;  %v19689_v26 = vpop.f32.mrf.mxu1  ;;  %20418 = vmax.xlane.f32.xlu0 %v20417_v10 }
0x1676   : > { %v34337_v20 = vmul.f32 0.35355338, %v19689_v26 }
0x1677   : > { %v28671_v27 = vpop.f32.mrf.mxu1 }
0x1678   : > { %v20429_v44 = vsel %vm1344_vm2, %v34337_v20, -inf }
0x1679   : > { %20430 = vmax.xlane.f32.xlu1 %v20429_v44  ;;  %v19845_v31 = vpop.f32.mrf.mxu1 }
0x167a   : > { %v34341_v29 = vmul.f32 0.35355338, %v19845_v31 }
0x167b   : > { %v28681_v43 = vpop.f32.mrf.mxu1 }
0x167c   : > { %v20435_v51 = vsel %vm1344_vm2, %v34341_v29, -inf }
0x167d   : > { %20436 = vmax.xlane.f32.xlu1 %v20435_v51  ;;  %v20001_v11 = vpop.f32.mrf.mxu1 }
0x167e   : > { %v34345_v33 = vmul.f32 0.35355338, %v20001_v11 }
0x167f   : > { %v28691_v10 = vpop.f32.mrf.mxu1 }
0x1680   : > { %v20441_v27 = vsel %vm1344_vm2, %v34345_v33, -inf  ;;  %v34357_v10 = vpop.eup %29615 }
0x1681   : > { %20442 = vmax.xlane.f32.xlu1 %v20441_v27  ;;  %v20157_v25 = vpop.f32.mrf.mxu1  ;;  %36167 = vst [vmem:[#allocation87_spill] sm:$0xff] %v34357_v10  ;;  %v20552_v27 = vsel %vm1344_vm2, %v34357_v10, 0.0 }
0x1682   : > { %v34349_v26 = vmul.f32 0.35355338, %v20157_v25  ;;  %v20466_v25 = vsub.f32 %v34253_v0, %v34298_v38 }
0x1683   : > { %v28701_v44 = vpop.f32.mrf.mxu1 }
0x1684   : > { %v20447_v31 = vsel %vm1344_vm2, %v34349_v26, -inf  ;;  %v20489_v44 = vmul.f32 1.442695, %v20466_v25  ;;  %v36171_v25 = vld [vmem:[#allocation24_spill] sm:$0xff] }
0x1685   : > { %20448 = vmax.xlane.f32.xlu1 %v20447_v31  ;;  %v20313_v24 = vpop.f32.mrf.mxu1  ;;  %v20468_v31 = vsub.f32 %v34257_v6, %v34310_v39  ;;  %v36169_v39 = vld [vmem:[#allocation52_spill] sm:$0xff] }
0x1686   : > { %v34353_v43 = vmul.f32 0.35355338, %v20313_v24  ;;  %29617 = vpow2.f32 %v20489_v44  ;;  %v36172_v44 = vld [vmem:[#allocation55_spill] sm:$0xff] }
0x1687   : > { %v28711_v51 = vpop.f32.mrf.mxu1  ;;  %v20493_v24 = vmul.f32 1.442695, %v20468_v31  ;;  %v36173_v31 = vld [vmem:[#allocation23_spill] sm:$0xff] }
0x1688   : > { %v20453_v11 = vsel %vm1344_vm2, %v34353_v43, -inf  ;;  %v20470_v51 = vsub.f32 %v34261_v2, %v20446_v46  ;;  %v36170_v46 = vld [vmem:[#allocation50_spill] sm:$0xff] }
0x1689   : > { %20454 = vmax.xlane.f32.xlu1 %v20453_v11  ;;  %29619 = vpow2.f32 %v20493_v24  ;;  %v36174_v24 = vld [vmem:[#allocation62_spill] sm:$0xff] }
0x168a   : > { %v20497_v11 = vmul.f32 1.442695, %v20470_v51  ;;  %v36175_v51 = vld [vmem:[#allocation27_spill] sm:$0xff] }
0x168b   : > { %20663 = vrot.lane.b32.xlu0 %v36109_v3, %s30011_s23  ;;  %v36168_v3 = vld [vmem:[#allocation58_spill] sm:$0xff] }
0x168c   : > { %29621 = vpow2.f32 %v20497_v11 }
0x168d   : > { %20553 = vadd.xlane.f32.xlu1 %v20552_v27  ;;  %v20501_v27 = vmul.f32 1.442695, %v20472_v30 }
0x168f   : > { %29623 = vpow2.f32 %v20501_v27 }
0x1693   : > { %v34371_v10 = vpop.eup %29617 }
0x1694   : > { %v20528_v0 = vsel %vm1344_vm2, %v34371_v10, 0.0 }
0x1696   : > { %v34375_v6 = vpop.eup %29619 }
0x1697   : > { %v20534_v2 = vsel %vm1344_vm2, %v34375_v6, 0.0 }
0x1699   : > { %v34379_v38 = vpop.eup %29621 }
0x169a   : > { %v20540_v15 = vsel %vm1344_vm2, %v34379_v38, 0.0 }
0x169c   : > { %v34383_v13 = vpop.eup %29623 }
0x169d   : > { %v20546_v30 = vsel %vm1344_vm2, %v34383_v13, 0.0 }
0x169e   : > { %21271 = vrot.lane.b32.xlu1 %v36168_v3, %s30011_s23 }
0x16aa   : > { %20529 = vadd.xlane.f32.xlu0 %v20528_v0 }
0x16ae   : > { %20535 = vadd.xlane.f32.xlu0 %v20534_v2 }
0x16b2   : > { %20541 = vadd.xlane.f32.xlu0 %v20540_v15 }
0x16b6   : > { %20547 = vadd.xlane.f32.xlu0 %v20546_v30 }
0x16cc   : > { %20739 = vrot.lane.b32.xlu0 %v36169_v39, %s30011_s23 }
0x16d0   : > { %20815 = vrot.lane.b32.xlu0 %v36170_v46, %s30011_s23 }
0x16d4   : > { %20891 = vrot.lane.b32.xlu0 %v36171_v25, %s30011_s23 }
0x16d8   : > { %20967 = vrot.lane.b32.xlu0 %v36172_v44, %s30011_s23 }
0x16dc   : > { %21043 = vrot.lane.b32.xlu0 %v36173_v31, %s30011_s23 }
0x16e0   : > { %21119 = vrot.lane.b32.xlu0 %v36174_v24, %s30011_s23 }
0x16e4   : > { %21195 = vrot.lane.b32.xlu0 %v36175_v51, %s30011_s23 }
0x16e6   : > { %v20512_v11 = vpop.xlane.xlu0 %20511 }
0x16e7   : > { %29625 = vrcp.f32 %v20512_v11 }
0x16e8   : > { %21347 = vrot.lane.b32.xlu0 %v36084_v8, %s30011_s23 }
0x16ea   : > { %v34407_v27 = vpop.xlane.xlu0 %20517 }
0x16ec   : > { %21423 = vrot.lane.b32.xlu0 %v36088_v28, %s30011_s23 }
0x16f0   : > { %21499 = vrot.lane.b32.xlu0 %v36085_v34, %s30011_s23 }
0x16f4   : > { %21575 = vrot.lane.b32.xlu0 %v36091_v19, %s30011_s23  ;;  %v29626_v25 = vpop.eup %29625 }
0x16f5   : > { %v20558_v8 = vmul.f32 %v29626_v25, %v34300_v62 }
0x16f6   : > { %v20413_v0 = vpop.xlane.xlu0 %20412 }
0x16f7   : > { %v20459_v2 = vsub.f32 %v34320_v36, %v20413_v0 }
0x16f9   : > { %v20475_v15 = vmul.f32 1.442695, %v20459_v2 }
0x16fa   : > { %v34412_v30 = vpop.xlane.xlu0 %20523 }
0x16fb   : > { %29627 = vpow2.f32 %v20475_v15 }
0x16fe   : > { %v20425_v51 = vpop.xlane.xlu1 %20424  ;;  %v20419_v31 = vpop.xlane.xlu0 %20418 }
0x16ff   : > { %v20463_v28 = vsub.f32 %v34330_v53, %v20425_v51  ;;  %v20461_v34 = vsub.f32 %v34326_v59, %v20419_v31 }
0x1701   : > { %v20479_v11 = vmul.f32 1.442695, %v20461_v34  ;;  %v20483_v3 = vmul.f32 1.442695, %v20463_v28 }
0x1702   : > { %v20431_v24 = vpop.xlane.xlu1 %20430  ;;  %v20664_v19 = vpop.permute.xlu0 %20663 }
0x1703   : > { %v20465_v44 = vsub.f32 %v34337_v20, %v20431_v24  ;;  %28723 = vmatpush3.msra.mxu0 %v20664_v19  ;;  %29629 = vpow2.f32 %v20479_v11 }
0x1704   : > { %28725 = vmatmul.mubr.msk.f32.vlgmr.msra.gmra.mxu0 %vm1344_vm2, %v20558_v8  ;;  %28732 = vmatprep.subr.mxu0 %v35908_v40  ;;  %29631 = vpow2.f32 %v20483_v3 }
0x1705   : > { %28734 = vmatprep.mubr.msk.f32.mxu0 %vm30009_vm1, %v35908_v40  ;;  %v20487_v36 = vmul.f32 1.442695, %v20465_v44 }
0x1706   : > { %v20437_v59 = vpop.xlane.xlu1 %20436 }
0x1707   : > { %v20467_v34 = vsub.f32 %v34341_v29, %v20437_v59  ;;  %29633 = vpow2.f32 %v20487_v36 }
0x1708   : > { %v34423_v62 = vpop.eup %29627 }
0x1709   : > { %v20507_v28 = vsel %vm1344_vm2, %v34423_v62, 0.0  ;;  %v20491_v19 = vmul.f32 1.442695, %v20467_v34 }
0x170a   : > { %v20443_v53 = vpop.xlane.xlu1 %20442  ;;  %20508 = vadd.xlane.f32.xlu1 %v20507_v28 }
0x170b   : > { %v20469_v8 = vsub.f32 %v34345_v33, %v20443_v53  ;;  %29635 = vpow2.f32 %v20491_v19 }
0x170d   : > { %v20495_v20 = vmul.f32 1.442695, %v20469_v8 }
0x170e   : > { %v20449_v25 = vpop.xlane.xlu1 %20448 }
0x170f   : > { %v20471_v3 = vsub.f32 %v34349_v26, %v20449_v25  ;;  %29637 = vpow2.f32 %v20495_v20 }
0x1710   : > { %v34429_v44 = vpop.eup %29629 }
0x1711   : > { %v20499_v29 = vmul.f32 1.442695, %v20471_v3  ;;  %v20513_v24 = vsel %vm1344_vm2, %v34429_v44, 0.0  ;;  %v34433_v51 = vpop.eup %29631 }
0x1712   : > { %v20455_v31 = vpop.xlane.xlu1 %20454  ;;  %20514 = vadd.xlane.f32.xlu1 %v20513_v24  ;;  %v20519_v33 = vsel %vm1344_vm2, %v34433_v51, 0.0 }
0x1713   : > { %v20473_v0 = vsub.f32 %v34353_v43, %v20455_v31  ;;  %29639 = vpow2.f32 %v20499_v29 }
0x1714   : > { %v34438_v15 = vpop.eup %29633 }
0x1715   : > { %v20503_v2 = vmul.f32 1.442695, %v20473_v0  ;;  %v20525_v26 = vsel %vm1344_vm2, %v34438_v15, 0.0 }
0x1716   : > { %20520 = vadd.xlane.f32.xlu1 %v20519_v33 }
0x1717   : > { %29641 = vpow2.f32 %v20503_v2 }
0x1718   : > { %v34442_v11 = vpop.eup %29635  ;;  %29643 = vrcp.f32 %v34407_v27 }
0x1719   : > { %v20531_v36 = vsel %vm1344_vm2, %v34442_v11, 0.0  ;;  %29645 = vrcp.f32 %v34412_v30 }
0x171a   : > { %20526 = vadd.xlane.f32.xlu1 %v20525_v26 }
0x171c   : > { %v34446_v43 = vpop.eup %29637 }
0x171d   : > { %v20537_v59 = vsel %vm1344_vm2, %v34446_v43, 0.0 }
0x171e   : > { %20532 = vadd.xlane.f32.xlu1 %v20531_v36  ;;  %v36182_v36 = vld [vmem:[#allocation87_spill] sm:$0xff] }
0x1720   : > { %v34450_v34 = vpop.eup %29639 }
0x1721   : > { %v20543_v53 = vsel %vm1344_vm2, %v34450_v34, 0.0 }
0x1722   : > { %20538 = vadd.xlane.f32.xlu1 %v20537_v59 }
0x1724   : > { %v34452_v28 = vpop.eup %29641 }
0x1725   : > { %v20549_v19 = vsel %vm1344_vm2, %v34452_v28, 0.0 }
0x1726   : > { %20550 = vadd.xlane.f32.xlu0 %v20549_v19  ;;  %20544 = vadd.xlane.f32.xlu1 %v20543_v53 }
0x1733   : > { %v20530_v8 = vpop.xlane.xlu0 %20529 }
0x1734   : > { %29647 = vrcp.f32 %v20530_v8 }
0x1737   : > { %v20536_v20 = vpop.xlane.xlu0 %20535  ;;  %21651 = vrot.lane.b32.xlu1 %v36086_v58, %s30011_s23 }
0x1738   : > { %29649 = vrcp.f32 %v20536_v20 }
0x173b   : > { %v20542_v25 = vpop.xlane.xlu0 %20541  ;;  %22014 = vrot.lane.b32.xlu1 %v36111_v1, %s30012_s7  ;;  %v29644_v1 = vpop.eup %29643 }
0x173c   : > { %21727 = vrot.lane.b32.xlu0 %v36093_v54, %s30011_s23  ;;  %v20562_v31 = vmul.f32 %v29644_v1, %v34306_v37  ;;  %29651 = vrcp.f32 %v20542_v25 }
0x173f   : > { %v20548_v3 = vpop.xlane.xlu0 %20547  ;;  %22092 = vrot.lane.b32.xlu1 %v36113_v56, %s30012_s7 }
0x1740   : > { %22012 = vrot.lane.b32.xlu0 %v36112_v49, %s30012_s7  ;;  %29653 = vrcp.f32 %v20548_v3 }
0x1743   : > { %v34470_v27 = vpop.permute.xlu0 %20739  ;;  %22170 = vrot.lane.b32.xlu1 %v33101_v23, %s30012_s7 }
0x1744   : > { %22090 = vrot.lane.b32.xlu0 %v33065_v16, %s30012_s7  ;;  %v29646_v16 = vpop.eup %29645 }
0x1747   : > { %v20816_v29 = vpop.permute.xlu0 %20815  ;;  %22248 = vrot.lane.b32.xlu1 %v33095_v22, %s30012_s7 }
0x1748   : > { %22168 = vrot.lane.b32.xlu0 %v33099_v52, %s30012_s7  ;;  %28733 = vmatpush3.msra.mxu0 %v20816_v29  ;;  %v20566_v52 = vmul.f32 %v29646_v16, %v34324_v47 }
0x1749   : > { %28735 = vmatmul.mubr.msk.f32.vlgmr.msra.gmra.mxu0 %vm1344_vm2, %v20562_v31  ;;  %28742 = vmatprep.subr.mxu0 %v35908_v40 }
0x174a   : > { %28744 = vmatprep.mubr.msk.f32.mxu0 %vm30009_vm1, %v35908_v40 }
0x174b   : > { %v34483_v23 = vpop.permute.xlu0 %20891  ;;  %22326 = vrot.lane.b32.xlu1 %v33119_v50, %s30012_s7 }
0x174c   : > { %22246 = vrot.lane.b32.xlu0 %v33093_v32, %s30012_s7  ;;  %v34502_v32 = vpop.xlane.xlu1 %20553 }
0x174f   : > { %v20968_v22 = vpop.permute.xlu0 %20967  ;;  %22404 = vrot.lane.b32.xlu1 %v33108_v9, %s30012_s7  ;;  %v29648_v9 = vpop.eup %29647 }
0x1750   : > { %22324 = vrot.lane.b32.xlu0 %v33117_v17, %s30012_s7  ;;  %28743 = vmatpush3.msra.mxu0 %v20968_v22  ;;  %v20570_v50 = vmul.f32 %v29648_v9, %v34371_v10  ;;  %v29650_v56 = vpop.eup %29649  ;;  %v21272_v37 = vpop.permute.xlu1 %21271  ;;  %v13027_v22 = vld [vmem:[#allocation7 + $0x30] sm:$0xff] }
0x1751   : > { %28745 = vmatmul.mubr.msk.f32.vlgmr.msra.gmra.mxu0 %vm1344_vm2, %v20566_v52  ;;  %28752 = vmatprep.subr.mxu0 %v35908_v40 }
0x1752   : > { %28754 = vmatprep.mubr.msk.f32.mxu0 %vm30009_vm1, %v35908_v40 }
0x1753   : > { %v34498_v49 = vpop.permute.xlu0 %21043  ;;  %22482 = vrot.lane.b32.xlu1 %v33139_v48, %s30012_s7 }
0x1754   : > { %22402 = vrot.lane.b32.xlu0 %v33106_v55, %s30012_s7  ;;  %v20574_v55 = vmul.f32 %v29650_v56, %v34375_v6 }
0x1757   : > { %v21120_v17 = vpop.permute.xlu0 %21119  ;;  %22560 = vrot.lane.b32.xlu1 %v33128_v42, %s30012_s7 }
0x1758   : > { %22480 = vrot.lane.b32.xlu0 %v33151_v35, %s30012_s7  ;;  %28753 = vmatpush3.msra.mxu0 %v21120_v17  ;;  %v29652_v35 = vpop.eup %29651 }
0x1759   : > { %28755 = vmatmul.mubr.msk.f32.vlgmr.msra.gmra.mxu0 %vm1344_vm2, %v20570_v50  ;;  %28762 = vmatprep.subr.mxu0 %v35908_v40  ;;  %v20578_v47 = vmul.f32 %v29652_v35, %v34379_v38 }
0x175a   : > { %28763 = vmatpush3.msra.mxu0 %v21272_v37  ;;  %28764 = vmatprep.mubr.msk.f32.mxu0 %vm30009_vm1, %v35908_v40 }
0x175b   : > { %v34515_v48 = vpop.permute.xlu0 %21195  ;;  %22638 = vrot.lane.b32.xlu1 %v33167_v45, %s30012_s7  ;;  %28772 = vmatprep.subr.mxu0 %v35908_v40 }
0x175c   : > { %22558 = vrot.lane.b32.xlu0 %v33133_v14, %s30012_s7 }
0x175d   : > { %28765 = vmatmul.mubr.msk.f32.vlgmr.msra.gmra.mxu0 %vm1344_vm2, %v20574_v55 }
0x175e   : > { %28774 = vmatprep.mubr.msk.f32.mxu0 %vm30009_vm1, %v35908_v40 }
0x175f   : > { %v34526_v42 = vpop.permute.xlu0 %21347  ;;  %22636 = vrot.lane.b32.xlu1 %v33165_v18, %s30012_s7 }
0x1760   : > { %22716 = vrot.lane.b32.xlu0 %v33161_v57, %s30012_s7  ;;  %v29654_v57 = vpop.eup %29653 }
0x1763   : > { %v21424_v45 = vpop.permute.xlu0 %21423  ;;  %22794 = vrot.lane.b32.xlu1 %v33185_v7, %s30012_s7  ;;  %v36178_v7 = vld [vmem:[#allocation39_spill] sm:$0xff] }
0x1764   : > { %22714 = vrot.lane.b32.xlu0 %v33159_v61, %s30012_s7  ;;  %28773 = vmatpush3.msra.mxu0 %v21424_v45  ;;  %v20582_v61 = vmul.f32 %v29654_v57, %v34383_v13 }
0x1765   : > { %28775 = vmatmul.mubr.msk.f32.vlgmr.msra.gmra.mxu0 %vm1344_vm2, %v20578_v47  ;;  %28782 = vmatprep.subr.mxu0 %v35908_v40 }
0x1766   : > { %28784 = vmatprep.mubr.msk.f32.mxu0 %vm30009_vm1, %v35908_v40 }
0x1767   : > { %v34541_v14 = vpop.permute.xlu0 %21499  ;;  %22792 = vrot.lane.b32.xlu1 %v33183_v12, %s30012_s7  ;;  %v36177_v12 = vld [vmem:[#allocation41_spill] sm:$0xff] }
0x1768   : > { %22872 = vrot.lane.b32.xlu0 %v33174_v60, %s30012_s7  ;;  %v36176_v60 = vld [vmem:[#allocation49_spill] sm:$0xff] }
0x176b   : > { %v21576_v18 = vpop.permute.xlu0 %21575  ;;  %22950 = vrot.lane.b32.xlu1 %v33207_v41, %s30012_s7  ;;  %v36179_v41 = vld [vmem:[#allocation45_spill] sm:$0xff] }
0x176c   : > { %22870 = vrot.lane.b32.xlu0 %v36114_v5, %s30012_s7  ;;  %28783 = vmatpush3.msra.mxu0 %v21576_v18  ;;  %v36180_v5 = vld [vmem:[#allocation51_spill] sm:$0xff] }
0x176d   : > { %28785 = vmatmul.mubr.msk.f32.vlgmr.msra.gmra.mxu0 %vm1344_vm2, %v20582_v61  ;;  %28792 = vmatprep.subr.mxu0 %v35908_v40 }
0x176e   : > { %28794 = vmatprep.mubr.msk.f32.mxu0 %vm30009_vm1, %v35908_v40 }
0x176f   : > { %22948 = vrot.lane.b32.xlu1 %v36176_v60, %s30012_s7 }
0x1770   : > { %23028 = vrot.lane.b32.xlu0 %v36115_v63, %s30012_s7  ;;  %v36181_v63 = vld [vmem:[#allocation48_spill] sm:$0xff] }
0x1773   : > { %23106 = vrot.lane.b32.xlu1 %v36177_v12, %s30012_s7 }
0x1774   : > { %23026 = vrot.lane.b32.xlu0 %v36116_v21, %s30012_s7 }
0x1777   : > { %23104 = vrot.lane.b32.xlu1 %v36178_v7, %s30012_s7 }
0x1778   : > { %23184 = vrot.lane.b32.xlu0 %v36117_v4, %s30012_s7 }
0x177b   : > { %23528 = vrot.lane.b32.xlu1 %v36179_v41, %s30012_s7 }
0x177c   : > { %23182 = vrot.lane.b32.xlu0 %v36180_v5, %s30012_s7 }
0x177f   : > { %23680 = vrot.lane.b32.xlu1 %v36170_v46, %s30012_s7 }
0x1780   : > { %23452 = vrot.lane.b32.xlu0 %v36181_v63, %s30012_s7 }
0x1784   : > { %23604 = vrot.lane.b32.xlu0 %v36169_v39, %s30012_s7 }
0x1793   : > { %v20509_v21 = vpop.xlane.xlu1 %20508 }
0x1794   : > { %29655 = vrcp.f32 %v20509_v21 }
0x179b   : > { %v20515_v10 = vpop.xlane.xlu1 %20514 }
0x179c   : > { %29657 = vrcp.f32 %v20515_v10 }
0x179f   : > { %v20521_v4 = vpop.xlane.xlu1 %20520 }
0x17a0   : > { %29659 = vrcp.f32 %v20521_v4 }
0x17a1   : > { %v29656_v6 = vpop.eup %29655  ;;  %29661 = vrcp.f32 %v34502_v32 }
0x17a2   : > { %v20556_v38 = vmul.f32 %v29656_v6, %v34423_v62 }
0x17a3   : > { %v20527_v13 = vpop.xlane.xlu1 %20526 }
0x17a4   : > { %28720 = vmatmul.mubr.msk.f32.vlgmr.msra.gmra.mxu1 %vm1344_vm2, %v20556_v38  ;;  %29663 = vrcp.f32 %v20527_v13 }
0x17a5   : > { %28728 = vmatpush3.msra.mxu1 %v34470_v27  ;;  %28729 = vmatprep.mubr.msk.f32.mxu1 %vm30009_vm1, %v35908_v40 }
0x17a6   : > { %28737 = vmatprep.subr.mxu1 %v35908_v40 }
0x17a7   : > { %v20533_v39 = vpop.xlane.xlu1 %20532 }
0x17a8   : > { %29665 = vrcp.f32 %v20533_v39 }
0x17a9   : > { %v29658_v46 = vpop.eup %29657 }
0x17aa   : > { %v20560_v30 = vmul.f32 %v29658_v46, %v34429_v44 }
0x17ab   : > { %v20539_v24 = vpop.xlane.xlu1 %20538 }
0x17ac   : > { %29667 = vrcp.f32 %v20539_v24  ;;  %28730 = vmatmul.mubr.msk.f32.vlgmr.msra.gmra.mxu1 %vm1344_vm2, %v20560_v30 }
0x17ad   : > { %v29660_v62 = vpop.eup %29659  ;;  %28738 = vmatpush3.msra.mxu1 %v34483_v23  ;;  %28739 = vmatprep.mubr.msk.f32.mxu1 %vm30009_vm1, %v35908_v40 }
0x17ae   : > { %v20564_v0 = vmul.f32 %v29660_v62, %v34433_v51  ;;  %28747 = vmatprep.subr.mxu1 %v35908_v40  ;;  %v29662_v33 = vpop.eup %29661 }
0x17af   : > { %v20551_v2 = vpop.xlane.xlu0 %20550  ;;  %v20545_v26 = vpop.xlane.xlu1 %20544  ;;  %v20586_v59 = vmul.f32 %v29662_v33, %v36182_v36 }
0x17b0   : > { %29669 = vrcp.f32 %v20545_v26  ;;  %28740 = vmatmul.mubr.msk.f32.vlgmr.msra.gmra.mxu1 %vm1344_vm2, %v20564_v0 }
0x17b1   : > { %v29664_v44 = vpop.eup %29663  ;;  %28748 = vmatpush3.msra.mxu1 %v34498_v49  ;;  %28749 = vmatprep.mubr.msk.f32.mxu1 %vm30009_vm1, %v35908_v40  ;;  %29671 = vrcp.f32 %v20551_v2 }
0x17b2   : > { %v20568_v19 = vmul.f32 %v29664_v44, %v34438_v15  ;;  %28757 = vmatprep.subr.mxu1 %v35908_v40 }
0x17b3   : > { %v21728_v51 = vpop.permute.xlu0 %21727  ;;  %v21652_v53 = vpop.permute.xlu1 %21651 }
0x17b4   : > { %28793 = vmatpush3.msra.mxu0 %v21728_v51  ;;  %28750 = vmatmul.mubr.msk.f32.vlgmr.msra.gmra.mxu1 %vm1344_vm2, %v20568_v19 }
0x17b5   : > { %28795 = vmatmul.mubr.msk.f32.vlgmr.msra.gmra.mxu0 %vm1344_vm2, %v20586_v59  ;;  %v29666_v8 = vpop.eup %29665  ;;  %28758 = vmatpush3.msra.mxu1 %v34515_v48 }
0x17b6   : > { %28759 = vmatprep.mubr.msk.f32.mxu1 %vm30009_vm1, %v35908_v40  ;;  %v20572_v20 = vmul.f32 %v29666_v8, %v34442_v11  ;;  %28767 = vmatprep.subr.mxu1 %v35908_v40 }
0x17b7   : > { %28823 = vmatprep.subr.mxu0 %v35908_v40  ;;  %v22013_v15 = vpop.permute.xlu0 %22012  ;;  %v22015_v25 = vpop.permute.xlu1 %22014  ;;  %28825 = vmatprep.mubr.msk.f32.mxu0 %vm30009_vm1, %v35908_v40 }
0x17b8   : > { %28760 = vmatmul.mubr.msk.f32.vlgmr.msra.gmra.mxu1 %vm1344_vm2, %v20572_v20  ;;  %28824 = vmatpush3.xpose.msk.msra.mxu0 %vm1344_vm2, %v22015_v25 }
0x17b9   : > { %v29668_v3 = vpop.eup %29667  ;;  %28768 = vmatpush3.msra.mxu1 %v34526_v42  ;;  %28769 = vmatprep.mubr.msk.f32.mxu1 %vm30009_vm1, %v35908_v40 }
0x17ba   : > { %v20576_v11 = vmul.f32 %v29668_v3, %v34446_v43  ;;  %28777 = vmatprep.subr.mxu1 %v35908_v40  ;;  %28828 = vmatprep.subr.mxu0 %v35908_v40 }
0x17bb   : > { %v22091_v27 = vpop.permute.xlu0 %22090  ;;  %v22093_v1 = vpop.permute.xlu1 %22092  ;;  %28826 = vmatmul.mubr.msk.f32.vlgmr.msra.gmra.mxu0 %vm1344_vm2, %v22013_v15 }
0x17bc   : > { %28770 = vmatmul.mubr.msk.f32.vlgmr.msra.gmra.mxu1 %vm1344_vm2, %v20576_v11  ;;  %28829 = vmatpush3.xpose.msk.msra.mxu0 %vm1344_vm2, %v22093_v1 }
0x17bd   : > { %v29670_v29 = vpop.eup %29669  ;;  %28778 = vmatpush3.msra.mxu1 %v34541_v14  ;;  %28830 = vmatprep.mubr.msk.f32.mxu0 %vm30009_vm1, %v35908_v40 }
0x17be   : > { %v20580_v43 = vmul.f32 %v29670_v29, %v34450_v34  ;;  %28779 = vmatprep.mubr.msk.f32.mxu1 %vm30009_vm1, %v35908_v40  ;;  %28787 = vmatprep.subr.mxu1 %v35908_v40  ;;  %v29672_v23 = vpop.eup %29671 }
0x17bf   : > { %v22169_v31 = vpop.permute.xlu0 %22168  ;;  %v22171_v16 = vpop.permute.xlu1 %22170  ;;  %28831 = vmatmul.mubr.msk.f32.vlgmr.msra.gmra.mxu0 %vm1344_vm2, %v22091_v27  ;;  %28833 = vmatprep.subr.mxu0 %v35908_v40  ;;  %v20584_v34 = vmul.f32 %v29672_v23, %v34452_v28 }
0x17c0   : > { %28780 = vmatmul.mubr.msk.f32.vlgmr.msra.gmra.mxu1 %vm1344_vm2, %v20580_v43  ;;  %28834 = vmatpush3.xpose.msk.msra.mxu0 %vm1344_vm2, %v22171_v16 }
0x17c1   : > { %28788 = vmatpush3.msra.mxu1 %v21652_v53  ;;  %28835 = vmatprep.mubr.msk.f32.mxu0 %vm30009_vm1, %v35908_v40 }
0x17c2   : > { %28789 = vmatprep.mubr.msk.f32.mxu1 %vm30009_vm1, %v35908_v40  ;;  %28838 = vmatprep.subr.mxu0 %v35908_v40 }
0x17c3   : > { %v22247_v52 = vpop.permute.xlu0 %22246  ;;  %v22249_v49 = vpop.permute.xlu1 %22248  ;;  %28836 = vmatmul.mubr.msk.f32.vlgmr.msra.gmra.mxu0 %vm1344_vm2, %v22169_v31  ;;  %28797 = vmatprep.subr.mxu1 %v13027_v22 }
0x17c4   : > { %v34640_v32 = vpop.f32.mrf.mxu0  ;;  %28790 = vmatmul.mubr.msk.f32.vlgmr.msra.gmra.mxu1 %vm1344_vm2, %v20584_v34  ;;  %28839 = vmatpush3.xpose.msk.msra.mxu0 %vm1344_vm2, %v22249_v49 }
0x17c5   : > { %28840 = vmatprep.mubr.msk.f32.mxu0 %vm30009_vm1, %v35908_v40  ;;  %28843 = vmatprep.subr.mxu0 %v35908_v40 }
0x17c6   : > { %v28726_v9 = vpop.f32.mrf.mxu0  ;;  %28798 = vmatpush3.msra.mxu1 %v13027_v22 }
0x17c7   : > { %v22325_v28 = vpop.permute.xlu0 %22324  ;;  %v22327_v17 = vpop.permute.xlu1 %22326  ;;  %28841 = vmatmul.mubr.msk.f32.vlgmr.msra.gmra.mxu0 %vm1344_vm2, %v22247_v52  ;;  %28863 = vmatprep.subr.mxu1 %v35908_v40 }
0x17c8   : > { %28844 = vmatpush3.xpose.msk.msra.mxu0 %vm1344_vm2, %v22327_v17  ;;  %28845 = vmatprep.mubr.msk.f32.mxu0 %vm30009_vm1, %v35908_v40 }
0x17c9   : > { %28848 = vmatprep.subr.mxu0 %v35908_v40 }
0x17cb   : > { %v22403_v50 = vpop.permute.xlu0 %22402  ;;  %v22405_v56 = vpop.permute.xlu1 %22404  ;;  %28846 = vmatmul.mubr.msk.f32.vlgmr.msra.gmra.mxu0 %vm1344_vm2, %v22325_v28 }
0x17cc   : > { %28849 = vmatpush3.xpose.msk.msra.mxu0 %vm1344_vm2, %v22405_v56  ;;  %28850 = vmatprep.mubr.msk.f32.mxu0 %vm30009_vm1, %v35908_v40 }
0x17cd   : > { %28853 = vmatprep.subr.mxu0 %v35908_v40 }
0x17cf   : > { %v22481_v37 = vpop.permute.xlu0 %22480  ;;  %v22483_v48 = vpop.permute.xlu1 %22482  ;;  %28851 = vmatmul.mubr.msk.f32.vlgmr.msra.gmra.mxu0 %vm1344_vm2, %v22403_v50 }
0x17d0   : > { %28854 = vmatpush3.xpose.msk.msra.mxu0 %vm1344_vm2, %v22483_v48  ;;  %28855 = vmatprep.mubr.msk.f32.mxu0 %vm30009_vm1, %v35908_v40 }
0x17d1   : > { %28858 = vmatprep.subr.mxu0 %v35908_v40 }
0x17d3   : > { %v22559_v55 = vpop.permute.xlu0 %22558  ;;  %v22561_v42 = vpop.permute.xlu1 %22560  ;;  %28856 = vmatmul.mubr.msk.f32.vlgmr.msra.gmra.mxu0 %vm1344_vm2, %v22481_v37 }
0x17d4   : > { %28859 = vmatpush3.xpose.msk.msra.mxu0 %vm1344_vm2, %v22561_v42  ;;  %28860 = vmatprep.mubr.msk.f32.mxu0 %vm30009_vm1, %v35908_v40 }
0x17d5   : > { %28868 = vmatprep.subr.mxu0 %v35908_v40 }
0x17d7   : > { %v22717_v35 = vpop.permute.xlu0 %22716  ;;  %v22639_v45 = vpop.permute.xlu1 %22638  ;;  %28861 = vmatmul.mubr.msk.f32.vlgmr.msra.gmra.mxu0 %vm1344_vm2, %v22559_v55 }
0x17d8   : > { %28869 = vmatpush3.xpose.msk.msra.mxu0 %vm1344_vm2, %v22717_v35  ;;  %28870 = vmatprep.mubr.msk.f32.mxu0 %vm30009_vm1, %v35908_v40 }
0x17d9   : > { %28878 = vmatprep.subr.mxu0 %v35908_v40 }
0x17db   : > { %v22715_v47 = vpop.permute.xlu0 %22714  ;;  %v34673_v14 = vpop.permute.xlu1 %22636 }
0x17dc   : > { %28871 = vmatmul.mubr.msk.f32.vlgmr.msra.gmra.mxu0 %vm1344_vm2, %v22715_v47 }
0x17dd   : > { %28880 = vmatprep.mubr.msk.f32.mxu0 %vm30009_vm1, %v35908_v40 }
0x17df   : > { %v22873_v57 = vpop.permute.xlu0 %22872  ;;  %v34678_v18 = vpop.permute.xlu1 %22794 }
0x17e0   : > { %28879 = vmatpush3.xpose.msk.msra.mxu0 %vm1344_vm2, %v22873_v57 }
0x17e1   : > { %28888 = vmatprep.subr.mxu0 %v35908_v40 }
0x17e3   : > { %v22871_v61 = vpop.permute.xlu0 %22870  ;;  %v34682_v60 = vpop.permute.xlu1 %22792 }
0x17e4   : > { %28881 = vmatmul.mubr.msk.f32.vlgmr.msra.gmra.mxu0 %vm1344_vm2, %v22871_v61 }
0x17e5   : > { %28890 = vmatprep.mubr.msk.f32.mxu0 %vm30009_vm1, %v35908_v40 }
0x17e7   : > { %v23029_v12 = vpop.permute.xlu0 %23028  ;;  %v34687_v7 = vpop.permute.xlu1 %22950 }
0x17e8   : > { %28889 = vmatpush3.xpose.msk.msra.mxu0 %vm1344_vm2, %v23029_v12 }
0x17e9   : > { %28898 = vmatprep.subr.mxu0 %v35908_v40 }
0x17eb   : > { %v23027_v41 = vpop.permute.xlu0 %23026  ;;  %v34691_v5 = vpop.permute.xlu1 %22948 }
0x17ec   : > { %28891 = vmatmul.mubr.msk.f32.vlgmr.msra.gmra.mxu0 %vm1344_vm2, %v23027_v41 }
0x17ed   : > { %28900 = vmatprep.mubr.msk.f32.mxu0 %vm30009_vm1, %v35908_v40 }
0x17ef   : > { %v23185_v63 = vpop.permute.xlu0 %23184  ;;  %v34696_v21 = vpop.permute.xlu1 %23106 }
0x17f0   : > { %28899 = vmatpush3.xpose.msk.msra.mxu0 %vm1344_vm2, %v23185_v63 }
0x17f1   : > { %28908 = vmatprep.subr.mxu0 %v35908_v40 }
0x17f3   : > { %v23183_v10 = vpop.permute.xlu0 %23182  ;;  %v34700_v4 = vpop.permute.xlu1 %23104 }
0x17f4   : > { %28901 = vmatmul.mubr.msk.f32.vlgmr.msra.gmra.mxu0 %vm1344_vm2, %v23183_v10 }
0x17f5   : > { %28910 = vmatprep.mubr.msk.f32.mxu0 %vm30009_vm1, %v35908_v40 }
0x17f7   : > { %v23529_v6 = vpop.permute.xlu1 %23528 }
0x17f8   : > { %28909 = vmatpush3.msra.mxu0 %v23529_v6  ;;  %v23453_v6 = vpop.permute.xlu0 %23452 }
0x17f9   : > { %28918 = vmatprep.subr.mxu0 %v35908_v40 }
0x1809   : > { %v20887_v38 = vpop.f32.mrf.mxu0 }
0x180b   : > { %v28736_v13 = vpop.f32.mrf.mxu0 }
0x1811   : > { %v21039_v39 = vpop.f32.mrf.mxu0 }
0x1813   : > { %v28746_v46 = vpop.f32.mrf.mxu0 }
0x1819   : > { %v21191_v30 = vpop.f32.mrf.mxu0 }
0x181b   : > { %v28756_v24 = vpop.f32.mrf.mxu0 }
0x181d   : > { %v21343_v62 = vpop.f32.mrf.mxu0 }
0x181f   : > { %v28766_v0 = vpop.f32.mrf.mxu0 }
0x1825   : > { %v21495_v2 = vpop.f32.mrf.mxu0 }
0x1827   : > { %v28776_v33 = vpop.f32.mrf.mxu0 }
0x182d   : > { %v21647_v26 = vpop.f32.mrf.mxu0 }
0x182f   : > { %v28786_v44 = vpop.f32.mrf.mxu0 }
0x1864   : > { %v20659_v36 = vpop.f32.mrf.mxu1 }
0x1865   : > { %28799 = vmatprep.mubr.msk.f32.mxu1 %vm1344_vm2, %v20659_v36 }
0x1866   : > { %v28721_v59 = vpop.f32.mrf.mxu1  ;;  %28800 = vmatmul.mubr.msk.f32.vlgmr.msra.gmra.mxu1 %vm1344_vm2, %v34640_v32 }
0x1867   : > { %28864 = vmatpush3.xpose.msk.msra.mxu1 %vm1344_vm2, %v22639_v45 }
0x1868   : > { %28873 = vmatprep.subr.mxu1 %v35908_v40 }
0x186c   : > { %v20811_v19 = vpop.f32.mrf.mxu1 }
0x186d   : > { %28802 = vmatprep.mubr.msk.f32.mxu1 %vm1344_vm2, %v20811_v19 }
0x186e   : > { %v28731_v51 = vpop.f32.mrf.mxu1  ;;  %28803 = vmatmul.mubr.msk.f32.gmra.mxu1 %vm1344_vm2, %v20887_v38 }
0x1870   : > { %v20963_v53 = vpop.f32.mrf.mxu1 }
0x1871   : > { %28805 = vmatprep.mubr.msk.f32.mxu1 %vm1344_vm2, %v20963_v53 }
0x1872   : > { %v28741_v8 = vpop.f32.mrf.mxu1  ;;  %28806 = vmatmul.mubr.msk.f32.gmra.mxu1 %vm1344_vm2, %v21039_v39 }
0x1874   : > { %v21115_v20 = vpop.f32.mrf.mxu1 }
0x1875   : > { %v21799_v15 = vpop.f32.mrf.mxu0  ;;  %28808 = vmatprep.mubr.msk.f32.mxu1 %vm1344_vm2, %v21115_v20  ;;  %v34801_v20 = vpop.permute.xlu1 %23680 }
0x1876   : > { %v28751_v25 = vpop.f32.mrf.mxu1  ;;  %28809 = vmatmul.mubr.msk.f32.gmra.mxu1 %vm1344_vm2, %v21191_v30 }
0x1877   : > { %v28796_v3 = vpop.f32.mrf.mxu0 }
0x1878   : > { %v21267_v11 = vpop.f32.mrf.mxu1 }
0x1879   : > { %28811 = vmatprep.mubr.msk.f32.mxu1 %vm1344_vm2, %v21267_v11 }
0x187a   : > { %v28761_v27 = vpop.f32.mrf.mxu1  ;;  %28812 = vmatmul.mubr.msk.f32.gmra.mxu1 %vm1344_vm2, %v21343_v62 }
0x187b   : > { %v22086_v1 = vpop.f32.mrf.mxu0 }
0x187c   : > { %v34719_v29 = vmul.f32 0.35355338, %v22086_v1  ;;  %v21419_v43 = vpop.f32.mrf.mxu1 }
0x187d   : > { %28814 = vmatprep.mubr.msk.f32.mxu1 %vm1344_vm2, %v21419_v43  ;;  %v28827_v31 = vpop.f32.mrf.mxu0 }
0x187e   : > { %v28771_v23 = vpop.f32.mrf.mxu1  ;;  %28815 = vmatmul.mubr.msk.f32.gmra.mxu1 %vm1344_vm2, %v21495_v2  ;;  %v23276_v16 = vsel %vm1344_vm2, %v34719_v29, -inf }
0x187f   : > { %23277 = vmax.xlane.f32.xlu1 %v23276_v16  ;;  %v22164_v22 = vpop.f32.mrf.mxu0 }
0x1880   : > { %v34725_v34 = vmul.f32 0.35355338, %v22164_v22  ;;  %v21571_v52 = vpop.f32.mrf.mxu1 }
0x1881   : > { %28817 = vmatprep.mubr.msk.f32.mxu1 %vm1344_vm2, %v21571_v52  ;;  %v28832_v49 = vpop.f32.mrf.mxu0 }
0x1882   : > { %v28781_v32 = vpop.f32.mrf.mxu1  ;;  %28818 = vmatmul.mubr.msk.f32.gmra.mxu1 %vm1344_vm2, %v21647_v26  ;;  %v23279_v9 = vsel %vm1344_vm2, %v34725_v34, -inf }
0x1883   : > { %23280 = vmax.xlane.f32.xlu0 %v23279_v9  ;;  %v22242_v28 = vpop.f32.mrf.mxu0 }
0x1884   : > { %v34731_v17 = vmul.f32 0.35355338, %v22242_v28  ;;  %v21723_v50 = vpop.f32.mrf.mxu1 }
0x1885   : > { %28820 = vmatprep.mubr.msk.f32.mxu1 %vm1344_vm2, %v21723_v50  ;;  %v28837_v56 = vpop.f32.mrf.mxu0 }
0x1886   : > { %v28791_v37 = vpop.f32.mrf.mxu1  ;;  %28821 = vmatmul.mubr.msk.f32.gmra.mxu1 %vm1344_vm2, %v21799_v15  ;;  %v23282_v48 = vsel %vm1344_vm2, %v34731_v17, -inf  ;;  %v34803_v15 = vpop.permute.xlu0 %23604 }
0x1887   : > { %23283 = vmax.xlane.f32.xlu0 %v23282_v48  ;;  %v22320_v55 = vpop.f32.mrf.mxu0  ;;  %28865 = vmatprep.mubr.msk.f32.mxu1 %vm30009_vm1, %v35908_v40 }
0x1888   : > { %v34739_v42 = vmul.f32 0.35355338, %v22320_v55 }
0x1889   : > { %v28842_v35 = vpop.f32.mrf.mxu0 }
0x188a   : > { %28866 = vmatmul.mubr.msk.f32.vlgmr.msra.gmra.mxu1 %vm1344_vm2, %v34673_v14  ;;  %v23285_v45 = vsel %vm1344_vm2, %v34739_v42, -inf }
0x188b   : > { %28874 = vmatpush3.xpose.msk.msra.mxu1 %vm1344_vm2, %v34678_v18  ;;  %23286 = vmax.xlane.f32.xlu1 %v23285_v45  ;;  %v22398_v47 = vpop.f32.mrf.mxu0 }
0x188c   : > { %v34747_v57 = vmul.f32 0.35355338, %v22398_v47  ;;  %28875 = vmatprep.mubr.msk.f32.mxu1 %vm30009_vm1, %v35908_v40  ;;  %28883 = vmatprep.subr.mxu1 %v35908_v40 }
0x188d   : > { %v28847_v61 = vpop.f32.mrf.mxu0 }
0x188e   : > { %28876 = vmatmul.mubr.msk.f32.vlgmr.msra.gmra.mxu1 %vm1344_vm2, %v34682_v60  ;;  %v23288_v14 = vsel %vm1344_vm2, %v34747_v57, -inf  ;;  %v36184_v61 = vld [vmem:[#allocation54_spill] sm:$0xff] }
0x188f   : > { %28884 = vmatpush3.xpose.msk.msra.mxu1 %vm1344_vm2, %v34687_v7  ;;  %23289 = vmax.xlane.f32.xlu0 %v23288_v14  ;;  %v22476_v18 = vpop.f32.mrf.mxu0 }
0x1890   : > { %v34758_v12 = vmul.f32 0.35355338, %v22476_v18  ;;  %28885 = vmatprep.mubr.msk.f32.mxu1 %vm30009_vm1, %v35908_v40  ;;  %28893 = vmatprep.subr.mxu1 %v35908_v40 }
0x1891   : > { %v28852_v41 = vpop.f32.mrf.mxu0 }
0x1892   : > { %28886 = vmatmul.mubr.msk.f32.vlgmr.msra.gmra.mxu1 %vm1344_vm2, %v34691_v5  ;;  %v23291_v60 = vsel %vm1344_vm2, %v34758_v12, -inf }
0x1893   : > { %28894 = vmatpush3.xpose.msk.msra.mxu1 %vm1344_vm2, %v34696_v21  ;;  %23292 = vmax.xlane.f32.xlu1 %v23291_v60  ;;  %v22554_v7 = vpop.f32.mrf.mxu0 }
0x1894   : > { %v34769_v63 = vmul.f32 0.35355338, %v22554_v7  ;;  %28895 = vmatprep.mubr.msk.f32.mxu1 %vm30009_vm1, %v35908_v40  ;;  %28903 = vmatprep.subr.mxu1 %v35908_v40 }
0x1895   : > { %v28857_v10 = vpop.f32.mrf.mxu0 }
0x1896   : > { %28896 = vmatmul.mubr.msk.f32.vlgmr.msra.gmra.mxu1 %vm1344_vm2, %v34700_v4  ;;  %v23294_v5 = vsel %vm1344_vm2, %v34769_v63, -inf }
0x1897   : > { %28904 = vmatpush3.msra.mxu1 %v23453_v6  ;;  %23295 = vmax.xlane.f32.xlu0 %v23294_v5  ;;  %v22632_v21 = vpop.f32.mrf.mxu0 }
0x1898   : > { %v34778_v38 = vmul.f32 0.35355338, %v22632_v21  ;;  %28905 = vmatprep.mubr.msk.f32.mxu1 %vm30009_vm1, %v35908_v40  ;;  %28913 = vmatprep.subr.mxu1 %v35908_v40 }
0x1899   : > { %v28862_v13 = vpop.f32.mrf.mxu0 }
0x189a   : > { %v23297_v39 = vsel %vm1344_vm2, %v34778_v38, -inf }
0x189b   : > { %23298 = vmax.xlane.f32.xlu1 %v23297_v39 }
0x189c   : > { %v22788_v46 = vpop.f32.mrf.mxu0 }
0x189d   : > { %v34785_v4 = vmul.f32 0.35355338, %v22788_v46  ;;  %v36185_v46 = vld [vmem:[#allocation75_spill] sm:$0xff] }
0x189e   : > { %v28872_v30 = vpop.f32.mrf.mxu0 }
0x189f   : > { %v23303_v24 = vsel %vm1344_vm2, %v34785_v4, -inf  ;;  %v36186_v30 = vld [vmem:[#allocation67_spill] sm:$0xff] }
0x18a0   : > { %23304 = vmax.xlane.f32.xlu1 %v23303_v24  ;;  %v19084_v24 = vadd.f32 %v36186_v30, %v36185_v46 }
0x18a4   : > { %v22944_v62 = vpop.f32.mrf.mxu0 }
0x18a5   : > { %v34789_v0 = vmul.f32 0.35355338, %v22944_v62 }
0x18a6   : > { %v28882_v2 = vpop.f32.mrf.mxu0 }
0x18a7   : > { %v23309_v33 = vsel %vm1344_vm2, %v34789_v0, -inf }
0x18a8   : > { %23310 = vmax.xlane.f32.xlu1 %v23309_v33 }
0x18ac   : > { %v23100_v26 = vpop.f32.mrf.mxu0 }
0x18ad   : > { %v34793_v44 = vmul.f32 0.35355338, %v23100_v26 }
0x18ae   : > { %v28892_v36 = vpop.f32.mrf.mxu0 }
0x18af   : > { %v23315_v59 = vsel %vm1344_vm2, %v34793_v44, -inf }
0x18b0   : > { %23316 = vmax.xlane.f32.xlu1 %v23315_v59  ;;  %v36187_v59 = vld [vmem:[#allocation76_spill] sm:$0xff] }
0x18b4   : > { %v23256_v19 = vpop.f32.mrf.mxu0 }
0x18b5   : > { %v34797_v51 = vmul.f32 0.35355338, %v23256_v19  ;;  %v36188_v19 = vld [vmem:[#allocation46_spill] sm:$0xff] }
0x18b6   : > { %v28902_v53 = vpop.f32.mrf.mxu0 }
0x18b7   : > { %v23321_v8 = vsel %vm1344_vm2, %v34797_v51, -inf  ;;  %v19094_v53 = vadd.f32 %v36188_v19, %v36187_v59 }
0x18b8   : > { %23322 = vmax.xlane.f32.xlu1 %v23321_v8 }
0x1908   : > { %v23278_v25 = vpop.xlane.xlu1 %23277 }
0x1909   : > { %v23324_v3 = vsub.f32 %v34719_v29, %v23278_v25 }
0x190b   : > { %v23340_v11 = vmul.f32 1.442695, %v23324_v3 }
0x190c   : > { %v23281_v27 = vpop.xlane.xlu0 %23280 }
0x190d   : > { %29673 = vpow2.f32 %v23340_v11  ;;  %v23325_v1 = vsub.f32 %v34725_v34, %v23281_v27 }
0x190f   : > { %v23342_v43 = vmul.f32 1.442695, %v23325_v1 }
0x1910   : > { %v23284_v31 = vpop.xlane.xlu0 %23283 }
0x1911   : > { %29675 = vpow2.f32 %v23342_v43  ;;  %v23326_v23 = vsub.f32 %v34731_v17, %v23284_v31  ;;  %v36189_v31 = vld [vmem:[#allocation77_spill] sm:$0xff] }
0x1913   : > { %v23344_v16 = vmul.f32 1.442695, %v23326_v23  ;;  %v36190_v23 = vld [vmem:[#allocation53_spill] sm:$0xff] }
0x1914   : > { %v23287_v22 = vpop.xlane.xlu1 %23286 }
0x1915   : > { %29677 = vpow2.f32 %v23344_v16  ;;  %v23327_v52 = vsub.f32 %v34739_v42, %v23287_v22  ;;  %v19104_v16 = vadd.f32 %v36190_v23, %v36189_v31 }
0x1917   : > { %v23346_v49 = vmul.f32 1.442695, %v23327_v52 }
0x1918   : > { %v23290_v32 = vpop.xlane.xlu0 %23289 }
0x1919   : > { %29679 = vpow2.f32 %v23346_v49  ;;  %v23328_v29 = vsub.f32 %v34747_v57, %v23290_v32  ;;  %v36183_v57 = vld [vmem:[#allocation73_spill] sm:$0xff] }
0x191a   : > { %v34810_v9 = vpop.eup %29673  ;;  %v19074_v14 = vadd.f32 %v36184_v61, %v36183_v57  ;;  %v36195_v57 = vld [vmem:[#allocation81_spill] sm:$0xff]  ;;  %v36196_v61 = vld [vmem:[#allocation59_spill] sm:$0xff] }
0x191b   : > { %v23348_v28 = vmul.f32 1.442695, %v23328_v29  ;;  %v23372_v34 = vsel %vm1344_vm2, %v34810_v9, 0.0  ;;  %v36191_v29 = vld [vmem:[#allocation79_spill] sm:$0xff] }
0x191c   : > { %v23293_v50 = vpop.xlane.xlu1 %23292  ;;  %23373 = vadd.xlane.f32.xlu0 %v23372_v34 }
0x191d   : > { %29681 = vpow2.f32 %v23348_v28  ;;  %v23329_v17 = vsub.f32 %v34758_v12, %v23293_v50  ;;  %v36192_v28 = vld [vmem:[#allocation19_spill] sm:$0xff] }
0x191e   : > { %v34815_v56 = vpop.eup %29675  ;;  %v19114_v34 = vadd.f32 %v36192_v28, %v36191_v29 }
0x191f   : > { %v23350_v37 = vmul.f32 1.442695, %v23329_v17  ;;  %v23375_v48 = vsel %vm1344_vm2, %v34815_v56, 0.0 }
0x1920   : > { %23376 = vadd.xlane.f32.xlu1 %v23375_v48  ;;  %v23296_v55 = vpop.xlane.xlu0 %23295  ;;  %v36194_v48 = vld [vmem:[#allocation56_spill] sm:$0xff] }
0x1921   : > { %29683 = vpow2.f32 %v23350_v37  ;;  %v23330_v42 = vsub.f32 %v34769_v63, %v23296_v55  ;;  %v36193_v37 = vld [vmem:[#allocation80_spill] sm:$0xff] }
0x1922   : > { %v34820_v35 = vpop.eup %29677  ;;  %v19109_v55 = vadd.f32 %v36194_v48, %v36193_v37 }
0x1923   : > { %v23352_v45 = vmul.f32 1.442695, %v23330_v42  ;;  %v23378_v47 = vsel %vm1344_vm2, %v34820_v35, 0.0 }
0x1924   : > { %v23299_v18 = vpop.xlane.xlu1 %23298  ;;  %23379 = vadd.xlane.f32.xlu0 %v23378_v47 }
0x1925   : > { %29685 = vpow2.f32 %v23352_v45  ;;  %v23331_v12 = vsub.f32 %v34778_v38, %v23299_v18 }
0x1926   : > { %v28801_v41 = vpop.f32.mrf.mxu1  ;;  %v34827_v60 = vpop.eup %29679 }
0x1927   : > { %v34829_v7 = vadd.f32 %v28801_v41, %v19074_v14  ;;  %v23354_v63 = vmul.f32 1.442695, %v23331_v12  ;;  %v23381_v10 = vsel %vm1344_vm2, %v34827_v60, 0.0  ;;  %v19124_v14 = vadd.f32 %v36196_v61, %v36195_v57  ;;  %v36197_v41 = vld [vmem:[#allocation82_spill] sm:$0xff] }
0x1928   : > { %23382 = vadd.xlane.f32.xlu1 %v23381_v10  ;;  %v34838_v39 = vpop.f32.mrf.mxu1 }
0x1929   : > { %v23305_v6 = vpop.xlane.xlu1 %23304  ;;  %29687 = vpow2.f32 %v23354_v63  ;;  %v36198_v63 = vld [vmem:[#allocation66_spill] sm:$0xff] }
0x192a   : > { %v23333_v5 = vsub.f32 %v34785_v4, %v23305_v6  ;;  %v34834_v21 = vpop.eup %29681  ;;  %v19119_v10 = vadd.f32 %v36198_v63, %v36197_v41 }
0x192b   : > { %v23384_v38 = vsel %vm1344_vm2, %v34834_v21, 0.0 }
0x192c   : > { %v23358_v13 = vmul.f32 1.442695, %v23333_v5  ;;  %23385 = vadd.xlane.f32.xlu0 %v23384_v38  ;;  %v36200_v38 = vld [vmem:[#allocation68_spill] sm:$0xff] }
0x192e   : > { %29689 = vpow2.f32 %v23358_v13  ;;  %v34842_v62 = vpop.eup %29683  ;;  %v28804_v2 = vpop.f32.mrf.mxu1  ;;  %v36199_v13 = vld [vmem:[#allocation83_spill] sm:$0xff] }
0x192f   : > { %v34844_v33 = vadd.f32 %v28804_v2, %v19084_v24  ;;  %v23387_v4 = vsel %vm1344_vm2, %v34842_v62, 0.0  ;;  %v19134_v46 = vadd.f32 %v36200_v38, %v36199_v13  ;;  %v36210_v13 = vld [vmem:[#allocation32_spill] sm:$0xff] }
0x1930   : > { %v34848_v26 = vpop.f32.mrf.mxu1  ;;  %23388 = vadd.xlane.f32.xlu1 %v23387_v4  ;;  %v36201_v4 = vld [vmem:[#allocation84_spill] sm:$0xff] }
0x1931   : > { %v23311_v36 = vpop.xlane.xlu1 %23310 }
0x1932   : > { %v23335_v8 = vsub.f32 %v34789_v0, %v23311_v36  ;;  %v34853_v25 = vpop.eup %29685  ;;  %v28807_v3 = vpop.f32.mrf.mxu1  ;;  %v36202_v36 = vld [vmem:[#allocation69_spill] sm:$0xff] }
0x1933   : > { %v34855_v27 = vadd.f32 %v28807_v3, %v19094_v53  ;;  %v23390_v1 = vsel %vm1344_vm2, %v34853_v25, 0.0  ;;  %v19129_v59 = vadd.f32 %v36202_v36, %v36201_v4  ;;  %v36203_v3 = vld [vmem:[#allocation85_spill] sm:$0xff] }
0x1934   : > { %v23362_v11 = vmul.f32 1.442695, %v23335_v8  ;;  %v34859_v43 = vpop.f32.mrf.mxu1  ;;  %23391 = vadd.xlane.f32.xlu0 %v23390_v1 }
0x1936   : > { %29691 = vpow2.f32 %v23362_v11  ;;  %v34863_v22 = vpop.eup %29687  ;;  %v28810_v52 = vpop.f32.mrf.mxu1  ;;  %v36204_v11 = vld [vmem:[#allocation40_spill] sm:$0xff] }
0x1937   : > { %v34865_v0 = vadd.f32 %v28810_v52, %v19104_v16  ;;  %v23393_v49 = vsel %vm1344_vm2, %v34863_v22, 0.0  ;;  %v19144_v1 = vadd.f32 %v36204_v11, %v36203_v3  ;;  %v36205_v16 = vld [vmem:[#allocation86_spill] sm:$0xff] }
0x1938   : > { %v34869_v32 = vpop.f32.mrf.mxu1  ;;  %23394 = vadd.xlane.f32.xlu1 %v23393_v49  ;;  %v36206_v52 = vld [vmem:[#allocation70_spill] sm:$0xff] }
0x1939   : > { %v19139_v49 = vadd.f32 %v36206_v52, %v36205_v16  ;;  %v36212_v16 = vld [vmem:[#allocation23_spill] sm:$0xff] }
0x193a   : > { %v28813_v17 = vpop.f32.mrf.mxu1 }
0x193b   : > { %v34873_v50 = vpop.eup %29689  ;;  %v34877_v42 = vadd.f32 %v28813_v17, %v19114_v34  ;;  %v36207_v17 = vld [vmem:[#allocation55_spill] sm:$0xff] }
0x193c   : > { %v23399_v45 = vsel %vm1344_vm2, %v34873_v50, 0.0  ;;  %v21957_v47 = vpop.f32.mrf.mxu1 }
0x193d   : > { %23400 = vadd.xlane.f32.xlu0 %v23399_v45  ;;  %v34883_v18 = vadd.f32 %v21957_v47, %v19109_v55  ;;  %v36208_v45 = vld [vmem:[#allocation62_spill] sm:$0xff] }
0x193e   : > { %v28816_v12 = vpop.f32.mrf.mxu1 }
0x193f   : > { %v34887_v6 = vadd.f32 %v28816_v12, %v19124_v14  ;;  %v36209_v12 = vld [vmem:[#allocation58_spill] sm:$0xff] }
0x1940   : > { %v21967_v5 = vpop.f32.mrf.mxu1 }
0x1941   : > { %v34891_v30 = vadd.f32 %v21967_v5, %v19119_v10 }
0x1942   : > { %v28819_v2 = vpop.f32.mrf.mxu1 }
0x1943   : > { %v34893_v24 = vpop.eup %29691  ;;  %v34897_v19 = vadd.f32 %v28819_v2, %v19134_v46 }
0x1944   : > { %v23405_v53 = vsel %vm1344_vm2, %v34893_v24, 0.0  ;;  %v21977_v8 = vpop.f32.mrf.mxu1 }
0x1945   : > { %23406 = vadd.xlane.f32.xlu0 %v23405_v53  ;;  %v34903_v31 = vadd.f32 %v21977_v8, %v19129_v59  ;;  %v36211_v59 = vld [vmem:[#allocation24_spill] sm:$0xff]  ;;  %v23317_v53 = vpop.xlane.xlu1 %23316 }
0x1946   : > { %v28822_v23 = vpop.f32.mrf.mxu1  ;;  %v23337_v8 = vsub.f32 %v34793_v44, %v23317_v53 }
0x1947   : > { %v34907_v29 = vadd.f32 %v28822_v23, %v19144_v1 }
0x1948   : > { %v21987_v28 = vpop.f32.mrf.mxu1  ;;  %v23366_v3 = vmul.f32 1.442695, %v23337_v8 }
0x1949   : > { %v34909_v34 = vadd.f32 %v21987_v28, %v19139_v49  ;;  %23832 = vrot.lane.b32.xlu1 %v36207_v17, %s30012_s7  ;;  %v23323_v23 = vpop.xlane.xlu1 %23322 }
0x194a   : > { %v22710_v37 = vpop.f32.mrf.mxu1  ;;  %29693 = vpow2.f32 %v23366_v3  ;;  %v23339_v28 = vsub.f32 %v34797_v51, %v23323_v23  ;;  %v36213_v23 = vld [vmem:[#allocation27_spill] sm:$0xff] }
0x194b   : > { %v34913_v48 = vmul.f32 0.35355338, %v22710_v37 }
0x194c   : > { %v28867_v55 = vpop.f32.mrf.mxu1  ;;  %v23370_v44 = vmul.f32 1.442695, %v23339_v28 }
0x194d   : > { %23984 = vrot.lane.b32.xlu1 %v36208_v45, %s30012_s7  ;;  %v23300_v47 = vsel %vm1344_vm2, %v34913_v48, -inf }
0x194e   : > { %v22866_v57 = vpop.f32.mrf.mxu1  ;;  %23301 = vmax.xlane.f32.xlu0 %v23300_v47 }
0x194f   : > { %v34919_v61 = vmul.f32 0.35355338, %v22866_v57 }
0x1950   : > { %v28877_v14 = vpop.f32.mrf.mxu1 }
0x1951   : > { %24136 = vrot.lane.b32.xlu1 %v36209_v12, %s30012_s7  ;;  %v23306_v41 = vsel %vm1344_vm2, %v34919_v61, -inf }
0x1952   : > { %v23022_v63 = vpop.f32.mrf.mxu1  ;;  %23307 = vmax.xlane.f32.xlu0 %v23306_v41 }
0x1953   : > { %v34925_v10 = vmul.f32 0.35355338, %v23022_v63 }
0x1954   : > { %v28887_v5 = vpop.f32.mrf.mxu1 }
0x1955   : > { %24212 = vrot.lane.b32.xlu1 %v36210_v13, %s30012_s7  ;;  %v23312_v38 = vsel %vm1344_vm2, %v34925_v10, -inf }
0x1956   : > { %v23178_v46 = vpop.f32.mrf.mxu1  ;;  %23313 = vmax.xlane.f32.xlu0 %v23312_v38 }
0x1957   : > { %v34931_v2 = vmul.f32 0.35355338, %v23178_v46  ;;  %v34938_v11 = vpop.eup %29693 }
0x1958   : > { %v28897_v4 = vpop.f32.mrf.mxu1  ;;  %v23411_v1 = vsel %vm1344_vm2, %v34938_v11, 0.0 }
0x1959   : > { %v23318_v36 = vsel %vm1344_vm2, %v34931_v2, -inf }
0x195a   : > { %23319 = vmax.xlane.f32.xlu0 %v23318_v36 }
0x1970   : > { %23756 = vrot.lane.b32.xlu0 %v36211_v59, %s30012_s7 }
0x198f   : > { %23412 = vadd.xlane.f32.xlu0 %v23411_v1 }
0x19a5   : > { %23908 = vrot.lane.b32.xlu0 %v36212_v16, %s30012_s7  ;;  %v23374_v52 = vpop.xlane.xlu0 %23373 }
0x19a6   : > { %29695 = vrcp.f32 %v23374_v52  ;;  %v36214_v52 = vld [vmem:[#allocation63_spill] sm:$0xff] }
0x19a9   : > { %v23377_v49 = vpop.xlane.xlu1 %23376 }
0x19aa   : > { %29697 = vrcp.f32 %v23377_v49  ;;  %v36215_v49 = vld [vmem:[#allocation60_spill] sm:$0xff] }
0x19ad   : > { %v23380_v17 = vpop.xlane.xlu0 %23379 }
0x19ae   : > { %29699 = vrcp.f32 %v23380_v17 }
0x19b1   : > { %v23383_v37 = vpop.xlane.xlu1 %23382 }
0x19b2   : > { %29701 = vrcp.f32 %v23383_v37 }
0x19b3   : > { %v29696_v55 = vpop.eup %29695  ;;  %29703 = vpow2.f32 %v23370_v44 }
0x19b4   : > { %v23421_v45 = vmul.f32 %v29696_v55, %v34810_v9 }
0x19b6   : > { %28906 = vmatmul.mubr.msk.f32.vlgmr.msra.gmra.mxu1 %vm1344_vm2, %v23421_v45  ;;  %v36216_v45 = vld [vmem:[#allocation31_spill] sm:$0xff] }
0x19b7   : > { %v29698_v47 = vpop.eup %29697  ;;  %28914 = vmatpush3.msra.mxu1 %v34803_v15  ;;  %28915 = vmatprep.mubr.msk.f32.mxu1 %vm30009_vm1, %v35908_v40  ;;  %v23386_v15 = vpop.xlane.xlu0 %23385 }
0x19b8   : > { %v23423_v57 = vmul.f32 %v29698_v47, %v34815_v56  ;;  %28923 = vmatprep.subr.mxu1 %v35908_v40 }
0x19b9   : > { %v23389_v51 = vpop.xlane.xlu1 %23388 }
0x19ba   : > { %29705 = vrcp.f32 %v23389_v51  ;;  %28911 = vmatmul.mubr.msk.f32.vlgmr.msra.gmra.mxu0 %vm1344_vm2, %v23423_v57 }
0x19bb   : > { %v29700_v14 = vpop.eup %29699  ;;  %28919 = vmatpush3.msra.mxu0 %v34801_v20  ;;  %28920 = vmatprep.mubr.msk.f32.mxu0 %vm30009_vm1, %v35908_v40 }
0x19bc   : > { %v23425_v9 = vmul.f32 %v29700_v14, %v34820_v35  ;;  %28928 = vmatprep.subr.mxu0 %v35908_v40 }
0x19bd   : > { %v23392_v63 = vpop.xlane.xlu0 %23391 }
0x19be   : > { %28916 = vmatmul.mubr.msk.f32.vlgmr.msra.gmra.mxu1 %vm1344_vm2, %v23425_v9 }
0x19bf   : > { %v29702_v56 = vpop.eup %29701  ;;  %28925 = vmatprep.mubr.msk.f32.mxu1 %vm30009_vm1, %v35908_v40 }
0x19c0   : > { %v34961_v12 = vpop.eup %29703  ;;  %v23427_v41 = vmul.f32 %v29702_v56, %v34827_v60 }
0x19c1   : > { %v23395_v20 = vpop.xlane.xlu1 %23394  ;;  %v23417_v35 = vsel %vm1344_vm2, %v34961_v12, 0.0 }
0x19c2   : > { %29707 = vrcp.f32 %v23395_v20  ;;  %28921 = vmatmul.mubr.msk.f32.vlgmr.msra.gmra.mxu0 %vm1344_vm2, %v23427_v41 }
0x19c3   : > { %28930 = vmatprep.mubr.msk.f32.mxu0 %vm30009_vm1, %v35908_v40 }
0x19c4   : > { %23418 = vadd.xlane.f32.xlu0 %v23417_v35 }
0x19c5   : > { %v23833_v5 = vpop.permute.xlu1 %23832 }
0x19c6   : > { %v23401_v13 = vpop.xlane.xlu0 %23400  ;;  %28929 = vmatpush3.msra.mxu0 %v23833_v5 }
0x19c7   : > { %29709 = vrcp.f32 %v23401_v13  ;;  %v29706_v38 = vpop.eup %29705  ;;  %28938 = vmatprep.subr.mxu0 %v35908_v40 }
0x19c8   : > { %v23431_v60 = vmul.f32 %v29706_v38, %v34842_v62  ;;  %29711 = vrcp.f32 %v23386_v15 }
0x19c9   : > { %v23985_v46 = vpop.permute.xlu1 %23984 }
0x19ca   : > { %28931 = vmatmul.mubr.msk.f32.vlgmr.msra.gmra.mxu0 %vm1344_vm2, %v23431_v60 }
0x19cb   : > { %28939 = vmatpush3.msra.mxu0 %v23985_v46  ;;  %28940 = vmatprep.mubr.msk.f32.mxu0 %vm30009_vm1, %v35908_v40 }
0x19cc   : > { %28948 = vmatprep.subr.mxu0 %v35908_v40 }
0x19cd   : > { %v24137_v59 = vpop.permute.xlu1 %24136 }
0x19ce   : > { %v23407_v8 = vpop.xlane.xlu0 %23406 }
0x19cf   : > { %v29708_v4 = vpop.eup %29707 }
0x19d0   : > { %v23435_v36 = vmul.f32 %v29708_v4, %v34863_v22 }
0x19d2   : > { %28941 = vmatmul.mubr.msk.f32.vlgmr.msra.gmra.mxu0 %vm1344_vm2, %v23435_v36 }
0x19d3   : > { %28949 = vmatpush3.msra.mxu0 %v24137_v59  ;;  %28950 = vmatprep.mubr.msk.f32.mxu0 %vm30009_vm1, %v35908_v40 }
0x19d4   : > { %v29710_v53 = vpop.eup %29709  ;;  %28958 = vmatprep.subr.mxu0 %v35908_v40 }
0x19d5   : > { %v23439_v62 = vmul.f32 %v29710_v53, %v34873_v50  ;;  %v29712_v17 = vpop.eup %29711  ;;  %v24213_v53 = vpop.permute.xlu1 %24212 }
0x19d7   : > { %28951 = vmatmul.mubr.msk.f32.vlgmr.msra.gmra.mxu0 %vm1344_vm2, %v23439_v62  ;;  %v23302_v3 = vpop.xlane.xlu0 %23301 }
0x19d8   : > { %28960 = vmatprep.mubr.msk.f32.mxu0 %vm30009_vm1, %v35908_v40  ;;  %v23332_v22 = vsub.f32 %v34913_v48, %v23302_v3  ;;  %v23429_v48 = vmul.f32 %v29712_v17, %v34834_v21 }
0x19da   : > { %v23356_v1 = vmul.f32 1.442695, %v23332_v22  ;;  %24060 = vrot.lane.b32.xlu0 %v36213_v23, %s30012_s7 }
0x19db   : > { %v23308_v16 = vpop.xlane.xlu0 %23307 }
0x19dc   : > { %29713 = vpow2.f32 %v23356_v1 }
0x19dd   : > { %29715 = vrcp.f32 %v23392_v63 }
0x19de   : > { %24288 = vrot.lane.b32.xlu0 %v36214_v52, %s30012_s7 }
0x19df   : > { %v23314_v50 = vpop.xlane.xlu0 %23313 }
0x19e0   : > { %v23336_v47 = vsub.f32 %v34925_v10, %v23314_v50 }
0x19e2   : > { %24440 = vrot.lane.b32.xlu0 %v36215_v49, %s30012_s7  ;;  %v23364_v57 = vmul.f32 1.442695, %v23336_v47 }
0x19e3   : > { %v23320_v28 = vpop.xlane.xlu0 %23319 }
0x19e4   : > { %v23338_v51 = vsub.f32 %v34931_v2, %v23320_v28 }
0x19e6   : > { %24592 = vrot.lane.b32.xlu0 %v36093_v54, %s30012_s7  ;;  %v23334_v54 = vsub.f32 %v34919_v61, %v23308_v16  ;;  %v23368_v14 = vmul.f32 1.442695, %v23338_v51 }
0x19e7   : > { %v23757_v44 = vpop.permute.xlu0 %23756 }
0x19e8   : > { %28924 = vmatpush3.msra.mxu1 %v23757_v44  ;;  %v23360_v21 = vmul.f32 1.442695, %v23334_v54 }
0x19e9   : > { %v34994_v37 = vpop.eup %29713  ;;  %28926 = vmatmul.mubr.msk.f32.vlgmr.msra.gmra.mxu1 %vm1344_vm2, %v23429_v48  ;;  %28933 = vmatprep.subr.mxu1 %v35908_v40 }
0x19ea   : > { %v23396_v55 = vsel %vm1344_vm2, %v34994_v37, 0.0  ;;  %28935 = vmatprep.mubr.msk.f32.mxu1 %vm30009_vm1, %v35908_v40  ;;  %29717 = vpow2.f32 %v23360_v21  ;;  %v29716_v15 = vpop.eup %29715 }
0x19eb   : > { %23397 = vadd.xlane.f32.xlu1 %v23396_v55  ;;  %29719 = vpow2.f32 %v23364_v57  ;;  %v23433_v41 = vmul.f32 %v29716_v15, %v34853_v25 }
0x19ec   : > { %29721 = vpow2.f32 %v23368_v14 }
0x19ed   : > { %29723 = vrcp.f32 %v23407_v8 }
0x19f7   : > { %v35007_v56 = vpop.eup %29717 }
0x19f8   : > { %v23402_v61 = vsel %vm1344_vm2, %v35007_v56, 0.0  ;;  %v35016_v10 = vpop.eup %29719 }
0x19f9   : > { %v23408_v2 = vsel %vm1344_vm2, %v35016_v10, 0.0  ;;  %v35020_v63 = vpop.eup %29721 }
0x19fa   : > { %v23414_v25 = vsel %vm1344_vm2, %v35020_v63, 0.0  ;;  %v29724_v13 = vpop.eup %29723 }
0x19fb   : > { %v23443_v38 = vmul.f32 %v29724_v13, %v34893_v24 }
0x19fc   : > { %24364 = vrot.lane.b32.xlu1 %v36216_v45, %s30012_s7 }
0x1a18   : > { %v23413_v9 = vpop.xlane.xlu0 %23412 }
0x1a19   : > { %29725 = vrcp.f32 %v23413_v9 }
0x1a1c   : > { %v23909_v20 = vpop.permute.xlu0 %23908 }
0x1a1d   : > { %28934 = vmatpush3.msra.mxu1 %v23909_v20 }
0x1a1e   : > { %28936 = vmatmul.mubr.msk.f32.vlgmr.msra.gmra.mxu1 %vm1344_vm2, %v23433_v41  ;;  %28943 = vmatprep.subr.mxu1 %v35908_v40  ;;  %v13028_v41 = vld [vmem:[#allocation7 + $0x38] sm:$0xff] }
0x1a1f   : > { %28945 = vmatprep.mubr.msk.f32.mxu1 %vm30009_vm1, %v35908_v40 }
0x1a20   : > { %23403 = vadd.xlane.f32.xlu1 %v23402_v61 }
0x1a24   : > { %23409 = vadd.xlane.f32.xlu1 %v23408_v2 }
0x1a26   : > { %v29726_v46 = vpop.eup %29725 }
0x1a28   : > { %23415 = vadd.xlane.f32.xlu1 %v23414_v25 }
0x1a39   : > { %24516 = vrot.lane.b32.xlu1 %v36086_v58, %s30012_s7  ;;  %v23447_v58 = vmul.f32 %v29726_v46, %v34938_v11 }
0x1a4d   : > { %v23419_v35 = vpop.xlane.xlu0 %23418 }
0x1a4e   : > { %29727 = vrcp.f32 %v23419_v35 }
0x1a51   : > { %v24061_v5 = vpop.permute.xlu0 %24060 }
0x1a52   : > { %28944 = vmatpush3.msra.mxu1 %v24061_v5 }
0x1a53   : > { %28953 = vmatprep.subr.mxu1 %v35908_v40 }
0x1a55   : > { %v24289_v60 = vpop.permute.xlu0 %24288 }
0x1a56   : > { %28959 = vmatpush3.msra.mxu0 %v24289_v60 }
0x1a57   : > { %28961 = vmatmul.mubr.msk.f32.vlgmr.msra.gmra.mxu0 %vm1344_vm2, %v23443_v38  ;;  %28968 = vmatprep.subr.mxu0 %v35908_v40 }
0x1a58   : > { %28970 = vmatprep.mubr.msk.f32.mxu0 %vm30009_vm1, %v35908_v40 }
0x1a59   : > { %v24441_v4 = vpop.permute.xlu0 %24440 }
0x1a5a   : > { %28969 = vmatpush3.msra.mxu0 %v24441_v4 }
0x1a5b   : > { %v29728_v36 = vpop.eup %29727  ;;  %28971 = vmatmul.mubr.msk.f32.vlgmr.msra.gmra.mxu0 %vm1344_vm2, %v23447_v58  ;;  %28978 = vmatprep.subr.mxu0 %v35908_v40 }
0x1a5c   : > { %v23451_v24 = vmul.f32 %v29728_v36, %v34961_v12  ;;  %28980 = vmatprep.mubr.msk.f32.mxu0 %vm30009_vm1, %v35908_v40 }
0x1a5d   : > { %v24593_v59 = vpop.permute.xlu0 %24592 }
0x1a5e   : > { %28979 = vmatpush3.msra.mxu0 %v24593_v59 }
0x1a5f   : > { %28981 = vmatmul.mubr.msk.f32.vlgmr.msra.gmra.mxu0 %vm1344_vm2, %v23451_v24 }
0x1a60   : > { %25299 = vmatprep.mubr.f32.mxu0 %v35908_v40 }
0x1a74   : > { %v23398_v11 = vpop.xlane.xlu1 %23397 }
0x1a75   : > { %29729 = vrcp.f32 %v23398_v11 }
0x1a76   : > { %v23524_v8 = vpop.f32.mrf.mxu1 }
0x1a78   : > { %v28907_v62 = vpop.f32.mrf.mxu1  ;;  %v24365_v45 = vpop.permute.xlu1 %24364 }
0x1a79   : > { %v36218_v62 = vld [vmem:[#allocation42_spill] sm:$0xff] }
0x1a7a   : > { %v23600_v3 = vpop.f32.mrf.mxu0 }
0x1a7c   : > { %v28912_v22 = vpop.f32.mrf.mxu0 }
0x1a7d   : > { %v36219_v22 = vld [vmem:[#allocation47_spill] sm:$0xff] }
0x1a7e   : > { %v23676_v1 = vpop.f32.mrf.mxu1 }
0x1a80   : > { %v28917_v23 = vpop.f32.mrf.mxu1 }
0x1a82   : > { %v29730_v16 = vpop.eup %29729  ;;  %v23752_v12 = vpop.f32.mrf.mxu0 }
0x1a83   : > { %v23437_v52 = vmul.f32 %v29730_v16, %v34994_v37 }
0x1a84   : > { %v28922_v50 = vpop.f32.mrf.mxu0 }
0x1a85   : > { %28946 = vmatmul.mubr.msk.f32.vlgmr.msra.gmra.mxu1 %vm1344_vm2, %v23437_v52  ;;  %v36220_v50 = vld [vmem:[#allocation72_spill] sm:$0xff] }
0x1a86   : > { %28954 = vmatpush3.msra.mxu1 %v24213_v53  ;;  %28955 = vmatprep.mubr.msk.f32.mxu1 %vm30009_vm1, %v35908_v40  ;;  %v13029_v53 = vld [vmem:[%s35689_s8] sm:$0x3] }
0x1a87   : > { %28963 = vmatprep.subr.mxu1 %v35908_v40 }
0x1a8a   : > { %v23904_v49 = vpop.f32.mrf.mxu0 }
0x1a8c   : > { %v28932_v28 = vpop.f32.mrf.mxu0 }
0x1a92   : > { %v24056_v17 = vpop.f32.mrf.mxu0 }
0x1a94   : > { %v28942_v48 = vpop.f32.mrf.mxu0 }
0x1a97   : > { %v24208_v44 = vpop.f32.mrf.mxu0 }
0x1a99   : > { %v28952_v55 = vpop.f32.mrf.mxu0 }
0x1aa9   : > { %v23404_v54 = vpop.xlane.xlu1 %23403  ;;  %v23828_v21 = vpop.f32.mrf.mxu1 }
0x1aaa   : > { %29731 = vrcp.f32 %v23404_v54 }
0x1aab   : > { %v28927_v37 = vpop.f32.mrf.mxu1 }
0x1aad   : > { %v23410_v47 = vpop.xlane.xlu1 %23409 }
0x1aae   : > { %29733 = vrcp.f32 %v23410_v47  ;;  %v36224_v47 = vld [vmem:[#allocation43_spill] sm:$0xff] }
0x1ab1   : > { %v23416_v57 = vpop.xlane.xlu1 %23415 }
0x1ab2   : > { %29735 = vrcp.f32 %v23416_v57 }
0x1ab5   : > { %v24517_v20 = vpop.permute.xlu1 %24516 }
0x1ab7   : > { %v29732_v51 = vpop.eup %29731 }
0x1ab8   : > { %v23441_v14 = vmul.f32 %v29732_v51, %v35007_v56  ;;  %v36225_v51 = vld [vmem:[#allocation28_spill] sm:$0xff] }
0x1aba   : > { %28956 = vmatmul.mubr.msk.f32.vlgmr.msra.gmra.mxu1 %vm1344_vm2, %v23441_v14 }
0x1abb   : > { %v29734_v9 = vpop.eup %29733  ;;  %28964 = vmatpush3.msra.mxu1 %v24365_v45  ;;  %28965 = vmatprep.mubr.msk.f32.mxu1 %vm30009_vm1, %v35908_v40  ;;  %v36222_v45 = vld [vmem:[#allocation22_spill] sm:$0xff] }
0x1abc   : > { %v23445_v15 = vmul.f32 %v29734_v9, %v35016_v10  ;;  %28973 = vmatprep.subr.mxu1 %v35908_v40 }
0x1abe   : > { %28966 = vmatmul.mubr.msk.f32.vlgmr.msra.gmra.mxu1 %vm1344_vm2, %v23445_v15 }
0x1abf   : > { %v29736_v61 = vpop.eup %29735  ;;  %28974 = vmatpush3.msra.mxu1 %v24517_v20  ;;  %28975 = vmatprep.mubr.msk.f32.mxu1 %vm30009_vm1, %v35908_v40 }
0x1ac0   : > { %v23449_v56 = vmul.f32 %v29736_v61, %v35020_v63  ;;  %28983 = vmatprep.subr.mxu1 %v13028_v41  ;;  %v36226_v61 = vld [vmem:[#allocation21_spill] sm:$0xff] }
0x1ac2   : > { %28976 = vmatmul.mubr.msk.f32.vlgmr.msra.gmra.mxu1 %vm1344_vm2, %v23449_v56 }
0x1ac3   : > { %28985 = vmatprep.mubr.msk.f32.mxu1 %vm1344_vm2, %v23524_v8  ;;  %28984 = vmatpush3.msra.mxu1 %v13028_v41  ;;  %v36217_v8 = vld [vmem:[#allocation71_spill] sm:$0xff] }
0x1ac6   : > { %28986 = vmatmul.mubr.msk.f32.vlgmr.msra.gmra.mxu1 %vm1344_vm2, %v23600_v3  ;;  %v19069_v3 = vadd.f32 %v36218_v62, %v36217_v8 }
0x1ac7   : > { %28988 = vmatprep.mubr.msk.f32.mxu1 %vm1344_vm2, %v23676_v1  ;;  %v35078_v1 = vrot.slane %v13029_v53, %v36219_v22  ;;  %v36231_v53 = vld [vmem:[#allocation61_spill] sm:$0xff] }
0x1ac8   : > { %v21996_v16 = vadd.f32 %v34838_v39, %v19069_v3  ;;  %v36223_v39 = vld [vmem:[#allocation74_spill] sm:$0xff] }
0x1aca   : > { %28989 = vmatmul.mubr.msk.f32.gmra.mxu1 %vm1344_vm2, %v23752_v12 }
0x1acb   : > { %28991 = vmatprep.mubr.msk.f32.mxu1 %vm1344_vm2, %v23828_v21 }
0x1ace   : > { %28992 = vmatmul.mubr.msk.f32.gmra.mxu1 %vm1344_vm2, %v23904_v49  ;;  %v36221_v49 = vld [vmem:[#allocation44_spill] sm:$0xff] }
0x1acf   : > { %v19079_v28 = vadd.f32 %v36221_v49, %v36220_v50 }
0x1ad1   : > { %v21998_v55 = vadd.f32 %v34848_v26, %v19079_v28  ;;  %v36233_v28 = vld [vmem:[#allocation33_spill] sm:$0xff] }
0x1ade   : > { %v23980_v10 = vpop.f32.mrf.mxu1 }
0x1adf   : > { %28994 = vmatprep.mubr.msk.f32.mxu1 %vm1344_vm2, %v23980_v10 }
0x1ae0   : > { %v28937_v2 = vpop.f32.mrf.mxu1  ;;  %28995 = vmatmul.mubr.msk.f32.gmra.mxu1 %vm1344_vm2, %v24056_v17 }
0x1b17   : > { %v24360_v63 = vpop.f32.mrf.mxu0 }
0x1b19   : > { %v28962_v25 = vpop.f32.mrf.mxu0 }
0x1b1a   : > { %v36227_v25 = vld [vmem:[#allocation26_spill] sm:$0xff] }
0x1b1b   : > { %v24512_v35 = vpop.f32.mrf.mxu0 }
0x1b1d   : > { %v28972_v5 = vpop.f32.mrf.mxu0 }
0x1b1f   : > { %v24664_v13 = vpop.f32.mrf.mxu0 }
0x1b21   : > { %v28982_v38 = vpop.f32.mrf.mxu0 }
0x1b45   : > { %v24132_v60 = vpop.f32.mrf.mxu1 }
0x1b46   : > { %28997 = vmatprep.mubr.msk.f32.mxu1 %vm1344_vm2, %v24132_v60 }
0x1b47   : > { %v28947_v46 = vpop.f32.mrf.mxu1  ;;  %28998 = vmatmul.mubr.msk.f32.gmra.mxu1 %vm1344_vm2, %v24208_v44 }
0x1b7a   : > { %v24284_v58 = vpop.f32.mrf.mxu1 }
0x1b7b   : > { %29000 = vmatprep.mubr.msk.f32.mxu1 %vm1344_vm2, %v24284_v58  ;;  %v36229_v58 = vld [vmem:[#allocation30_spill] sm:$0xff] }
0x1b7c   : > { %v28957_v4 = vpop.f32.mrf.mxu1  ;;  %29001 = vmatmul.mubr.msk.f32.gmra.mxu1 %vm1344_vm2, %v24360_v63 }
0x1b7e   : > { %v24436_v36 = vpop.f32.mrf.mxu1 }
0x1b7f   : > { %29003 = vmatprep.mubr.msk.f32.mxu1 %vm1344_vm2, %v24436_v36 }
0x1b80   : > { %v28967_v24 = vpop.f32.mrf.mxu1  ;;  %29004 = vmatmul.mubr.msk.f32.gmra.mxu1 %vm1344_vm2, %v24512_v35 }
0x1b82   : > { %v24588_v59 = vpop.f32.mrf.mxu1 }
0x1b83   : > { %29006 = vmatprep.mubr.msk.f32.mxu1 %vm1344_vm2, %v24588_v59  ;;  %v36230_v59 = vld [vmem:[#allocation78_spill] sm:$0xff] }
0x1b84   : > { %v28977_v11 = vpop.f32.mrf.mxu1  ;;  %29007 = vmatmul.mubr.msk.f32.gmra.mxu1 %vm1344_vm2, %v24664_v13  ;;  %v36228_v13 = vld [vmem:[#allocation25_spill] sm:$0xff] }
0x1b85   : > { %v19099_v11 = vadd.f32 %v36231_v53, %v36230_v59  ;;  %v36238_v59 = vld [vmem:[#allocation37_spill] sm:$0xff] }
0x1b86   : > { %v28987_v23 = vpop.f32.mrf.mxu1 }
0x1b87   : > { %v24862_v12 = vadd.f32 %v28987_v23, %v34829_v7  ;;  %v19089_v7 = vadd.f32 %v36224_v47, %v36223_v39  ;;  %v22002_v62 = vadd.f32 %v34869_v32, %v19099_v11 }
0x1b88   : > { %v24782_v52 = vpop.f32.mrf.mxu1 }
0x1b89   : > { %v24882_v17 = vadd.f32 %v35078_v1, %v24862_v12  ;;  %v24861_v48 = vadd.f32 %v24782_v52, %v21996_v16  ;;  %v22000_v41 = vadd.f32 %v34859_v43, %v19089_v7  ;;  %v36232_v52 = vld [vmem:[#allocation29_spill] sm:$0xff]  ;;  %v36235_v7 = vld [vmem:[#allocation35_spill] sm:$0xff] }
0x1b8a   : > { %v28990_v44 = vpop.f32.mrf.mxu1 }
0x1b8b   : > { %v35087_v54 = vadd.f32 %v24882_v17, %v36222_v45  ;;  %v24881_v21 = vadd.f32 %v35078_v1, %v24861_v48  ;;  %v24864_v37 = vadd.f32 %v28990_v44, %v34844_v33 }
0x1b8c   : > { %v24792_v57 = vpop.f32.mrf.mxu1 }
0x1b8d   : > { %v35094_v14 = vadd.f32 %v24881_v21, %v36225_v51  ;;  %v24884_v9 = vadd.f32 %v35078_v1, %v24864_v37  ;;  %v24863_v15 = vadd.f32 %v24792_v57, %v21998_v55  ;;  %v24918_v26 = vsel %vm578_vm0, %v35087_v54, 0.0  ;;  %v36234_v37 = vld [vmem:[#allocation34_spill] sm:$0xff] }
0x1b8e   : > { %24919 = vadd.xlane.f32.xlu0 %v24918_v26  ;;  %v28993_v20 = vpop.f32.mrf.mxu1 }
0x1b8f   : > { %v35101_v56 = vadd.f32 %v24884_v9, %v36226_v61  ;;  %v24883_v33 = vadd.f32 %v35078_v1, %v24863_v15  ;;  %v24866_v10 = vadd.f32 %v28993_v20, %v34855_v27  ;;  %v24915_v2 = vsel %vm578_vm0, %v35094_v14, 0.0 }
0x1b90   : > { %24916 = vadd.xlane.f32.xlu1 %v24915_v2  ;;  %v24802_v63 = vpop.f32.mrf.mxu1 }
0x1b91   : > { %v35108_v35 = vadd.f32 %v24883_v33, %v36227_v25  ;;  %v24886_v5 = vadd.f32 %v35078_v1, %v24866_v10  ;;  %v24865_v43 = vadd.f32 %v24802_v63, %v22000_v41  ;;  %v24924_v46 = vsel %vm578_vm0, %v35101_v56, 0.0  ;;  %v36236_v10 = vld [vmem:[#allocation36_spill] sm:$0xff] }
0x1b93   : > { %v35112_v38 = vadd.f32 %v24886_v5, %v36228_v13  ;;  %v24885_v60 = vadd.f32 %v35078_v1, %v24865_v43  ;;  %v24921_v27 = vsel %vm578_vm0, %v35108_v35, 0.0 }
0x1b94   : > { %24925 = vadd.xlane.f32.xlu1 %v24924_v46  ;;  %24922 = vadd.xlane.f32.xlu0 %v24921_v27 }
0x1b95   : > { %v35120_v4 = vadd.f32 %v24885_v60, %v36229_v58  ;;  %v24930_v36 = vsel %vm578_vm0, %v35112_v38, 0.0  ;;  %v36237_v60 = vld [vmem:[#allocation38_spill] sm:$0xff] }
0x1b97   : > { %v24927_v24 = vsel %vm578_vm0, %v35120_v4, 0.0 }
0x1b98   : > { %24931 = vadd.xlane.f32.xlu1 %v24930_v36  ;;  %24928 = vadd.xlane.f32.xlu0 %v24927_v24 }
0x1ba0   : > { %v28996_v8 = vpop.f32.mrf.mxu1 }
0x1ba1   : > { %v24868_v3 = vadd.f32 %v28996_v8, %v34865_v0 }
0x1ba2   : > { %v24812_v23 = vpop.f32.mrf.mxu1 }
0x1ba3   : > { %v24888_v16 = vadd.f32 %v35078_v1, %v24868_v3  ;;  %v24867_v12 = vadd.f32 %v24812_v23, %v22002_v62  ;;  %v36239_v23 = vld [vmem:[#allocation64_spill] sm:$0xff] }
0x1ba5   : > { %v35132_v50 = vadd.f32 %v24888_v16, %v36232_v52  ;;  %v24887_v49 = vadd.f32 %v35078_v1, %v24867_v12 }
0x1ba7   : > { %v35136_v17 = vadd.f32 %v24887_v49, %v36233_v28  ;;  %v24936_v48 = vsel %vm578_vm0, %v35132_v50, 0.0 }
0x1ba8   : > { %24937 = vadd.xlane.f32.xlu1 %v24936_v48 }
0x1ba9   : > { %v24933_v32 = vsel %vm578_vm0, %v35136_v17, 0.0 }
0x1baa   : > { %24934 = vadd.xlane.f32.xlu0 %v24933_v32  ;;  %v36240_v32 = vld [vmem:[#allocation57_spill] sm:$0xff] }
0x1c07   : > { %v28999_v0 = vpop.f32.mrf.mxu1 }
0x1c08   : > { %v24870_v44 = vadd.f32 %v28999_v0, %v34877_v42 }
0x1c09   : > { %v24822_v55 = vpop.f32.mrf.mxu1 }
0x1c0a   : > { %v24890_v45 = vadd.f32 %v35078_v1, %v24870_v44  ;;  %v24869_v21 = vadd.f32 %v24822_v55, %v34883_v18 }
0x1c0c   : > { %v35146_v39 = vadd.f32 %v24890_v45, %v36234_v37  ;;  %v24889_v47 = vadd.f32 %v35078_v1, %v24869_v21 }
0x1c0e   : > { %v35150_v57 = vadd.f32 %v24889_v47, %v36235_v7  ;;  %v24942_v51 = vsel %vm578_vm0, %v35146_v39, 0.0  ;;  %v36241_v47 = vld [vmem:[#allocation65_spill] sm:$0xff] }
0x1c0f   : > { %24943 = vadd.xlane.f32.xlu1 %v24942_v51 }
0x1c10   : > { %v24939_v42 = vsel %vm578_vm0, %v35150_v57, 0.0 }
0x1c11   : > { %24940 = vadd.xlane.f32.xlu0 %v24939_v42 }
0x1c17   : > { %v24920_v41 = vpop.xlane.xlu0 %24919 }
0x1c18   : > { %v24964_v5 = vmul.f32 0.03125, %v24920_v41 }
0x1c19   : > { %v24917_v9 = vpop.xlane.xlu1 %24916 }
0x1c1a   : > { %v24963_v58 = vmul.f32 0.03125, %v24917_v9  ;;  %v35179_v62 = vsub.f32 %v35087_v54, %v24964_v5 }
0x1c1d   : > { %v24926_v43 = vpop.xlane.xlu1 %24925  ;;  %v24923_v36 = vpop.xlane.xlu0 %24922 }
0x1c1e   : > { %v24965_v48 = vmul.f32 0.03125, %v24923_v36 }
0x1c21   : > { %v24932_v28 = vpop.xlane.xlu1 %24931  ;;  %v24929_v45 = vpop.xlane.xlu0 %24928 }
0x1c22   : > { %v24968_v37 = vmul.f32 0.03125, %v24932_v28  ;;  %v24967_v9 = vmul.f32 0.03125, %v24929_v45  ;;  %v25167_v28 = vld [vmem:[#allocation8] sm:$0xff] }
0x1c24   : > { %v35215_v41 = vsub.f32 %v35112_v38, %v24968_v37 }
0x1c31   : > { %v24938_v42 = vpop.xlane.xlu1 %24937 }
0x1c3c   : > { %v29002_v15 = vpop.f32.mrf.mxu1 }
0x1c3d   : > { %v24872_v18 = vadd.f32 %v29002_v15, %v34887_v6 }
0x1c3e   : > { %v24832_v26 = vpop.f32.mrf.mxu1 }
0x1c3f   : > { %v24892_v20 = vadd.f32 %v35078_v1, %v24872_v18  ;;  %v24871_v61 = vadd.f32 %v24832_v26, %v34891_v30  ;;  %v24935_v26 = vpop.xlane.xlu0 %24934 }
0x1c40   : > { %v29005_v33 = vpop.f32.mrf.mxu1 }
0x1c41   : > { %v35160_v2 = vadd.f32 %v24892_v20, %v36236_v10  ;;  %v24891_v63 = vadd.f32 %v35078_v1, %v24871_v61  ;;  %v24874_v25 = vadd.f32 %v29005_v33, %v34897_v19  ;;  %v24970_v20 = vmul.f32 0.03125, %v24938_v42 }
0x1c42   : > { %v24842_v13 = vpop.f32.mrf.mxu1  ;;  %v35221_v10 = vsub.f32 %v35120_v4, %v24967_v9 }
0x1c43   : > { %v35165_v46 = vadd.f32 %v24891_v63, %v36237_v60  ;;  %v24894_v6 = vadd.f32 %v35078_v1, %v24874_v25  ;;  %v24873_v27 = vadd.f32 %v24842_v13, %v34903_v31  ;;  %v24948_v30 = vsel %vm578_vm0, %v35160_v2, 0.0 }
0x1c44   : > { %24949 = vadd.xlane.f32.xlu1 %v24948_v30  ;;  %v29008_v24 = vpop.f32.mrf.mxu1  ;;  %v24966_v31 = vmul.f32 0.03125, %v24926_v43  ;;  %v24969_v63 = vmul.f32 0.03125, %v24935_v26  ;;  %v35227_v43 = vsub.f32 %v35132_v50, %v24970_v20  ;;  %v25000_v60 = vmul.f32 %v35215_v41, %v35215_v41 }
0x1c45   : > { %v35172_v53 = vadd.f32 %v24894_v6, %v36238_v59  ;;  %v24893_v19 = vadd.f32 %v35078_v1, %v24873_v27  ;;  %v24876_v11 = vadd.f32 %v29008_v24, %v34907_v29  ;;  %v24945_v8 = vsel %vm578_vm0, %v35165_v46, 0.0 }
0x1c46   : > { %24946 = vadd.xlane.f32.xlu0 %v24945_v8  ;;  %v24852_v3 = vpop.f32.mrf.mxu1  ;;  %v35189_v29 = vsub.f32 %v35094_v14, %v24963_v58  ;;  %v35200_v21 = vsub.f32 %v35101_v56, %v24966_v31  ;;  %v35233_v6 = vsub.f32 %v35136_v17, %v24969_v63  ;;  %v24999_v30 = vmul.f32 %v35221_v10, %v35221_v10  ;;  %v25174_v8 = vld [vmem:[#allocation8 + $0x38] sm:$0xff]  ;;  %v25173_v31 = vld [vmem:[#allocation8 + $0x30] sm:$0xff] }
0x1c47   : > { %v35182_v16 = vadd.f32 %v24893_v19, %v36239_v23  ;;  %v24896_v12 = vadd.f32 %v35078_v1, %v24876_v11  ;;  %v24875_v52 = vadd.f32 %v24852_v3, %v34909_v34  ;;  %v24954_v49 = vsel %vm578_vm0, %v35172_v53, 0.0  ;;  %25259 = vmatprep.subr.mxu0 %v25174_v8  ;;  %v25172_v3 = vld [vmem:[#allocation8 + $0x28] sm:$0xff]  ;;  %v25171_v23 = vld [vmem:[#allocation8 + $0x20] sm:$0xff] }
0x1c48   : > { %24955 = vadd.xlane.f32.xlu1 %v24954_v49  ;;  %v24996_v34 = vmul.f32 %v35179_v62, %v35179_v62  ;;  %v24995_v18 = vmul.f32 %v35189_v29, %v35189_v29  ;;  %v24998_v33 = vmul.f32 %v35200_v21, %v35200_v21  ;;  %v25026_v58 = vsel %vm578_vm0, %v25000_v60, 0.0  ;;  %25260 = vmatpush1.msra.mxu0 %v25173_v31  ;;  %v25168_v49 = vld [vmem:[#allocation8 + $0x8] sm:$0xff] }
0x1c49   : > { %v35192_v0 = vadd.f32 %v24896_v12, %v36240_v32  ;;  %v24895_v44 = vadd.f32 %v35078_v1, %v24875_v52  ;;  %v24951_v55 = vsel %vm578_vm0, %v35182_v16, 0.0  ;;  %v35208_v1 = vsub.f32 %v35108_v35, %v24965_v48  ;;  %25261 = vmatprep.subr.mxu0 %v25172_v3  ;;  %v25170_v12 = vld [vmem:[#allocation8 + $0x18] sm:$0xff]  ;;  %v25169_v52 = vld [vmem:[#allocation8 + $0x10] sm:$0xff] }
0x1c4a   : > { %24952 = vadd.xlane.f32.xlu0 %v24951_v55  ;;  %v25014_v61 = vsel %vm578_vm0, %v24996_v34, 0.0  ;;  %v25011_v25 = vsel %vm578_vm0, %v24995_v18, 0.0  ;;  %v25020_v13 = vsel %vm578_vm0, %v24998_v33, 0.0  ;;  %v25002_v36 = vmul.f32 %v35227_v43, %v35227_v43  ;;  %25262 = vmatpush1.msra.mxu0 %v25171_v23 }
0x1c4b   : > { %v35203_v7 = vadd.f32 %v24895_v44, %v36241_v47  ;;  %v24960_v51 = vsel %vm578_vm0, %v35192_v0, 0.0  ;;  %v24997_v5 = vmul.f32 %v35208_v1, %v35208_v1  ;;  %v25023_v24 = vsel %vm578_vm0, %v24999_v30, 0.0  ;;  %25263 = vmatprep.subr.mxu0 %v25170_v12 }
0x1c4c   : > { %24961 = vadd.xlane.f32.xlu1 %v24960_v51  ;;  %v25001_v59 = vmul.f32 %v35233_v6, %v35233_v6  ;;  %v25032_v19 = vsel %vm578_vm0, %v25002_v36, 0.0  ;;  %25264 = vmatpush1.msra.mxu0 %v25169_v52 }
0x1c4d   : > { %v24957_v15 = vsel %vm578_vm0, %v35203_v7, 0.0  ;;  %v25017_v27 = vsel %vm578_vm0, %v24997_v5, 0.0  ;;  %25265 = vmatprep.subr.mxu0 %v25168_v49 }
0x1c4e   : > { %24958 = vadd.xlane.f32.xlu0 %v24957_v15  ;;  %v25029_v11 = vsel %vm578_vm0, %v25001_v59, 0.0  ;;  %25266 = vmatpush1.msra.mxu0 %v25167_v28 }
0x1c50   : > { %25015 = vadd.xlane.f32.xlu1 %v25014_v61 }
0x1c52   : > { %25012 = vadd.xlane.f32.xlu0 %v25011_v25 }
0x1c54   : > { %25021 = vadd.xlane.f32.xlu1 %v25020_v13 }
0x1c56   : > { %25018 = vadd.xlane.f32.xlu0 %v25017_v27 }
0x1c58   : > { %25027 = vadd.xlane.f32.xlu1 %v25026_v58 }
0x1c5a   : > { %25024 = vadd.xlane.f32.xlu0 %v25023_v24 }
0x1c5c   : > { %25033 = vadd.xlane.f32.xlu1 %v25032_v19 }
0x1c5e   : > { %25030 = vadd.xlane.f32.xlu0 %v25029_v11 }
0x1c98   : > { %v24944_v48 = vpop.xlane.xlu1 %24943 }
0x1c99   : > { %v24972_v32 = vmul.f32 0.03125, %v24944_v48 }
0x1c9a   : > { %v24941_v44 = vpop.xlane.xlu0 %24940 }
0x1c9b   : > { %v35247_v55 = vsub.f32 %v35146_v39, %v24972_v32  ;;  %v24971_v45 = vmul.f32 0.03125, %v24941_v44 }
0x1c9d   : > { %v35250_v34 = vsub.f32 %v35150_v57, %v24971_v45  ;;  %v25004_v37 = vmul.f32 %v35247_v55, %v35247_v55 }
0x1c9f   : > { %v25038_v47 = vsel %vm578_vm0, %v25004_v37, 0.0  ;;  %v25003_v51 = vmul.f32 %v35250_v34, %v35250_v34 }
0x1ca0   : > { %25039 = vadd.xlane.f32.xlu1 %v25038_v47 }
0x1ca1   : > { %v25035_v42 = vsel %vm578_vm0, %v25003_v51, 0.0 }
0x1ca2   : > { %25036 = vadd.xlane.f32.xlu0 %v25035_v42 }
0x1ccd   : > { %v24950_v9 = vpop.xlane.xlu1 %24949 }
0x1cce   : > { %v24974_v15 = vmul.f32 0.03125, %v24950_v9 }
0x1ccf   : > { %v24947_v18 = vpop.xlane.xlu0 %24946 }
0x1cd0   : > { %v35259_v26 = vsub.f32 %v35160_v2, %v24974_v15  ;;  %v24973_v20 = vmul.f32 0.03125, %v24947_v18 }
0x1cd1   : > { %v24956_v61 = vpop.xlane.xlu1 %24955 }
0x1cd2   : > { %v35262_v33 = vsub.f32 %v35165_v46, %v24973_v20  ;;  %v24976_v63 = vmul.f32 0.03125, %v24956_v61  ;;  %v25006_v25 = vmul.f32 %v35259_v26, %v35259_v26 }
0x1cd3   : > { %v24953_v5 = vpop.xlane.xlu0 %24952 }
0x1cd4   : > { %v35267_v13 = vsub.f32 %v35172_v53, %v24976_v63  ;;  %v24975_v60 = vmul.f32 0.03125, %v24953_v5  ;;  %v25044_v27 = vsel %vm578_vm0, %v25006_v25, 0.0  ;;  %v25005_v30 = vmul.f32 %v35262_v33, %v35262_v33 }
0x1cd5   : > { %v24962_v58 = vpop.xlane.xlu1 %24961  ;;  %25045 = vadd.xlane.f32.xlu1 %v25044_v27 }
0x1cd6   : > { %v35273_v36 = vsub.f32 %v35182_v16, %v24975_v60  ;;  %v24978_v24 = vmul.f32 0.03125, %v24962_v58  ;;  %v25041_v59 = vsel %vm578_vm0, %v25005_v30, 0.0  ;;  %v25008_v19 = vmul.f32 %v35267_v13, %v35267_v13 }
0x1cd7   : > { %25042 = vadd.xlane.f32.xlu0 %v25041_v59  ;;  %v24959_v11 = vpop.xlane.xlu0 %24958 }
0x1cd8   : > { %v35279_v8 = vsub.f32 %v35192_v0, %v24978_v24  ;;  %v24977_v31 = vmul.f32 0.03125, %v24959_v11  ;;  %v25050_v3 = vsel %vm578_vm0, %v25008_v19, 0.0  ;;  %v25007_v23 = vmul.f32 %v35273_v36, %v35273_v36 }
0x1cd9   : > { %25051 = vadd.xlane.f32.xlu1 %v25050_v3  ;;  %v25016_v12 = vpop.xlane.xlu1 %25015 }
0x1cda   : > { %v35285_v52 = vsub.f32 %v35203_v7, %v24977_v31  ;;  %v25060_v49 = vmul.f32 0.03125, %v25016_v12  ;;  %v25047_v28 = vsel %vm578_vm0, %v25007_v23, 0.0  ;;  %v25010_v48 = vmul.f32 %v35279_v8, %v35279_v8 }
0x1cdb   : > { %25048 = vadd.xlane.f32.xlu0 %v25047_v28  ;;  %v25013_v32 = vpop.xlane.xlu0 %25012  ;;  %v35299_v28 = vld [vmem:[%s35690_s9] ss:$0 sm:$0xff] }
0x1cdc   : > { %v25076_v44 = vadd.f32 1e-05, %v25060_v49  ;;  %v25059_v45 = vmul.f32 0.03125, %v25013_v32  ;;  %v25056_v37 = vsel %vm578_vm0, %v25010_v48, 0.0  ;;  %v25009_v47 = vmul.f32 %v35285_v52, %v35285_v52 }
0x1cdd   : > { %25057 = vadd.xlane.f32.xlu1 %v25056_v37  ;;  %v25022_v51 = vpop.xlane.xlu1 %25021 }
0x1cde   : > { %29737 = vrsqrt.f32 %v25076_v44  ;;  %v25075_v42 = vadd.f32 1e-05, %v25059_v45  ;;  %v25062_v9 = vmul.f32 0.03125, %v25022_v51  ;;  %v25053_v15 = vsel %vm578_vm0, %v25009_v47, 0.0  ;;  %v35305_v45 = vld [vmem:[%s35691_s10] ss:$0 sm:$0xff] }
0x1cdf   : > { %25054 = vadd.xlane.f32.xlu0 %v25053_v15  ;;  %v25019_v18 = vpop.xlane.xlu0 %25018 }
0x1ce0   : > { %29739 = vrsqrt.f32 %v25075_v42  ;;  %v25061_v20 = vmul.f32 0.03125, %v25019_v18  ;;  %v25078_v61 = vadd.f32 1e-05, %v25062_v9 }
0x1ce1   : > { %v25028_v25 = vpop.xlane.xlu1 %25027 }
0x1ce2   : > { %v25077_v63 = vadd.f32 1e-05, %v25061_v20  ;;  %v25064_v27 = vmul.f32 0.03125, %v25028_v25 }
0x1ce3   : > { %v25025_v5 = vpop.xlane.xlu0 %25024 }
0x1ce4   : > { %29741 = vrsqrt.f32 %v25077_v63  ;;  %v25063_v60 = vmul.f32 0.03125, %v25025_v5  ;;  %v25080_v24 = vadd.f32 1e-05, %v25064_v27 }
0x1ce5   : > { %29743 = vrsqrt.f32 %v25078_v61  ;;  %v25034_v59 = vpop.xlane.xlu1 %25033 }
0x1ce6   : > { %v25079_v30 = vadd.f32 1e-05, %v25063_v60  ;;  %v25066_v3 = vmul.f32 0.03125, %v25034_v59 }
0x1ce7   : > { %v25031_v58 = vpop.xlane.xlu0 %25030 }
0x1ce8   : > { %29745 = vrsqrt.f32 %v25079_v30  ;;  %v25065_v19 = vmul.f32 0.03125, %v25031_v58  ;;  %v25082_v44 = vadd.f32 1e-05, %v25066_v3 }
0x1ce9   : > { %29747 = vrsqrt.f32 %v25080_v24 }
0x1cea   : > { %v25081_v49 = vadd.f32 1e-05, %v25065_v19 }
0x1ceb   : > { %v29738_v11 = vpop.eup %29737 }
0x1cec   : > { %v25108_v23 = vmul.f32 %v29738_v11, %v35179_v62  ;;  %29749 = vrsqrt.f32 %v25081_v49 }
0x1ced   : > { %v29740_v31 = vpop.eup %29739  ;;  %29751 = vrsqrt.f32 %v25082_v44 }
0x1cee   : > { %v25107_v12 = vmul.f32 %v29740_v31, %v35189_v29  ;;  %v25130_v37 = vmul.f32 %v35299_v28, %v25108_v23 }
0x1cf0   : > { %v25129_v48 = vmul.f32 %v35299_v28, %v25107_v12  ;;  %v25152_v42 = vadd.f32 %v35305_v45, %v25130_v37  ;;  %v25570_v37 = vld [vmem:[%s35694_s13 + $0x70] sm:$0xff] }
0x1cf1   : > { %v29742_v32 = vpop.eup %29741 }
0x1cf2   : > { %v25109_v62 = vmul.f32 %v29742_v32, %v35208_v1  ;;  %v25151_v29 = vadd.f32 %v35305_v45, %v25129_v48  ;;  %v29744_v47 = vpop.eup %29743 }
0x1cf3   : > { %v25110_v51 = vmul.f32 %v29744_v47, %v35200_v21 }
0x1cf4   : > { %26505 = vmatmul.mubr.msk.f32.vlgmr.msra.gmra.mxu0 %vm578_vm0, %v25151_v29  ;;  %v25131_v9 = vmul.f32 %v35299_v28, %v25109_v62  ;;  %v25571_v62 = vld [vmem:[%s35694_s13 + $0x78] sm:$0xff] }
0x1cf5   : > { %25305 = vmatprep.mubr.f32.mxu0 %v35908_v40  ;;  %v29746_v15 = vpop.eup %29745  ;;  %v25132_v20 = vmul.f32 %v35299_v28, %v25110_v51  ;;  %29009 = vmatprep.subr.mxu1 %v25571_v62 }
0x1cf6   : > { %v25111_v1 = vmul.f32 %v29746_v15, %v35221_v10  ;;  %v25153_v18 = vadd.f32 %v35305_v45, %v25131_v9  ;;  %v29748_v61 = vpop.eup %29747  ;;  %29010 = vmatpush3.msra.mxu1 %v25571_v62  ;;  %v25567_v9 = vld [vmem:[%s35694_s13 + $0x58] sm:$0xff]  ;;  %v25566_v15 = vld [vmem:[%s35694_s13 + $0x50] sm:$0xff] }
0x1cf7   : > { %v25112_v21 = vmul.f32 %v29748_v61, %v35215_v41  ;;  %v25154_v63 = vadd.f32 %v35305_v45, %v25132_v20  ;;  %29011 = vmatprep.subr.mxu1 %v25570_v37  ;;  %v25563_v20 = vld [vmem:[%s35694_s13 + $0x38] sm:$0xff]  ;;  %v25562_v61 = vld [vmem:[%s35694_s13 + $0x30] sm:$0xff] }
0x1cf8   : > { %26506 = vmatmul.mubr.msk.f32.gmra.mxu0 %vm578_vm0, %v25152_v42  ;;  %v25133_v25 = vmul.f32 %v35299_v28, %v25111_v1  ;;  %29012 = vmatpush3.msra.mxu1 %v25570_v37  ;;  %v25565_v1 = vld [vmem:[%s35694_s13 + $0x48] sm:$0xff] }
0x1cf9   : > { %25311 = vmatprep.mubr.f32.mxu0 %v35908_v40  ;;  %v29750_v5 = vpop.eup %29749  ;;  %v25134_v27 = vmul.f32 %v35299_v28, %v25112_v21  ;;  %v25561_v21 = vld [vmem:[%s35694_s13 + $0x28] sm:$0xff] }
0x1cfa   : > { %v25113_v10 = vmul.f32 %v29750_v5, %v35233_v6  ;;  %v25155_v60 = vadd.f32 %v35305_v45, %v25133_v25  ;;  %v29752_v30 = vpop.eup %29751  ;;  %v25559_v25 = vld [vmem:[%s35694_s13 + $0x18] sm:$0xff]  ;;  %v25558_v5 = vld [vmem:[%s35694_s13 + $0x10] sm:$0xff] }
0x1cfb   : > { %v25114_v41 = vmul.f32 %v29752_v30, %v35227_v43  ;;  %v25156_v58 = vadd.f32 %v35305_v45, %v25134_v27 }
0x1cfc   : > { %26507 = vmatmul.mubr.msk.f32.gmra.mxu0 %vm578_vm0, %v25153_v18  ;;  %v25135_v24 = vmul.f32 %v35299_v28, %v25113_v10  ;;  %v25564_v18 = vld [vmem:[%s35694_s13 + $0x40] sm:$0xff]  ;;  %v25557_v10 = vld [vmem:[%s35694_s13 + $0x8] sm:$0xff] }
0x1cfd   : > { %25317 = vmatprep.mubr.f32.mxu0 %v35908_v40  ;;  %v25136_v59 = vmul.f32 %v35299_v28, %v25114_v41 }
0x1cfe   : > { %v25157_v6 = vadd.f32 %v35305_v45, %v25135_v24 }
0x1cff   : > { %v25158_v19 = vadd.f32 %v35305_v45, %v25136_v59 }
0x1d00   : > { %26508 = vmatmul.mubr.msk.f32.gmra.mxu0 %vm578_vm0, %v25154_v63  ;;  %v25560_v63 = vld [vmem:[%s35694_s13 + $0x20] sm:$0xff] }
0x1d01   : > { %25323 = vmatprep.mubr.f32.mxu0 %v35908_v40 }
0x1d04   : > { %26509 = vmatmul.mubr.msk.f32.gmra.mxu0 %vm578_vm0, %v25155_v60  ;;  %v25556_v60 = vld [vmem:[%s35694_s13] sm:$0xff] }
0x1d05   : > { %25329 = vmatprep.mubr.f32.mxu0 %v35908_v40 }
0x1d08   : > { %26510 = vmatmul.mubr.msk.f32.gmra.mxu0 %vm578_vm0, %v25156_v58 }
0x1d09   : > { %25335 = vmatprep.mubr.f32.mxu0 %v35908_v40 }
0x1d0c   : > { %26511 = vmatmul.mubr.msk.f32.gmra.mxu0 %vm578_vm0, %v25157_v6 }
0x1d0d   : > { %25341 = vmatprep.mubr.f32.mxu0 %v35908_v40 }
0x1d10   : > { %26512 = vmatmul.mubr.msk.f32.gmra.mxu0 %vm578_vm0, %v25158_v19 }
0x1d11   : > { %25347 = vmatprep.mubr.f32.mxu0 %v35908_v40 }
0x1d29   : > { %v25040_v43 = vpop.xlane.xlu1 %25039 }
0x1d2a   : > { %v25068_v11 = vmul.f32 0.03125, %v25040_v43 }
0x1d2b   : > { %v25037_v31 = vpop.xlane.xlu0 %25036 }
0x1d2c   : > { %v25084_v3 = vadd.f32 1e-05, %v25068_v11  ;;  %v25067_v23 = vmul.f32 0.03125, %v25037_v31 }
0x1d2e   : > { %29753 = vrsqrt.f32 %v25084_v3  ;;  %v25083_v12 = vadd.f32 1e-05, %v25067_v23 }
0x1d30   : > { %29755 = vrsqrt.f32 %v25083_v12 }
0x1d3b   : > { %v29754_v49 = vpop.eup %29753 }
0x1d3c   : > { %v25116_v32 = vmul.f32 %v29754_v49, %v35247_v55  ;;  %v25569_v55 = vld [vmem:[%s35694_s13 + $0x68] sm:$0xff] }
0x1d3d   : > { %v29756_v48 = vpop.eup %29755  ;;  %29013 = vmatprep.subr.mxu1 %v25569_v55 }
0x1d3e   : > { %v25115_v44 = vmul.f32 %v29756_v48, %v35250_v34  ;;  %v25138_v51 = vmul.f32 %v35299_v28, %v25116_v32  ;;  %29014 = vmatpush3.msra.mxu1 %v25569_v55  ;;  %v25568_v34 = vld [vmem:[%s35694_s13 + $0x60] sm:$0xff] }
0x1d3f   : > { %29015 = vmatprep.subr.mxu1 %v25568_v34 }
0x1d40   : > { %v25137_v29 = vmul.f32 %v35299_v28, %v25115_v44  ;;  %v25160_v42 = vadd.f32 %v35305_v45, %v25138_v51  ;;  %29016 = vmatpush3.msra.mxu1 %v25568_v34 }
0x1d41   : > { %29017 = vmatprep.subr.mxu1 %v25567_v9 }
0x1d42   : > { %v25159_v47 = vadd.f32 %v35305_v45, %v25137_v29  ;;  %29018 = vmatpush3.msra.mxu1 %v25567_v9 }
0x1d43   : > { %29019 = vmatprep.subr.mxu1 %v25566_v15 }
0x1d44   : > { %26513 = vmatmul.mubr.msk.f32.gmra.mxu0 %vm578_vm0, %v25159_v47  ;;  %29020 = vmatpush3.msra.mxu1 %v25566_v15 }
0x1d45   : > { %25353 = vmatprep.mubr.f32.mxu0 %v35908_v40  ;;  %29021 = vmatprep.subr.mxu1 %v25565_v1 }
0x1d46   : > { %29022 = vmatpush3.msra.mxu1 %v25565_v1 }
0x1d47   : > { %29023 = vmatprep.subr.mxu1 %v25564_v18 }
0x1d48   : > { %26514 = vmatmul.mubr.msk.f32.gmra.mxu0 %vm578_vm0, %v25160_v42  ;;  %29024 = vmatpush3.msra.mxu1 %v25564_v18 }
0x1d49   : > { %25359 = vmatprep.mubr.f32.mxu0 %v35908_v40  ;;  %29025 = vmatprep.subr.mxu1 %v25563_v20 }
0x1d4a   : > { %29026 = vmatpush3.msra.mxu1 %v25563_v20 }
0x1d4b   : > { %29027 = vmatprep.subr.mxu1 %v25562_v61 }
0x1d4c   : > { %29028 = vmatpush3.msra.mxu1 %v25562_v61 }
0x1d4d   : > { %29029 = vmatprep.subr.mxu1 %v25561_v21 }
0x1d4e   : > { %29030 = vmatpush3.msra.mxu1 %v25561_v21 }
0x1d4f   : > { %29031 = vmatprep.subr.mxu1 %v25560_v63 }
0x1d50   : > { %29032 = vmatpush3.msra.mxu1 %v25560_v63 }
0x1d51   : > { %29033 = vmatprep.subr.mxu1 %v25559_v25 }
0x1d52   : > { %29034 = vmatpush3.msra.mxu1 %v25559_v25 }
0x1d53   : > { %29035 = vmatprep.subr.mxu1 %v25558_v5 }
0x1d54   : > { %29036 = vmatpush3.msra.mxu1 %v25558_v5 }
0x1d55   : > { %29037 = vmatprep.subr.mxu1 %v25557_v10 }
0x1d56   : > { %29038 = vmatpush3.msra.mxu1 %v25557_v10 }
0x1d57   : > { %29039 = vmatprep.subr.mxu1 %v25556_v60 }
0x1d58   : > { %29040 = vmatpush3.msra.mxu1 %v25556_v60 }
0x1d5e   : > { %v25046_v27 = vpop.xlane.xlu1 %25045 }
0x1d5f   : > { %v25070_v30 = vmul.f32 0.03125, %v25046_v27 }
0x1d60   : > { %v25043_v41 = vpop.xlane.xlu0 %25042 }
0x1d61   : > { %v25086_v58 = vadd.f32 1e-05, %v25070_v30  ;;  %v25069_v24 = vmul.f32 0.03125, %v25043_v41 }
0x1d62   : > { %v25052_v6 = vpop.xlane.xlu1 %25051 }
0x1d63   : > { %29757 = vrsqrt.f32 %v25086_v58  ;;  %v25085_v59 = vadd.f32 1e-05, %v25069_v24  ;;  %v25072_v19 = vmul.f32 0.03125, %v25052_v6 }
0x1d64   : > { %v25049_v43 = vpop.xlane.xlu0 %25048 }
0x1d65   : > { %29759 = vrsqrt.f32 %v25085_v59  ;;  %v25071_v11 = vmul.f32 0.03125, %v25049_v43  ;;  %v25088_v31 = vadd.f32 1e-05, %v25072_v19 }
0x1d66   : > { %v25058_v23 = vpop.xlane.xlu1 %25057 }
0x1d67   : > { %v25087_v3 = vadd.f32 1e-05, %v25071_v11  ;;  %v25074_v48 = vmul.f32 0.03125, %v25058_v23 }
0x1d68   : > { %v25055_v12 = vpop.xlane.xlu0 %25054 }
0x1d69   : > { %29761 = vrsqrt.f32 %v25087_v3  ;;  %v25073_v49 = vmul.f32 0.03125, %v25055_v12  ;;  %v25090_v44 = vadd.f32 1e-05, %v25074_v48 }
0x1d6a   : > { %29763 = vrsqrt.f32 %v25088_v31 }
0x1d6b   : > { %v25089_v32 = vadd.f32 1e-05, %v25073_v49 }
0x1d6d   : > { %29765 = vrsqrt.f32 %v25089_v32 }
0x1d6e   : > { %29767 = vrsqrt.f32 %v25090_v44 }
0x1d70   : > { %v29758_v62 = vpop.eup %29757 }
0x1d71   : > { %v25118_v37 = vmul.f32 %v29758_v62, %v35259_v26 }
0x1d72   : > { %v29760_v29 = vpop.eup %29759 }
0x1d73   : > { %v25117_v47 = vmul.f32 %v29760_v29, %v35262_v33  ;;  %v25140_v9 = vmul.f32 %v35299_v28, %v25118_v37 }
0x1d75   : > { %v25139_v51 = vmul.f32 %v35299_v28, %v25117_v47  ;;  %v25162_v26 = vadd.f32 %v35305_v45, %v25140_v9 }
0x1d76   : > { %v29762_v55 = vpop.eup %29761 }
0x1d77   : > { %v25119_v34 = vmul.f32 %v29762_v55, %v35273_v36  ;;  %v25161_v42 = vadd.f32 %v35305_v45, %v25139_v51  ;;  %v29764_v15 = vpop.eup %29763 }
0x1d78   : > { %v25120_v1 = vmul.f32 %v29764_v15, %v35267_v13 }
0x1d79   : > { %26515 = vmatmul.mubr.msk.f32.gmra.mxu0 %vm578_vm0, %v25161_v42  ;;  %v25141_v33 = vmul.f32 %v35299_v28, %v25119_v34 }
0x1d7a   : > { %25365 = vmatprep.mubr.f32.mxu0 %v35908_v40  ;;  %v29766_v18 = vpop.eup %29765  ;;  %v25142_v61 = vmul.f32 %v35299_v28, %v25120_v1 }
0x1d7b   : > { %v25121_v36 = vmul.f32 %v29766_v18, %v35285_v52  ;;  %v25163_v20 = vadd.f32 %v35305_v45, %v25141_v33  ;;  %v29768_v21 = vpop.eup %29767 }
0x1d7c   : > { %v25122_v13 = vmul.f32 %v29768_v21, %v35279_v8  ;;  %v25164_v63 = vadd.f32 %v35305_v45, %v25142_v61  ;;  %v25175_v8 = vld [vmem:[%s35693_s12] sm:$0x3] }
0x1d7d   : > { %26516 = vmatmul.mubr.msk.f32.gmra.mxu0 %vm578_vm0, %v25162_v26  ;;  %v25143_v25 = vmul.f32 %v35299_v28, %v25121_v36  ;;  %v35435_v60 = vrot.slane %v25175_v8, %v36219_v22 }
0x1d7e   : > { %25371 = vmatprep.mubr.f32.mxu0 %v35908_v40  ;;  %v25144_v5 = vmul.f32 %v35299_v28, %v25122_v13 }
0x1d7f   : > { %v25165_v52 = vadd.f32 %v35305_v45, %v25143_v25 }
0x1d80   : > { %v25166_v10 = vadd.f32 %v35305_v45, %v25144_v5 }
0x1d81   : > { %26517 = vmatmul.mubr.msk.f32.gmra.mxu0 %vm578_vm0, %v25163_v20 }
0x1d82   : > { %25377 = vmatprep.mubr.f32.mxu0 %v35908_v40 }
0x1d85   : > { %26518 = vmatmul.mubr.msk.f32.gmra.mxu0 %vm578_vm0, %v25164_v63 }
0x1d86   : > { %25383 = vmatprep.mubr.f32.mxu0 %v35908_v40 }
0x1d89   : > { %26519 = vmatmul.mubr.msk.f32.gmra.mxu0 %vm578_vm0, %v25165_v52 }
0x1d8a   : > { %25389 = vmatprep.mubr.f32.mxu0 %v35908_v40 }
0x1d8d   : > { %26520 = vmatmul.mubr.msk.f32.gmra.mxu0 %vm578_vm0, %v25166_v10 }
0x1db4   : > { %v35437_v27 = vpop.f32.mrf.mxu0 }
0x1db6   : > { %v25303_v30 = vpop.f32.mrf.mxu0 }
0x1db7   : > { %v35440_v28 = vadd.f32 %v25303_v30, %v35435_v60 }
0x1db8   : > { %v35442_v41 = vpop.f32.mrf.mxu0 }
0x1db9   : > { %v25396_v40 = vmul.f32 %v35440_v28, %v35440_v28 }
0x1dba   : > { %v25309_v45 = vpop.f32.mrf.mxu0 }
0x1dbb   : > { %v25412_v58 = vmul.f32 %v25396_v40, %v35440_v28  ;;  %v35448_v24 = vadd.f32 %v25309_v45, %v35435_v60 }
0x1dbc   : > { %v35450_v6 = vpop.f32.mrf.mxu0 }
0x1dbd   : > { %v25428_v22 = vmul.f32 0.044715, %v25412_v58  ;;  %v25397_v59 = vmul.f32 %v35448_v24, %v35448_v24 }
0x1dbe   : > { %v25315_v19 = vpop.f32.mrf.mxu0 }
0x1dbf   : > { %v25444_v43 = vadd.f32 %v25428_v22, %v35440_v28  ;;  %v25413_v11 = vmul.f32 %v25397_v59, %v35448_v24  ;;  %v35457_v31 = vadd.f32 %v25315_v19, %v35435_v60  ;;  %v36242_v19 = vld [vmem:[#allocation20_spill] sm:$0xff] }
0x1dc0   : > { %v35459_v3 = vpop.f32.mrf.mxu0 }
0x1dc1   : > { %v25460_v23 = vmul.f32 0.7978846, %v25444_v43  ;;  %v25429_v12 = vmul.f32 0.044715, %v25413_v11  ;;  %v25398_v49 = vmul.f32 %v35457_v31, %v35457_v31  ;;  %v35500_v43 = vrot.slane %v25175_v8, %v36242_v19 }
0x1dc2   : > { %v25321_v48 = vpop.f32.mrf.mxu0 }
0x1dc3   : > { %29769 = vtanh.f32 %v25460_v23  ;;  %v25445_v32 = vadd.f32 %v25429_v12, %v35448_v24  ;;  %v25414_v44 = vmul.f32 %v25398_v49, %v35457_v31  ;;  %v35466_v62 = vadd.f32 %v25321_v48, %v35435_v60 }
0x1dc4   : > { %v35468_v29 = vpop.f32.mrf.mxu0  ;;  %v25302_v8 = vadd.f32 %v35437_v27, %v35500_v43  ;;  %v25320_v19 = vadd.f32 %v35459_v3, %v35500_v43 }
0x1dc5   : > { %v25461_v37 = vmul.f32 0.7978846, %v25445_v32  ;;  %v25430_v47 = vmul.f32 0.044715, %v25414_v44  ;;  %v25399_v51 = vmul.f32 %v35466_v62, %v35466_v62 }
0x1dc6   : > { %v25327_v55 = vpop.f32.mrf.mxu0 }
0x1dc7   : > { %29771 = vtanh.f32 %v25461_v37  ;;  %v25446_v34 = vadd.f32 %v25430_v47, %v35457_v31  ;;  %v25415_v42 = vmul.f32 %v25399_v51, %v35466_v62  ;;  %v35475_v9 = vadd.f32 %v25327_v55, %v35435_v60 }
0x1dc8   : > { %v35477_v15 = vpop.f32.mrf.mxu0 }
0x1dc9   : > { %v25462_v1 = vmul.f32 0.7978846, %v25446_v34  ;;  %v25431_v26 = vmul.f32 0.044715, %v25415_v42  ;;  %v25400_v33 = vmul.f32 %v35475_v9, %v35475_v9  ;;  %v25332_v3 = vadd.f32 %v35477_v15, %v35500_v43 }
0x1dca   : > { %v25333_v18 = vpop.f32.mrf.mxu0 }
0x1dcb   : > { %29773 = vtanh.f32 %v25462_v1  ;;  %v25447_v36 = vadd.f32 %v25431_v26, %v35466_v62  ;;  %v25416_v20 = vmul.f32 %v25400_v33, %v35475_v9  ;;  %v35484_v61 = vadd.f32 %v25333_v18, %v35435_v60 }
0x1dcc   : > { %v35486_v21 = vpop.f32.mrf.mxu0  ;;  %v25308_v18 = vadd.f32 %v35442_v41, %v35500_v43 }
0x1dcd   : > { %v25463_v13 = vmul.f32 0.7978846, %v25447_v36  ;;  %v25432_v63 = vmul.f32 0.044715, %v25416_v20  ;;  %v25401_v25 = vmul.f32 %v35484_v61, %v35484_v61 }
0x1dce   : > { %v25339_v52 = vpop.f32.mrf.mxu0 }
0x1dcf   : > { %29775 = vtanh.f32 %v25463_v13  ;;  %v25448_v5 = vadd.f32 %v25432_v63, %v35475_v9  ;;  %v25417_v10 = vmul.f32 %v25401_v25, %v35484_v61  ;;  %v35493_v30 = vadd.f32 %v25339_v52, %v35435_v60 }
0x1dd0   : > { %v29770_v40 = vpop.eup %29769  ;;  %v35495_v45 = vpop.f32.mrf.mxu0 }
0x1dd1   : > { %v25464_v58 = vmul.f32 0.7978846, %v25448_v5  ;;  %v25433_v22 = vmul.f32 0.044715, %v25417_v10  ;;  %v25402_v59 = vmul.f32 %v35493_v30, %v35493_v30  ;;  %v25492_v23 = vadd.f32 1.0, %v29770_v40 }
0x1dd2   : > { %v25345_v11 = vpop.f32.mrf.mxu0  ;;  %v25314_v10 = vadd.f32 %v35450_v6, %v35500_v43  ;;  %v25326_v6 = vadd.f32 %v35468_v29, %v35500_v43  ;;  %v25338_v29 = vadd.f32 %v35486_v21, %v35500_v43 }
0x1dd3   : > { %29777 = vtanh.f32 %v25464_v58  ;;  %v25449_v12 = vadd.f32 %v25433_v22, %v35484_v61  ;;  %v25418_v49 = vmul.f32 %v25402_v59, %v35493_v30  ;;  %v35505_v48 = vadd.f32 %v25345_v11, %v35435_v60 }
0x1dd4   : > { %v29772_v32 = vpop.eup %29771  ;;  %v25508_v44 = vmul.f32 0.5, %v25492_v23 }
0x1dd5   : > { %v25493_v37 = vadd.f32 1.0, %v29772_v32  ;;  %v25465_v47 = vmul.f32 0.7978846, %v25449_v12  ;;  %v25434_v51 = vmul.f32 0.044715, %v25418_v49  ;;  %v25403_v55 = vmul.f32 %v35505_v48, %v35505_v48 }
0x1dd6   : > { %v25524_v34 = vmul.f32 %v25508_v44, %v35440_v28 }
0x1dd7   : > { %v25509_v42 = vmul.f32 0.5, %v25493_v37  ;;  %29779 = vtanh.f32 %v25465_v47  ;;  %v25450_v1 = vadd.f32 %v25434_v51, %v35493_v30  ;;  %v25419_v26 = vmul.f32 %v25403_v55, %v35505_v48 }
0x1dd8   : > { %v29774_v33 = vpop.eup %29773  ;;  %v25540_v36 = vmul.f32 %v25524_v34, %v25302_v8 }
0x1dd9   : > { %v25525_v20 = vmul.f32 %v25509_v42, %v35448_v24  ;;  %v25466_v13 = vmul.f32 0.7978846, %v25450_v1  ;;  %v25435_v63 = vmul.f32 0.044715, %v25419_v26  ;;  %v25494_v25 = vadd.f32 1.0, %v29774_v33 }
0x1dda   : > { %29041 = vmatprep.mubr.f32.mxu1 %v25540_v36 }
0x1ddb   : > { %v25541_v27 = vmul.f32 %v25525_v20, %v25308_v18  ;;  %29781 = vtanh.f32 %v25466_v13  ;;  %v25451_v28 = vadd.f32 %v25435_v63, %v35505_v48  ;;  %v25510_v52 = vmul.f32 0.5, %v25494_v25 }
0x1ddc   : > { %v29776_v5 = vpop.eup %29775  ;;  %v25344_v18 = vadd.f32 %v35495_v45, %v35500_v43 }
0x1ddd   : > { %v25495_v40 = vadd.f32 1.0, %v29776_v5  ;;  %v25467_v58 = vmul.f32 0.7978846, %v25451_v28  ;;  %29042 = vmatmul.mubr.f32.vlgmr.msra.gmra.mxu1 %v25541_v27  ;;  %v25526_v41 = vmul.f32 %v25510_v52, %v35457_v31 }
0x1ddf   : > { %v25511_v22 = vmul.f32 0.5, %v25495_v40  ;;  %29783 = vtanh.f32 %v25467_v58  ;;  %v25542_v24 = vmul.f32 %v25526_v41, %v25314_v10 }
0x1de0   : > { %v29778_v59 = vpop.eup %29777 }
0x1de1   : > { %v25527_v11 = vmul.f32 %v25511_v22, %v35466_v62  ;;  %29044 = vmatprep.mubr.f32.mxu1 %v25542_v24  ;;  %v25496_v23 = vadd.f32 1.0, %v29778_v59 }
0x1de3   : > { %v25543_v12 = vmul.f32 %v25527_v11, %v25320_v19  ;;  %v25512_v49 = vmul.f32 0.5, %v25496_v23 }
0x1de4   : > { %v29780_v32 = vpop.eup %29779 }
0x1de5   : > { %v25497_v44 = vadd.f32 1.0, %v29780_v32  ;;  %29045 = vmatmul.mubr.f32.gmra.mxu1 %v25543_v12  ;;  %v25528_v31 = vmul.f32 %v25512_v49, %v35475_v9 }
0x1de7   : > { %v25513_v37 = vmul.f32 0.5, %v25497_v44  ;;  %v25544_v47 = vmul.f32 %v25528_v31, %v25326_v6 }
0x1de8   : > { %v29782_v51 = vpop.eup %29781 }
0x1de9   : > { %v25529_v62 = vmul.f32 %v25513_v37, %v35484_v61  ;;  %29047 = vmatprep.mubr.f32.mxu1 %v25544_v47  ;;  %v25498_v55 = vadd.f32 1.0, %v29782_v51 }
0x1deb   : > { %v25545_v8 = vmul.f32 %v25529_v62, %v25332_v3  ;;  %v25514_v34 = vmul.f32 0.5, %v25498_v55 }
0x1dec   : > { %v29784_v42 = vpop.eup %29783 }
0x1ded   : > { %v25499_v1 = vadd.f32 1.0, %v29784_v42  ;;  %29048 = vmatmul.mubr.f32.gmra.mxu1 %v25545_v8  ;;  %v25530_v9 = vmul.f32 %v25514_v34, %v35493_v30 }
0x1def   : > { %v25515_v26 = vmul.f32 0.5, %v25499_v1  ;;  %v25546_v33 = vmul.f32 %v25530_v9, %v25338_v29 }
0x1df1   : > { %v25531_v15 = vmul.f32 %v25515_v26, %v35505_v48  ;;  %29050 = vmatprep.mubr.f32.mxu1 %v25546_v33 }
0x1df3   : > { %v25547_v61 = vmul.f32 %v25531_v15, %v25344_v18 }
0x1df5   : > { %29051 = vmatmul.mubr.f32.gmra.mxu1 %v25547_v61 }
0x1e04   : > { %v25349_v36 = vpop.f32.mrf.mxu0 }
0x1e05   : > { %v25350_v19 = vadd.f32 %v25349_v36, %v35500_v43 }
0x1e06   : > { %v25351_v20 = vpop.f32.mrf.mxu0 }
0x1e07   : > { %v25352_v13 = vadd.f32 %v25351_v20, %v35435_v60 }
0x1e08   : > { %v25355_v63 = vpop.f32.mrf.mxu0 }
0x1e09   : > { %v25404_v21 = vmul.f32 %v25352_v13, %v25352_v13  ;;  %v25356_v32 = vadd.f32 %v25355_v63, %v35500_v43 }
0x1e0a   : > { %v25357_v25 = vpop.f32.mrf.mxu0 }
0x1e0b   : > { %v25420_v27 = vmul.f32 %v25404_v21, %v25352_v13  ;;  %v25358_v30 = vadd.f32 %v25357_v25, %v35435_v60 }
0x1e0d   : > { %v25436_v28 = vmul.f32 0.044715, %v25420_v27  ;;  %v25405_v52 = vmul.f32 %v25358_v30, %v25358_v30 }
0x1e0f   : > { %v25452_v5 = vadd.f32 %v25436_v28, %v25352_v13  ;;  %v25421_v10 = vmul.f32 %v25405_v52, %v25358_v30 }
0x1e11   : > { %v25468_v45 = vmul.f32 0.7978846, %v25452_v5  ;;  %v25437_v40 = vmul.f32 0.044715, %v25421_v10 }
0x1e13   : > { %29785 = vtanh.f32 %v25468_v45  ;;  %v25453_v48 = vadd.f32 %v25437_v40, %v25358_v30 }
0x1e15   : > { %v25469_v58 = vmul.f32 0.7978846, %v25453_v48 }
0x1e17   : > { %29787 = vtanh.f32 %v25469_v58 }
0x1e20   : > { %v29786_v41 = vpop.eup %29785 }
0x1e21   : > { %v25500_v22 = vadd.f32 1.0, %v29786_v41 }
0x1e23   : > { %v25516_v24 = vmul.f32 0.5, %v25500_v22 }
0x1e24   : > { %v29788_v59 = vpop.eup %29787 }
0x1e25   : > { %v25501_v11 = vadd.f32 1.0, %v29788_v59  ;;  %v25532_v23 = vmul.f32 %v25516_v24, %v25352_v13 }
0x1e27   : > { %v25517_v12 = vmul.f32 0.5, %v25501_v11  ;;  %v25548_v49 = vmul.f32 %v25532_v23, %v25350_v19 }
0x1e29   : > { %v25533_v6 = vmul.f32 %v25517_v12, %v25358_v30  ;;  %29053 = vmatprep.mubr.f32.mxu1 %v25548_v49 }
0x1e2b   : > { %v25549_v44 = vmul.f32 %v25533_v6, %v25356_v32 }
0x1e2d   : > { %29054 = vmatmul.mubr.f32.gmra.mxu1 %v25549_v44 }
0x1e39   : > { %v25361_v31 = vpop.f32.mrf.mxu0 }
0x1e3b   : > { %v25363_v37 = vpop.f32.mrf.mxu0 }
0x1e3c   : > { %v25364_v47 = vadd.f32 %v25363_v37, %v35435_v60 }
0x1e3d   : > { %v25367_v51 = vpop.f32.mrf.mxu0 }
0x1e3e   : > { %v25406_v3 = vmul.f32 %v25364_v47, %v25364_v47 }
0x1e3f   : > { %v25369_v62 = vpop.f32.mrf.mxu0 }
0x1e40   : > { %v25422_v55 = vmul.f32 %v25406_v3, %v25364_v47  ;;  %v25370_v8 = vadd.f32 %v25369_v62, %v35435_v60 }
0x1e41   : > { %v35542_v34 = vpop.f32.mrf.mxu0 }
0x1e42   : > { %v25438_v42 = vmul.f32 0.044715, %v25422_v55  ;;  %v25407_v29 = vmul.f32 %v25370_v8, %v25370_v8 }
0x1e43   : > { %v25375_v1 = vpop.f32.mrf.mxu0 }
0x1e44   : > { %v25454_v9 = vadd.f32 %v25438_v42, %v25364_v47  ;;  %v25423_v26 = vmul.f32 %v25407_v29, %v25370_v8  ;;  %v25376_v33 = vadd.f32 %v25375_v1, %v35435_v60  ;;  %v25362_v29 = vadd.f32 %v25361_v31, %v35500_v43 }
0x1e45   : > { %v35545_v18 = vpop.f32.mrf.mxu0 }
0x1e46   : > { %v25470_v15 = vmul.f32 0.7978846, %v25454_v9  ;;  %v25439_v61 = vmul.f32 0.044715, %v25423_v26  ;;  %v25408_v36 = vmul.f32 %v25376_v33, %v25376_v33 }
0x1e47   : > { %v25381_v20 = vpop.f32.mrf.mxu0 }
0x1e48   : > { %29789 = vtanh.f32 %v25470_v15  ;;  %v25455_v13 = vadd.f32 %v25439_v61, %v25370_v8  ;;  %v25424_v63 = vmul.f32 %v25408_v36, %v25376_v33  ;;  %v25382_v21 = vadd.f32 %v25381_v20, %v35435_v60 }
0x1e49   : > { %v25385_v25 = vpop.f32.mrf.mxu0  ;;  %v25368_v36 = vadd.f32 %v25367_v51, %v35500_v43 }
0x1e4a   : > { %v25471_v27 = vmul.f32 0.7978846, %v25455_v13  ;;  %v25440_v30 = vmul.f32 0.044715, %v25424_v63  ;;  %v25409_v28 = vmul.f32 %v25382_v21, %v25382_v21 }
0x1e4b   : > { %v25387_v52 = vpop.f32.mrf.mxu0 }
0x1e4c   : > { %29791 = vtanh.f32 %v25471_v27  ;;  %v25456_v5 = vadd.f32 %v25440_v30, %v25376_v33  ;;  %v25425_v10 = vmul.f32 %v25409_v28, %v25382_v21  ;;  %v25388_v45 = vadd.f32 %v25387_v52, %v35435_v60 }
0x1e4d   : > { %v25391_v40 = vpop.f32.mrf.mxu0  ;;  %v25374_v28 = vadd.f32 %v35542_v34, %v35500_v43 }
0x1e4e   : > { %v25472_v48 = vmul.f32 0.7978846, %v25456_v5  ;;  %v25441_v58 = vmul.f32 0.044715, %v25425_v10  ;;  %v25410_v41 = vmul.f32 %v25388_v45, %v25388_v45 }
0x1e4f   : > { %v25393_v22 = vpop.f32.mrf.mxu0 }
0x1e50   : > { %29793 = vtanh.f32 %v25472_v48  ;;  %v25457_v24 = vadd.f32 %v25441_v58, %v25382_v21  ;;  %v25426_v59 = vmul.f32 %v25410_v41, %v25388_v45  ;;  %v25394_v19 = vadd.f32 %v25393_v22, %v35435_v60 }
0x1e51   : > { %v25380_v48 = vadd.f32 %v35545_v18, %v35500_v43  ;;  %v35561_v18 = vld [vmem:[%s36243_s18] ss:$0 sm:$0xff] }
0x1e52   : > { %v25473_v11 = vmul.f32 0.7978846, %v25457_v24  ;;  %v25442_v23 = vmul.f32 0.044715, %v25426_v59  ;;  %v25411_v12 = vmul.f32 %v25394_v19, %v25394_v19  ;;  %v25386_v24 = vadd.f32 %v25385_v25, %v35500_v43 }
0x1e54   : > { %29795 = vtanh.f32 %v25473_v11  ;;  %v25458_v49 = vadd.f32 %v25442_v23, %v25388_v45  ;;  %v25427_v32 = vmul.f32 %v25411_v12, %v25394_v19  ;;  %v25392_v23 = vadd.f32 %v25391_v40, %v35500_v43 }
0x1e55   : > { %v29790_v6 = vpop.eup %29789 }
0x1e56   : > { %v25474_v44 = vmul.f32 0.7978846, %v25458_v49  ;;  %v25443_v37 = vmul.f32 0.044715, %v25427_v32  ;;  %v25502_v3 = vadd.f32 1.0, %v29790_v6 }
0x1e58   : > { %29797 = vtanh.f32 %v25474_v44  ;;  %v25459_v62 = vadd.f32 %v25443_v37, %v25394_v19  ;;  %v25518_v55 = vmul.f32 0.5, %v25502_v3 }
0x1e59   : > { %v29792_v42 = vpop.eup %29791 }
0x1e5a   : > { %v25503_v1 = vadd.f32 1.0, %v29792_v42  ;;  %v25475_v9 = vmul.f32 0.7978846, %v25459_v62  ;;  %v25534_v26 = vmul.f32 %v25518_v55, %v25364_v47 }
0x1e5c   : > { %v25519_v60 = vmul.f32 0.5, %v25503_v1  ;;  %29799 = vtanh.f32 %v25475_v9  ;;  %v25550_v15 = vmul.f32 %v25534_v26, %v25362_v29 }
0x1e5d   : > { %v29794_v61 = vpop.eup %29793 }
0x1e5e   : > { %v25535_v20 = vmul.f32 %v25519_v60, %v25370_v8  ;;  %29056 = vmatprep.mubr.f32.mxu1 %v25550_v15  ;;  %v25504_v13 = vadd.f32 1.0, %v29794_v61 }
0x1e60   : > { %v25551_v63 = vmul.f32 %v25535_v20, %v25368_v36  ;;  %v25520_v27 = vmul.f32 0.5, %v25504_v13 }
0x1e61   : > { %v29796_v30 = vpop.eup %29795 }
0x1e62   : > { %v25505_v52 = vadd.f32 1.0, %v29796_v30  ;;  %29057 = vmatmul.mubr.f32.gmra.mxu1 %v25551_v63  ;;  %v25536_v31 = vmul.f32 %v25520_v27, %v25376_v33 }
0x1e64   : > { %v25521_v5 = vmul.f32 0.5, %v25505_v52  ;;  %v25552_v47 = vmul.f32 %v25536_v31, %v25374_v28 }
0x1e65   : > { %v29798_v10 = vpop.eup %29797 }
0x1e66   : > { %v25537_v58 = vmul.f32 %v25521_v5, %v25382_v21  ;;  %29059 = vmatprep.mubr.f32.mxu1 %v25552_v47  ;;  %v25506_v51 = vadd.f32 1.0, %v29798_v10 }
0x1e68   : > { %v25553_v8 = vmul.f32 %v25537_v58, %v25380_v48  ;;  %v25522_v41 = vmul.f32 0.5, %v25506_v51 }
0x1e69   : > { %v29800_v22 = vpop.eup %29799 }
0x1e6a   : > { %v25507_v59 = vadd.f32 1.0, %v29800_v22  ;;  %29060 = vmatmul.mubr.f32.gmra.mxu1 %v25553_v8  ;;  %v25538_v34 = vmul.f32 %v25522_v41, %v25388_v45 }
0x1e6c   : > { %v25523_v11 = vmul.f32 0.5, %v25507_v59  ;;  %v25554_v33 = vmul.f32 %v25538_v34, %v25386_v24 }
0x1e6e   : > { %v25539_v12 = vmul.f32 %v25523_v11, %v25394_v19  ;;  %29062 = vmatprep.mubr.f32.mxu1 %v25554_v33 }
0x1e70   : > { %v25555_v49 = vmul.f32 %v25539_v12, %v25392_v23 }
0x1e72   : > { %29063 = vmatmul.mubr.f32.gmra.mxu1 %v25555_v49 }
0x1e9d   : > { %v29043_v21 = vpop.f32.mrf.mxu1 }
0x1e9e   : > { %v25651_v25 = vadd.f32 %v29043_v21, %v35561_v18 }
0x1e9f   : > { %v25645_v32 = vpop.f32.mrf.mxu1 }
0x1ea0   : > { %v25725_v6 = vadd.f32 %v25651_v25, %v35087_v54  ;;  %v25646_v45 = vadd.f32 %v35561_v18, %v25645_v32 }
0x1ea2   : > { %25741 = vst.msk [vmem:[%s35568_s14 + $0x8] sm:$0xff] %vm578_vm0, %v25725_v6  ;;  %v25724_v43 = vadd.f32 %v25646_v45, %v35094_v14 }
0x1ea4   : > { %25740 = vst.msk [vmem:[%s35568_s14] sm:$0xff] %vm578_vm0, %v25724_v43 }
0x1ea5   : > { %v29046_v40 = vpop.f32.mrf.mxu1 }
0x1ea6   : > { %v25661_v54 = vadd.f32 %v29046_v40, %v35561_v18 }
0x1ea7   : > { %v25655_v19 = vpop.f32.mrf.mxu1 }
0x1ea8   : > { %v25727_v44 = vadd.f32 %v25661_v54, %v35101_v56  ;;  %v25656_v37 = vadd.f32 %v35561_v18, %v25655_v19 }
0x1eaa   : > { %25743 = vst.msk [vmem:[%s35568_s14 + $0x18] sm:$0xff] %vm578_vm0, %v25727_v44  ;;  %v25726_v3 = vadd.f32 %v25656_v37, %v35108_v35 }
0x1eac   : > { %25742 = vst.msk [vmem:[%s35568_s14 + $0x10] sm:$0xff] %vm578_vm0, %v25726_v3 }
0x1ead   : > { %v29049_v14 = vpop.f32.mrf.mxu1 }
0x1eae   : > { %v25671_v62 = vadd.f32 %v29049_v14, %v35561_v18 }
0x1eaf   : > { %v25665_v55 = vpop.f32.mrf.mxu1 }
0x1eb0   : > { %v25729_v42 = vadd.f32 %v25671_v62, %v35112_v38  ;;  %v25666_v29 = vadd.f32 %v35561_v18, %v25665_v55 }
0x1eb2   : > { %25745 = vst.msk [vmem:[%s35568_s14 + $0x28] sm:$0xff] %vm578_vm0, %v25729_v42  ;;  %v25728_v56 = vadd.f32 %v25666_v29, %v35120_v4 }
0x1eb4   : > { %25744 = vst.msk [vmem:[%s35568_s14 + $0x20] sm:$0xff] %vm578_vm0, %v25728_v56 }
0x1eb5   : > { %v29052_v35 = vpop.f32.mrf.mxu1 }
0x1eb6   : > { %v25681_v1 = vadd.f32 %v29052_v35, %v35561_v18 }
0x1eb7   : > { %v25675_v9 = vpop.f32.mrf.mxu1 }
0x1eb8   : > { %v25731_v26 = vadd.f32 %v25681_v1, %v35132_v50  ;;  %v25676_v60 = vadd.f32 %v35561_v18, %v25675_v9 }
0x1eba   : > { %25747 = vst.msk [vmem:[%s35568_s14 + $0x38] sm:$0xff] %vm578_vm0, %v25731_v26  ;;  %v25730_v38 = vadd.f32 %v25676_v60, %v35136_v17 }
0x1ebc   : > { %25746 = vst.msk [vmem:[%s35568_s14 + $0x30] sm:$0xff] %vm578_vm0, %v25730_v38 }
0x1eed   : > { %v29055_v4 = vpop.f32.mrf.mxu1 }
0x1eee   : > { %v25691_v15 = vadd.f32 %v29055_v4, %v35561_v18 }
0x1eef   : > { %v25685_v61 = vpop.f32.mrf.mxu1 }
0x1ef0   : > { %v25733_v36 = vadd.f32 %v25691_v15, %v35146_v39  ;;  %v25686_v20 = vadd.f32 %v35561_v18, %v25685_v61 }
0x1ef2   : > { %25749 = vst.msk [vmem:[%s35568_s14 + $0x48] sm:$0xff] %vm578_vm0, %v25733_v36  ;;  %v25732_v50 = vadd.f32 %v25686_v20, %v35150_v57 }
0x1ef4   : > { %25748 = vst.msk [vmem:[%s35568_s14 + $0x40] sm:$0xff] %vm578_vm0, %v25732_v50 }
0x1f22   : > { %v29058_v17 = vpop.f32.mrf.mxu1 }
0x1f23   : > { %v25701_v13 = vadd.f32 %v29058_v17, %v35561_v18 }
0x1f24   : > { %v25695_v63 = vpop.f32.mrf.mxu1 }
0x1f25   : > { %v25735_v27 = vadd.f32 %v25701_v13, %v35160_v2  ;;  %v25696_v39 = vadd.f32 %v35561_v18, %v25695_v63 }
0x1f27   : > { %25751 = vst.msk [vmem:[%s35568_s14 + $0x58] sm:$0xff] %vm578_vm0, %v25735_v27  ;;  %v25734_v30 = vadd.f32 %v25696_v39, %v35165_v46 }
0x1f29   : > { %25750 = vst.msk [vmem:[%s35568_s14 + $0x50] sm:$0xff] %vm578_vm0, %v25734_v30 }
0x1f2a   : > { %v29061_v57 = vpop.f32.mrf.mxu1 }
0x1f2b   : > { %v25711_v28 = vadd.f32 %v29061_v57, %v35561_v18 }
0x1f2c   : > { %v25705_v52 = vpop.f32.mrf.mxu1 }
0x1f2d   : > { %v25737_v31 = vadd.f32 %v25711_v28, %v35172_v53  ;;  %v25706_v5 = vadd.f32 %v35561_v18, %v25705_v52 }
0x1f2f   : > { %25753 = vst.msk [vmem:[%s35568_s14 + $0x68] sm:$0xff] %vm578_vm0, %v25737_v31  ;;  %v25736_v2 = vadd.f32 %v25706_v5, %v35182_v16 }
0x1f31   : > { %25752 = vst.msk [vmem:[%s35568_s14 + $0x60] sm:$0xff] %vm578_vm0, %v25736_v2 }
0x1f32   : > { %v29064_v46 = vpop.f32.mrf.mxu1 }
0x1f33   : > { %v25721_v47 = vadd.f32 %v29064_v46, %v35561_v18 }
0x1f34   : > { %v25715_v10 = vpop.f32.mrf.mxu1 }
0x1f35   : > { %v25739_v48 = vadd.f32 %v25721_v47, %v35192_v0  ;;  %v25716_v53 = vadd.f32 %v35561_v18, %v25715_v10 }
0x1f37   : > { %25755 = vst.msk [vmem:[%s35568_s14 + $0x78] sm:$0xff] %vm578_vm0, %v25739_v48  ;;  %v25738_v16 = vadd.f32 %v25716_v53, %v35203_v7 }
0x1f39   : > { %25754 = vst.msk [vmem:[%s35568_s14 + $0x70] sm:$0xff] %vm578_vm0, %v25738_v16 }
0x1f3a   : > { %29939 = shalt.err (!%p29936_p10)
}
0x1f3b   : > { %s29940_s23 = scalar_lea.hbm %s35631_s24, 2048  ;;  %s29944_s14 = scalar_lea.hbm %s36244_s11, 4096 }
0x1f3c   : > { %p29941_p6 = scmp.ne.s32.totalorder %s35631_s24, %s29940_s23  ;;  %p29945_p3 = scmp.lt.s32.totalorder %s35631_s24, %s36244_s11 }
0x1f3d   : > { %p29946_p11 = scmp.lt.s32.totalorder %s29944_s14, %s29940_s23 }
0x1f3e   : > { %p29942_p4 = pnand %p29941_p6, %p36245_p1 }
0x1f3f   : > { %p29947_p5 = por %p29946_p11, %p29945_p3 }
0x1f40   : > { %p29943_p8 = pneg %p29942_p4 }
0x1f42   : > { %p29948_p7 = pnand %p29947_p5, %p29943_p8 }
0x1f44   : > { %29951 = shalt.err (!%p29948_p7)
}
0x1f45   : > { %s30014_s28 = smov 128   ;;  %s30015_s26 = smov 8  }
0x1f46   : > { %29087 = dma.vmem_to_hbm [thread:$0]  (%p36245_p1), %s35633_s25, 2048, %s35631_s24, %s25757_s22, %s30014_s28, %s30014_s28, %s30015_s26  }
0x1f47 PF: > { %s36246_s6 = sld [smem:[#allocation15_spill]]  ;;  %p36249_p9 = scmp.ge.s32.totalorder %s29998_s21, 2 }
0x1f48   : > { %s36247_s16 = sld [smem:[#allocation17_spill]] }
0x1f4d   : > { %s25785_s15 = sand.u32 1, %s36246_s6  }
0x1f4e   : > { %p36248_p12 = scmp.ne.s32.totalorder %s36247_s16, 0  ;;  %s25786_s23 = scalar_lea.sflag [#allocation4], %s25785_s15 }
0x1f50   : > { %p29104_p13 = pnand %p36249_p9, %p36248_p12 }
0x1f52   : > { %p29105_p0 = pneg %p29104_p13 }
0x1f54   : > { %29981 = dma.done.wait (%p29105_p0), %s25786_s23, 2048  }
0x1f55   : > { %29983 = vsyncadd (%p29105_p0), %s25786_s23, 4294965248  ;;  %s36250_s7 = sld [smem:[#allocation16_spill]]  ;;  %p30_p2 = scmp.ge.s32.totalorder %s30182_s17, 4  }
0x1f56   : > { %s36251_s20 = sld [smem:[#allocation18_spill]]  ;;  %s36252_s18 = smov %s29990_s19 }
0x1f57   : > { %s36254_s21 = smov %s30182_s17  ;;  %32 = sbr.rel (!%p30_p2) target bundleno = 13 (0xd), region = 141 }
0x1f5b   : > { %s36253_s19 = smov %s36250_s7 }
0x1f5c   :  { %25791 = vsyncpa [#allocation3], 1 }
0x1f5d   :  { %25793 = vsyncpa [#allocation3 + $0x1], 1 }
0x1f5e   :  { %25794 = vsyncpa [#allocation6], 1 }
0x1f5f   :  { %25795 = vsyncpa [#allocation9], 1 }
0x1f60   :  { %25796 = vsyncpa [#allocation4], 1 }
0x1f61   :  { %25798 = vsyncpa [#allocation4 + $0x1], 1 }

</bundles_post_ra>
